<compile_context>
chip_gen: v7x
topology: tpu7x:2x2x1
jax: 0.10.0
libtpu: 0.0.40
codegen_flags: <defaults>
</compile_context>

<pallas_src>
import numpy as np
import jax
import jax.numpy as jnp
from jax.experimental import pallas as pl
from jax.experimental.pallas import tpu as pltpu

H = W = 7
HW = H * W
K = 7  # SpatialAttention conv kernel size (padding = 3)

WEIGHT_ORDER = ['w_sa', 'sa_b', 'w_pool', 'w_se1', 'w_se2', 'w_bcast',
                'ca_w1', 'ca_w2']


# --------------------------------------------------------------------------- #
# Pallas kernel: one grid step per TB-sized batch tile (batch in the lane dim).
# --------------------------------------------------------------------------- #
def sensor_block_kernel(xv_ref, xs_ref,
                        w_sa_ref, sa_b_ref, w_pool_ref, w_se1_ref, w_se2_ref,
                        w_bcast_ref, ca_w1_ref, ca_w2_ref,
                        out_ref):
    f32 = jnp.float32
    xv = xv_ref[...].astype(f32)            # (HW, Cv, TB)  vision
    xs = xs_ref[...].astype(f32)            # (HW, Cs, TB)  sensor
    Cv = xv.shape[1]

    # ---------------- SpatialAttention on the vision branch ----------------
    max_v_c = jnp.max(xv, axis=1)                              # (HW, TB)
    mean_v_c = jnp.mean(xv, axis=1)                            # (HW, TB)
    sa_in = jnp.concatenate([max_v_c, mean_v_c], axis=0)       # (2*HW, TB)
    sa = jax.nn.sigmoid(
        jnp.dot(w_sa_ref[...], sa_in, preferred_element_type=f32)
        + sa_b_ref[0])                                         # (HW, TB)
    out_v = xv * sa[:, None, :]                                # (HW, Cv, TB)

    # -------------- TimeSpectrumAttention on the sensor branch -------------
    max_s_c = jnp.max(xs, axis=1)                              # (HW, TB)
    mean_s_c = jnp.mean(xs, axis=1)                            # (HW, TB)
    w_pool = w_pool_ref[...]                                   # (14, HW)
    pooled_max = jnp.dot(w_pool, max_s_c, preferred_element_type=f32)   # (14, TB)
    pooled_avg = jnp.dot(w_pool, mean_s_c, preferred_element_type=f32)  # (14, TB)
    # block-diagonal SE (se1 drives rows 0..6 / se2 rows 7..13); the second
    # SE layer is linear, so relu(max) + relu(avg) is folded before it.
    w_se1 = w_se1_ref[...]                                     # (8, 14)
    h = (jnp.maximum(jnp.dot(w_se1, pooled_max, preferred_element_type=f32), 0.0)
         + jnp.maximum(jnp.dot(w_se1, pooled_avg, preferred_element_type=f32), 0.0))
    dims = jax.nn.sigmoid(
        jnp.dot(w_se2_ref[...], h, preferred_element_type=f32))          # (14, TB)
    att = jnp.dot(w_bcast_ref[...], dims, preferred_element_type=f32)    # (HW, TB)
    out_s = xs * att[:, None, :]                               # (HW, Cs, TB)

    # --------------------------- ChannelAttention ---------------------------
    max_pool = jnp.concatenate(
        [jnp.max(out_v, axis=0), jnp.max(out_s, axis=0)], axis=0)    # (C, TB)
    mean_pool = jnp.concatenate(
        [jnp.mean(out_v, axis=0), jnp.mean(out_s, axis=0)], axis=0)  # (C, TB)
    ca_w1 = ca_w1_ref[...]                                     # (cr, C)
    h_ca = (jnp.maximum(jnp.dot(ca_w1, max_pool, preferred_element_type=f32), 0.0)
            + jnp.maximum(jnp.dot(ca_w1, mean_pool, preferred_element_type=f32), 0.0))
    ca = jax.nn.sigmoid(
        jnp.dot(ca_w2_ref[...], h_ca, preferred_element_type=f32))       # (C, TB)
    ca_v = ca[:Cv]                                             # (Cv, TB)
    ca_s = ca[Cv:]                                             # (Cs, TB)

    out1_v = out_v * ca_v[None, :, :] + xv                     # residual w/ base_out
    out1_s = out_s * ca_s[None, :, :] + xs

    # ----------------------------- pooling heads ----------------------------
    base_v = jnp.mean(xv, axis=0)                              # AvgPool2d(7,7) == mean
    base_s = jnp.mean(xs, axis=0)
    mire_v = jnp.max(out1_v, axis=0) + base_v                  # AdaptiveMaxPool2d(1)+base
    mire_s = jnp.max(out1_s, axis=0) + base_s
    sbase = jnp.max(xs, axis=0)
    stf = jnp.max(out_s, axis=0)

    # merged lane-dense output slab: (2*Cv + 4*Cs, TB)
    out_ref[...] = jnp.concatenate(
        [mire_v, mire_s, base_v, base_s, sbase, stf], axis=0)


# --------------------------------------------------------------------------- #
# Wrapper
# --------------------------------------------------------------------------- #
def _round_up(x, m):
    return ((x + m - 1) // m) * m


def sensor_block_forward(xv, xs, kparams, tb=128,
                         input_dtype=jnp.bfloat16,
                         vmem_limit_bytes=48 * 1024 * 1024):
    """xv: (B, HW, Cv) vision, xs: (B, HW, Cs) sensor — channels-last, flattened.

    The wrapper relays these to the kernel in a batch-minor (HW, C, Bpad)
    layout (batch tile in the lane dim) and as bf16; tb is the batch tile
    (multiple of 128).  Sweep tb per generation: 128 on v7x, 256 on v6e,
    64-128 on v5e for very wide channel counts.
    """
    B, hw, Cv = xv.shape
    Cs = xs.shape[2]
    assert hw == HW, "kernel is specialized for a 7x7 spatial grid"
    ctot = 2 * Cv + 4 * Cs

    # --- batch tile (lane dim): multiple of 128, >=2 grid steps for v7x ---
    if B >= 128:
        tb = max(128, _round_up(tb, 128))
        if B >= 256:                      # keep both v7x TensorCores busy
            tb = min(tb, _round_up((B + 1) // 2, 128))
        tb = min(tb, _round_up(B, 128))
    else:
        tb = _round_up(B, 8)              # single step, full-dim block
    Bpad = _round_up(B, tb)

    # --- batch-minor, lane-dense layout + bf16 HBM traffic ---
    def to_kernel_layout(x):
        x = x.astype(input_dtype)
        x = jnp.transpose(x, (1, 2, 0))   # (HW, C, B)
        if Bpad != B:
            x = jnp.pad(x, ((0, 0), (0, 0), (0, Bpad - B)))
        return x

    xv_k = to_kernel_layout(xv)
    xs_k = to_kernel_layout(xs)

    weights = [kparams[n] for n in WEIGHT_ORDER]

    in_specs = [pl.BlockSpec((hw, Cv, tb), lambda b: (0, 0, b)),
                pl.BlockSpec((hw, Cs, tb), lambda b: (0, 0, b))]
    for name, w in zip(WEIGHT_ORDER, weights):
        if name == 'sa_b':
            in_specs.append(pl.BlockSpec(memory_space=pltpu.MemorySpace.SMEM))
        else:
            nd = w.ndim
            in_specs.append(pl.BlockSpec(w.shape, lambda b, _n=nd: (0,) * _n))

    out_specs = pl.BlockSpec((ctot, tb), lambda b: (0, b))
    out_shape = jax.ShapeDtypeStruct((ctot, Bpad), jnp.float32)

    grid_spec = pltpu.PrefetchScalarGridSpec(
        num_scalar_prefetch=0, grid=(Bpad // tb,),
        in_specs=in_specs, out_specs=out_specs)

    out = pl.pallas_call(
        sensor_block_kernel,
        grid_spec=grid_spec,
        out_shape=out_shape,
        compiler_params=pltpu.CompilerParams(
            dimension_semantics=("parallel",),      # batch tiles independent
            vmem_limit_bytes=vmem_limit_bytes),      # headroom for big tb / C
    )(xv_k, xs_k, *weights)

    out = out.T[:B]                                  # (B, ctot)
    Cc = Cv + Cs
    return {'mire': out[:, :Cc],
            'base': out[:, Cc:2 * Cc],
            'sensor_base': out[:, 2 * Cc:2 * Cc + Cs],
            'sensor_tf': out[:, 2 * Cc + Cs:2 * Cc + 2 * Cs]}


# --------------------------------------------------------------------------- #
# Deterministic parameter init (mirrors the shapes from the module __init__)
# and packing of the tiny weights into kernel operands (weight-on-left form).
# --------------------------------------------------------------------------- #
def init_params(key, Cv, Cs, reduction=16):
    C = Cv + Cs
    cr = max(C // reduction, 1)
    ks = jax.random.split(key, 8)
    nrm = lambda k, shape: 0.1 * jax.random.normal(k, shape, dtype=jnp.float32)
    raw = dict(
        sa_conv_w=nrm(ks[0], (1, 2, K, K)),   # SpatialAttention Conv2d(2,1,7,pad=3)
        sa_conv_b=nrm(ks[1], (1,)),
        se1_w1=nrm(ks[2], (4, 7)),            # TSA Conv2d(7,4,1)
        se1_w2=nrm(ks[3], (7, 4)),            # TSA Conv2d(4,7,1)
        se2_w1=nrm(ks[4], (4, 7)),
        se2_w2=nrm(ks[5], (7, 4)),
        ca_w1=nrm(ks[6], (cr, C)),            # CA Conv2d(C, C//r, 1)
        ca_w2=nrm(ks[7], (C, cr)),            # CA Conv2d(C//r, C, 1)
    )

    # Unroll the 7x7 SAME conv into a dense (HW x 2*HW) matrix (bias separate).
    w = np.asarray(raw['sa_conv_w'])
    wm_max = np.zeros((HW, HW), np.float32)
    wm_avg = np.zeros((HW, HW), np.float32)
    pad = K // 2
    for i in range(H):
        for j in range(W):
            p = i * W + j
            for ki in range(K):
                for kj in range(K):
                    ii, jj = i + ki - pad, j + kj - pad
                    if 0 <= ii < H and 0 <= jj < W:
                        q = ii * W + jj
                        wm_max[p, q] = w[0, 0, ki, kj]
                        wm_avg[p, q] = w[0, 1, ki, kj]
    w_sa = np.concatenate([wm_max, wm_avg], axis=1)            # (49, 98)

    # Adaptive-pool / broadcast matrices for the 7x7 time-spectrum attention.
    pool_w = np.zeros((W, HW), np.float32)     # avg over H -> indexed by W (x_dim2)
    pool_h = np.zeros((H, HW), np.float32)     # avg over W -> indexed by H (x_dim3)
    bcast = np.zeros((HW, 2 * W), np.float32)  # att[p] = dim1[w(p)] + dim2[h(p)]
    for hh in range(H):
        for ww in range(W):
            p = hh * W + ww
            pool_w[ww, p] = 1.0 / H
            pool_h[hh, p] = 1.0 / W
            bcast[p, ww] = 1.0
            bcast[p, W + hh] = 1.0
    w_pool = np.concatenate([pool_w, pool_h], axis=0)          # (14, 49)

    # Block-diagonal packing of the two SE branches (se1 = W-axis, se2 = H-axis).
    se1_w1 = np.asarray(raw['se1_w1']); se1_w2 = np.asarray(raw['se1_w2'])
    se2_w1 = np.asarray(raw['se2_w1']); se2_w2 = np.asarray(raw['se2_w2'])
    w_se1 = np.zeros((8, 14), np.float32)
    w_se1[:4, :7] = se1_w1
    w_se1[4:, 7:] = se2_w1
    w_se2 = np.zeros((14, 8), np.float32)
    w_se2[:7, :4] = se1_w2
    w_se2[7:, 4:] = se2_w2

    kparams = dict(
        w_sa=jnp.asarray(w_sa),
        sa_b=jnp.asarray(np.asarray(raw['sa_conv_b']).reshape(1).astype(np.float32)),
        w_pool=jnp.asarray(w_pool),
        w_se1=jnp.asarray(w_se1),
        w_se2=jnp.asarray(w_se2),
        w_bcast=jnp.asarray(bcast),
        ca_w1=jnp.asarray(np.asarray(raw['ca_w1'])),           # (cr, C)
        ca_w2=jnp.asarray(np.asarray(raw['ca_w2'])),           # (C, cr)
    )
    return raw, kparams


# --------------------------------------------------------------------------- #
# Pure-JAX reference (NCHW, mirrors the PyTorch forward exactly)
# --------------------------------------------------------------------------- #
def reference_forward(inputs, raw):
    vision = jnp.concatenate(inputs[:2], axis=1)     # (B, Cv, 7, 7)
    sensor = jnp.concatenate(inputs[2:], axis=1)     # (B, Cs, 7, 7)
    base_out = jnp.concatenate(inputs, axis=1)       # (B, C, 7, 7)

    # SpatialAttention
    mx = jnp.max(vision, axis=1, keepdims=True)
    av = jnp.mean(vision, axis=1, keepdims=True)
    cat = jnp.concatenate([mx, av], axis=1)
    conv = jax.lax.conv_general_dilated(cat, raw['sa_conv_w'], (1, 1), 'SAME',
                                        dimension_numbers=('NCHW', 'OIHW', 'NCHW'))
    sa = jax.nn.sigmoid(conv + raw['sa_conv_b'].reshape(1, 1, 1, 1))
    out_v = vision * sa

    # TimeSpectrumAttention
    mxs = jnp.max(sensor, axis=1, keepdims=True)
    avs = jnp.mean(sensor, axis=1, keepdims=True)
    d2m, d3m = jnp.mean(mxs, axis=2)[:, 0, :], jnp.mean(mxs, axis=3)[:, 0, :]
    d2a, d3a = jnp.mean(avs, axis=2)[:, 0, :], jnp.mean(avs, axis=3)[:, 0, :]

    def se(w1, w2, v):
        return jnp.maximum(v @ w1.T, 0.0) @ w2.T

    dim1 = jax.nn.sigmoid(se(raw['se1_w1'], raw['se1_w2'], d2m)
                          + se(raw['se1_w1'], raw['se1_w2'], d2a))   # (B,7) over W
    dim2 = jax.nn.sigmoid(se(raw['se2_w1'], raw['se2_w2'], d3m)
                          + se(raw['se2_w1'], raw['se2_w2'], d3a))   # (B,7) over H
    att = dim1[:, None, None, :] + dim2[:, None, :, None]
    out_s = sensor * att

    # ChannelAttention + residual
    out1 = jnp.concatenate([out_v, out_s], axis=1)
    mxsp, avsp = jnp.max(out1, axis=(2, 3)), jnp.mean(out1, axis=(2, 3))

    def seca(v):
        return jnp.maximum(v @ raw['ca_w1'].T, 0.0) @ raw['ca_w2'].T

    ca = jax.nn.sigmoid(seca(mxsp) + seca(avsp))[:, :, None, None]
    out1 = out1 * ca + base_out

    base = jnp.mean(base_out, axis=(2, 3))
    mire = jnp.max(out1, axis=(2, 3)) + base
    return {'mire': mire, 'base': base,
            'sensor_base': jnp.max(sensor, axis=(2, 3)),
            'sensor_tf': jnp.max(out_s, axis=(2, 3))}


# --------------------------------------------------------------------------- #
if __name__ == "__main__":
    # B=260 exercises the production path: multi-step grid (3 x tb=128),
    # batch-pad tail, and the megacore "parallel" split on v7x.
    B, c_each = 260, 8               # 4 modalities x 8 channels -> channel = 32
    Cv = Cs = 2 * c_each
    C = Cv + Cs

    key = jax.random.PRNGKey(0)
    kin, kpar = jax.random.split(key)

    # Four modality inputs, PyTorch NCHW convention: (B, c_each, 7, 7).
    # Quantize to bf16-representable values so the kernel (bf16 HBM path) and
    # the f32 reference consume identical data.
    inputs_nchw = [jax.random.normal(k, (B, c_each, H, W), dtype=jnp.float32)
                   .astype(jnp.bfloat16).astype(jnp.float32)
                   for k in jax.random.split(kin, 4)]

    def to_flat(tensors):                    # NCHW -> (B, HW, C) channels-last
        x = jnp.concatenate(tensors, axis=1)
        return x.transpose(0, 2, 3, 1).reshape(x.shape[0], HW, -1)

    xv = to_flat(inputs_nchw[:2])            # vision  (B, 49, Cv)
    xs = to_flat(inputs_nchw[2:])            # sensor  (B, 49, Cs)

    raw, kparams = init_params(kpar, Cv, Cs, reduction=16)

    out = sensor_block_forward(xv, xs, kparams, tb=128)
    out = jax.block_until_ready(out)

    ref = reference_forward(inputs_nchw, raw)
    for name in ('mire', 'base', 'sensor_base', 'sensor_tf'):
        np.testing.assert_allclose(np.asarray(out[name]), np.asarray(ref[name]),
                                   rtol=2e-3, atol=2e-3)

    print("KERNEL_OK")
</pallas_src>

<mosaic_0001>
module attributes {stable_mosaic.version = 11 : i64} {
  func.func @sensor_block_kernel(%arg0: i32, %arg1: memref<49x16x128xbf16, #tpu.memory_space<vmem>>, %arg2: memref<49x16x128xbf16, #tpu.memory_space<vmem>>, %arg3: memref<49x98xf32, #tpu.memory_space<vmem>>, %arg4: memref<1xf32, #tpu.memory_space<smem>>, %arg5: memref<14x49xf32, #tpu.memory_space<vmem>>, %arg6: memref<8x14xf32, #tpu.memory_space<vmem>>, %arg7: memref<14x8xf32, #tpu.memory_space<vmem>>, %arg8: memref<49x14xf32, #tpu.memory_space<vmem>>, %arg9: memref<2x32xf32, #tpu.memory_space<vmem>>, %arg10: memref<32x2xf32, #tpu.memory_space<vmem>>, %arg11: memref<96x128xf32, #tpu.memory_space<vmem>>) attributes {dimension_semantics = [#tpu.dimension_semantics<parallel>], iteration_bounds = array<i64: 3>, scalar_prefetch = 0 : i64, scratch_operands = 0 : i64, tpu.core_type = #tpu.core_type<tc>, window_params = [{transform_indices = @transform_0, window_bounds = array<i64: 49, 16, 128>}, {transform_indices = @transform_1, window_bounds = array<i64: 49, 16, 128>}, {pipeline_mode = #tpu.pipeline_mode<synchronous>, transform_indices = @transform_2, window_bounds = array<i64: 49, 98>}, {transform_indices = @transform_3, window_bounds = array<i64: 1>}, {pipeline_mode = #tpu.pipeline_mode<synchronous>, transform_indices = @transform_4, window_bounds = array<i64: 14, 49>}, {pipeline_mode = #tpu.pipeline_mode<synchronous>, transform_indices = @transform_5, window_bounds = array<i64: 8, 14>}, {pipeline_mode = #tpu.pipeline_mode<synchronous>, transform_indices = @transform_6, window_bounds = array<i64: 14, 8>}, {pipeline_mode = #tpu.pipeline_mode<synchronous>, transform_indices = @transform_7, window_bounds = array<i64: 49, 14>}, {pipeline_mode = #tpu.pipeline_mode<synchronous>, transform_indices = @transform_8, window_bounds = array<i64: 2, 32>}, {pipeline_mode = #tpu.pipeline_mode<synchronous>, transform_indices = @transform_9, window_bounds = array<i64: 32, 2>}, {transform_indices = @transform_10, window_bounds = array<i64: 96, 128>}]} {
    %c0 = arith.constant 0 : index
    %c0_0 = arith.constant 0 : index
    %c0_1 = arith.constant 0 : index
    %0 = vector.load %arg1[%c0, %c0_0, %c0_1] : memref<49x16x128xbf16, #tpu.memory_space<vmem>>, vector<49x16x128xbf16>
    %1 = arith.extf %0 : vector<49x16x128xbf16> to vector<49x16x128xf32>
    %c0_2 = arith.constant 0 : index
    %c0_3 = arith.constant 0 : index
    %c0_4 = arith.constant 0 : index
    %2 = vector.load %arg2[%c0_2, %c0_3, %c0_4] : memref<49x16x128xbf16, #tpu.memory_space<vmem>>, vector<49x16x128xbf16>
    %3 = arith.extf %2 : vector<49x16x128xbf16> to vector<49x16x128xf32>
    %cst = arith.constant dense<0xFF800000> : vector<49x128xf32>
    %4 = vector.multi_reduction <maximumf>, %1, %cst [1] : vector<49x16x128xf32> to vector<49x128xf32>
    %cst_5 = arith.constant dense<0.000000e+00> : vector<49x128xf32>
    %5 = vector.multi_reduction <add>, %1, %cst_5 [1] : vector<49x16x128xf32> to vector<49x128xf32>
    %cst_6 = arith.constant 1.600000e+01 : f32
    %6 = vector.broadcast %cst_6 : f32 to vector<49x128xf32>
    %7 = arith.divf %5, %6 : vector<49x128xf32>
    %8 = tpu.concatenate %4, %7 in 0 : vector<49x128xf32>, vector<49x128xf32> -> vector<98x128xf32>
    %c0_7 = arith.constant 0 : index
    %c0_8 = arith.constant 0 : index
    %9 = vector.load %arg3[%c0_7, %c0_8] : memref<49x98xf32, #tpu.memory_space<vmem>>, vector<49x98xf32>
    %cst_9 = arith.constant dense<0.000000e+00> : vector<49x128xf32>
    %10 = tpu.matmul %9, %8, %cst_9 {dimension_numbers = #tpu.dot_dimension_numbers<[1], [0], [0], [1], [0, 0, 1, 1], [], []>} : vector<49x98xf32>, vector<98x128xf32>, vector<49x128xf32> -> vector<49x128xf32>
    %c0_10 = arith.constant 0 : index
    %11 = memref.load %arg4[%c0_10] : memref<1xf32, #tpu.memory_space<smem>>
    %12 = vector.broadcast %11 : f32 to vector<49x128xf32>
    %13 = arith.addf %10, %12 : vector<49x128xf32>
    %14 = arith.negf %13 : vector<49x128xf32>
    %15 = math.exp %14 : vector<49x128xf32>
    %cst_11 = arith.constant 1.000000e+00 : f32
    %16 = vector.broadcast %cst_11 : f32 to vector<49x128xf32>
    %17 = arith.addf %16, %15 : vector<49x128xf32>
    %18 = arith.divf %16, %17 : vector<49x128xf32>
    %19 = vector.shape_cast %18 : vector<49x128xf32> to vector<49x1x128xf32>
    %20 = vector.broadcast %19 : vector<49x1x128xf32> to vector<49x16x128xf32>
    %21 = arith.mulf %1, %20 : vector<49x16x128xf32>
    %cst_12 = arith.constant dense<0xFF800000> : vector<49x128xf32>
    %22 = vector.multi_reduction <maximumf>, %3, %cst_12 [1] : vector<49x16x128xf32> to vector<49x128xf32>
    %cst_13 = arith.constant dense<0.000000e+00> : vector<49x128xf32>
    %23 = vector.multi_reduction <add>, %3, %cst_13 [1] : vector<49x16x128xf32> to vector<49x128xf32>
    %cst_14 = arith.constant 1.600000e+01 : f32
    %24 = vector.broadcast %cst_14 : f32 to vector<49x128xf32>
    %25 = arith.divf %23, %24 : vector<49x128xf32>
    %c0_15 = arith.constant 0 : index
    %c0_16 = arith.constant 0 : index
    %26 = vector.load %arg5[%c0_15, %c0_16] : memref<14x49xf32, #tpu.memory_space<vmem>>, vector<14x49xf32>
    %cst_17 = arith.constant dense<0.000000e+00> : vector<14x128xf32>
    %27 = tpu.matmul %26, %22, %cst_17 {dimension_numbers = #tpu.dot_dimension_numbers<[1], [0], [0], [1], [0, 0, 1, 1], [], []>} : vector<14x49xf32>, vector<49x128xf32>, vector<14x128xf32> -> vector<14x128xf32>
    %cst_18 = arith.constant dense<0.000000e+00> : vector<14x128xf32>
    %28 = tpu.matmul %26, %25, %cst_18 {dimension_numbers = #tpu.dot_dimension_numbers<[1], [0], [0], [1], [0, 0, 1, 1], [], []>} : vector<14x49xf32>, vector<49x128xf32>, vector<14x128xf32> -> vector<14x128xf32>
    %c0_19 = arith.constant 0 : index
    %c0_20 = arith.constant 0 : index
    %29 = vector.load %arg6[%c0_19, %c0_20] : memref<8x14xf32, #tpu.memory_space<vmem>>, vector<8x14xf32>
    %cst_21 = arith.constant dense<0.000000e+00> : vector<8x128xf32>
    %30 = tpu.matmul %29, %27, %cst_21 {dimension_numbers = #tpu.dot_dimension_numbers<[1], [0], [0], [1], [0, 0, 1, 1], [], []>} : vector<8x14xf32>, vector<14x128xf32>, vector<8x128xf32> -> vector<8x128xf32>
    %cst_22 = arith.constant 0.000000e+00 : f32
    %31 = vector.broadcast %cst_22 : f32 to vector<8x128xf32>
    %32 = arith.maximumf %30, %31 : vector<8x128xf32>
    %cst_23 = arith.constant dense<0.000000e+00> : vector<8x128xf32>
    %33 = tpu.matmul %29, %28, %cst_23 {dimension_numbers = #tpu.dot_dimension_numbers<[1], [0], [0], [1], [0, 0, 1, 1], [], []>} : vector<8x14xf32>, vector<14x128xf32>, vector<8x128xf32> -> vector<8x128xf32>
    %cst_24 = arith.constant 0.000000e+00 : f32
    %34 = vector.broadcast %cst_24 : f32 to vector<8x128xf32>
    %35 = arith.maximumf %33, %34 : vector<8x128xf32>
    %36 = arith.addf %32, %35 : vector<8x128xf32>
    %c0_25 = arith.constant 0 : index
    %c0_26 = arith.constant 0 : index
    %37 = vector.load %arg7[%c0_25, %c0_26] : memref<14x8xf32, #tpu.memory_space<vmem>>, vector<14x8xf32>
    %cst_27 = arith.constant dense<0.000000e+00> : vector<14x128xf32>
    %38 = tpu.matmul %37, %36, %cst_27 {dimension_numbers = #tpu.dot_dimension_numbers<[1], [0], [0], [1], [0, 0, 1, 1], [], []>} : vector<14x8xf32>, vector<8x128xf32>, vector<14x128xf32> -> vector<14x128xf32>
    %39 = arith.negf %38 : vector<14x128xf32>
    %40 = math.exp %39 : vector<14x128xf32>
    %cst_28 = arith.constant 1.000000e+00 : f32
    %41 = vector.broadcast %cst_28 : f32 to vector<14x128xf32>
    %42 = arith.addf %41, %40 : vector<14x128xf32>
    %43 = arith.divf %41, %42 : vector<14x128xf32>
    %c0_29 = arith.constant 0 : index
    %c0_30 = arith.constant 0 : index
    %44 = vector.load %arg8[%c0_29, %c0_30] : memref<49x14xf32, #tpu.memory_space<vmem>>, vector<49x14xf32>
    %cst_31 = arith.constant dense<0.000000e+00> : vector<49x128xf32>
    %45 = tpu.matmul %44, %43, %cst_31 {dimension_numbers = #tpu.dot_dimension_numbers<[1], [0], [0], [1], [0, 0, 1, 1], [], []>} : vector<49x14xf32>, vector<14x128xf32>, vector<49x128xf32> -> vector<49x128xf32>
    %46 = vector.shape_cast %45 : vector<49x128xf32> to vector<49x1x128xf32>
    %47 = vector.broadcast %46 : vector<49x1x128xf32> to vector<49x16x128xf32>
    %48 = arith.mulf %3, %47 : vector<49x16x128xf32>
    %cst_32 = arith.constant dense<0xFF800000> : vector<16x128xf32>
    %49 = vector.multi_reduction <maximumf>, %21, %cst_32 [0] : vector<49x16x128xf32> to vector<16x128xf32>
    %cst_33 = arith.constant dense<0xFF800000> : vector<16x128xf32>
    %50 = vector.multi_reduction <maximumf>, %48, %cst_33 [0] : vector<49x16x128xf32> to vector<16x128xf32>
    %51 = tpu.concatenate %49, %50 in 0 : vector<16x128xf32>, vector<16x128xf32> -> vector<32x128xf32>
    %cst_34 = arith.constant dense<0.000000e+00> : vector<16x128xf32>
    %52 = vector.multi_reduction <add>, %21, %cst_34 [0] : vector<49x16x128xf32> to vector<16x128xf32>
    %cst_35 = arith.constant 4.900000e+01 : f32
    %53 = vector.broadcast %cst_35 : f32 to vector<16x128xf32>
    %54 = arith.divf %52, %53 : vector<16x128xf32>
    %cst_36 = arith.constant dense<0.000000e+00> : vector<16x128xf32>
    %55 = vector.multi_reduction <add>, %48, %cst_36 [0] : vector<49x16x128xf32> to vector<16x128xf32>
    %cst_37 = arith.constant 4.900000e+01 : f32
    %56 = vector.broadcast %cst_37 : f32 to vector<16x128xf32>
    %57 = arith.divf %55, %56 : vector<16x128xf32>
    %58 = tpu.concatenate %54, %57 in 0 : vector<16x128xf32>, vector<16x128xf32> -> vector<32x128xf32>
    %c0_38 = arith.constant 0 : index
    %c0_39 = arith.constant 0 : index
    %59 = vector.load %arg9[%c0_38, %c0_39] : memref<2x32xf32, #tpu.memory_space<vmem>>, vector<2x32xf32>
    %cst_40 = arith.constant dense<0.000000e+00> : vector<2x128xf32>
    %60 = tpu.matmul %59, %51, %cst_40 {dimension_numbers = #tpu.dot_dimension_numbers<[1], [0], [0], [1], [0, 0, 1, 1], [], []>} : vector<2x32xf32>, vector<32x128xf32>, vector<2x128xf32> -> vector<2x128xf32>
    %cst_41 = arith.constant 0.000000e+00 : f32
    %61 = vector.broadcast %cst_41 : f32 to vector<2x128xf32>
    %62 = arith.maximumf %60, %61 : vector<2x128xf32>
    %cst_42 = arith.constant dense<0.000000e+00> : vector<2x128xf32>
    %63 = tpu.matmul %59, %58, %cst_42 {dimension_numbers = #tpu.dot_dimension_numbers<[1], [0], [0], [1], [0, 0, 1, 1], [], []>} : vector<2x32xf32>, vector<32x128xf32>, vector<2x128xf32> -> vector<2x128xf32>
    %cst_43 = arith.constant 0.000000e+00 : f32
    %64 = vector.broadcast %cst_43 : f32 to vector<2x128xf32>
    %65 = arith.maximumf %63, %64 : vector<2x128xf32>
    %66 = arith.addf %62, %65 : vector<2x128xf32>
    %c0_44 = arith.constant 0 : index
    %c0_45 = arith.constant 0 : index
    %67 = vector.load %arg10[%c0_44, %c0_45] : memref<32x2xf32, #tpu.memory_space<vmem>>, vector<32x2xf32>
    %cst_46 = arith.constant dense<0.000000e+00> : vector<32x128xf32>
    %68 = tpu.matmul %67, %66, %cst_46 {dimension_numbers = #tpu.dot_dimension_numbers<[1], [0], [0], [1], [0, 0, 1, 1], [], []>} : vector<32x2xf32>, vector<2x128xf32>, vector<32x128xf32> -> vector<32x128xf32>
    %69 = arith.negf %68 : vector<32x128xf32>
    %70 = math.exp %69 : vector<32x128xf32>
    %cst_47 = arith.constant 1.000000e+00 : f32
    %71 = vector.broadcast %cst_47 : f32 to vector<32x128xf32>
    %72 = arith.addf %71, %70 : vector<32x128xf32>
    %73 = arith.divf %71, %72 : vector<32x128xf32>
    %74 = vector.extract_strided_slice %73 {offsets = [0, 0], sizes = [16, 128], strides = [1, 1]} : vector<32x128xf32> to vector<16x128xf32>
    %75 = vector.extract_strided_slice %73 {offsets = [16, 0], sizes = [16, 128], strides = [1, 1]} : vector<32x128xf32> to vector<16x128xf32>
    %76 = vector.shape_cast %74 : vector<16x128xf32> to vector<1x16x128xf32>
    %77 = vector.broadcast %76 : vector<1x16x128xf32> to vector<49x16x128xf32>
    %78 = arith.mulf %21, %77 : vector<49x16x128xf32>
    %79 = arith.addf %78, %1 : vector<49x16x128xf32>
    %80 = vector.shape_cast %75 : vector<16x128xf32> to vector<1x16x128xf32>
    %81 = vector.broadcast %80 : vector<1x16x128xf32> to vector<49x16x128xf32>
    %82 = arith.mulf %48, %81 : vector<49x16x128xf32>
    %83 = arith.addf %82, %3 : vector<49x16x128xf32>
    %cst_48 = arith.constant dense<0.000000e+00> : vector<16x128xf32>
    %84 = vector.multi_reduction <add>, %1, %cst_48 [0] : vector<49x16x128xf32> to vector<16x128xf32>
    %cst_49 = arith.constant 4.900000e+01 : f32
    %85 = vector.broadcast %cst_49 : f32 to vector<16x128xf32>
    %86 = arith.divf %84, %85 : vector<16x128xf32>
    %cst_50 = arith.constant dense<0.000000e+00> : vector<16x128xf32>
    %87 = vector.multi_reduction <add>, %3, %cst_50 [0] : vector<49x16x128xf32> to vector<16x128xf32>
    %cst_51 = arith.constant 4.900000e+01 : f32
    %88 = vector.broadcast %cst_51 : f32 to vector<16x128xf32>
    %89 = arith.divf %87, %88 : vector<16x128xf32>
    %cst_52 = arith.constant dense<0xFF800000> : vector<16x128xf32>
    %90 = vector.multi_reduction <maximumf>, %79, %cst_52 [0] : vector<49x16x128xf32> to vector<16x128xf32>
    %91 = arith.addf %90, %86 : vector<16x128xf32>
    %cst_53 = arith.constant dense<0xFF800000> : vector<16x128xf32>
    %92 = vector.multi_reduction <maximumf>, %83, %cst_53 [0] : vector<49x16x128xf32> to vector<16x128xf32>
    %93 = arith.addf %92, %89 : vector<16x128xf32>
    %cst_54 = arith.constant dense<0xFF800000> : vector<16x128xf32>
    %94 = vector.multi_reduction <maximumf>, %3, %cst_54 [0] : vector<49x16x128xf32> to vector<16x128xf32>
    %cst_55 = arith.constant dense<0xFF800000> : vector<16x128xf32>
    %95 = vector.multi_reduction <maximumf>, %48, %cst_55 [0] : vector<49x16x128xf32> to vector<16x128xf32>
    %96 = tpu.concatenate %91, %93, %86, %89, %94, %95 in 0 : vector<16x128xf32>, vector<16x128xf32>, vector<16x128xf32>, vector<16x128xf32>, vector<16x128xf32>, vector<16x128xf32> -> vector<96x128xf32>
    %c0_56 = arith.constant 0 : index
    %c0_57 = arith.constant 0 : index
    %97 = vector.load %arg11[%c0_56, %c0_57] : memref<96x128xf32, #tpu.memory_space<vmem>>, vector<96x128xf32>
    tpu.vector_store %arg11[%c0_56, %c0_57], %96 {strides = array<i32>} : memref<96x128xf32, #tpu.memory_space<vmem>>, vector<96x128xf32>,
    return
  }
  func.func @transform_0(%arg0: i32) -> (i32, i32, i32) {
    %c0_i32 = arith.constant 0 : i32
    %c0_i32_0 = arith.constant 0 : i32
    %c0_i32_1 = arith.constant 0 : i32
    return %c0_i32, %c0_i32_0, %arg0 : i32, i32, i32
  }
  func.func @transform_1(%arg0: i32) -> (i32, i32, i32) {
    %c0_i32 = arith.constant 0 : i32
    %c0_i32_0 = arith.constant 0 : i32
    %c0_i32_1 = arith.constant 0 : i32
    return %c0_i32, %c0_i32_0, %arg0 : i32, i32, i32
  }
  func.func @transform_2(%arg0: i32) -> (i32, i32) {
    %c0_i32 = arith.constant 0 : i32
    %c0_i32_0 = arith.constant 0 : i32
    %c0_i32_1 = arith.constant 0 : i32
    return %c0_i32, %c0_i32_0 : i32, i32
  }
  func.func @transform_3(%arg0: i32) -> i32 {
    %c0_i32 = arith.constant 0 : i32
    %c0_i32_0 = arith.constant 0 : i32
    return %c0_i32 : i32
  }
  func.func @transform_4(%arg0: i32) -> (i32, i32) {
    %c0_i32 = arith.constant 0 : i32
    %c0_i32_0 = arith.constant 0 : i32
    %c0_i32_1 = arith.constant 0 : i32
    return %c0_i32, %c0_i32_0 : i32, i32
  }
  func.func @transform_5(%arg0: i32) -> (i32, i32) {
    %c0_i32 = arith.constant 0 : i32
    %c0_i32_0 = arith.constant 0 : i32
    %c0_i32_1 = arith.constant 0 : i32
    return %c0_i32, %c0_i32_0 : i32, i32
  }
  func.func @transform_6(%arg0: i32) -> (i32, i32) {
    %c0_i32 = arith.constant 0 : i32
    %c0_i32_0 = arith.constant 0 : i32
    %c0_i32_1 = arith.constant 0 : i32
    return %c0_i32, %c0_i32_0 : i32, i32
  }
  func.func @transform_7(%arg0: i32) -> (i32, i32) {
    %c0_i32 = arith.constant 0 : i32
    %c0_i32_0 = arith.constant 0 : i32
    %c0_i32_1 = arith.constant 0 : i32
    return %c0_i32, %c0_i32_0 : i32, i32
  }
  func.func @transform_8(%arg0: i32) -> (i32, i32) {
    %c0_i32 = arith.constant 0 : i32
    %c0_i32_0 = arith.constant 0 : i32
    %c0_i32_1 = arith.constant 0 : i32
    return %c0_i32, %c0_i32_0 : i32, i32
  }
  func.func @transform_9(%arg0: i32) -> (i32, i32) {
    %c0_i32 = arith.constant 0 : i32
    %c0_i32_0 = arith.constant 0 : i32
    %c0_i32_1 = arith.constant 0 : i32
    return %c0_i32, %c0_i32_0 : i32, i32
  }
  func.func @transform_10(%arg0: i32) -> (i32, i32) {
    %c0_i32 = arith.constant 0 : i32
    %c0_i32_0 = arith.constant 0 : i32
    return %c0_i32, %arg0 : i32, i32
  }
}

</mosaic_0001>

<bundles_post_ra>
// kernel: tpu_custom_call.1
= control target key start
LH: loop header
LB: loop body
LE: loop exit
PB: predicated region body
PF: predicated region fallthrough
CT: control target
= control target key end

     0   :  { %s11601_s0 = inlined_call_operand.hbm [shape: bf16[49,16,384], index: 0, kind: input, shape index: {}]   ;;  %s11602_s1 = inlined_call_operand.hbm [shape: bf16[49,16,384], index: 1, kind: input, shape index: {}]   ;;  %s11603_s2 = inlined_call_operand.vmem [shape: f32[49,98], index: 2, kind: input, shape index: {}]   ;;  %s11604_s3 = inlined_call_operand.<no memory space> [shape: f32[1], index: 3, kind: input, shape index: {}]   ;;  %s11605_s4 = inlined_call_operand.vmem [shape: f32[14,49], index: 4, kind: input, shape index: {}]   ;;  %s11606_s5 = inlined_call_operand.vmem [shape: f32[8,14], index: 5, kind: input, shape index: {}]   ;;  %s11607_s6 = inlined_call_operand.vmem [shape: f32[14,8], index: 6, kind: input, shape index: {}]   ;;  %s11608_s7 = inlined_call_operand.vmem [shape: f32[49,14], index: 7, kind: input, shape index: {}]   ;;  %s11609_s8 = inlined_call_operand.vmem [shape: f32[2,32], index: 8, kind: input, shape index: {}]   ;;  %s11610_s9 = inlined_call_operand.vmem [shape: f32[32,2], index: 9, kind: input, shape index: {}]   ;;  %s11611_s10 = inlined_call_operand.hbm [shape: f32[96,384], index: 10, kind: output, shape index: {}]  }
   0x1   :  { %12290 = sst [smem:[#allocation406_spill]] %s11601_s0 }
   0x2   :  { %15 = sst [smem:[#allocation2]] %s11604_s3 }
   0x3   :  { %16 = vsyncpa [#allocation4], 0 }
   0x4   :  { %18 = vsyncpa [#allocation4 + $0x1], 0 }
   0x5   :  { %19 = vsyncpa [#allocation7], 0 }
   0x6   :  { %21 = vsyncpa [#allocation7 + $0x1], 0 }
   0x7   :  { %22 = vsyncpa [#allocation5], 0 }
   0x8   :  { %24 = vsyncpa [#allocation5 + $0x1], 0  ;;  %s7544_s15 = smov 0   ;;  %s7546_s16 = smov 0  }
   0x9   :  { %s7548_s17 = smov 0   ;;  %s7550_s18 = smov 0  }
   0xa LB: > { %12291 = sst [smem:[#allocation12_spill]] %s7466_s17  ;;  %s7565_s3 = sadd.s32 4294967295, %s7470_s18   ;;  %s7470_s18 = sphi %s7550_s18, %s13588_s18   ;;  %s7466_s17 = sphi %s7548_s17, %s13590_s17   ;;  %s7462_s16 = sphi %s7546_s16, %s13592_s16   ;;  %s7458_s15 = sphi %s7544_s15, %s13591_s15  }
   0xb   : > { %s6382_s19 = sadd.s32 4294967294, %s7470_s18   ;;  %s7569_s20 = sadd.s32 1, %s7470_s18  }
   0xc   : > { %12292 = sst [smem:[#allocation13_spill]] %s7569_s20  ;;  %s37_s21 = sadd.s32 1, %s7466_s17 }
   0xd   : > { %s34_s22 = ssub.s32 %s7470_s18, %s7569_s20  ;;  %p44_p0 = scmp.ne.s32.totalorder %s7466_s17, %s7462_s16 }
   0xe   : > { %p35_p1 = scmp.eq.s32.totalorder %s34_s22, 0  ;;  %p45_p2 = scmp.eq.s32.totalorder %s7470_s18, 0 }
   0xf   : > { %p50_p3 = scmp.ne.s32.totalorder %s7462_s16, %s7458_s15  ;;  %p51_p4 = scmp.eq.s32.totalorder %s7565_s3, 0 }
  0x10   : > { %s7581_s23 = scalar_select %p35_p1, %s7466_s17, %s37_s21  }
  0x11   : > { %p46_p5 = por %p45_p2, %p44_p0  ;;  %p7583_p6 = por %p51_p4, %p50_p3 }
  0x12   : > { %12293 = sst [smem:[#allocation14_spill]] %s7581_s23  ;;  %p268_p7 = scmp.eq.s32.totalorder %s7565_s3, 2 }
  0x13   : > { %s12294_s24 = scalar_select %p7583_p6, 1, 0 }
  0x14   : > { %p274_p8 = scmp.eq.s32.totalorder %s6382_s19, 2  ;;  %p7240_p9 = scmp.lt.s32.totalorder %s7470_s18, 3 }
  0x15   : > { %p7589_p10 = por %p268_p7, %p44_p0  ;;  %s7598_s27 = sand.u32 1, %s7466_s17  }
  0x16   : > { %p7593_p11 = por %p274_p8, %p50_p3  ;;  %s11612_s28 = sshll.u32 %s7470_s18, 6 }
  0x17   : > { %s12295_s25 = scalar_select %p7589_p10, 1, 0 }
  0x18   : > { %s12296_s26 = scalar_select %p7593_p11, 1, 0 }
  0x19   : > { %s11615_s29 = smul.u32 392, %s7598_s27  ;;  %s12298_s0 = sld [smem:[#allocation406_spill]] }
  0x1a   : > { %12297 = sst [smem:[#allocation15_spill]] %s12296_s26  ;;  %p7609_p12 = pnand %p7240_p9, %p46_p5 }
  0x1b   : > { %s322_s14 = scalar_lea.vmem [#allocation3], %s11615_s29  ;;  %s319_s21 = scalar_lea.sflag [#allocation4], %s7598_s27 }
  0x1c   : > { %s328_s19 = sshll.u32 %s322_s14, 4  ;;  %p7342_p1 = pneg %p7609_p12  ;;  %s7615_s19 = int_to_ptr.vmem [resolvable:$true] %s328_s19 }
  0x1f   : > { %s7607_s12 = scalar_lea.hbm %s12298_s0, %s11612_s28  ;;  %s7345_s28 = scalar_lea.hbm %s12298_s0, 18816 }
  0x20   : > { %s7340_s22 = scalar_lea.hbm %s7607_s12, 6272  ;;  %p7346_p4 = scmp.lt.u32.totalorder %s7607_s12, %s12298_s0 }
  0x21   : > { %p7341_p0 = scmp.ne.s32.totalorder %s7607_s12, %s7340_s22  ;;  %p7347_p5 = scmp.lt.u32.totalorder %s7345_s28, %s7340_s22 }
  0x22   : > { %p7349_p8 = scmp.lt.u32.totalorder %s7340_s22, %s7607_s12 }
  0x23   : > { %p7343_p2 = pnand %p7342_p1, %p7341_p0  ;;  %p7348_p7 = por %p7347_p5, %p7346_p4 }
  0x25   : > { %p7344_p3 = pneg %p7343_p2  ;;  %p7350_p9 = por %p7349_p8, %p7348_p7 }
  0x27   : > { %p7351_p13 = pnand %p7350_p9, %p7344_p3 }
  0x29   : > { %7354 = shalt.err (!%p7351_p13)
}
  0x2a   : > { %s7355_s14 = scalar_lea.vmem %s7615_s19, 6272  ;;  %s7472_s30 = smov [#allocation3]  }
  0x2b   : > { %p7356_p0 = scmp.ne.s32.totalorder %s7615_s19, %s7355_s14  ;;  %s7360_s11 = sshll.u32 %s7472_s30, 4  ;;  %s7361_s11 = int_to_ptr.vmem [resolvable:$false] %s7360_s11 }
  0x2c   : > { %s7362_s17 = scalar_lea.vmem %s7361_s11, 12544  ;;  %p7363_p10 = scmp.lt.s32.totalorder %s7615_s19, %s7361_s11 }
  0x2d   : > { %p7358_p2 = pnand %p7356_p0, %p7342_p1  ;;  %p7364_p4 = scmp.lt.s32.totalorder %s7362_s17, %s7355_s14 }
  0x2f   : > { %p7359_p11 = pneg %p7358_p2  ;;  %p7365_p5 = por %p7364_p4, %p7363_p10 }
  0x31   : > { %p7366_p7 = pnand %p7365_p5, %p7359_p11 }
  0x33   : > { %7369 = shalt.err (!%p7366_p7)
}
  0x34   : > { %s11619_s23 = smov 192   ;;  %s7474_s28 = smov 64  }
  0x35   : > { %s7475_s22 = smov 4   ;;  %p356_p10 = scmp.lt.s32.totalorder %s7470_s18, 4 }
  0x36   : > { %7232 = dma.hbm_to_vmem [thread:$0]  (!%p7609_p12), %s7607_s12, 6272, %s7615_s19, %s319_s21, %s11619_s23, %s7474_s28, %s7475_s22  }
  0x37   : > { %s12300_s14 = sshll.u32 %s7470_s18, 6  ;;  %p12301_p11 = scmp.ge.s32.totalorder %s7470_s18, 1 }
  0x38   : > { %s7655_s17 = scalar_lea.hbm %s11602_s1, %s12300_s14  ;;  %s12303_s0 = smul.u32 392, %s7598_s27 }
  0x39   : > { %p7659_p13 = pnand %p12301_p11, %p356_p10  ;;  %s339_s12 = scalar_lea.sflag [#allocation7], %s7598_s27 }
  0x3a   : > { %s342_s20 = scalar_lea.vmem [#allocation6], %s12303_s0  ;;  %s7370_s19 = scalar_lea.hbm %s7655_s17, 6272 }
  0x3b   : > { %s348_s26 = sshll.u32 %s342_s20, 4  ;;  %p7371_p3 = scmp.ne.s32.totalorder %s7655_s17, %s7370_s19  ;;  %s7665_s26 = int_to_ptr.vmem [resolvable:$true] %s348_s26 }
  0x3c   : > { %s7375_s30 = scalar_lea.hbm %s11602_s1, 18816  ;;  %p7376_p0 = scmp.lt.u32.totalorder %s7655_s17, %s11602_s1 }
  0x3d   : > { %p7373_p8 = pnand %p7371_p3, %p7342_p1  ;;  %p7377_p2 = scmp.lt.u32.totalorder %s7375_s30, %s7370_s19 }
  0x3e   : > { %p7379_p5 = scmp.lt.u32.totalorder %s7370_s19, %s7655_s17 }
  0x3f   : > { %p7374_p9 = pneg %p7373_p8  ;;  %p7378_p4 = por %p7377_p2, %p7376_p0 }
  0x41   : > { %p7380_p7 = por %p7379_p5, %p7378_p4 }
  0x43   : > { %p7381_p10 = pnand %p7380_p7, %p7374_p9 }
  0x45   : > { %7384 = shalt.err (!%p7381_p10)
}
  0x46   : > { %s7385_s0 = scalar_lea.vmem %s7665_s26, 6272  ;;  %s7476_s20 = smov [#allocation6]  }
  0x47   : > { %p7386_p11 = scmp.ne.s32.totalorder %s7665_s26, %s7385_s0  ;;  %s7390_s21 = sshll.u32 %s7476_s20, 4  ;;  %s7391_s21 = int_to_ptr.vmem [resolvable:$false] %s7390_s21 }
  0x48   : > { %s7392_s23 = scalar_lea.vmem %s7391_s21, 12544  ;;  %p7393_p6 = scmp.lt.s32.totalorder %s7665_s26, %s7391_s21 }
  0x49   : > { %p7388_p3 = pnand %p7386_p11, %p7342_p1  ;;  %p7394_p0 = scmp.lt.s32.totalorder %s7392_s23, %s7385_s0 }
  0x4b   : > { %p7389_p8 = pneg %p7388_p3  ;;  %p7395_p2 = por %p7394_p0, %p7393_p6 }
  0x4d   : > { %p7396_p4 = pnand %p7395_p2, %p7389_p8 }
  0x4f   : > { %7399 = shalt.err (!%p7396_p4)
}
  0x50   : > { %s12304_s19 = smov 192   ;;  %360 = sbr.rel (%p7659_p13) target bundleno = 2098 (0x832), region = 60 }
  0x51   : > { %7235 = dma.hbm_to_vmem [thread:$0]  (!%p7609_p12), %s7655_s17, 6272, %s7665_s26, %s339_s12, %s12304_s19, %s7474_s28, %s7475_s22  }
  0x57   : > { %s7699_s14 = sand.u32 1, %s7462_s16   ;;  %p12305_p6 = scmp.ne.s32.totalorder %s12294_s24, 0 }
  0x58   : > { %s7221_s30 = smul.u32 392, %s7699_s14  ;;  %s363_s11 = scalar_lea.sflag [#allocation4], %s7699_s14 }
  0x5a   : > { %s7703_s13 = scalar_lea.vmem [#allocation3], %s7221_s30 }
  0x5b   : > { %7445 = dma.done.wait (%p12305_p6), %s363_s11, 6272  }
  0x5c   : > { %7447 = vsyncadd (%p12305_p6), %s363_s11, 4294961024  ;;  %s372_s26 = scalar_lea.sflag [#allocation7], %s7699_s14  ;;  %s7710_s27 = scalar_lea.vmem [#allocation6], %s7221_s30 }
  0x5d   : > { %7449 = dma.done.wait (%p12305_p6), %s372_s26, 6272  }
  0x5e   : > { %7451 = vsyncadd (%p12305_p6), %s372_s26, 4294961024  ;;  %v6636_v0 = vld [vmem:[%s7710_s27] sm:$0xff]   ;;  %v6879_v1 = vld [vmem:[%s7710_s27 + $0x8] sm:$0xff]   ;;  %vm1594_vm0 = vcmask 1041409   ;;  %vm1596_vm1 = vcmask 1042434   ;;  %vm1598_vm2 = vcmask 1043459  }
  0x5f   : > { %v6880_v2 = vld [vmem:[%s7710_s27 + $0x10] sm:$0xff]   ;;  %v6882_v3 = vld [vmem:[%s7710_s27 + $0x20] sm:$0xff]   ;;  %v6883_v4 = vld [vmem:[%s7710_s27 + $0x28] sm:$0xff]   ;;  %v7721_v5 = vunpack.c.l.bf16 %v6636_v0  ;;  %v7723_v6 = vunpack.c.h.bf16 %v6636_v0  ;;  %v7736_v14 = vunpack.c.l.bf16 %v6879_v1  ;;  %v7738_v15 = vunpack.c.h.bf16 %v6879_v1  ;;  %s7222_s24 = smul.u32 96, %s7699_s14  ;;  %s1756_s19 = sld [smem:[#allocation2]] }
  0x60   : > { %v6884_v7 = vld [vmem:[%s7710_s27 + $0x30] sm:$0xff]   ;;  %v6881_v8 = vld [vmem:[%s7710_s27 + $0x18] sm:$0xff]   ;;  %v7727_v9 = vunpack.c.l.bf16 %v6882_v3  ;;  %v7729_v10 = vunpack.c.h.bf16 %v6882_v3  ;;  %v7731_v11 = vunpack.c.l.bf16 %v6883_v4  ;;  %v7733_v12 = vunpack.c.h.bf16 %v6883_v4  ;;  %v6886_v18 = vld [vmem:[%s7710_s27 + $0x40] sm:$0xff]   ;;  %s6436_s0 = sshll.u32 %s7565_s3, 7  ;;  %s6274_s30 = scalar_lea.sflag [#allocation5], %s7699_s14 }
  0x61   : > { %12306 = vst [vmem:[#allocation16_spill] sm:$0xff] %v7721_v5  ;;  %12307 = vst [vmem:[#allocation17_spill] sm:$0xff] %v7723_v6  ;;  %v6885_v13 = vld [vmem:[%s7710_s27 + $0x38] sm:$0xff]   ;;  %v7740_v16 = vunpack.c.l.bf16 %v6880_v2  ;;  %v7742_v17 = vunpack.c.h.bf16 %v6880_v2  ;;  %v7749_v21 = vunpack.c.l.bf16 %v6884_v7  ;;  %v7751_v22 = vunpack.c.h.bf16 %v6884_v7  ;;  %v6887_v23 = vld [vmem:[%s7710_s27 + $0x48] sm:$0xff]   ;;  %s8240_s29 = scalar_lea.vmem [#allocation8], %s7222_s24  ;;  %p13585_p1 = scmp.ne.s32.totalorder %s12295_s25, 0 }
  0x62   : > { %12308 = vst [vmem:[#allocation18_spill] sm:$0xff] %v7727_v9  ;;  %12309 = vst [vmem:[#allocation19_spill] sm:$0xff] %v7729_v10  ;;  %v6167_v19 = vmax.f32 %v7731_v11, %v7727_v9  ;;  %v6215_v20 = vmax.f32 %v7733_v12, %v7729_v10  ;;  %v6888_v24 = vld [vmem:[%s7710_s27 + $0x50] sm:$0xff]   ;;  %v7755_v25 = vunpack.c.l.bf16 %v6881_v8  ;;  %v7757_v26 = vunpack.c.h.bf16 %v6881_v8  ;;  %v6889_v29 = vld [vmem:[%s7710_s27 + $0x58] sm:$0xff]   ;;  %s6286_s20 = sshll.u32 %s8240_s29, 4  ;;  %s7482_s3 = smov [#allocation8]   ;;  %s11556_s20 = int_to_ptr.vmem [resolvable:$true] %s6286_s20 }
  0x63   : > { %12310 = vst [vmem:[#allocation20_spill] sm:$0xff] %v7731_v11  ;;  %12311 = vst [vmem:[#allocation21_spill] sm:$0xff] %v7733_v12  ;;  %v7759_v27 = vunpack.c.l.bf16 %v6885_v13  ;;  %v7761_v28 = vunpack.c.h.bf16 %v6885_v13  ;;  %v7766_v32 = vunpack.c.l.bf16 %v6886_v18  ;;  %v7768_v33 = vunpack.c.h.bf16 %v6886_v18  ;;  %v6890_v34 = vld [vmem:[%s7710_s27 + $0x60] sm:$0xff]   ;;  %s7400_s11 = scalar_lea.vmem %s11556_s20, 1536 }
  0x64   : > { %12312 = vst [vmem:[#allocation22_spill] sm:$0xff] %v7736_v14  ;;  %12313 = vst [vmem:[#allocation23_spill] sm:$0xff] %v7738_v15  ;;  %v6168_v30 = vmax.f32 %v7749_v21, %v6167_v19  ;;  %v6216_v31 = vmax.f32 %v7751_v22, %v6215_v20  ;;  %v7771_v35 = vunpack.c.l.bf16 %v6887_v23  ;;  %v7773_v36 = vunpack.c.h.bf16 %v6887_v23  ;;  %v6891_v23 = vld [vmem:[%s7710_s27 + $0x68] sm:$0xff]   ;;  %p7401_p12 = scmp.ne.s32.totalorder %s11556_s20, %s7400_s11 }
  0x65   : > { %12314 = vst [vmem:[#allocation24_spill] sm:$0xff] %v7740_v16  ;;  %12315 = vst [vmem:[#allocation25_spill] sm:$0xff] %v7742_v17  ;;  %v7775_v37 = vunpack.c.l.bf16 %v6888_v24  ;;  %v7777_v38 = vunpack.c.h.bf16 %v6888_v24  ;;  %v7781_v41 = vunpack.c.l.bf16 %v6889_v29  ;;  %v7783_v42 = vunpack.c.h.bf16 %v6889_v29 }
  0x66   : > { %12316 = vst [vmem:[#allocation26_spill] sm:$0xff] %v7749_v21  ;;  %12317 = vst [vmem:[#allocation27_spill] sm:$0xff] %v7751_v22  ;;  %v6169_v39 = vmax.f32 %v7759_v27, %v6168_v30  ;;  %v6217_v40 = vmax.f32 %v7761_v28, %v6216_v31  ;;  %v7785_v43 = vunpack.c.l.bf16 %v6890_v34  ;;  %v7787_v44 = vunpack.c.h.bf16 %v6890_v34  ;;  %p7402_p13 = pnand %p7401_p12, %p13585_p1 }
  0x67   : > { %12318 = vst [vmem:[#allocation28_spill] sm:$0xff] %v7755_v25  ;;  %12319 = vst [vmem:[#allocation29_spill] sm:$0xff] %v7757_v26  ;;  %v2583_v45 = vmax.f32 %v7721_v5, %v7723_v6  ;;  %v2590_v46 = vmax.f32 %v7736_v14, %v7738_v15  ;;  %v2597_v49 = vmax.f32 %v7740_v16, %v7742_v17  ;;  %vm1600_vm3 = vcmask 1044484  }
  0x68   : > { %12320 = vst [vmem:[#allocation30_spill] sm:$0xff] %v7759_v27  ;;  %12321 = vst [vmem:[#allocation31_spill] sm:$0xff] %v7761_v28  ;;  %v6170_v47 = vmax.f32 %v7766_v32, %v6169_v39  ;;  %v6218_v48 = vmax.f32 %v7768_v33, %v6217_v40  ;;  %v2604_v50 = vmax.f32 %v7755_v25, %v7757_v26  ;;  %v6892_v40 = vld [vmem:[%s7710_s27 + $0x70] sm:$0xff]   ;;  %vm1602_vm4 = vcmask 1045509   ;;  %p7403_p9 = pneg %p7402_p13 }
  0x69   : > { %12322 = vst [vmem:[#allocation32_spill] sm:$0xff] %v7766_v32  ;;  %12323 = vst [vmem:[#allocation33_spill] sm:$0xff] %v7768_v33  ;;  %v2584_v51 = vrot.slane %v2583_v45, 4  ;;  %v2591_v52 = vrot.slane %v2590_v46, 4  ;;  %v2611_v53 = vmax.f32 %v7727_v9, %v7729_v10  ;;  %v2618_v54 = vmax.f32 %v7731_v11, %v7733_v12 }
  0x6a   : > { %12324 = vst [vmem:[#allocation34_spill] sm:$0xff] %v7771_v35  ;;  %12325 = vst [vmem:[#allocation35_spill] sm:$0xff] %v7773_v36  ;;  %v6171_v55 = vmax.f32 %v7771_v35, %v6170_v47  ;;  %v6219_v56 = vmax.f32 %v7773_v36, %v6218_v48  ;;  %v2598_v57 = vrot.slane %v2597_v49, 4  ;;  %v2605_v58 = vrot.slane %v2604_v50, 4 }
  0x6b   : > { %12326 = vst [vmem:[#allocation36_spill] sm:$0xff] %v7775_v37  ;;  %12327 = vst [vmem:[#allocation37_spill] sm:$0xff] %v7777_v38  ;;  %v2585_v59 = vmax.f32 %v2583_v45, %v2584_v51  ;;  %v2592_v60 = vmax.f32 %v2590_v46, %v2591_v52  ;;  %v2612_v61 = vrot.slane %v2611_v53, 4  ;;  %v2619_v62 = vrot.slane %v2618_v54, 4  ;;  %v6893_v45 = vld [vmem:[%s7710_s27 + $0x78] sm:$0xff]  }
  0x6c   : > { %12328 = vst [vmem:[#allocation38_spill] sm:$0xff] %v7781_v41  ;;  %12329 = vst [vmem:[#allocation39_spill] sm:$0xff] %v7783_v42  ;;  %v6172_v63 = vmax.f32 %v7775_v37, %v6171_v55  ;;  %v6220_v0 = vmax.f32 %v7777_v38, %v6219_v56  ;;  %v2599_v1 = vmax.f32 %v2597_v49, %v2598_v57  ;;  %v7816_v51 = vunpack.c.h.bf16 %v6891_v23 }
  0x6d   : > { %12330 = vst [vmem:[#allocation40_spill] sm:$0xff] %v7785_v43  ;;  %12331 = vst [vmem:[#allocation41_spill] sm:$0xff] %v7787_v44  ;;  %v2606_v2 = vmax.f32 %v2604_v50, %v2605_v58  ;;  %v2586_v3 = vrot.slane %v2585_v59, 2  ;;  %v2593_v4 = vrot.slane %v2592_v60, 2  ;;  %v2613_v7 = vmax.f32 %v2611_v53, %v2612_v61 }
  0x6e   : > { %v2620_v8 = vmax.f32 %v2618_v54, %v2619_v62  ;;  %v6173_v13 = vmax.f32 %v7781_v41, %v6172_v63  ;;  %v6221_v18 = vmax.f32 %v7783_v42, %v6220_v0  ;;  %v2600_v19 = vrot.slane %v2599_v1, 2  ;;  %12333 = vst [vmem:[#allocation43_spill] sm:$0xff] %v7816_v51 }
  0x6f   : > { %v2607_v20 = vrot.slane %v2606_v2, 2  ;;  %v2587_v24 = vmax.f32 %v2585_v59, %v2586_v3  ;;  %v2594_v29 = vmax.f32 %v2592_v60, %v2593_v4  ;;  %v2614_v30 = vrot.slane %v2613_v7, 2 }
  0x70   : > { %v2621_v31 = vrot.slane %v2620_v8, 2  ;;  %v6174_v34 = vmax.f32 %v7785_v43, %v6173_v13  ;;  %v6222_v39 = vmax.f32 %v7787_v44, %v6221_v18  ;;  %v2601_v46 = vmax.f32 %v2599_v1, %v2600_v19 }
  0x71   : > { %v2608_v47 = vmax.f32 %v2606_v2, %v2607_v20  ;;  %v2588_v48 = vrot.slane %v2587_v24, 1  ;;  %v2595_v49 = vrot.slane %v2594_v29, 1  ;;  %v7814_v50 = vunpack.c.l.bf16 %v6891_v23 }
  0x72   : > { %v7818_v52 = vmax.f32 %v2613_v7, %v2614_v30  ;;  %v7820_v53 = vmax.f32 %v2620_v8, %v2621_v31  ;;  %v7822_v54 = vunpack.c.l.bf16 %v6892_v40  ;;  %v7824_v55 = vunpack.c.h.bf16 %v6892_v40 }
  0x73   : > { %12332 = vst [vmem:[#allocation42_spill] sm:$0xff] %v7814_v50  ;;  %v7826_v56 = vunpack.c.l.bf16 %v6893_v45  ;;  %v7828_v57 = vunpack.c.h.bf16 %v6893_v45  ;;  %v6175_v58 = vmax.f32 %v7814_v50, %v6174_v34  ;;  %v6223_v59 = vmax.f32 %v7816_v51, %v6222_v39 }
  0x74   : > { %12334 = vst [vmem:[#allocation44_spill] sm:$0xff] %v7822_v54  ;;  %12335 = vst [vmem:[#allocation45_spill] sm:$0xff] %v7824_v55  ;;  %v2602_v60 = vrot.slane %v2601_v46, 1  ;;  %v2609_v61 = vrot.slane %v2608_v47, 1  ;;  %v7832_v62 = vmax.f32 %v2587_v24, %v2588_v48  ;;  %v7834_v63 = vmax.f32 %v2594_v29, %v2595_v49 }
  0x75   : > { %12336 = vst [vmem:[#allocation46_spill] sm:$0xff] %v7826_v56  ;;  %12337 = vst [vmem:[#allocation47_spill] sm:$0xff] %v7828_v57  ;;  %v2625_v0 = vmax.f32 %v7749_v21, %v7751_v22  ;;  %v2632_v1 = vmax.f32 %v7759_v27, %v7761_v28  ;;  %v2616_v2 = vrot.slane %v7818_v52, 1  ;;  %v2623_v3 = vrot.slane %v7820_v53, 1 }
  0x76   : > { %v2639_v4 = vmax.f32 %v7766_v32, %v7768_v33  ;;  %v2646_v7 = vmax.f32 %v7771_v35, %v7773_v36  ;;  %v2653_v18 = vmax.f32 %v7775_v37, %v7777_v38  ;;  %v2660_v19 = vmax.f32 %v7781_v41, %v7783_v42 }
  0x77   : > { %v2626_v8 = vrot.slane %v2625_v0, 4  ;;  %v2633_v13 = vrot.slane %v2632_v1, 4  ;;  %v2667_v24 = vmax.f32 %v7785_v43, %v7787_v44  ;;  %v2674_v29 = vmax.f32 %v7814_v50, %v7816_v51 }
  0x78   : > { %v2640_v20 = vrot.slane %v2639_v4, 4  ;;  %v2647_v23 = vrot.slane %v2646_v7, 4  ;;  %v7855_v30 = vmax.f32 %v7822_v54, %v6175_v58  ;;  %v2654_v34 = vrot.slane %v2653_v18, 4 }
  0x79   : > { %v2627_v31 = vmax.f32 %v2625_v0, %v2626_v8  ;;  %v2661_v39 = vrot.slane %v2660_v19, 4  ;;  %v2668_v48 = vrot.slane %v2667_v24, 4  ;;  %v2675_v49 = vrot.slane %v2674_v29, 4 }
  0x7a   : > { %v2641_v40 = vmax.f32 %v2639_v4, %v2640_v20  ;;  %v2648_v45 = vmax.f32 %v2646_v7, %v2647_v23  ;;  %v2634_v41 = vmax.f32 %v2632_v1, %v2633_v13  ;;  %v2655_v38 = vmax.f32 %v2653_v18, %v2654_v34 }
  0x7b   : > { %v2628_v42 = vrot.slane %v2627_v31, 2  ;;  %v2662_v44 = vmax.f32 %v2660_v19, %v2661_v39  ;;  %v2669_v50 = vmax.f32 %v2667_v24, %v2668_v48  ;;  %v2676_v58 = vmax.f32 %v2674_v29, %v2675_v49 }
  0x7c   : > { %v2642_v43 = vrot.slane %v2641_v40, 2  ;;  %v2649_v51 = vrot.slane %v2648_v45, 2  ;;  %v7858_v37 = vmax.f32 %v7824_v55, %v6223_v59  ;;  %v2603_v0 = vmax.f32 %v2601_v46, %v2602_v60 }
  0x7d   : > { %v2656_v8 = vrot.slane %v2655_v38, 2  ;;  %v2663_v36 = vrot.slane %v2662_v44, 2  ;;  %v2670_v20 = vrot.slane %v2669_v50, 2  ;;  %v2677_v23 = vrot.slane %v2676_v58, 2 }
  0x7e   : > { %v2643_v4 = vmax.f32 %v2641_v40, %v2642_v43  ;;  %v2650_v7 = vmax.f32 %v2648_v45, %v2649_v51  ;;  %v2610_v35 = vmax.f32 %v2608_v47, %v2609_v61  ;;  %v2635_v1 = vrot.slane %v2634_v41, 2 }
  0x7f   : > { %v2657_v13 = vmax.f32 %v2655_v38, %v2656_v8  ;;  %v2664_v18 = vmax.f32 %v2662_v44, %v2663_v36  ;;  %v2629_v19 = vmax.f32 %v2627_v31, %v2628_v42  ;;  %v2671_v24 = vmax.f32 %v2669_v50, %v2670_v20 }
  0x80   : > { %v2644_v34 = vrot.slane %v2643_v4, 1  ;;  %v2651_v39 = vrot.slane %v2650_v7, 1  ;;  %v2617_v29 = vmax.f32 %v7818_v52, %v2616_v2  ;;  %v2624_v59 = vmax.f32 %v7820_v53, %v2623_v3 }
  0x81   : > { %v2658_v46 = vrot.slane %v2657_v13, 1  ;;  %v2665_v60 = vrot.slane %v2664_v18, 1  ;;  %v2672_v43 = vrot.slane %v2671_v24, 1  ;;  %v2678_v51 = vmax.f32 %v2676_v58, %v2677_v23 }
  0x82   : > { %v2645_v48 = vmax.f32 %v2643_v4, %v2644_v34  ;;  %v2652_v49 = vmax.f32 %v2650_v7, %v2651_v39  ;;  %v2681_v38 = vmax.f32 %v7822_v54, %v7824_v55  ;;  %v2688_v36 = vmax.f32 %v7826_v56, %v7828_v57 }
  0x83   : > { %v2659_v40 = vmax.f32 %v2657_v13, %v2658_v46  ;;  %v2666_v45 = vmax.f32 %v2664_v18, %v2665_v60  ;;  %v2630_v42 = vrot.slane %v2629_v19, 1  ;;  %v2636_v44 = vmax.f32 %v2634_v41, %v2635_v1  ;;  %v6894_v13 = vld [vmem:[%s7710_s27 + $0x80] sm:$0xff]   ;;  %v6895_v46 = vld [vmem:[%s7710_s27 + $0x88] sm:$0xff]  }
  0x84   : > { %v3369_v47 = vsel %vm1594_vm0, %v7834_v63, %v7832_v62  ;;  %v3376_v50 = vsel %vm1594_vm0, %v2652_v49, %v2645_v48  ;;  %v2682_v52 = vrot.slane %v2681_v38, 4  ;;  %v2689_v53 = vrot.slane %v2688_v36, 4 }
  0x85   : > { %v3370_v61 = vsel %vm1596_vm1, %v2603_v0, %v3369_v47  ;;  %v3377_v2 = vsel %vm1596_vm1, %v2659_v40, %v3376_v50  ;;  %v6177_v3 = vmax.f32 %v7826_v56, %v7855_v30  ;;  %v2673_v31 = vmax.f32 %v2671_v24, %v2672_v43 }
  0x86   : > { %v2679_v58 = vrot.slane %v2678_v51, 1  ;;  %v3371_v41 = vsel %vm1598_vm2, %v2610_v35, %v3370_v61  ;;  %v2683_v8 = vmax.f32 %v2681_v38, %v2682_v52  ;;  %v2690_v4 = vmax.f32 %v2688_v36, %v2689_v53 }
  0x87   : > { %v3372_v62 = vsel %vm1600_vm3, %v2617_v29, %v3371_v41  ;;  %v3378_v63 = vsel %vm1598_vm2, %v2666_v45, %v3377_v2  ;;  %v6225_v7 = vmax.f32 %v7828_v57, %v7858_v37  ;;  %vm1604_vm5 = vcmask 1046534  }
  0x88   : > { %v2631_v0 = vmax.f32 %v2629_v19, %v2630_v42  ;;  %v2637_v20 = vrot.slane %v2636_v44, 1  ;;  %v2684_v23 = vrot.slane %v2683_v8, 2  ;;  %v2691_v30 = vrot.slane %v2690_v4, 2 }
  0x89   : > { %v3373_v1 = vsel %vm1602_vm4, %v2624_v59, %v3372_v62  ;;  %v6165_v35 = vmax.f32 %v7721_v5, %v7740_v16  ;;  %vm1606_vm6 = vcmask 1047559   ;;  %v2680_v18 = vmax.f32 %v2678_v51, %v2679_v58 }
  0x8a   : > { %v3379_v34 = vsel %vm1600_vm3, %v2673_v31, %v3378_v63  ;;  %v6166_v39 = vmax.f32 %v7736_v14, %v7755_v25  ;;  %v2685_v37 = vmax.f32 %v2683_v8, %v2684_v23  ;;  %v2692_v24 = vmax.f32 %v2690_v4, %v2691_v30  ;;  %v6898_v63 = vld [vmem:[%s7710_s27 + $0xa0] sm:$0xff]   ;;  %v6899_v30 = vld [vmem:[%s7710_s27 + $0xa8] sm:$0xff]  }
  0x8b   : > { %v6178_v19 = vmax.f32 %v6165_v35, %v6177_v3  ;;  %v6213_v29 = vmax.f32 %v7723_v6, %v7742_v17  ;;  %v2638_v59 = vmax.f32 %v2636_v44, %v2637_v20  ;;  %v3374_v60 = vsel %vm1604_vm5, %v2631_v0, %v3373_v1  ;;  %v6896_v44 = vld [vmem:[%s7710_s27 + $0x90] sm:$0xff]   ;;  %v6897_v3 = vld [vmem:[%s7710_s27 + $0x98] sm:$0xff]  }
  0x8c   : > { %v6214_v48 = vmax.f32 %v7738_v15, %v7757_v26  ;;  %v7892_v49 = vunpack.c.l.bf16 %v6894_v13  ;;  %v2686_v43 = vrot.slane %v2685_v37, 1  ;;  %v2693_v51 = vrot.slane %v2692_v24, 1 }
  0x8d   : > { %v6179_v40 = vmax.f32 %v6166_v39, %v6178_v19  ;;  %v6226_v45 = vmax.f32 %v6213_v29, %v6225_v7  ;;  %v3380_v38 = vsel %vm1602_vm4, %v2680_v18, %v3379_v34  ;;  %v7895_v36 = vunpack.c.h.bf16 %v6894_v13  ;;  %v6900_v34 = vld [vmem:[%s7710_s27 + $0xb0] sm:$0xff]   ;;  %v6901_v29 = vld [vmem:[%s7710_s27 + $0xb8] sm:$0xff]  }
  0x8e   : > { %12338 = vst [vmem:[#allocation48_spill] sm:$0xff] %v7892_v49  ;;  %v7897_v42 = vunpack.c.l.bf16 %v6895_v46  ;;  %v2687_v47 = vmax.f32 %v2685_v37, %v2686_v43  ;;  %v2694_v50 = vmax.f32 %v2692_v24, %v2693_v51  ;;  %v3375_v61 = vsel %vm1606_vm6, %v2638_v59, %v3374_v60  ;;  %v6902_v43 = vld [vmem:[%s7710_s27 + $0xc0] sm:$0xff]  }
  0x8f   : > { %12339 = vst [vmem:[#allocation49_spill] sm:$0xff] %v7895_v36  ;;  %v6227_v52 = vmax.f32 %v6214_v48, %v6226_v45  ;;  %v6180_v53 = vmax.f32 %v7892_v49, %v6179_v40  ;;  %v7902_v2 = vunpack.c.h.bf16 %v6895_v46  ;;  %v7908_v8 = vunpack.c.l.bf16 %v6896_v44 }
  0x90   : > { %12340 = vst [vmem:[#allocation50_spill] sm:$0xff] %v7897_v42  ;;  %v3381_v31 = vsel %vm1604_vm5, %v2687_v47, %v3380_v38  ;;  %v7911_v62 = vunpack.c.h.bf16 %v6896_v44  ;;  %v7916_v23 = vunpack.c.l.bf16 %v6897_v3  ;;  %v7921_v13 = vunpack.c.h.bf16 %v6897_v3  ;;  %v6903_v44 = vld [vmem:[%s7710_s27 + $0xc8] sm:$0xff]   ;;  %v6904_v47 = vld [vmem:[%s7710_s27 + $0xd0] sm:$0xff]  }
  0x91   : > { %12341 = vst [vmem:[#allocation51_spill] sm:$0xff] %v7902_v2  ;;  %v6228_v58 = vmax.f32 %v7895_v36, %v6227_v52  ;;  %v6181_v41 = vmax.f32 %v7897_v42, %v6180_v53  ;;  %12342 = vst [vmem:[#allocation52_spill] sm:$0xff] %v7908_v8  ;;  %v3382_v4 = vsel %vm1606_vm6, %v2694_v50, %v3381_v31  ;;  %v7923_v18 = vunpack.c.l.bf16 %v6898_v63  ;;  %v6905_v50 = vld [vmem:[%s7710_s27 + $0xd8] sm:$0xff]   ;;  %v6906_v31 = vld [vmem:[%s7710_s27 + $0xe0] sm:$0xff]  }
  0x92   : > { %12343 = vst [vmem:[#allocation53_spill] sm:$0xff] %v7911_v62  ;;  %v7171_v7 = vpack.c.bf16 %v3382_v4, %v3375_v61  ;;  %12344 = vst [vmem:[#allocation54_spill] sm:$0xff] %v7916_v23  ;;  %v7928_v24 = vunpack.c.h.bf16 %v6898_v63  ;;  %v7930_v19 = vunpack.c.l.bf16 %v6899_v30  ;;  %v7935_v60 = vunpack.c.h.bf16 %v6899_v30 }
  0x93   : > { %v6229_v0 = vmax.f32 %v7902_v2, %v6228_v58  ;;  %v6182_v20 = vmax.f32 %v7908_v8, %v6181_v41  ;;  %12345 = vst [vmem:[#allocation55_spill] sm:$0xff] %v7921_v13  ;;  %12346 = vst [vmem:[#allocation56_spill] sm:$0xff] %v7923_v18  ;;  %v7937_v48 = vunpack.c.l.bf16 %v6900_v34  ;;  %v7942_v45 = vunpack.c.h.bf16 %v6900_v34 }
  0x94   : > { %7172 = vmatprep.subr.bf16.mxu1 %v7171_v7  ;;  %12347 = vst [vmem:[#allocation57_spill] sm:$0xff] %v7928_v24  ;;  %12348 = vst [vmem:[#allocation58_spill] sm:$0xff] %v7930_v19  ;;  %v7944_v38 = vunpack.c.l.bf16 %v6901_v29  ;;  %v7951_v61 = vunpack.c.h.bf16 %v6901_v29  ;;  %v7953_v3 = vunpack.c.l.bf16 %v6902_v43  ;;  %v7956_v58 = vunpack.c.h.bf16 %v6902_v43 }
  0x95   : > { %v6230_v1 = vmax.f32 %v7911_v62, %v6229_v0  ;;  %v6183_v35 = vmax.f32 %v7916_v23, %v6182_v20  ;;  %7174 = vmatpush3.bf16.msra.mxu1 %v7171_v7  ;;  %12349 = vst [vmem:[#allocation59_spill] sm:$0xff] %v7935_v60  ;;  %12350 = vst [vmem:[#allocation60_spill] sm:$0xff] %v7937_v48  ;;  %v7958_v41 = vunpack.c.l.bf16 %v6903_v44  ;;  %v7960_v4 = vunpack.c.h.bf16 %v6903_v44 }
  0x96   : > { %12351 = vst [vmem:[#allocation61_spill] sm:$0xff] %v7942_v45  ;;  %12352 = vst [vmem:[#allocation62_spill] sm:$0xff] %v7944_v38  ;;  %v7962_v63 = vunpack.c.l.bf16 %v6904_v47  ;;  %v7966_v20 = vunpack.c.h.bf16 %v6904_v47  ;;  %v7968_v30 = vunpack.c.l.bf16 %v6905_v50  ;;  %v7973_v34 = vunpack.c.l.bf16 %v6906_v31 }
  0x97   : > { %v6231_v39 = vmax.f32 %v7921_v13, %v6230_v1  ;;  %v6184_v37 = vmax.f32 %v7923_v18, %v6183_v35  ;;  %12353 = vst [vmem:[#allocation63_spill] sm:$0xff] %v7951_v61  ;;  %12354 = vst [vmem:[#allocation64_spill] sm:$0xff] %v7953_v3  ;;  %v6907_v1 = vld [vmem:[%s7710_s27 + $0xe8] sm:$0xff]   ;;  %v7971_v35 = vunpack.c.h.bf16 %v6905_v50  ;;  %v2716_v43 = vmax.f32 %v7916_v23, %v7921_v13 }
  0x98   : > { %12355 = vst [vmem:[#allocation65_spill] sm:$0xff] %v7956_v58  ;;  %12356 = vst [vmem:[#allocation66_spill] sm:$0xff] %v7958_v41  ;;  %v8005_v56 = vunpack.c.h.bf16 %v6907_v1  ;;  %vm3417_vm7 = vcmask 400384   ;;  %vm1747_vm8 = vcmask 1040384   ;;  %vm7478_vm9 = vmmov 0  }
  0x99   : > { %v6232_v46 = vmax.f32 %v7928_v24, %v6231_v39  ;;  %v6185_v59 = vmax.f32 %v7930_v19, %v6184_v37  ;;  %12357 = vst [vmem:[#allocation67_spill] sm:$0xff] %v7960_v4  ;;  %12358 = vst [vmem:[#allocation68_spill] sm:$0xff] %v7962_v63  ;;  %v2695_v39 = vmax.f32 %v7892_v49, %v7895_v36  ;;  %vm3680_vm10 = vcmask 1045504  }
  0x9a   : > { %12359 = vst [vmem:[#allocation69_spill] sm:$0xff] %v7966_v20  ;;  %12360 = vst [vmem:[#allocation70_spill] sm:$0xff] %v7968_v30  ;;  %v2702_v37 = vmax.f32 %v7897_v42, %v7902_v2  ;;  %vm7480_vm11 = vmmov 1   ;;  %vm3676_vm13 = vcmask 113664   ;;  %vm3832_vm14 = vcmask 64512  }
  0x9b   : > { %v6233_v51 = vmax.f32 %v7935_v60, %v6232_v46  ;;  %v6186_v40 = vmax.f32 %v7937_v48, %v6185_v59  ;;  %12361 = vst [vmem:[#allocation71_spill] sm:$0xff] %v7971_v35  ;;  %12362 = vst [vmem:[#allocation72_spill] sm:$0xff] %v7973_v34  ;;  %v2709_v59 = vmax.f32 %v7908_v8, %v7911_v62  ;;  %v2696_v44 = vrot.slane %v2695_v39, 4 }
  0x9c   : > { %v2703_v47 = vrot.slane %v2702_v37, 4  ;;  %v2723_v62 = vmax.f32 %v7923_v18, %v7928_v24  ;;  %v6908_v24 = vld [vmem:[%s7710_s27 + $0xf0] sm:$0xff]   ;;  %12365 = vst [vmem:[#allocation75_spill] sm:$0xff] %v8005_v56  ;;  %vm8452_vm12 = vmpackc.low %vm3680_vm10, %vm7480_vm11  ;;  %vm1780_vm15 = vcmask 1041408  }
  0x9d   : > { %v6234_v52 = vmax.f32 %v7942_v45, %v6233_v51  ;;  %v6187_v53 = vmax.f32 %v7944_v38, %v6186_v40  ;;  %v7985_v51 = vunpack.c.h.bf16 %v6906_v31  ;;  %v7987_v40 = vunpack.c.l.bf16 %v6907_v1 }
  0x9e   : > { %v2697_v2 = vmax.f32 %v2695_v39, %v2696_v44  ;;  %v2730_v31 = vmax.f32 %v7930_v19, %v7935_v60  ;;  %v2724_v36 = vrot.slane %v2723_v62, 4  ;;  %v8009_v55 = vunpack.c.h.bf16 %v6908_v24 }
  0x9f   : > { %v6235_v7 = vmax.f32 %v7951_v61, %v6234_v52  ;;  %v6188_v0 = vmax.f32 %v7953_v3, %v6187_v53  ;;  %12363 = vst [vmem:[#allocation73_spill] sm:$0xff] %v7985_v51  ;;  %12364 = vst [vmem:[#allocation74_spill] sm:$0xff] %v7987_v40  ;;  %v2710_v53 = vrot.slane %v2709_v59, 4 }
  0xa0   : > { %v2731_v49 = vrot.slane %v2730_v31, 4  ;;  %v2725_v19 = vmax.f32 %v2723_v62, %v2724_v36  ;;  %12367 = vst [vmem:[#allocation77_spill] sm:$0xff] %v8009_v55 }
  0xa1   : > { %v6236_v29 = vmax.f32 %v7956_v58, %v6235_v7  ;;  %v6189_v46 = vmax.f32 %v7958_v41, %v6188_v0  ;;  %v2717_v7 = vrot.slane %v2716_v43, 4  ;;  %v2704_v0 = vmax.f32 %v2702_v37, %v2703_v47 }
  0xa2   : > { %v2711_v8 = vmax.f32 %v2709_v59, %v2710_v53  ;;  %v2726_v36 = vrot.slane %v2725_v19, 2 }
  0xa3   : > { %v6237_v50 = vmax.f32 %v7960_v4, %v6236_v29  ;;  %v6190_v52 = vmax.f32 %v7962_v63, %v6189_v46  ;;  %v2718_v42 = vmax.f32 %v2716_v43, %v2717_v7  ;;  %v2698_v29 = vrot.slane %v2697_v2, 2  ;;  %v6909_v43 = vld [vmem:[%s7710_s27 + $0xf8] sm:$0xff]  }
  0xa4   : > { %v2705_v46 = vrot.slane %v2704_v0, 2  ;;  %v2712_v44 = vrot.slane %v2711_v8, 2 }
  0xa5   : > { %v6238_v13 = vmax.f32 %v7966_v20, %v6237_v50  ;;  %v6191_v23 = vmax.f32 %v7968_v30, %v6190_v52  ;;  %v2719_v47 = vrot.slane %v2718_v42, 2  ;;  %v2699_v18 = vmax.f32 %v2697_v2, %v2698_v29 }
  0xa6   : > { %v2706_v60 = vmax.f32 %v2704_v0, %v2705_v46  ;;  %v2732_v50 = vmax.f32 %v2730_v31, %v2731_v49  ;;  %v2713_v53 = vmax.f32 %v2711_v8, %v2712_v44  ;;  %v8011_v2 = vunpack.c.l.bf16 %v6909_v43 }
  0xa7   : > { %v6239_v39 = vmax.f32 %v7971_v35, %v6238_v13  ;;  %v6192_v37 = vmax.f32 %v7973_v34, %v6191_v23  ;;  %v2700_v7 = vrot.slane %v2699_v18, 1  ;;  %v2720_v57 = vmax.f32 %v2718_v42, %v2719_v47 }
  0xa8   : > { %v8007_v13 = vunpack.c.l.bf16 %v6908_v24  ;;  %v2707_v23 = vrot.slane %v2706_v60, 1  ;;  %12368 = vst [vmem:[#allocation78_spill] sm:$0xff] %v8011_v2  ;;  %v2733_v49 = vrot.slane %v2732_v50, 2  ;;  %v8018_v8 = vunpack.c.h.bf16 %v6909_v43 }
  0xa9   : > { %v6240_v52 = vmax.f32 %v7985_v51, %v6239_v39  ;;  %v8002_v59 = vmax.f32 %v7987_v40, %v6192_v37  ;;  %v2714_v42 = vrot.slane %v2713_v53, 1  ;;  %v8020_v1 = vmax.f32 %v2699_v18, %v2700_v7 }
  0xaa   : > { %12366 = vst [vmem:[#allocation76_spill] sm:$0xff] %v8007_v13  ;;  %12369 = vst [vmem:[#allocation79_spill] sm:$0xff] %v8018_v8  ;;  %v2721_v31 = vrot.slane %v2720_v57, 1  ;;  %v2737_v24 = vmax.f32 %v7937_v48, %v7942_v45  ;;  %v2744_v29 = vmax.f32 %v7944_v38, %v7951_v61  ;;  %v2708_v46 = vmax.f32 %v2706_v60, %v2707_v23 }
  0xab   : > { %v8014_v62 = vmax.f32 %v8005_v56, %v6240_v52  ;;  %v2751_v39 = vmax.f32 %v7953_v3, %v7956_v58  ;;  %v2758_v37 = vmax.f32 %v7958_v41, %v7960_v4  ;;  %v2765_v44 = vmax.f32 %v7962_v63, %v7966_v20 }
  0xac   : > { %v2727_v47 = vmax.f32 %v2725_v19, %v2726_v36  ;;  %v2734_v18 = vmax.f32 %v2732_v50, %v2733_v49  ;;  %v2738_v52 = vrot.slane %v2737_v24, 4  ;;  %v2745_v43 = vrot.slane %v2744_v29, 4 }
  0xad   : > { %v2752_v7 = vrot.slane %v2751_v39, 4  ;;  %v2759_v0 = vrot.slane %v2758_v37, 4  ;;  %v2766_v45 = vrot.slane %v2765_v44, 4  ;;  %v2772_v61 = vmax.f32 %v7968_v30, %v7971_v35 }
  0xae   : > { %v2715_v60 = vmax.f32 %v2713_v53, %v2714_v42  ;;  %v2739_v23 = vmax.f32 %v2737_v24, %v2738_v52  ;;  %v2779_v58 = vmax.f32 %v7973_v34, %v7985_v51  ;;  %v2786_v4 = vmax.f32 %v7987_v40, %v8005_v56 }
  0xaf   : > { %v2753_v41 = vmax.f32 %v2751_v39, %v2752_v7  ;;  %v2760_v20 = vmax.f32 %v2758_v37, %v2759_v0  ;;  %v2767_v19 = vmax.f32 %v2765_v44, %v2766_v45  ;;  %v2773_v50 = vrot.slane %v2772_v61, 4 }
  0xb0   : > { %v2740_v36 = vrot.slane %v2739_v23, 2  ;;  %v2746_v49 = vmax.f32 %v2744_v29, %v2745_v43  ;;  %v2780_v63 = vrot.slane %v2779_v58, 4  ;;  %v2787_v3 = vrot.slane %v2786_v4, 4 }
  0xb1   : > { %v2754_v38 = vrot.slane %v2753_v41, 2  ;;  %v2761_v48 = vrot.slane %v2760_v20, 2  ;;  %v2768_v54 = vrot.slane %v2767_v19, 2  ;;  %v2774_v35 = vmax.f32 %v2772_v61, %v2773_v50 }
  0xb2   : > { %v2722_v53 = vmax.f32 %v2720_v57, %v2721_v31  ;;  %v2728_v42 = vrot.slane %v2727_v47, 1  ;;  %v2781_v24 = vmax.f32 %v2779_v58, %v2780_v63  ;;  %v2788_v52 = vmax.f32 %v2786_v4, %v2787_v3 }
  0xb3   : > { %v2755_v51 = vmax.f32 %v2753_v41, %v2754_v38  ;;  %v2762_v34 = vmax.f32 %v2760_v20, %v2761_v48  ;;  %v2769_v30 = vmax.f32 %v2767_v19, %v2768_v54  ;;  %v2775_v56 = vrot.slane %v2774_v35, 2 }
  0xb4   : > { %v2741_v39 = vmax.f32 %v2739_v23, %v2740_v36  ;;  %v2747_v0 = vrot.slane %v2746_v49, 2  ;;  %v2782_v45 = vrot.slane %v2781_v24, 2  ;;  %v2789_v37 = vrot.slane %v2788_v52, 2 }
  0xb5   : > { %v2756_v44 = vrot.slane %v2755_v51, 1  ;;  %v2763_v29 = vrot.slane %v2762_v34, 1  ;;  %v2770_v43 = vrot.slane %v2769_v30, 1  ;;  %v2776_v7 = vmax.f32 %v2774_v35, %v2775_v56 }
  0xb6   : > { %v2729_v40 = vmax.f32 %v2727_v47, %v2728_v42  ;;  %v2735_v33 = vrot.slane %v2734_v18, 1  ;;  %v2783_v32 = vmax.f32 %v2781_v24, %v2782_v45  ;;  %v2790_v61 = vmax.f32 %v2788_v52, %v2789_v37  ;;  %v6911_v37 = vld [vmem:[%s7710_s27 + $0x108] sm:$0xff]  }
  0xb7   : > { %v2757_v57 = vmax.f32 %v2755_v51, %v2756_v44  ;;  %v2764_v31 = vmax.f32 %v2762_v34, %v2763_v29  ;;  %v2771_v58 = vmax.f32 %v2769_v30, %v2770_v43  ;;  %v2777_v3 = vrot.slane %v2776_v7, 1 }
  0xb8   : > { %v2748_v38 = vmax.f32 %v2746_v49, %v2747_v0  ;;  %v2784_v48 = vrot.slane %v2783_v32, 1  ;;  %v2793_v54 = vmax.f32 %v8007_v13, %v8009_v55  ;;  %v2800_v41 = vmax.f32 %v8011_v2, %v8018_v8 }
  0xb9   : > { %v2742_v4 = vrot.slane %v2741_v39, 1  ;;  %v2778_v63 = vmax.f32 %v2776_v7, %v2777_v3  ;;  %v3383_v56 = vsel %vm1594_vm0, %v2708_v46, %v8020_v1  ;;  %v3390_v20 = vsel %vm1594_vm0, %v2764_v31, %v2757_v57 }
  0xba   : > { %v6242_v30 = vmax.f32 %v8009_v55, %v8014_v62  ;;  %v2736_v35 = vmax.f32 %v2734_v18, %v2735_v33  ;;  %v2794_v34 = vrot.slane %v2793_v54, 4  ;;  %v2801_v51 = vrot.slane %v2800_v41, 4  ;;  %v6910_v62 = vld [vmem:[%s7710_s27 + $0x100] sm:$0xff]  }
  0xbb   : > { %v12370_v47 = vmax.f32 %v8007_v13, %v8002_v59  ;;  %v2791_v19 = vrot.slane %v2790_v61, 1  ;;  %v3384_v50 = vsel %vm1596_vm1, %v2715_v60, %v3383_v56  ;;  %v3391_v36 = vsel %vm1596_vm1, %v2771_v58, %v3390_v20 }
  0xbc   : > { %v2785_v1 = vmax.f32 %v2783_v32, %v2784_v48  ;;  %v2795_v46 = vmax.f32 %v2793_v54, %v2794_v34  ;;  %v2802_v49 = vmax.f32 %v2800_v41, %v2801_v51  ;;  %v3385_v42 = vsel %vm1598_vm2, %v2722_v53, %v3384_v50  ;;  %v6913_v41 = vld [vmem:[%s7710_s27 + $0x118] sm:$0xff]   ;;  %v6914_v34 = vld [vmem:[%s7710_s27 + $0x120] sm:$0xff]  }
  0xbd   : > { %v6195_v23 = vmax.f32 %v8011_v2, %v12370_v47  ;;  %v2743_v33 = vmax.f32 %v2741_v39, %v2742_v4  ;;  %v2749_v18 = vrot.slane %v2748_v38, 1  ;;  %v3386_v24 = vsel %vm1600_vm3, %v2729_v40, %v3385_v42  ;;  %v6912_v40 = vld [vmem:[%s7710_s27 + $0x110] sm:$0xff]  }
  0xbe   : > { %v3392_v59 = vsel %vm1598_vm2, %v2778_v63, %v3391_v36  ;;  %v6243_v52 = vmax.f32 %v8018_v8, %v6242_v30  ;;  %v2796_v0 = vrot.slane %v2795_v46, 2  ;;  %v2803_v45 = vrot.slane %v2802_v49, 2 }
  0xbf   : > { %v3387_v60 = vsel %vm1602_vm4, %v2736_v35, %v3386_v24  ;;  %v2792_v32 = vmax.f32 %v2790_v61, %v2791_v19  ;;  %v8060_v44 = vunpack.c.l.bf16 %v6910_v62  ;;  %v3393_v39 = vsel %vm1600_vm3, %v2785_v1, %v3392_v59  ;;  %v6915_v1 = vld [vmem:[%s7710_s27 + $0x128] sm:$0xff]   ;;  %v6916_v24 = vld [vmem:[%s7710_s27 + $0x130] sm:$0xff]  }
  0xc0   : > { %v2797_v53 = vmax.f32 %v2795_v46, %v2796_v0  ;;  %v2804_v29 = vmax.f32 %v2802_v49, %v2803_v45  ;;  %v8063_v43 = vunpack.c.h.bf16 %v6910_v62  ;;  %v2750_v7 = vmax.f32 %v2748_v38, %v2749_v18 }
  0xc1   : > { %12371 = vst [vmem:[#allocation80_spill] sm:$0xff] %v8060_v44  ;;  %v3388_v57 = vsel %vm1604_vm5, %v2743_v33, %v3387_v60  ;;  %v6196_v31 = vmax.f32 %v8060_v44, %v6195_v23  ;;  %v8068_v58 = vunpack.c.l.bf16 %v6911_v37  ;;  %v8071_v54 = vunpack.c.h.bf16 %v6911_v37  ;;  %v6917_v60 = vld [vmem:[%s7710_s27 + $0x138] sm:$0xff]  }
  0xc2   : > { %12372 = vst [vmem:[#allocation81_spill] sm:$0xff] %v8063_v43  ;;  %v2798_v3 = vrot.slane %v2797_v53, 1  ;;  %v2805_v48 = vrot.slane %v2804_v29, 1  ;;  %v6244_v61 = vmax.f32 %v8063_v43, %v6243_v52  ;;  %v3394_v4 = vsel %vm1602_vm4, %v2792_v32, %v3393_v39  ;;  %v6918_v39 = vld [vmem:[%s7710_s27 + $0x140] sm:$0xff]  }
  0xc3   : > { %12373 = vst [vmem:[#allocation82_spill] sm:$0xff] %v8068_v58  ;;  %12374 = vst [vmem:[#allocation83_spill] sm:$0xff] %v8071_v54  ;;  %v6197_v63 = vmax.f32 %v8068_v58, %v6196_v31  ;;  %v8076_v38 = vunpack.c.l.bf16 %v6912_v40  ;;  %v8079_v35 = vunpack.c.h.bf16 %v6912_v40  ;;  %v3389_v51 = vsel %vm1606_vm6, %v2750_v7, %v3388_v57 }
  0xc4   : > { %v2799_v56 = vmax.f32 %v2797_v53, %v2798_v3  ;;  %v2806_v20 = vmax.f32 %v2804_v29, %v2805_v48  ;;  %v6245_v30 = vmax.f32 %v8071_v54, %v6244_v61  ;;  %v8084_v23 = vunpack.c.l.bf16 %v6913_v41  ;;  %v6919_v3 = vld [vmem:[%s7710_s27 + $0x148] sm:$0xff]   ;;  %v6920_v48 = vld [vmem:[%s7710_s27 + $0x150] sm:$0xff]  }
  0xc5   : > { %12375 = vst [vmem:[#allocation84_spill] sm:$0xff] %v8076_v38  ;;  %12376 = vst [vmem:[#allocation85_spill] sm:$0xff] %v8079_v35  ;;  %v6198_v47 = vmax.f32 %v8076_v38, %v6197_v63  ;;  %v8088_v36 = vunpack.c.h.bf16 %v6913_v41  ;;  %v8093_v42 = vunpack.c.l.bf16 %v6914_v34  ;;  %v8096_v18 = vunpack.c.h.bf16 %v6914_v34 }
  0xc6   : > { %12377 = vst [vmem:[#allocation86_spill] sm:$0xff] %v8084_v23  ;;  %v3395_v19 = vsel %vm1604_vm5, %v2799_v56, %v3394_v4  ;;  %v6246_v50 = vmax.f32 %v8079_v35, %v6245_v30  ;;  %v8100_v52 = vunpack.c.l.bf16 %v6915_v1  ;;  %v8103_v45 = vunpack.c.h.bf16 %v6915_v1  ;;  %v6921_v4 = vld [vmem:[%s7710_s27 + $0x158] sm:$0xff]   ;;  %v6923_v30 = vld [vmem:[%s7710_s27 + $0x168] sm:$0xff]  }
  0xc7   : > { %12378 = vst [vmem:[#allocation87_spill] sm:$0xff] %v8088_v36  ;;  %v3396_v46 = vsel %vm1606_vm6, %v2806_v20, %v3395_v19  ;;  %v6199_v49 = vmax.f32 %v8084_v23, %v6198_v47  ;;  %12379 = vst [vmem:[#allocation88_spill] sm:$0xff] %v8093_v42  ;;  %v8107_v32 = vunpack.c.l.bf16 %v6916_v24  ;;  %v8110_v29 = vunpack.c.h.bf16 %v6916_v24  ;;  %v6922_v20 = vld [vmem:[%s7710_s27 + $0x160] sm:$0xff]  }
  0xc8   : > { %v7175_v62 = vpack.c.bf16 %v3396_v46, %v3389_v51  ;;  %v6247_v33 = vmax.f32 %v8088_v36, %v6246_v50  ;;  %12380 = vst [vmem:[#allocation89_spill] sm:$0xff] %v8096_v18  ;;  %12381 = vst [vmem:[#allocation90_spill] sm:$0xff] %v8100_v52  ;;  %v8114_v7 = vunpack.c.l.bf16 %v6917_v60  ;;  %v8117_v31 = vunpack.c.h.bf16 %v6917_v60 }
  0xc9   : > { %v6200_v59 = vmax.f32 %v8093_v42, %v6199_v49  ;;  %12382 = vst [vmem:[#allocation91_spill] sm:$0xff] %v8103_v45  ;;  %12383 = vst [vmem:[#allocation92_spill] sm:$0xff] %v8107_v32  ;;  %v8122_v41 = vunpack.c.l.bf16 %v6918_v39  ;;  %v8126_v56 = vunpack.c.h.bf16 %v6918_v39  ;;  %v8131_v51 = vunpack.c.l.bf16 %v6919_v3 }
  0xca   : > { %7176 = vmatprep.subr.bf16.mxu1 %v7175_v62  ;;  %v6248_v0 = vmax.f32 %v8096_v18, %v6247_v33  ;;  %12384 = vst [vmem:[#allocation93_spill] sm:$0xff] %v8110_v29  ;;  %12385 = vst [vmem:[#allocation94_spill] sm:$0xff] %v8114_v7  ;;  %v8133_v47 = vunpack.c.h.bf16 %v6919_v3  ;;  %v8135_v19 = vunpack.c.l.bf16 %v6920_v48  ;;  %v8138_v1 = vunpack.c.h.bf16 %v6920_v48 }
  0xcb   : > { %7178 = vmatpush3.bf16.msra.mxu1 %v7175_v62  ;;  %v6201_v37 = vmax.f32 %v8100_v52, %v6200_v59  ;;  %12386 = vst [vmem:[#allocation95_spill] sm:$0xff] %v8117_v31  ;;  %12387 = vst [vmem:[#allocation96_spill] sm:$0xff] %v8122_v41  ;;  %v8140_v46 = vunpack.c.l.bf16 %v6921_v4  ;;  %v8142_v49 = vunpack.c.h.bf16 %v6921_v4  ;;  %v6924_v62 = vld [vmem:[%s7710_s27 + $0x170] sm:$0xff]   ;;  %v8146_v24 = vunpack.c.l.bf16 %v6922_v20 }
  0xcc   : > { %v6249_v53 = vmax.f32 %v8103_v45, %v6248_v0  ;;  %12388 = vst [vmem:[#allocation97_spill] sm:$0xff] %v8126_v56  ;;  %12389 = vst [vmem:[#allocation98_spill] sm:$0xff] %v8131_v51  ;;  %v8148_v59 = vunpack.c.h.bf16 %v6922_v20  ;;  %v8150_v0 = vunpack.c.l.bf16 %v6923_v30  ;;  %v2814_v39 = vmax.f32 %v8068_v58, %v8071_v54 }
  0xcd   : > { %v6202_v40 = vmax.f32 %v8107_v32, %v6201_v37  ;;  %12390 = vst [vmem:[#allocation99_spill] sm:$0xff] %v8133_v47  ;;  %12391 = vst [vmem:[#allocation100_spill] sm:$0xff] %v8135_v19  ;;  %v6925_v37 = vld [vmem:[%s7710_s27 + $0x178] sm:$0xff]   ;;  %v8161_v3 = vunpack.c.h.bf16 %v6923_v30  ;;  %v8163_v48 = vunpack.c.l.bf16 %v6924_v62  ;;  %v8169_v54 = vunpack.c.h.bf16 %v6924_v62 }
  0xce   : > { %v6250_v57 = vmax.f32 %v8110_v29, %v6249_v53  ;;  %12392 = vst [vmem:[#allocation101_spill] sm:$0xff] %v8138_v1  ;;  %12393 = vst [vmem:[#allocation102_spill] sm:$0xff] %v8140_v46  ;;  %v2807_v53 = vmax.f32 %v8060_v44, %v8063_v43  ;;  %v2815_v20 = vrot.slane %v2814_v39, 4  ;;  %v8171_v58 = vunpack.c.l.bf16 %v6925_v37 }
  0xcf   : > { %v6203_v61 = vmax.f32 %v8114_v7, %v6202_v40  ;;  %12394 = vst [vmem:[#allocation103_spill] sm:$0xff] %v8142_v49  ;;  %12395 = vst [vmem:[#allocation104_spill] sm:$0xff] %v8146_v24  ;;  %v2821_v40 = vmax.f32 %v8076_v38, %v8079_v35 }
  0xd0   : > { %v6251_v63 = vmax.f32 %v8117_v31, %v6250_v57  ;;  %12396 = vst [vmem:[#allocation105_spill] sm:$0xff] %v8148_v59  ;;  %12397 = vst [vmem:[#allocation106_spill] sm:$0xff] %v8150_v0  ;;  %v2816_v38 = vmax.f32 %v2814_v39, %v2815_v20 }
  0xd1   : > { %v6204_v34 = vmax.f32 %v8122_v41, %v6203_v61  ;;  %12398 = vst [vmem:[#allocation107_spill] sm:$0xff] %v8161_v3  ;;  %12399 = vst [vmem:[#allocation108_spill] sm:$0xff] %v8163_v48  ;;  %v2828_v61 = vmax.f32 %v8084_v23, %v8088_v36  ;;  %v8175_v36 = vunpack.c.h.bf16 %v6925_v37  ;;  %v2835_v23 = vmax.f32 %v8093_v42, %v8096_v18 }
  0xd2   : > { %v6252_v50 = vmax.f32 %v8126_v56, %v6251_v63  ;;  %v2808_v63 = vrot.slane %v2807_v53, 4  ;;  %12400 = vst [vmem:[#allocation109_spill] sm:$0xff] %v8169_v54  ;;  %12401 = vst [vmem:[#allocation110_spill] sm:$0xff] %v8171_v58  ;;  %v2817_v8 = vrot.slane %v2816_v38, 2 }
  0xd3   : > { %v6206_v33 = vmax.f32 %v6204_v34, %v8131_v51  ;;  %v2822_v34 = vrot.slane %v2821_v40, 4  ;;  %v2829_v35 = vrot.slane %v2828_v61, 4  ;;  %12402 = vst [vmem:[#allocation111_spill] sm:$0xff] %v8175_v36 }
  0xd4   : > { %v6254_v60 = vmax.f32 %v6252_v50, %v8133_v47 }
  0xd5   : > { %v6208_v57 = vmax.f32 %v6206_v33, %v8135_v19  ;;  %v2809_v33 = vmax.f32 %v2807_v53, %v2808_v63  ;;  %v2823_v43 = vmax.f32 %v2821_v40, %v2822_v34  ;;  %v2842_v53 = vmax.f32 %v8100_v52, %v8103_v45 }
  0xd6   : > { %v6256_v4 = vmax.f32 %v6254_v60, %v8138_v1  ;;  %v2830_v60 = vmax.f32 %v2828_v61, %v2829_v35  ;;  %v2818_v40 = vmax.f32 %v2816_v38, %v2817_v8 }
  0xd7   : > { %v6210_v50 = vmax.f32 %v6208_v57, %v8140_v46  ;;  %v2810_v62 = vrot.slane %v2809_v33, 2  ;;  %v2824_v2 = vrot.slane %v2823_v43, 2  ;;  %v2843_v34 = vrot.slane %v2842_v53, 4 }
  0xd8   : > { %v6258_v30 = vmax.f32 %v6256_v4, %v8142_v49  ;;  %v2831_v13 = vrot.slane %v2830_v60, 2  ;;  %v2836_v4 = vrot.slane %v2835_v23, 4  ;;  %v2819_v18 = vrot.slane %v2818_v40, 1 }
  0xd9   : > { %v6205_v44 = vmax.f32 %v8146_v24, %v6210_v50  ;;  %v2811_v37 = vmax.f32 %v2809_v33, %v2810_v62  ;;  %v2825_v35 = vmax.f32 %v2823_v43, %v2824_v2  ;;  %v2844_v52 = vmax.f32 %v2842_v53, %v2843_v34 }
  0xda   : > { %v6253_v57 = vmax.f32 %v8148_v59, %v6258_v30  ;;  %v2832_v63 = vmax.f32 %v2830_v60, %v2831_v13  ;;  %v2837_v20 = vmax.f32 %v2835_v23, %v2836_v4  ;;  %v2849_v23 = vmax.f32 %v8107_v32, %v8110_v29 }
  0xdb   : > { %v6207_v55 = vmax.f32 %v6205_v44, %v8150_v0  ;;  %v2812_v30 = vrot.slane %v2811_v37, 1  ;;  %v2826_v44 = vrot.slane %v2825_v35, 1  ;;  %v2845_v38 = vrot.slane %v2844_v52, 2 }
  0xdc   : > { %v6255_v39 = vmax.f32 %v6253_v57, %v8161_v3  ;;  %v2833_v28 = vrot.slane %v2832_v63, 1  ;;  %v2838_v45 = vrot.slane %v2837_v20, 2  ;;  %v2856_v60 = vmax.f32 %v8114_v7, %v8117_v31 }
  0xdd   : > { %v6209_v61 = vmax.f32 %v6207_v55, %v8163_v48  ;;  %v8192_v2 = vmax.f32 %v2811_v37, %v2812_v30  ;;  %v8194_v55 = vmax.f32 %v2818_v40, %v2819_v18  ;;  %v8196_v13 = vmax.f32 %v2825_v35, %v2826_v44 }
  0xde   : > { %v6257_v50 = vmax.f32 %v6255_v39, %v8169_v54  ;;  %v8198_v8 = vmax.f32 %v2832_v63, %v2833_v28  ;;  %v2839_v43 = vmax.f32 %v2837_v20, %v2838_v45  ;;  %v2863_v57 = vmax.f32 %v8122_v41, %v8126_v56 }
  0xdf   : > { %v8187_v42 = vmax.f32 %v6209_v61, %v8171_v58  ;;  %v2870_v62 = vmax.f32 %v8131_v51, %v8133_v47  ;;  %v2877_v18 = vmax.f32 %v8135_v19, %v8138_v1  ;;  %v2846_v28 = vmax.f32 %v2844_v52, %v2845_v38 }
  0xe0   : > { %v8190_v33 = vmax.f32 %v6257_v50, %v8175_v36  ;;  %v2840_v4 = vrot.slane %v2839_v43, 1  ;;  %v2850_v53 = vrot.slane %v2849_v23, 4  ;;  %v2884_v45 = vmax.f32 %v8140_v46, %v8142_v49 }
  0xe1   : > { %v2857_v39 = vrot.slane %v2856_v60, 4  ;;  %v2864_v37 = vrot.slane %v2863_v57, 4  ;;  %v2871_v40 = vrot.slane %v2870_v62, 4  ;;  %v2878_v35 = vrot.slane %v2877_v18, 4 }
  0xe2   : > { %v2841_v61 = vmax.f32 %v2839_v43, %v2840_v4  ;;  %v2847_v63 = vrot.slane %v2846_v28, 1  ;;  %v2851_v20 = vmax.f32 %v2849_v23, %v2850_v53  ;;  %v2885_v34 = vrot.slane %v2884_v45, 4 }
  0xe3   : > { %v2858_v50 = vmax.f32 %v2856_v60, %v2857_v39  ;;  %v2865_v30 = vmax.f32 %v2863_v57, %v2864_v37  ;;  %v2872_v44 = vmax.f32 %v2870_v62, %v2871_v40  ;;  %v2879_v47 = vmax.f32 %v2877_v18, %v2878_v35 }
  0xe4   : > { %v2848_v51 = vmax.f32 %v2846_v28, %v2847_v63  ;;  %v2852_v1 = vrot.slane %v2851_v20, 2  ;;  %v2886_v19 = vmax.f32 %v2884_v45, %v2885_v34  ;;  %v2891_v52 = vmax.f32 %v8146_v24, %v8148_v59  ;;  %v6926_v59 = vld [vmem:[%s7710_s27 + $0x180] sm:$0xff]  }
  0xe5   : > { %v2859_v38 = vrot.slane %v2858_v50, 2  ;;  %v2866_v49 = vrot.slane %v2865_v30, 2  ;;  %v2873_v46 = vrot.slane %v2872_v44, 2  ;;  %v2880_v56 = vrot.slane %v2879_v47, 2 }
  0xe6   : > { %v2853_v41 = vmax.f32 %v2851_v20, %v2852_v1  ;;  %v2887_v31 = vrot.slane %v2886_v19, 2  ;;  %v2892_v43 = vrot.slane %v2891_v52, 4  ;;  %v2898_v23 = vmax.f32 %v8150_v0, %v8161_v3 }
  0xe7   : > { %v2860_v60 = vmax.f32 %v2858_v50, %v2859_v38  ;;  %v2867_v57 = vmax.f32 %v2865_v30, %v2866_v49  ;;  %v2874_v62 = vmax.f32 %v2872_v44, %v2873_v46  ;;  %v2881_v18 = vmax.f32 %v2879_v47, %v2880_v56 }
  0xe8   : > { %v2854_v4 = vrot.slane %v2853_v41, 1  ;;  %v2888_v28 = vmax.f32 %v2886_v19, %v2887_v31  ;;  %v2893_v53 = vmax.f32 %v2891_v52, %v2892_v43  ;;  %v2899_v45 = vrot.slane %v2898_v23, 4 }
  0xe9   : > { %v2861_v39 = vrot.slane %v2860_v60, 1  ;;  %v2868_v37 = vrot.slane %v2867_v57, 1  ;;  %v2875_v40 = vrot.slane %v2874_v62, 1  ;;  %v2882_v35 = vrot.slane %v2881_v18, 1 }
  0xea   : > { %v2855_v1 = vmax.f32 %v2853_v41, %v2854_v4  ;;  %v2889_v63 = vrot.slane %v2888_v28, 1  ;;  %v2894_v20 = vrot.slane %v2893_v53, 2  ;;  %v2900_v34 = vmax.f32 %v2898_v23, %v2899_v45 }
  0xeb   : > { %v2862_v3 = vmax.f32 %v2860_v60, %v2861_v39  ;;  %v2869_v50 = vmax.f32 %v2867_v57, %v2868_v37  ;;  %v2876_v38 = vmax.f32 %v2874_v62, %v2875_v40  ;;  %v2883_v49 = vmax.f32 %v2881_v18, %v2882_v35 }
  0xec   : > { %v2890_v46 = vmax.f32 %v2888_v28, %v2889_v63  ;;  %v2895_v56 = vmax.f32 %v2893_v53, %v2894_v20  ;;  %v2901_v47 = vrot.slane %v2900_v34, 2  ;;  %v2905_v31 = vmax.f32 %v8163_v48, %v8169_v54 }
  0xed   : > { %v2912_v19 = vmax.f32 %v8171_v58, %v8175_v36  ;;  %v3397_v41 = vsel %vm1594_vm0, %v8194_v55, %v8192_v2  ;;  %v3404_v30 = vsel %vm1594_vm0, %v2876_v38, %v2869_v50  ;;  %v8226_v44 = vunpack.c.l.bf16 %v6926_v59 }
  0xee   : > { %v2896_v52 = vrot.slane %v2895_v56, 1  ;;  %v2902_v43 = vmax.f32 %v2900_v34, %v2901_v47  ;;  %v2906_v23 = vrot.slane %v2905_v31, 4  ;;  %v3398_v60 = vsel %vm1596_vm1, %v8196_v13, %v3397_v41 }
  0xef   : > { %12403 = vst [vmem:[#allocation112_spill] sm:$0xff] %v8226_v44  ;;  %v2913_v57 = vrot.slane %v2912_v19, 4  ;;  %v3399_v62 = vsel %vm1598_vm2, %v8198_v8, %v3398_v60  ;;  %v3405_v18 = vsel %vm1596_vm1, %v2883_v49, %v3404_v30  ;;  %v6212_v4 = vmax.f32 %v8187_v42, %v8226_v44 }
  0xf0   : > { %v2897_v2 = vmax.f32 %v2895_v56, %v2896_v52  ;;  %v2903_v55 = vrot.slane %v2902_v43, 1  ;;  %v2907_v28 = vmax.f32 %v2905_v31, %v2906_v23  ;;  %v3400_v53 = vsel %vm1600_vm3, %v2841_v61, %v3399_v62  ;;  %v8248_v61 = vld [vmem:[%s11605_s4] sm:$0xff] }
  0xf1   : > { %v2914_v45 = vmax.f32 %v2912_v19, %v2913_v57  ;;  %v3401_v39 = vsel %vm1602_vm4, %v2848_v51, %v3400_v53  ;;  %v3406_v37 = vsel %vm1598_vm2, %v2890_v46, %v3405_v18  ;;  %v8238_v13 = vunpack.c.h.bf16 %v6926_v59  ;;  %6269 = vst [vmem:[%s8240_s29 + $0x40] sm:$0xff] %v6212_v4  ;;  %7059 = vmatprep.mubr.msk.f32.mxu1 %vm3417_vm7, %v8248_v61 }
  0xf2   : > { %v2904_v8 = vmax.f32 %v2902_v43, %v2903_v55  ;;  %v2908_v40 = vrot.slane %v2907_v28, 2  ;;  %v3402_v42 = vsel %vm1604_vm5, %v2855_v1, %v3401_v39  ;;  %v3407_v35 = vsel %vm1600_vm3, %v2897_v2, %v3406_v37 }
  0xf3   : > { %12404 = vst [vmem:[#allocation113_spill] sm:$0xff] %v8238_v13  ;;  %v2915_v51 = vrot.slane %v2914_v45, 2  ;;  %v3403_v59 = vsel %vm1606_vm6, %v2862_v3, %v3402_v42  ;;  %v6260_v63 = vmax.f32 %v8190_v33, %v8238_v13  ;;  %v2919_v50 = vmax.f32 %v8226_v44, %v8238_v13 }
  0xf4   : > { %v2909_v20 = vmax.f32 %v2907_v28, %v2908_v40  ;;  %v3408_v34 = vsel %vm1602_vm4, %v2904_v8, %v3407_v35  ;;  %v2926_v38 = vadd.f32 %v7723_v6, %v7721_v5  ;;  %v2933_v3 = vadd.f32 %v7738_v15, %v7736_v14 }
  0xf5   : > { %v2916_v1 = vmax.f32 %v2914_v45, %v2915_v51  ;;  %6270 = vst [vmem:[%s8240_s29 + $0x48] sm:$0xff] %v6260_v63  ;;  %v2940_v33 = vadd.f32 %v7742_v17, %v7740_v16  ;;  %v2920_v46 = vrot.slane %v2919_v50, 4  ;;  %v2947_v56 = vadd.f32 %v7757_v26, %v7755_v25 }
  0xf6   : > { %v2910_v49 = vrot.slane %v2909_v20, 1  ;;  %v2954_v47 = vadd.f32 %v7729_v10, %v7727_v9  ;;  %v2927_v19 = vrot.slane %v2926_v38, 4  ;;  %v2934_v41 = vrot.slane %v2933_v3, 4 }
  0xf7   : > { %v2917_v31 = vrot.slane %v2916_v1, 1  ;;  %v2941_v30 = vrot.slane %v2940_v33, 4  ;;  %v2921_v43 = vmax.f32 %v2919_v50, %v2920_v46  ;;  %v2948_v23 = vrot.slane %v2947_v56, 4 }
  0xf8   : > { %v2911_v52 = vmax.f32 %v2909_v20, %v2910_v49  ;;  %v2955_v60 = vrot.slane %v2954_v47, 4  ;;  %v2928_v62 = vadd.f32 %v2927_v19, %v2926_v38  ;;  %v2935_v18 = vadd.f32 %v2934_v41, %v2933_v3 }
  0xf9   : > { %v2918_v57 = vmax.f32 %v2916_v1, %v2917_v31  ;;  %v2942_v4 = vadd.f32 %v2941_v30, %v2940_v33  ;;  %v2922_v55 = vrot.slane %v2921_v43, 2  ;;  %v2949_v28 = vadd.f32 %v2948_v23, %v2947_v56  ;;  %v8278_v30 = vld [vmem:[%s11605_s4 + $0x8] sm:$0x3f] }
  0xfa   : > { %v3409_v2 = vsel %vm1604_vm5, %v2911_v52, %v3408_v34  ;;  %v2956_v53 = vadd.f32 %v2955_v60, %v2954_v47  ;;  %v2929_v39 = vrot.slane %v2928_v62, 2  ;;  %v2936_v37 = vrot.slane %v2935_v18, 2 }
  0xfb   : > { %v3410_v45 = vsel %vm1606_vm6, %v2918_v57, %v3409_v2  ;;  %v2943_v8 = vrot.slane %v2942_v4, 2  ;;  %v2923_v42 = vmax.f32 %v2921_v43, %v2922_v55  ;;  %v2950_v35 = vrot.slane %v2949_v28, 2 }
  0xfc   : > { %v7179_v40 = vpack.c.bf16 %v3410_v45, %v3403_v59  ;;  %v2957_v51 = vrot.slane %v2956_v53, 2  ;;  %v2930_v63 = vadd.f32 %v2929_v39, %v2928_v62  ;;  %v2937_v20 = vadd.f32 %v2936_v37, %v2935_v18  ;;  %v12408_v39 = vld [vmem:[#allocation34_spill] sm:$0xff]  ;;  %v12409_v37 = vld [vmem:[#allocation35_spill] sm:$0xff] }
  0xfd   : > { %v2944_v50 = vadd.f32 %v2943_v8, %v2942_v4  ;;  %v2961_v1 = vadd.f32 %v7733_v12, %v7731_v11  ;;  %v2924_v34 = vrot.slane %v2923_v42, 1  ;;  %v2951_v38 = vadd.f32 %v2950_v35, %v2949_v28  ;;  %v12405_v4 = vld [vmem:[#allocation31_spill] sm:$0xff]  ;;  %v12406_v28 = vld [vmem:[#allocation32_spill] sm:$0xff] }
  0xfe   : > { %7180 = vmatprep.subr.bf16.mxu1 %v7179_v40  ;;  %v2958_v3 = vadd.f32 %v2957_v51, %v2956_v53  ;;  %v2968_v33 = vadd.f32 %v7751_v22, %v7749_v21  ;;  %v2931_v49 = vrot.slane %v2930_v63, 1  ;;  %v2938_v46 = vrot.slane %v2937_v20, 1  ;;  %v12407_v53 = vld [vmem:[#allocation33_spill] sm:$0xff]  ;;  %v12417_v22 = vld [vmem:[#allocation43_spill] sm:$0xff] }
  0xff   : > { %7182 = vmatpush3.bf16.msra.mxu1 %v7179_v40  ;;  %v2945_v59 = vrot.slane %v2944_v50, 1  ;;  %v2962_v56 = vrot.slane %v2961_v1, 4  ;;  %v2925_v47 = vmax.f32 %v2923_v42, %v2924_v34  ;;  %v2952_v31 = vrot.slane %v2951_v38, 1  ;;  %v12410_v40 = vld [vmem:[#allocation36_spill] sm:$0xff]  ;;  %v12411_v42 = vld [vmem:[#allocation37_spill] sm:$0xff] }
 0x100   : > { %v2959_v19 = vrot.slane %v2958_v3, 1  ;;  %v2969_v41 = vrot.slane %v2968_v33, 4  ;;  %v8280_v52 = vadd.f32 %v2931_v49, %v2930_v63  ;;  %v8282_v43 = vadd.f32 %v2938_v46, %v2937_v20  ;;  %v12412_v20 = vld [vmem:[#allocation38_spill] sm:$0xff]  ;;  %v12414_v34 = vld [vmem:[#allocation40_spill] sm:$0xff] }
 0x101   : > { %v8284_v23 = vadd.f32 %v2945_v59, %v2944_v50  ;;  %v2963_v60 = vadd.f32 %v2962_v56, %v2961_v1  ;;  %7057 = vmatprep.subr.msk.mxu1 %vm1747_vm8, %v2925_v47  ;;  %v8287_v57 = vadd.f32 %v2952_v31, %v2951_v38  ;;  %v2975_v2 = vadd.f32 %v12405_v4, %v7759_v27  ;;  %v12413_v50 = vld [vmem:[#allocation39_spill] sm:$0xff]  ;;  %v12415_v38 = vld [vmem:[#allocation41_spill] sm:$0xff] }
 0x102   : > { %v8289_v62 = vadd.f32 %v2959_v19, %v2958_v3  ;;  %v2970_v18 = vadd.f32 %v2969_v41, %v2968_v33  ;;  %v2982_v45 = vadd.f32 %v12407_v53, %v12406_v28  ;;  %v2989_v8 = vadd.f32 %v12409_v37, %v12408_v39 }
 0x103   : > { %7058 = vmatpush3.msk.msra.mxu1 %vm1747_vm8, %v2925_v47  ;;  %v2964_v55 = vrot.slane %v2963_v60, 2  ;;  %v2996_v35 = vadd.f32 %v12411_v42, %v12410_v40  ;;  %v2976_v63 = vrot.slane %v2975_v2, 4  ;;  %v3003_v1 = vadd.f32 %v12413_v50, %v12412_v20 }
 0x104   : > { %7060 = vmatmul.mubr.msk.f32.vlgmr.msra.gmra.mrb[0].mxu1 %vm3417_vm7, %v8278_v30  ;;  %v2971_v51 = vrot.slane %v2970_v18, 2  ;;  %v3010_v3 = vadd.f32 %v12415_v38, %v12414_v34  ;;  %v2983_v49 = vrot.slane %v2982_v45, 4  ;;  %v2990_v46 = vrot.slane %v2989_v8, 4 }
 0x105   : > { %v2965_v33 = vadd.f32 %v2964_v55, %v2963_v60  ;;  %v2997_v59 = vrot.slane %v2996_v35, 4  ;;  %7076 = vmatprep.mubr.msk.f32.mxu1 %vm3417_vm7, %v8248_v61  ;;  %v2977_v47 = vadd.f32 %v2976_v63, %v2975_v2  ;;  %v3004_v31 = vrot.slane %v3003_v1, 4  ;;  %v12416_v63 = vld [vmem:[#allocation42_spill] sm:$0xff] }
 0x106   : > { %v2972_v56 = vadd.f32 %v2971_v51, %v2970_v18  ;;  %v3011_v19 = vrot.slane %v3010_v3, 4  ;;  %v2984_v42 = vadd.f32 %v2983_v49, %v2982_v45  ;;  %v2991_v40 = vadd.f32 %v2990_v46, %v2989_v8  ;;  %v12418_v46 = vld [vmem:[#allocation44_spill] sm:$0xff] }
 0x107   : > { %v2966_v41 = vrot.slane %v2965_v33, 1  ;;  %v2998_v37 = vadd.f32 %v2997_v59, %v2996_v35  ;;  %v2978_v50 = vrot.slane %v2977_v47, 2  ;;  %v3005_v20 = vadd.f32 %v3004_v31, %v3003_v1  ;;  %v12419_v1 = vld [vmem:[#allocation45_spill] sm:$0xff] }
 0x108   : > { %v2973_v39 = vrot.slane %v2972_v56, 1  ;;  %v3012_v53 = vadd.f32 %v3011_v19, %v3010_v3  ;;  %v2985_v60 = vrot.slane %v2984_v42, 2  ;;  %v2992_v55 = vrot.slane %v2991_v40, 2 }
 0x109   : > { %v2967_v38 = vadd.f32 %v2966_v41, %v2965_v33  ;;  %v2999_v34 = vrot.slane %v2998_v37, 2  ;;  %v2979_v4 = vadd.f32 %v2978_v50, %v2977_v47  ;;  %v3006_v27 = vrot.slane %v3005_v20, 2 }
 0x10a   : > { %v2974_v28 = vadd.f32 %v2973_v39, %v2972_v56  ;;  %v3013_v61 = vrot.slane %v3012_v53, 2  ;;  %v2986_v18 = vadd.f32 %v2985_v60, %v2984_v42  ;;  %v2993_v2 = vadd.f32 %v2992_v55, %v2991_v40 }
 0x10b   : > { %v3000_v51 = vadd.f32 %v2999_v34, %v2998_v37  ;;  %v3017_v45 = vadd.f32 %v12417_v22, %v12416_v63  ;;  %v2980_v8 = vrot.slane %v2979_v4, 1  ;;  %v3007_v35 = vadd.f32 %v3006_v27, %v3005_v20  ;;  %v12420_v27 = vld [vmem:[#allocation46_spill] sm:$0xff] }
 0x10c   : > { %v3014_v49 = vadd.f32 %v3013_v61, %v3012_v53  ;;  %v3024_v3 = vadd.f32 %v12419_v1, %v12418_v46  ;;  %v2987_v33 = vrot.slane %v2986_v18, 1  ;;  %v2994_v59 = vrot.slane %v2993_v2, 1  ;;  %v12421_v53 = vld [vmem:[#allocation47_spill] sm:$0xff] }
 0x10d   : > { %v3001_v31 = vrot.slane %v3000_v51, 1  ;;  %v3018_v19 = vrot.slane %v3017_v45, 4  ;;  %v2981_v39 = vadd.f32 %v2980_v8, %v2979_v4  ;;  %v3008_v50 = vrot.slane %v3007_v35, 1 }
 0x10e   : > { %v3015_v56 = vrot.slane %v3014_v49, 1  ;;  %v3025_v47 = vrot.slane %v3024_v3, 4  ;;  %v2988_v42 = vadd.f32 %v2987_v33, %v2986_v18  ;;  %v2995_v40 = vadd.f32 %v2994_v59, %v2993_v2 }
 0x10f   : > { %v3002_v37 = vadd.f32 %v3001_v31, %v3000_v51  ;;  %v3019_v34 = vadd.f32 %v3018_v19, %v3017_v45  ;;  %v3009_v41 = vadd.f32 %v3008_v50, %v3007_v35  ;;  %v3031_v20 = vadd.f32 %v12421_v53, %v12420_v27 }
 0x110   : > { %v3016_v60 = vadd.f32 %v3015_v56, %v3014_v49  ;;  %v3026_v55 = vadd.f32 %v3025_v47, %v3024_v3  ;;  %v3269_v1 = vmul.f32 0.0625, %v8280_v52  ;;  %v3270_v46 = vmul.f32 0.0625, %v8282_v43 }
 0x111   : > { %v3020_v61 = vrot.slane %v3019_v34, 2  ;;  %v3271_v4 = vmul.f32 0.0625, %v8284_v23  ;;  %v3032_v22 = vrot.slane %v3031_v20, 4  ;;  %v3272_v18 = vmul.f32 0.0625, %v8287_v57 }
 0x112   : > { %v3027_v8 = vrot.slane %v3026_v55, 2  ;;  %v3273_v2 = vmul.f32 0.0625, %v8289_v62  ;;  %v3274_v45 = vmul.f32 0.0625, %v2967_v38  ;;  %v3275_v35 = vmul.f32 0.0625, %v2974_v28  ;;  %v12422_v38 = vld [vmem:[#allocation48_spill] sm:$0xff] }
 0x113   : > { %v3021_v51 = vadd.f32 %v3020_v61, %v3019_v34  ;;  %v3276_v49 = vmul.f32 0.0625, %v2981_v39  ;;  %v3033_v33 = vadd.f32 %v3032_v22, %v3031_v20  ;;  %v3277_v59 = vmul.f32 0.0625, %v2988_v42  ;;  %v12423_v39 = vld [vmem:[#allocation49_spill] sm:$0xff] }
 0x114   : > { %v3028_v3 = vadd.f32 %v3027_v8, %v3026_v55  ;;  %v3278_v31 = vmul.f32 0.0625, %v2995_v40  ;;  %v3279_v52 = vmul.f32 0.0625, %v3002_v37  ;;  %v3280_v50 = vmul.f32 0.0625, %v3009_v41  ;;  %v12425_v8 = vld [vmem:[#allocation51_spill] sm:$0xff] }
 0x115   : > { %v3022_v19 = vrot.slane %v3021_v51, 1  ;;  %v3281_v43 = vmul.f32 0.0625, %v3016_v60  ;;  %v3034_v23 = vrot.slane %v3033_v33, 2  ;;  %v3550_v47 = vsel %vm1594_vm0, %v3270_v46, %v3269_v1 }
 0x116   : > { %v3029_v56 = vrot.slane %v3028_v3, 1  ;;  %v3557_v57 = vsel %vm1594_vm0, %v3278_v31, %v3277_v59  ;;  %v3551_v62 = vsel %vm1596_vm1, %v3271_v4, %v3550_v47  ;;  %v3038_v22 = vadd.f32 %v12423_v39, %v12422_v38  ;;  %v12424_v4 = vld [vmem:[#allocation50_spill] sm:$0xff]  ;;  %v12426_v59 = vld [vmem:[#allocation52_spill] sm:$0xff]  ;;  %v12427_v31 = vld [vmem:[#allocation53_spill] sm:$0xff] }
 0x117   : > { %v3023_v53 = vadd.f32 %v3022_v19, %v3021_v51  ;;  %v3558_v28 = vsel %vm1596_vm1, %v3279_v52, %v3557_v57  ;;  %v3035_v40 = vadd.f32 %v3034_v23, %v3033_v33  ;;  %v3552_v37 = vsel %vm1598_vm2, %v3272_v18, %v3551_v62  ;;  %v12429_v23 = vld [vmem:[#allocation55_spill] sm:$0xff]  ;;  %v12430_v57 = vld [vmem:[#allocation56_spill] sm:$0xff]  ;;  %v12431_v62 = vld [vmem:[#allocation57_spill] sm:$0xff] }
 0x118   : > { %v3030_v42 = vadd.f32 %v3029_v56, %v3028_v3  ;;  %v3559_v34 = vsel %vm1598_vm2, %v3280_v50, %v3558_v28  ;;  %v3553_v60 = vsel %vm1600_vm3, %v3273_v2, %v3552_v37  ;;  %v3039_v1 = vrot.slane %v3038_v22, 4  ;;  %v12433_v37 = vld [vmem:[#allocation59_spill] sm:$0xff]  ;;  %v12447_v39 = vld [vmem:[#allocation73_spill] sm:$0xff] }
 0x119   : > { %v3282_v41 = vmul.f32 0.0625, %v3023_v53  ;;  %v3560_v46 = vsel %vm1600_vm3, %v3281_v43, %v3559_v34  ;;  %v3036_v55 = vrot.slane %v3035_v40, 1  ;;  %v3554_v61 = vsel %vm1602_vm4, %v3274_v45, %v3553_v60  ;;  %v12428_v45 = vld [vmem:[#allocation54_spill] sm:$0xff] }
 0x11a   : > { %v3283_v20 = vmul.f32 0.0625, %v3030_v42  ;;  %v3045_v51 = vadd.f32 %v12425_v8, %v12424_v4  ;;  %v3555_v3 = vsel %vm1604_vm5, %v3275_v35, %v3554_v61  ;;  %v3040_v18 = vadd.f32 %v3039_v1, %v3038_v22  ;;  %v12432_v22 = vld [vmem:[#allocation58_spill] sm:$0xff]  ;;  %v12442_v4 = vld [vmem:[#allocation68_spill] sm:$0xff] }
 0x11b   : > { %v3561_v33 = vsel %vm1602_vm4, %v3282_v41, %v3560_v46  ;;  %v3052_v53 = vadd.f32 %v12427_v31, %v12426_v59  ;;  %v3037_v19 = vadd.f32 %v3036_v55, %v3035_v40  ;;  %v3556_v2 = vsel %vm1606_vm6, %v3276_v49, %v3555_v3  ;;  %v12434_v41 = vld [vmem:[#allocation60_spill] sm:$0xff]  ;;  %v12435_v40 = vld [vmem:[#allocation61_spill] sm:$0xff] }
 0x11c   : > { %v3562_v52 = vsel %vm1604_vm5, %v3283_v20, %v3561_v33  ;;  %v3046_v50 = vrot.slane %v3045_v51, 4  ;;  %v3041_v43 = vrot.slane %v3040_v18, 2  ;;  %v3059_v47 = vadd.f32 %v12429_v23, %v12428_v45 }
 0x11d   : > { %v3053_v56 = vrot.slane %v3052_v53, 4  ;;  %v3066_v35 = vadd.f32 %v12431_v62, %v12430_v57  ;;  %v3284_v28 = vmul.f32 0.0625, %v3037_v19  ;;  %v3073_v34 = vadd.f32 %v12433_v37, %v12432_v22 }
 0x11e   : > { %v3047_v42 = vadd.f32 %v3046_v50, %v3045_v51  ;;  %v3080_v60 = vadd.f32 %v12435_v40, %v12434_v41  ;;  %v3042_v49 = vadd.f32 %v3041_v43, %v3040_v18  ;;  %v3060_v1 = vrot.slane %v3059_v47, 4  ;;  %v12436_v43 = vld [vmem:[#allocation62_spill] sm:$0xff] }
 0x11f   : > { %v3054_v46 = vadd.f32 %v3053_v56, %v3052_v53  ;;  %v3067_v55 = vrot.slane %v3066_v35, 4  ;;  %v3563_v20 = vsel %vm1606_vm6, %v3284_v28, %v3562_v52  ;;  %v3074_v3 = vrot.slane %v3073_v34, 4  ;;  %v12437_v56 = vld [vmem:[#allocation63_spill] sm:$0xff] }
 0x120   : > { %v3048_v61 = vrot.slane %v3047_v42, 2  ;;  %v3081_v33 = vrot.slane %v3080_v60, 4  ;;  %v7183_v23 = vpack.c.bf16 %v3563_v20, %v3556_v2  ;;  %v3043_v45 = vrot.slane %v3042_v49, 1 }
 0x121   : > { %v3055_v62 = vrot.slane %v3054_v46, 2  ;;  %v3061_v19 = vadd.f32 %v3060_v1, %v3059_v47  ;;  %v3068_v50 = vadd.f32 %v3067_v55, %v3066_v35  ;;  %v3075_v57 = vadd.f32 %v3074_v3, %v3073_v34  ;;  %v12439_v35 = vld [vmem:[#allocation65_spill] sm:$0xff] }
 0x122   : > { %v3049_v51 = vadd.f32 %v3048_v61, %v3047_v42  ;;  %v3082_v37 = vadd.f32 %v3081_v33, %v3080_v60  ;;  %7184 = vmatprep.subr.bf16.mxu1 %v7183_v23  ;;  %v8347_v22 = vadd.f32 %v3043_v45, %v3042_v49  ;;  %v3087_v40 = vadd.f32 %v12437_v56, %v12436_v43  ;;  %v12438_v42 = vld [vmem:[#allocation64_spill] sm:$0xff]  ;;  %v12440_v56 = vld [vmem:[#allocation66_spill] sm:$0xff]  ;;  %v12441_v43 = vld [vmem:[#allocation67_spill] sm:$0xff] }
 0x123   : > { %v3056_v18 = vadd.f32 %v3055_v62, %v3054_v46  ;;  %v3062_v53 = vrot.slane %v3061_v19, 2  ;;  %7186 = vmatpush3.bf16.msra.mxu1 %v7183_v23  ;;  %v3069_v28 = vrot.slane %v3068_v50, 2  ;;  %v3076_v41 = vrot.slane %v3075_v57, 2 }
 0x124   : > { %v3050_v52 = vrot.slane %v3049_v51, 1  ;;  %v3083_v2 = vrot.slane %v3082_v37, 2  ;;  %v3088_v47 = vrot.slane %v3087_v40, 4  ;;  %v3094_v34 = vadd.f32 %v12439_v35, %v12438_v42  ;;  %v12443_v35 = vld [vmem:[#allocation69_spill] sm:$0xff]  ;;  %v12446_v42 = vld [vmem:[#allocation72_spill] sm:$0xff] }
 0x125   : > { %v3057_v20 = vrot.slane %v3056_v18, 1  ;;  %v3063_v31 = vadd.f32 %v3062_v53, %v3061_v19  ;;  %v3070_v45 = vadd.f32 %v3069_v28, %v3068_v50  ;;  %v3077_v49 = vadd.f32 %v3076_v41, %v3075_v57  ;;  %v12444_v28 = vld [vmem:[#allocation70_spill] sm:$0xff] }
 0x126   : > { %v8353_v60 = vadd.f32 %v3050_v52, %v3049_v51  ;;  %v3084_v62 = vadd.f32 %v3083_v2, %v3082_v37  ;;  %v3089_v55 = vadd.f32 %v3088_v47, %v3087_v40  ;;  %v3095_v61 = vrot.slane %v3094_v34, 4  ;;  %v12445_v2 = vld [vmem:[#allocation71_spill] sm:$0xff] }
 0x127   : > { %v3058_v46 = vadd.f32 %v3057_v20, %v3056_v18  ;;  %v3064_v1 = vrot.slane %v3063_v31, 1  ;;  %v3071_v23 = vrot.slane %v3070_v45, 1  ;;  %v3078_v3 = vrot.slane %v3077_v49, 1 }
 0x128   : > { %v3085_v33 = vrot.slane %v3084_v62, 1  ;;  %v3101_v59 = vadd.f32 %v12441_v43, %v12440_v56  ;;  %v3090_v53 = vrot.slane %v3089_v55, 2  ;;  %v3096_v8 = vadd.f32 %v3095_v61, %v3094_v34  ;;  %v12450_v61 = vld [vmem:[#allocation76_spill] sm:$0xff]  ;;  %v12451_v56 = vld [vmem:[#allocation77_spill] sm:$0xff] }
 0x129   : > { %v3065_v19 = vadd.f32 %v3064_v1, %v3063_v31  ;;  %v3108_v51 = vadd.f32 %v12443_v35, %v12442_v4  ;;  %v3072_v52 = vadd.f32 %v3071_v23, %v3070_v45  ;;  %v3079_v50 = vadd.f32 %v3078_v3, %v3077_v49  ;;  %v12448_v31 = vld [vmem:[#allocation74_spill] sm:$0xff]  ;;  %v12449_v1 = vld [vmem:[#allocation75_spill] sm:$0xff] }
 0x12a   : > { %v3086_v57 = vadd.f32 %v3085_v33, %v3084_v62  ;;  %v3102_v37 = vrot.slane %v3101_v59, 4  ;;  %v3091_v41 = vadd.f32 %v3090_v53, %v3089_v55  ;;  %v3097_v18 = vrot.slane %v3096_v8, 2 }
 0x12b   : > { %v3109_v40 = vrot.slane %v3108_v51, 4  ;;  %v3115_v20 = vadd.f32 %v12445_v2, %v12444_v28  ;;  %v3122_v43 = vadd.f32 %v12447_v39, %v12446_v42  ;;  %v3129_v34 = vadd.f32 %v12449_v1, %v12448_v31 }
 0x12c   : > { %v3103_v47 = vadd.f32 %v3102_v37, %v3101_v59  ;;  %v3136_v35 = vadd.f32 %v12451_v56, %v12450_v61  ;;  %v3092_v45 = vrot.slane %v3091_v41, 1  ;;  %v3098_v49 = vadd.f32 %v3097_v18, %v3096_v8  ;;  %v12452_v56 = vld [vmem:[#allocation78_spill] sm:$0xff]  ;;  %v12453_v61 = vld [vmem:[#allocation79_spill] sm:$0xff] }
 0x12d   : > { %v3110_v62 = vadd.f32 %v3109_v40, %v3108_v51  ;;  %v3116_v23 = vrot.slane %v3115_v20, 4  ;;  %v3123_v3 = vrot.slane %v3122_v43, 4  ;;  %v3130_v33 = vrot.slane %v3129_v34, 4 }
 0x12e   : > { %v3104_v55 = vrot.slane %v3103_v47, 2  ;;  %v3137_v53 = vrot.slane %v3136_v35, 4  ;;  %v3093_v4 = vadd.f32 %v3092_v45, %v3091_v41  ;;  %v3099_v2 = vrot.slane %v3098_v49, 1 }
 0x12f   : > { %v3111_v59 = vrot.slane %v3110_v62, 2  ;;  %v3117_v37 = vadd.f32 %v3116_v23, %v3115_v20  ;;  %v3124_v39 = vadd.f32 %v3123_v3, %v3122_v43  ;;  %v3131_v42 = vadd.f32 %v3130_v33, %v3129_v34 }
 0x130   : > { %v3105_v28 = vadd.f32 %v3104_v55, %v3103_v47  ;;  %v3138_v38 = vadd.f32 %v3137_v53, %v3136_v35  ;;  %v3100_v1 = vadd.f32 %v3099_v2, %v3098_v49  ;;  %v3143_v8 = vadd.f32 %v12453_v61, %v12452_v56 }
 0x131   : > { %v3112_v31 = vadd.f32 %v3111_v59, %v3110_v62  ;;  %v3118_v27 = vrot.slane %v3117_v37, 2  ;;  %v3125_v18 = vrot.slane %v3124_v39, 2  ;;  %v3132_v40 = vrot.slane %v3131_v42, 2 }
 0x132   : > { %v3106_v51 = vrot.slane %v3105_v28, 1  ;;  %v3139_v63 = vrot.slane %v3138_v38, 2  ;;  %v3144_v41 = vrot.slane %v3143_v8, 4  ;;  %v3285_v45 = vmul.f32 0.0625, %v8347_v22 }
 0x133   : > { %v3113_v21 = vrot.slane %v3112_v31, 1  ;;  %v3119_v12 = vadd.f32 %v3118_v27, %v3117_v37  ;;  %v3126_v47 = vadd.f32 %v3125_v18, %v3124_v39  ;;  %v3133_v43 = vadd.f32 %v3132_v40, %v3131_v42 }
 0x134   : > { %v3107_v20 = vadd.f32 %v3106_v51, %v3105_v28  ;;  %v3140_v34 = vadd.f32 %v3139_v63, %v3138_v38  ;;  %v3145_v49 = vadd.f32 %v3144_v41, %v3143_v8  ;;  %v3286_v62 = vmul.f32 0.0625, %v8353_v60  ;;  %v12455_v41 = vld [vmem:[#allocation81_spill] sm:$0xff] }
 0x135   : > { %v3114_v35 = vadd.f32 %v3113_v21, %v3112_v31  ;;  %v3120_v2 = vrot.slane %v3119_v12, 1  ;;  %v3127_v23 = vrot.slane %v3126_v47, 1  ;;  %v3134_v55 = vrot.slane %v3133_v43, 1 }
 0x136   : > { %v3141_v3 = vrot.slane %v3140_v34, 1  ;;  %v3287_v33 = vmul.f32 0.0625, %v3058_v46  ;;  %v3146_v59 = vrot.slane %v3145_v49, 2  ;;  %v3288_v61 = vmul.f32 0.0625, %v3065_v19 }
 0x137   : > { %v3121_v53 = vadd.f32 %v3120_v2, %v3119_v12  ;;  %v3289_v27 = vmul.f32 0.0625, %v3072_v52  ;;  %v3128_v37 = vadd.f32 %v3127_v23, %v3126_v47  ;;  %v3135_v56 = vadd.f32 %v3134_v55, %v3133_v43  ;;  %v12454_v52 = vld [vmem:[#allocation80_spill] sm:$0xff]  ;;  %v12456_v47 = vld [vmem:[#allocation82_spill] sm:$0xff] }
 0x138   : > { %v3142_v22 = vadd.f32 %v3141_v3, %v3140_v34  ;;  %v3290_v28 = vmul.f32 0.0625, %v3079_v50  ;;  %v3147_v39 = vadd.f32 %v3146_v59, %v3145_v49  ;;  %v3291_v42 = vmul.f32 0.0625, %v3086_v57  ;;  %v12457_v57 = vld [vmem:[#allocation83_spill] sm:$0xff]  ;;  %v12458_v34 = vld [vmem:[#allocation84_spill] sm:$0xff] }
 0x139   : > { %v3292_v63 = vmul.f32 0.0625, %v3093_v4  ;;  %v3293_v21 = vmul.f32 0.0625, %v3100_v1  ;;  %v3294_v38 = vmul.f32 0.0625, %v3107_v20  ;;  %v3295_v31 = vmul.f32 0.0625, %v3114_v35 }
 0x13a   : > { %v3296_v8 = vmul.f32 0.0625, %v3121_v53  ;;  %v3297_v60 = vmul.f32 0.0625, %v3128_v37  ;;  %v3148_v51 = vrot.slane %v3147_v39, 1  ;;  %v3298_v18 = vmul.f32 0.0625, %v3135_v56  ;;  %v12459_v56 = vld [vmem:[#allocation85_spill] sm:$0xff] }
 0x13b   : > { %v3299_v40 = vmul.f32 0.0625, %v3142_v22  ;;  %v3564_v12 = vsel %vm1594_vm0, %v3286_v62, %v3285_v45  ;;  %v3571_v19 = vsel %vm1594_vm0, %v3294_v38, %v3293_v21  ;;  %v3150_v50 = vadd.f32 %v12455_v41, %v12454_v52  ;;  %v12460_v21 = vld [vmem:[#allocation86_spill] sm:$0xff]  ;;  %v12461_v38 = vld [vmem:[#allocation87_spill] sm:$0xff] }
 0x13c   : > { %v3565_v46 = vsel %vm1596_vm1, %v3287_v33, %v3564_v12  ;;  %v3157_v4 = vadd.f32 %v12457_v57, %v12456_v47  ;;  %v3149_v1 = vadd.f32 %v3148_v51, %v3147_v39  ;;  %v3572_v43 = vsel %vm1596_vm1, %v3295_v31, %v3571_v19  ;;  %v12463_v12 = vld [vmem:[#allocation89_spill] sm:$0xff] }
 0x13d   : > { %v3566_v20 = vsel %vm1598_vm2, %v3288_v61, %v3565_v46  ;;  %v3164_v35 = vadd.f32 %v12459_v56, %v12458_v34  ;;  %v3573_v2 = vsel %vm1598_vm2, %v3296_v8, %v3572_v43  ;;  %v3151_v49 = vrot.slane %v3150_v50, 4 }
 0x13e   : > { %v3567_v45 = vsel %vm1600_vm3, %v3289_v27, %v3566_v20  ;;  %v3158_v62 = vrot.slane %v3157_v4, 4  ;;  %v3300_v23 = vmul.f32 0.0625, %v3149_v1  ;;  %v3574_v3 = vsel %vm1600_vm3, %v3297_v60, %v3573_v2  ;;  %v12462_v60 = vld [vmem:[#allocation88_spill] sm:$0xff] }
 0x13f   : > { %v3568_v55 = vsel %vm1602_vm4, %v3290_v28, %v3567_v45  ;;  %v3165_v33 = vrot.slane %v3164_v35, 4  ;;  %v3575_v61 = vsel %vm1602_vm4, %v3298_v18, %v3574_v3  ;;  %v3152_v59 = vadd.f32 %v3151_v49, %v3150_v50  ;;  %v12464_v50 = vld [vmem:[#allocation90_spill] sm:$0xff]  ;;  %v12466_v49 = vld [vmem:[#allocation95_spill] sm:$0xff] }
 0x140   : > { %v3569_v53 = vsel %vm1604_vm5, %v3291_v42, %v3568_v55  ;;  %v3159_v37 = vadd.f32 %v3158_v62, %v3157_v4  ;;  %v3576_v27 = vsel %vm1604_vm5, %v3299_v40, %v3575_v61  ;;  %v3171_v31 = vadd.f32 %v12461_v38, %v12460_v21  ;;  %v12465_v4 = vld [vmem:[#allocation91_spill] sm:$0xff] }
 0x141   : > { %v3570_v22 = vsel %vm1606_vm6, %v3292_v63, %v3569_v53  ;;  %v3166_v39 = vadd.f32 %v3165_v33, %v3164_v35  ;;  %v3577_v8 = vsel %vm1606_vm6, %v3300_v23, %v3576_v27  ;;  %v3153_v28 = vrot.slane %v3152_v59, 2 }
 0x142   : > { %v3160_v51 = vrot.slane %v3159_v37, 2  ;;  %v3178_v46 = vadd.f32 %v12463_v12, %v12462_v60  ;;  %v7187_v42 = vpack.c.bf16 %v3577_v8, %v3570_v22  ;;  %v3172_v18 = vrot.slane %v3171_v31, 4 }
 0x143   : > { %v3167_v19 = vrot.slane %v3166_v39, 2  ;;  %v3185_v1 = vadd.f32 %v12465_v4, %v12464_v50  ;;  %v3154_v63 = vadd.f32 %v3153_v28, %v3152_v59  ;;  %v3192_v43 = vadd.f32 %v8110_v29, %v8107_v32  ;;  %v12470_v29 = vld [vmem:[#allocation99_spill] sm:$0xff] }
 0x144   : > { %v3161_v20 = vadd.f32 %v3160_v51, %v3159_v37  ;;  %v3179_v40 = vrot.slane %v3178_v46, 4  ;;  %7188 = vmatprep.subr.bf16.mxu1 %v7187_v42  ;;  %v3173_v45 = vadd.f32 %v3172_v18, %v3171_v31  ;;  %v3199_v62 = vadd.f32 %v12466_v49, %v8114_v7  ;;  %v12467_v49 = vld [vmem:[#allocation96_spill] sm:$0xff]  ;;  %v12469_v7 = vld [vmem:[#allocation98_spill] sm:$0xff] }
 0x145   : > { %v3168_v35 = vadd.f32 %v3167_v19, %v3166_v39  ;;  %v3186_v2 = vrot.slane %v3185_v1, 4  ;;  %7190 = vmatpush3.bf16.msra.mxu1 %v7187_v42  ;;  %v3155_v23 = vrot.slane %v3154_v63, 1  ;;  %v3193_v33 = vrot.slane %v3192_v43, 4 }
 0x146   : > { %v3162_v55 = vrot.slane %v3161_v20, 1  ;;  %v3180_v3 = vadd.f32 %v3179_v40, %v3178_v46  ;;  %v3174_v61 = vrot.slane %v3173_v45, 2  ;;  %v3200_v37 = vrot.slane %v3199_v62, 4  ;;  %v12468_v46 = vld [vmem:[#allocation97_spill] sm:$0xff] }
 0x147   : > { %v3169_v53 = vrot.slane %v3168_v35, 1  ;;  %v3187_v59 = vadd.f32 %v3186_v2, %v3185_v1  ;;  %v8401_v22 = vadd.f32 %v3155_v23, %v3154_v63  ;;  %v3194_v39 = vadd.f32 %v3193_v33, %v3192_v43 }
 0x148   : > { %v8403_v27 = vadd.f32 %v3162_v55, %v3161_v20  ;;  %v3181_v8 = vrot.slane %v3180_v3, 2  ;;  %v3175_v28 = vadd.f32 %v3174_v61, %v3173_v45  ;;  %v3201_v19 = vadd.f32 %v3200_v37, %v3199_v62  ;;  %v12471_v20 = vld [vmem:[#allocation100_spill] sm:$0xff]  ;;  %v12472_v55 = vld [vmem:[#allocation101_spill] sm:$0xff] }
 0x149   : > { %v8405_v31 = vadd.f32 %v3169_v53, %v3168_v35  ;;  %v3188_v51 = vrot.slane %v3187_v59, 2  ;;  %v3195_v18 = vrot.slane %v3194_v39, 2  ;;  %v3206_v40 = vadd.f32 %v12468_v46, %v12467_v49 }
 0x14a   : > { %v3182_v42 = vadd.f32 %v3181_v8, %v3180_v3  ;;  %v3213_v1 = vadd.f32 %v12470_v29, %v12469_v7  ;;  %v3176_v2 = vrot.slane %v3175_v28, 1  ;;  %v3202_v23 = vrot.slane %v3201_v19, 2 }
 0x14b   : > { %v3189_v63 = vadd.f32 %v3188_v51, %v3187_v59  ;;  %v3220_v32 = vadd.f32 %v12472_v55, %v12471_v20  ;;  %v3196_v35 = vadd.f32 %v3195_v18, %v3194_v39  ;;  %v3207_v33 = vrot.slane %v3206_v40, 4  ;;  %v12473_v59 = vld [vmem:[#allocation102_spill] sm:$0xff]  ;;  %v12474_v51 = vld [vmem:[#allocation103_spill] sm:$0xff]  ;;  %v12475_v39 = vld [vmem:[#allocation105_spill] sm:$0xff] }
 0x14c   : > { %v3183_v43 = vrot.slane %v3182_v42, 1  ;;  %v3214_v45 = vrot.slane %v3213_v1, 4  ;;  %v3177_v53 = vadd.f32 %v3176_v2, %v3175_v28  ;;  %v3203_v3 = vadd.f32 %v3202_v23, %v3201_v19 }
 0x14d   : > { %v3190_v62 = vrot.slane %v3189_v63, 1  ;;  %v3221_v61 = vrot.slane %v3220_v32, 4  ;;  %v3197_v8 = vrot.slane %v3196_v35, 1  ;;  %v3208_v46 = vadd.f32 %v3207_v33, %v3206_v40 }
 0x14e   : > { %v3184_v37 = vadd.f32 %v3183_v43, %v3182_v42  ;;  %v3215_v49 = vadd.f32 %v3214_v45, %v3213_v1  ;;  %v3204_v29 = vrot.slane %v3203_v3, 1  ;;  %v3227_v50 = vadd.f32 %v12474_v51, %v12473_v59  ;;  %v12476_v42 = vld [vmem:[#allocation107_spill] sm:$0xff] }
 0x14f   : > { %v3191_v4 = vadd.f32 %v3190_v62, %v3189_v63  ;;  %v3222_v7 = vadd.f32 %v3221_v61, %v3220_v32  ;;  %v3198_v12 = vadd.f32 %v3197_v8, %v3196_v35  ;;  %v3209_v55 = vrot.slane %v3208_v46, 2 }
 0x150   : > { %v3216_v20 = vrot.slane %v3215_v49, 2  ;;  %v3234_v18 = vadd.f32 %v12475_v39, %v8146_v24  ;;  %v3205_v28 = vadd.f32 %v3204_v29, %v3203_v3  ;;  %v3228_v19 = vrot.slane %v3227_v50, 4 }
 0x151   : > { %v3223_v2 = vrot.slane %v3222_v7, 2  ;;  %v3241_v23 = vadd.f32 %v12476_v42, %v8150_v0  ;;  %v3210_v40 = vadd.f32 %v3209_v55, %v3208_v46  ;;  %v3248_v32 = vadd.f32 %v8169_v54, %v8163_v48 }
 0x152   : > { %v3217_v1 = vadd.f32 %v3216_v20, %v3215_v49  ;;  %v3235_v63 = vrot.slane %v3234_v18, 4  ;;  %v3229_v33 = vadd.f32 %v3228_v19, %v3227_v50  ;;  %v3255_v45 = vadd.f32 %v8175_v36, %v8171_v58 }
 0x153   : > { %v3224_v43 = vadd.f32 %v3223_v2, %v3222_v7  ;;  %v3242_v35 = vrot.slane %v3241_v23, 4  ;;  %v3211_v62 = vrot.slane %v3210_v40, 1  ;;  %v3249_v3 = vrot.slane %v3248_v32, 4 }
 0x154   : > { %v3218_v61 = vrot.slane %v3217_v1, 1  ;;  %v3236_v29 = vadd.f32 %v3235_v63, %v3234_v18  ;;  %v3230_v39 = vrot.slane %v3229_v33, 2  ;;  %v3256_v42 = vrot.slane %v3255_v45, 4 }
 0x155   : > { %v3225_v8 = vrot.slane %v3224_v43, 1  ;;  %v3243_v24 = vadd.f32 %v3242_v35, %v3241_v23  ;;  %v3212_v46 = vadd.f32 %v3211_v62, %v3210_v40  ;;  %v3250_v55 = vadd.f32 %v3249_v3, %v3248_v32 }
 0x156   : > { %v3219_v49 = vadd.f32 %v3218_v61, %v3217_v1  ;;  %v3237_v20 = vrot.slane %v3236_v29, 2  ;;  %v3231_v54 = vadd.f32 %v3230_v39, %v3229_v33  ;;  %v3257_v50 = vadd.f32 %v3256_v42, %v3255_v45 }
 0x157   : > { %v3226_v0 = vadd.f32 %v3225_v8, %v3224_v43  ;;  %v3244_v7 = vrot.slane %v3243_v24, 2  ;;  %v3251_v19 = vrot.slane %v3250_v55, 2  ;;  %v3301_v36 = vmul.f32 0.0625, %v8401_v22 }
 0x158   : > { %v3238_v2 = vadd.f32 %v3237_v20, %v3236_v29  ;;  %v3302_v58 = vmul.f32 0.0625, %v8403_v27  ;;  %v3232_v18 = vrot.slane %v3231_v54, 1  ;;  %v3258_v48 = vrot.slane %v3257_v50, 2 }
 0x159   : > { %v3245_v63 = vadd.f32 %v3244_v7, %v3243_v24  ;;  %v3303_v23 = vmul.f32 0.0625, %v8405_v31  ;;  %v3252_v40 = vadd.f32 %v3251_v19, %v3250_v55  ;;  %v3304_v1 = vmul.f32 0.0625, %v3177_v53 }
 0x15a   : > { %v3239_v35 = vrot.slane %v3238_v2, 1  ;;  %v3305_v62 = vmul.f32 0.0625, %v3184_v37  ;;  %v3233_v32 = vadd.f32 %v3232_v18, %v3231_v54  ;;  %v3259_v39 = vadd.f32 %v3258_v48, %v3257_v50 }
 0x15b   : > { %v3246_v43 = vrot.slane %v3245_v63, 1  ;;  %v3306_v33 = vmul.f32 0.0625, %v3191_v4  ;;  %v3253_v45 = vrot.slane %v3252_v40, 1  ;;  %v3307_v61 = vmul.f32 0.0625, %v3198_v12 }
 0x15c   : > { %v3240_v42 = vadd.f32 %v3239_v35, %v3238_v2  ;;  %v3308_v29 = vmul.f32 0.0625, %v3205_v28  ;;  %v3260_v3 = vrot.slane %v3259_v39, 1  ;;  %v3309_v27 = vmul.f32 0.0625, %v3212_v46 }
 0x15d   : > { %v3247_v22 = vadd.f32 %v3246_v43, %v3245_v63  ;;  %v3310_v8 = vmul.f32 0.0625, %v3219_v49  ;;  %v3254_v24 = vadd.f32 %v3253_v45, %v3252_v40  ;;  %v3311_v20 = vmul.f32 0.0625, %v3226_v0 }
 0x15e   : > { %v3312_v7 = vmul.f32 0.0625, %v3233_v32  ;;  %v3313_v31 = vmul.f32 0.0625, %v3240_v42  ;;  %v3261_v51 = vadd.f32 %v3260_v3, %v3259_v39  ;;  %v3578_v53 = vsel %vm1594_vm0, %v3302_v58, %v3301_v36 }
 0x15f   : > { %v3314_v55 = vmul.f32 0.0625, %v3247_v22  ;;  %v3585_v54 = vsel %vm1594_vm0, %v3310_v8, %v3309_v27  ;;  %v3315_v48 = vmul.f32 0.0625, %v3254_v24  ;;  %v3579_v4 = vsel %vm1596_vm1, %v3303_v23, %v3578_v53  ;;  %v3830_v8 = vld [vmem:[%s11607_s6] sm:$0xff] }
 0x160   : > { %v3586_v12 = vsel %vm1596_vm1, %v3311_v20, %v3585_v54  ;;  %v3262_v37 = vadd.f32 %v8238_v13, %v8226_v44  ;;  %v3316_v28 = vmul.f32 0.0625, %v3261_v51  ;;  %v3580_v46 = vsel %vm1598_vm2, %v3304_v1, %v3579_v4  ;;  %v6440_v24 = vld [vmem:[%s7703_s13] sm:$0xff]   ;;  %v6831_v20 = vld [vmem:[%s7703_s13 + $0x8] sm:$0xff]   ;;  %v6836_v4 = vld [vmem:[%s7703_s13 + $0x30] sm:$0xff]  }
 0x161   : > { %v3587_v0 = vsel %vm1598_vm2, %v3312_v7, %v3586_v12  ;;  %v3581_v49 = vsel %vm1600_vm3, %v3305_v62, %v3580_v46  ;;  %v11793_v36 = vmov 0.0|0.0   ;;  %v6832_v7 = vld [vmem:[%s7703_s13 + $0x10] sm:$0xff]   ;;  %v8477_v53 = vunpack.c.l.bf16 %v6440_v24 }
 0x162   : > { %v3588_v50 = vsel %vm1600_vm3, %v3313_v31, %v3587_v0  ;;  %v3263_v58 = vrot.slane %v3262_v37, 4  ;;  %7153 = vmatprep.subr.bf16.mxu0 %v11793_v36  ;;  %v3582_v2 = vsel %vm1602_vm4, %v3306_v33, %v3581_v49  ;;  %v11791_v33 = vmov 0.0   ;;  %v6833_v31 = vld [vmem:[%s7703_s13 + $0x18] sm:$0xff]   ;;  %v6838_v49 = vld [vmem:[%s7703_s13 + $0x40] sm:$0xff]  }
 0x163   : > { %v3589_v19 = vsel %vm1602_vm4, %v3314_v55, %v3588_v50  ;;  %v3583_v18 = vsel %vm1604_vm5, %v3307_v61, %v3582_v2  ;;  %7024 = vmatprep.mubr.msk.f32.mxu0 %vm7478_vm9, %v11791_v33  ;;  %v12477_v61 = vmov 0  ;;  %v6834_v55 = vld [vmem:[%s7703_s13 + $0x20] sm:$0xff]   ;;  %12480 = vst [vmem:[#allocation115_spill] sm:$0xff] %v8477_v53  ;;  %v8479_v54 = vunpack.c.h.bf16 %v6440_v24  ;;  %v6837_v0 = vld [vmem:[%s7703_s13 + $0x38] sm:$0xff]  }
 0x164   : > { %v3590_v51 = vsel %vm1604_vm5, %v3315_v48, %v3589_v19  ;;  %v3264_v63 = vadd.f32 %v3263_v58, %v3262_v37  ;;  %v3584_v23 = vsel %vm1606_vm6, %v3308_v29, %v3583_v18  ;;  %v12478_v61 = vsel %vm8452_vm12, 4294967295, %v12477_v61  ;;  %v3675_v29 = vld [vmem:[%s11606_s5] sm:$0xff]  ;;  %v6835_v48 = vld [vmem:[%s7703_s13 + $0x28] sm:$0xff]  }
 0x165   : > { %v3591_v35 = vsel %vm1606_vm6, %v3316_v28, %v3590_v51  ;;  %12479 = vst [vmem:[#allocation114_spill] sm:$0xff] %v12478_v61  ;;  %12481 = vst [vmem:[#allocation116_spill] sm:$0xff] %v8479_v54  ;;  %v8483_v12 = vunpack.c.l.bf16 %v6831_v20  ;;  %v8485_v37 = vunpack.c.h.bf16 %v6831_v20  ;;  %v8487_v28 = vunpack.c.l.bf16 %v6832_v7  ;;  %v6839_v18 = vld [vmem:[%s7703_s13 + $0x48] sm:$0xff]   ;;  %v6840_v51 = vld [vmem:[%s7703_s13 + $0x50] sm:$0xff]  }
 0x166   : > { %v7191_v40 = vpack.c.bf16 %v3591_v35, %v3584_v23  ;;  %v3265_v1 = vrot.slane %v3264_v63, 2  ;;  %v8489_v46 = vunpack.c.h.bf16 %v6832_v7  ;;  %v8493_v50 = vunpack.c.l.bf16 %v6833_v31 }
 0x167   : > { %12482 = vst [vmem:[#allocation117_spill] sm:$0xff] %v8483_v12  ;;  %12483 = vst [vmem:[#allocation118_spill] sm:$0xff] %v8485_v37  ;;  %v8495_v58 = vunpack.c.h.bf16 %v6833_v31  ;;  %v8497_v2 = vunpack.c.l.bf16 %v6834_v55  ;;  %v8499_v19 = vunpack.c.h.bf16 %v6834_v55  ;;  %v8505_v23 = vunpack.c.h.bf16 %v6835_v48  ;;  %v6844_v55 = vld [vmem:[%s7703_s13 + $0x70] sm:$0xff]  }
 0x168   : > { %7192 = vmatprep.subr.bf16.mxu1 %v7191_v40  ;;  %v3266_v62 = vadd.f32 %v3265_v1, %v3264_v63  ;;  %12484 = vst [vmem:[#allocation119_spill] sm:$0xff] %v8487_v28  ;;  %12485 = vst [vmem:[#allocation120_spill] sm:$0xff] %v8489_v46  ;;  %v8503_v63 = vunpack.c.l.bf16 %v6835_v48  ;;  %v8507_v35 = vunpack.c.l.bf16 %v6836_v4  ;;  %v6841_v1 = vld [vmem:[%s7703_s13 + $0x58] sm:$0xff]   ;;  %v809_v48 = vmax.f32 %v8477_v53, %v8479_v54 }
 0x169   : > { %7194 = vmatpush3.bf16.msra.mxu1 %v7191_v40  ;;  %12486 = vst [vmem:[#allocation121_spill] sm:$0xff] %v8493_v50  ;;  %12487 = vst [vmem:[#allocation122_spill] sm:$0xff] %v8495_v58  ;;  %v8509_v40 = vunpack.c.h.bf16 %v6836_v4  ;;  %v816_v4 = vmax.f32 %v8483_v12, %v8485_v37  ;;  %v8561_v44 = vunpack.c.l.bf16 %v6844_v55 }
 0x16a   : > { %v3267_v32 = vrot.slane %v3266_v62, 1  ;;  %12488 = vst [vmem:[#allocation123_spill] sm:$0xff] %v8497_v2  ;;  %12489 = vst [vmem:[#allocation124_spill] sm:$0xff] %v8499_v19 }
 0x16b   : > { %12490 = vst [vmem:[#allocation125_spill] sm:$0xff] %v8503_v63  ;;  %12491 = vst [vmem:[#allocation126_spill] sm:$0xff] %v8505_v23 }
 0x16c   : > { %v3268_v43 = vadd.f32 %v3267_v32, %v3266_v62  ;;  %12492 = vst [vmem:[#allocation127_spill] sm:$0xff] %v8507_v35  ;;  %12493 = vst [vmem:[#allocation128_spill] sm:$0xff] %v8509_v40  ;;  %v6842_v62 = vld [vmem:[%s7703_s13 + $0x60] sm:$0xff]   ;;  %v8513_v32 = vunpack.c.l.bf16 %v6837_v0 }
 0x16d   : > { %v8534_v24 = vunpack.c.l.bf16 %v6842_v62  ;;  %v8536_v20 = vunpack.c.h.bf16 %v6842_v62  ;;  %v810_v62 = vrot.slane %v809_v48, 4  ;;  %12508 = vst [vmem:[#allocation143_spill] sm:$0xff] %v8561_v44 }
 0x16e   : > { %v3317_v39 = vmul.f32 0.0625, %v3268_v43  ;;  %12494 = vst [vmem:[#allocation129_spill] sm:$0xff] %v8513_v32  ;;  %v8515_v43 = vunpack.c.h.bf16 %v6837_v0  ;;  %v823_v0 = vmax.f32 %v8487_v28, %v8489_v46 }
 0x16f   : > { %12504 = vst [vmem:[#allocation139_spill] sm:$0xff] %v8534_v24  ;;  %12505 = vst [vmem:[#allocation140_spill] sm:$0xff] %v8536_v20  ;;  %v811_v21 = vmax.f32 %v809_v48, %v810_v62 }
 0x170   : > { %7074 = vmatprep.subr.msk.mxu1 %vm1747_vm8, %v3317_v39  ;;  %12495 = vst [vmem:[#allocation130_spill] sm:$0xff] %v8515_v43  ;;  %v824_v59 = vrot.slane %v823_v0, 4 }
 0x171   : > { %7075 = vmatpush3.msk.msra.mxu1 %vm1747_vm8, %v3317_v39  ;;  %v8517_v39 = vunpack.c.l.bf16 %v6838_v49  ;;  %v812_v10 = vrot.slane %v811_v21, 2 }
 0x172   : > { %7077 = vmatmul.mubr.msk.f32.vlgmr.msra.gmra.mrb[2].mxu1 %vm3417_vm7, %v8278_v30  ;;  %7195 = vmatprep.subr.bf16.mxu1 %v11793_v36  ;;  %v825_v34 = vmax.f32 %v823_v0, %v824_v59 }
 0x173   : > { %7083 = vmatprep.mubr.msk.f32.mxu1 %vm7478_vm9, %v11791_v33  ;;  %12496 = vst [vmem:[#allocation131_spill] sm:$0xff] %v8517_v39  ;;  %v813_v6 = vmax.f32 %v811_v21, %v812_v10  ;;  %v8570_v10 = vunpack.c.h.bf16 %v6844_v55  ;;  %v893_v21 = vmax.f32 %v8534_v24, %v8536_v20 }
 0x174   : > { %v826_v17 = vrot.slane %v825_v34, 2 }
 0x175   : > { %12509 = vst [vmem:[#allocation144_spill] sm:$0xff] %v8570_v10 }
 0x176   : > { %v827_v62 = vmax.f32 %v825_v34, %v826_v17 }
 0x1d7   : > { %v7061_v42 = vpop.f32.mrb[0].mxu1 }
 0x1d8   : > { %v3492_v45 = vpop.f32.mrb[1].mxu1 }
 0x1d9   : > { %v7196_v30 = vpack.c.bf16 %v7061_v42, %v3492_v45  ;;  %v8519_v42 = vunpack.c.h.bf16 %v6838_v49  ;;  %v6843_v45 = vld [vmem:[%s7703_s13 + $0x68] sm:$0xff]   ;;  %v830_v49 = vmax.f32 %v8493_v50, %v8495_v58 }
 0x1da   : > { %v8538_v7 = vunpack.c.l.bf16 %v6843_v45  ;;  %v8540_v31 = vunpack.c.h.bf16 %v6843_v45  ;;  %v817_v45 = vrot.slane %v816_v4, 4 }
 0x1db   : > { %7198 = vmatpush3.bf16.msk.msra.mxu1 %vm8452_vm12, %v7196_v30  ;;  %12497 = vst [vmem:[#allocation132_spill] sm:$0xff] %v8519_v42  ;;  %v8522_v30 = vunpack.c.l.bf16 %v6839_v18  ;;  %v831_v60 = vrot.slane %v830_v49, 4 }
 0x1dc   : > { %7199 = vmatprep.subr.bf16.mxu1 %v11793_v36  ;;  %12506 = vst [vmem:[#allocation141_spill] sm:$0xff] %v8538_v7  ;;  %12507 = vst [vmem:[#allocation142_spill] sm:$0xff] %v8540_v31  ;;  %v858_v36 = vmax.f32 %v8513_v32, %v8515_v43  ;;  %v818_v56 = vmax.f32 %v816_v4, %v817_v45  ;;  %v6845_v4 = vld [vmem:[%s7703_s13 + $0x78] sm:$0xff]  }
 0x1dd   : > { %12498 = vst [vmem:[#allocation133_spill] sm:$0xff] %v8522_v30  ;;  %v832_v47 = vmax.f32 %v830_v49, %v831_v60  ;;  %v814_v60 = vrot.slane %v813_v6, 1 }
 0x1de   : > { %7084 = vmatmul.mubr.msk.f32.vlgmr.msra.gmra.mrb[4].mxu1 %vm3676_vm13, %v3675_v29  ;;  %v859_v11 = vrot.slane %v858_v36, 4  ;;  %v819_v9 = vrot.slane %v818_v56, 2 }
 0x1df   : > { %7090 = vmatprep.mubr.msk.f32.mxu1 %vm7478_vm9, %v11791_v33  ;;  %v851_v33 = vmax.f32 %v8507_v35, %v8509_v40  ;;  %v8576_v17 = vmax.f32 %v813_v6, %v814_v60 }
 0x1e0   : > { %v860_v15 = vmax.f32 %v858_v36, %v859_v11  ;;  %v820_v14 = vmax.f32 %v818_v56, %v819_v9  ;;  %v8572_v9 = vunpack.c.l.bf16 %v6845_v4  ;;  %v8574_v11 = vunpack.c.h.bf16 %v6845_v4 }
 0x1e1   : > { %v852_v41 = vrot.slane %v851_v33, 4 }
 0x1e2   : > { %v861_v0 = vrot.slane %v860_v15, 2  ;;  %12510 = vst [vmem:[#allocation145_spill] sm:$0xff] %v8572_v9  ;;  %12511 = vst [vmem:[#allocation146_spill] sm:$0xff] %v8574_v11 }
 0x1e3   : > { %v853_v25 = vmax.f32 %v851_v33, %v852_v41  ;;  %v828_v41 = vrot.slane %v827_v62, 1 }
 0x1e5   : > { %v854_v48 = vrot.slane %v853_v25, 2 }
 0x245   : > { %v7078_v22 = vpop.f32.mrb[2].mxu1 }
 0x246   : > { %v3666_v3 = vpop.f32.mrb[3].mxu1 }
 0x247   : > { %v7200_v27 = vpack.c.bf16 %v7078_v22, %v3666_v3  ;;  %v8526_v22 = vunpack.c.l.bf16 %v6840_v51  ;;  %v8528_v3 = vunpack.c.h.bf16 %v6840_v51  ;;  %v844_v51 = vmax.f32 %v8503_v63, %v8505_v23 }
 0x249   : > { %7202 = vmatpush3.bf16.msk.msra.mxu1 %vm8452_vm12, %v7200_v27  ;;  %12500 = vst [vmem:[#allocation135_spill] sm:$0xff] %v8526_v22  ;;  %12501 = vst [vmem:[#allocation136_spill] sm:$0xff] %v8528_v3  ;;  %v8530_v27 = vunpack.c.l.bf16 %v6841_v1  ;;  %v845_v57 = vrot.slane %v844_v51, 4 }
 0x24b   : > { %12502 = vst [vmem:[#allocation137_spill] sm:$0xff] %v8530_v27  ;;  %v846_v26 = vmax.f32 %v844_v51, %v845_v57  ;;  %v8568_v51 = vmax.f32 %v860_v15, %v861_v0 }
 0x24c   : > { %7091 = vmatmul.mubr.msk.f32.vlgmr.msra.gmra.mrb[6].mxu1 %vm3676_vm13, %v3675_v29  ;;  %v8524_v29 = vunpack.c.h.bf16 %v6839_v18  ;;  %v837_v18 = vmax.f32 %v8497_v2, %v8499_v19 }
 0x24d   : > { %7095 = vmatprep.mubr.msk.f32.mxu1 %vm3832_vm14, %v3830_v8  ;;  %v8532_v8 = vunpack.c.h.bf16 %v6841_v1  ;;  %v847_v5 = vrot.slane %v846_v26, 2  ;;  %v863_v6 = vrot.slane %v8568_v51, 1 }
 0x24e   : > { %12499 = vst [vmem:[#allocation134_spill] sm:$0xff] %v8524_v29  ;;  %v838_v38 = vrot.slane %v837_v18, 4  ;;  %v872_v34 = vmax.f32 %v8522_v30, %v8524_v29 }
 0x24f   : > { %12503 = vst [vmem:[#allocation138_spill] sm:$0xff] %v8532_v8  ;;  %v8564_v49 = vmax.f32 %v846_v26, %v847_v5  ;;  %v886_v56 = vmax.f32 %v8530_v27, %v8532_v8 }
 0x250   : > { %v839_v52 = vmax.f32 %v837_v18, %v838_v38  ;;  %v821_v38 = vrot.slane %v820_v14, 1  ;;  %v8566_v18 = vmax.f32 %v853_v25, %v854_v48  ;;  %v873_v55 = vrot.slane %v872_v34, 4 }
 0x251   : > { %v849_v5 = vrot.slane %v8564_v49, 1  ;;  %v907_v48 = vmax.f32 %v8561_v44, %v8570_v10 }
 0x252   : > { %v840_v16 = vrot.slane %v839_v52, 2  ;;  %v856_v25 = vrot.slane %v8566_v18, 1  ;;  %v874_v60 = vmax.f32 %v872_v34, %v873_v55 }
 0x254   : > { %v841_v59 = vmax.f32 %v839_v52, %v840_v16  ;;  %v8578_v16 = vmax.f32 %v820_v14, %v821_v38  ;;  %v8580_v52 = vmax.f32 %v827_v62, %v828_v41  ;;  %v879_v14 = vmax.f32 %v8526_v22, %v8528_v3 }
 0x255   : > { %v887_v62 = vrot.slane %v886_v56, 4  ;;  %v908_v41 = vrot.slane %v907_v48, 4  ;;  %v875_v8 = vrot.slane %v874_v60, 2 }
 0x256   : > { %v842_v33 = vrot.slane %v841_v59, 1  ;;  %v880_v4 = vrot.slane %v879_v14, 4 }
 0x257   : > { %v876_v29 = vmax.f32 %v874_v60, %v875_v8  ;;  %v6847_v60 = vld [vmem:[%s7703_s13 + $0x88] sm:$0xff]  }
 0x258   : > { %v8586_v15 = vmax.f32 %v841_v59, %v842_v33  ;;  %v914_v59 = vmax.f32 %v8572_v9, %v8574_v11  ;;  %v888_v33 = vmax.f32 %v886_v56, %v887_v62 }
 0x259   : > { %v877_v56 = vrot.slane %v876_v29, 1 }
 0x25a   : > { %v915_v20 = vrot.slane %v914_v59, 4  ;;  %v889_v10 = vrot.slane %v888_v33, 2 }
 0x25c   : > { %v916_v3 = vmax.f32 %v914_v59, %v915_v20  ;;  %v890_v34 = vmax.f32 %v888_v33, %v889_v10  ;;  %v12512_v33 = vmov 0.0|0.0  }
 0x25e   : > { %v917_v55 = vrot.slane %v916_v3, 2 }
 0x2b1   : > { %v8555_v1 = vpop.f32.mrb[4].mxu1 }
 0x2b2   : > { %v7085_v13 = vpop.f32.mrb[5].mxu1 }
 0x2b3   : > { %v833_v13 = vrot.slane %v832_v47, 2 }
 0x2b5   : > { %v834_v45 = vmax.f32 %v832_v47, %v833_v13  ;;  %v865_v47 = vmax.f32 %v8517_v39, %v8519_v42  ;;  %v900_v13 = vmax.f32 %v8538_v7, %v8540_v31  ;;  %v909_v7 = vmax.f32 %v907_v48, %v908_v41 }
 0x2b6   : > { %v918_v48 = vmax.f32 %v916_v3, %v917_v55  ;;  %v878_v41 = vmax.f32 %v876_v29, %v877_v56  ;;  %v8640_v56 = vunpack.c.h.bf16 %v6847_v60 }
 0x2b7   : > { %v835_v57 = vrot.slane %v834_v45, 1  ;;  %v866_v36 = vrot.slane %v865_v47, 4  ;;  %v901_v38 = vrot.slane %v900_v13, 4  ;;  %v910_v11 = vrot.slane %v909_v7, 2 }
 0x2b8   : > { %12516 = vst [vmem:[#allocation150_spill] sm:$0xff] %v8640_v56 }
 0x2b9   : > { %v8584_v26 = vmax.f32 %v834_v45, %v835_v57  ;;  %v894_v45 = vrot.slane %v893_v21, 4  ;;  %v867_v0 = vmax.f32 %v865_v47, %v866_v36  ;;  %v881_v57 = vmax.f32 %v879_v14, %v880_v4 }
 0x2ba   : > { %v902_v31 = vmax.f32 %v900_v13, %v901_v38  ;;  %v911_v4 = vmax.f32 %v909_v7, %v910_v11  ;;  %v857_v7 = vmax.f32 %v8566_v18, %v856_v25 }
 0x2bb   : > { %v895_v61 = vmax.f32 %v893_v21, %v894_v45  ;;  %v868_v24 = vrot.slane %v867_v0, 2  ;;  %v882_v27 = vrot.slane %v881_v57, 2  ;;  %v891_v45 = vrot.slane %v890_v34, 1 }
 0x2bc   : > { %v903_v30 = vrot.slane %v902_v31, 2  ;;  %v912_v20 = vrot.slane %v911_v4, 1 }
 0x2bd   : > { %v896_v44 = vrot.slane %v895_v61, 2  ;;  %v869_v22 = vmax.f32 %v867_v0, %v868_v24  ;;  %v883_v47 = vmax.f32 %v881_v57, %v882_v27  ;;  %v892_v8 = vmax.f32 %v890_v34, %v891_v45  ;;  %v6849_v57 = vld [vmem:[%s7703_s13 + $0x98] sm:$0xff]   ;;  %v6851_v34 = vld [vmem:[%s7703_s13 + $0xa8] sm:$0xff]  }
 0x2be   : > { %v904_v21 = vmax.f32 %v902_v31, %v903_v30  ;;  %v919_v0 = vrot.slane %v918_v48, 1  ;;  %v850_v27 = vmax.f32 %v8564_v49, %v849_v5  ;;  %v913_v3 = vmax.f32 %v911_v4, %v912_v20 }
 0x2bf   : > { %v897_v36 = vmax.f32 %v895_v61, %v896_v44  ;;  %v870_v14 = vrot.slane %v869_v22, 1  ;;  %v884_v62 = vrot.slane %v883_v47, 1  ;;  %v1595_v61 = vsel %vm1594_vm0, %v8578_v16, %v8576_v17 }
 0x2c0   : > { %v905_v9 = vrot.slane %v904_v21, 1  ;;  %v1597_v29 = vsel %vm1596_vm1, %v8580_v52, %v1595_v61  ;;  %v864_v31 = vmax.f32 %v8568_v51, %v863_v6  ;;  %v920_v49 = vmax.f32 %v918_v48, %v919_v0  ;;  %v6846_v6 = vld [vmem:[%s7703_s13 + $0x80] sm:$0xff]  }
 0x2c1   : > { %v898_v13 = vrot.slane %v897_v36, 1  ;;  %v871_v38 = vmax.f32 %v869_v22, %v870_v14  ;;  %v885_v24 = vmax.f32 %v883_v47, %v884_v62  ;;  %v1599_v10 = vsel %vm1598_vm2, %v8584_v26, %v1597_v29  ;;  %v6850_v47 = vld [vmem:[%s7703_s13 + $0xa0] sm:$0xff]  }
 0x2c2   : > { %v906_v44 = vmax.f32 %v904_v21, %v905_v9  ;;  %v1601_v18 = vsel %vm1600_vm3, %v8586_v15, %v1599_v10  ;;  %v6848_v15 = vld [vmem:[%s7703_s13 + $0x90] sm:$0xff]   ;;  %v8636_v55 = vunpack.c.h.bf16 %v6846_v6  ;;  %v8638_v14 = vunpack.c.l.bf16 %v6847_v60 }
 0x2c3   : > { %v899_v59 = vmax.f32 %v897_v36, %v898_v13  ;;  %v1608_v30 = vsel %vm1594_vm0, %v878_v41, %v871_v38  ;;  %v1603_v17 = vsel %vm1602_vm4, %v850_v27, %v1601_v18  ;;  %v8634_v36 = vunpack.c.l.bf16 %v6846_v6  ;;  %v6854_v18 = vld [vmem:[%s7703_s13 + $0xc0] sm:$0xff]  }
 0x2c4   : > { %v1609_v22 = vsel %vm1596_vm1, %v885_v24, %v1608_v30  ;;  %v1605_v51 = vsel %vm1604_vm5, %v857_v7, %v1603_v17  ;;  %12514 = vst [vmem:[#allocation148_spill] sm:$0xff] %v8636_v55  ;;  %12515 = vst [vmem:[#allocation149_spill] sm:$0xff] %v8638_v14  ;;  %v8642_v21 = vunpack.c.l.bf16 %v6848_v15  ;;  %v8644_v4 = vunpack.c.h.bf16 %v6848_v15  ;;  %v6852_v24 = vld [vmem:[%s7703_s13 + $0xb0] sm:$0xff]   ;;  %v6853_v30 = vld [vmem:[%s7703_s13 + $0xb8] sm:$0xff]  }
 0x2c5   : > { %v1610_v9 = vsel %vm1598_vm2, %v892_v8, %v1609_v22  ;;  %v1607_v5 = vsel %vm1606_vm6, %v864_v31, %v1605_v51  ;;  %12513 = vst [vmem:[#allocation147_spill] sm:$0xff] %v8634_v36  ;;  %v8646_v62 = vunpack.c.l.bf16 %v6849_v57  ;;  %v8648_v45 = vunpack.c.h.bf16 %v6849_v57  ;;  %v6857_v15 = vld [vmem:[%s7703_s13 + $0xd8] sm:$0xff]  }
 0x2c6   : > { %v1611_v11 = vsel %vm1600_vm3, %v899_v59, %v1610_v9  ;;  %12517 = vst [vmem:[#allocation151_spill] sm:$0xff] %v8642_v21  ;;  %12518 = vst [vmem:[#allocation152_spill] sm:$0xff] %v8644_v4  ;;  %v8650_v13 = vunpack.c.l.bf16 %v6850_v47  ;;  %v8652_v48 = vunpack.c.h.bf16 %v6850_v47  ;;  %v8654_v38 = vunpack.c.l.bf16 %v6851_v34 }
 0x2c7   : > { %v1612_v16 = vsel %vm1602_vm4, %v906_v44, %v1611_v11  ;;  %12519 = vst [vmem:[#allocation153_spill] sm:$0xff] %v8646_v62  ;;  %12520 = vst [vmem:[#allocation154_spill] sm:$0xff] %v8648_v45  ;;  %v8656_v41 = vunpack.c.h.bf16 %v6851_v34  ;;  %v921_v20 = vmax.f32 %v8634_v36, %v8636_v55  ;;  %v928_v8 = vmax.f32 %v8638_v14, %v8640_v56  ;;  %v6855_v11 = vld [vmem:[%s7703_s13 + $0xc8] sm:$0xff]  }
 0x2c8   : > { %v1613_v52 = vsel %vm1604_vm5, %v913_v3, %v1612_v16  ;;  %12521 = vst [vmem:[#allocation155_spill] sm:$0xff] %v8650_v13  ;;  %12522 = vst [vmem:[#allocation156_spill] sm:$0xff] %v8652_v48  ;;  %v935_v59 = vmax.f32 %v8642_v21, %v8644_v4  ;;  %v942_v0 = vmax.f32 %v8646_v62, %v8648_v45  ;;  %v8672_v22 = vunpack.c.l.bf16 %v6852_v24 }
 0x2c9   : > { %v1614_v25 = vsel %vm1606_vm6, %v920_v49, %v1613_v52  ;;  %12523 = vst [vmem:[#allocation157_spill] sm:$0xff] %v8654_v38  ;;  %12524 = vst [vmem:[#allocation158_spill] sm:$0xff] %v8656_v41  ;;  %v922_v27 = vrot.slane %v921_v20, 4  ;;  %v949_v44 = vmax.f32 %v8650_v13, %v8652_v48  ;;  %v956_v61 = vmax.f32 %v8654_v38, %v8656_v41 }
 0x2ca   : > { %v7154_v26 = vpack.c.bf16 %v1614_v25, %v1607_v5  ;;  %v929_v7 = vrot.slane %v928_v8, 4  ;;  %v936_v3 = vrot.slane %v935_v59, 4  ;;  %v943_v29 = vrot.slane %v942_v0, 4  ;;  %12525 = vst [vmem:[#allocation159_spill] sm:$0xff] %v8672_v22  ;;  %v6856_v5 = vld [vmem:[%s7703_s13 + $0xd0] sm:$0xff]  }
 0x2cb   : > { %v923_v31 = vmax.f32 %v921_v20, %v922_v27  ;;  %v950_v49 = vrot.slane %v949_v44, 4  ;;  %v957_v10 = vrot.slane %v956_v61, 4  ;;  %v8674_v9 = vunpack.c.h.bf16 %v6852_v24 }
 0x2cc   : > { %7155 = vmatpush3.bf16.msra.mxu0 %v7154_v26  ;;  %v930_v17 = vmax.f32 %v928_v8, %v929_v7  ;;  %v937_v16 = vmax.f32 %v935_v59, %v936_v3  ;;  %v944_v51 = vmax.f32 %v942_v0, %v943_v29  ;;  %v8678_v52 = vunpack.c.l.bf16 %v6853_v30  ;;  %v6858_v59 = vld [vmem:[%s7703_s13 + $0xe0] sm:$0xff]   ;;  %v6860_v7 = vld [vmem:[%s7703_s13 + $0xf0] sm:$0xff]  }
 0x2cd   : > { %7156 = vmatprep.subr.bf16.mxu0 %v12512_v33  ;;  %12526 = vst [vmem:[#allocation160_spill] sm:$0xff] %v8674_v9  ;;  %v924_v25 = vrot.slane %v923_v31, 2  ;;  %v951_v26 = vmax.f32 %v949_v44, %v950_v49  ;;  %v958_v6 = vmax.f32 %v956_v61, %v957_v10  ;;  %v8681_v60 = vunpack.c.h.bf16 %v6853_v30  ;;  %v6859_v30 = vld [vmem:[%s7703_s13 + $0xe8] sm:$0xff]   ;;  %v6861_v49 = vld [vmem:[%s7703_s13 + $0xf8] sm:$0xff]  }
 0x2ce   : > { %12527 = vst [vmem:[#allocation161_spill] sm:$0xff] %v8678_v52  ;;  %v931_v57 = vrot.slane %v930_v17, 2  ;;  %v938_v47 = vrot.slane %v937_v16, 2  ;;  %v945_v34 = vrot.slane %v944_v51, 2  ;;  %v8684_v20 = vunpack.c.l.bf16 %v6854_v18 }
 0x2cf   : > { %12528 = vst [vmem:[#allocation162_spill] sm:$0xff] %v8681_v60  ;;  %v8686_v24 = vunpack.c.h.bf16 %v6854_v18  ;;  %v8688_v8 = vunpack.c.l.bf16 %v6855_v11  ;;  %v925_v0 = vmax.f32 %v923_v31, %v924_v25  ;;  %v8691_v27 = vunpack.c.h.bf16 %v6855_v11 }
 0x2d0   : > { %12529 = vst [vmem:[#allocation163_spill] sm:$0xff] %v8684_v20  ;;  %v8693_v44 = vunpack.c.l.bf16 %v6856_v5  ;;  %v8695_v61 = vunpack.c.h.bf16 %v6856_v5  ;;  %v952_v3 = vrot.slane %v951_v26, 2  ;;  %v8699_v29 = vunpack.c.l.bf16 %v6857_v15 }
 0x2d1   : > { %12530 = vst [vmem:[#allocation164_spill] sm:$0xff] %v8686_v24  ;;  %12531 = vst [vmem:[#allocation165_spill] sm:$0xff] %v8688_v8  ;;  %v932_v10 = vmax.f32 %v930_v17, %v931_v57  ;;  %v939_v41 = vmax.f32 %v937_v16, %v938_v47  ;;  %v959_v18 = vrot.slane %v958_v6, 2  ;;  %v8702_v38 = vunpack.c.h.bf16 %v6857_v15 }
 0x2d2   : > { %12532 = vst [vmem:[#allocation166_spill] sm:$0xff] %v8691_v27  ;;  %12533 = vst [vmem:[#allocation167_spill] sm:$0xff] %v8693_v44  ;;  %v8704_v48 = vunpack.c.l.bf16 %v6858_v59  ;;  %v8706_v31 = vunpack.c.h.bf16 %v6858_v59  ;;  %v946_v11 = vmax.f32 %v944_v51, %v945_v34  ;;  %v8708_v25 = vunpack.c.l.bf16 %v6859_v30 }
 0x2d3   : > { %12534 = vst [vmem:[#allocation168_spill] sm:$0xff] %v8695_v61  ;;  %12535 = vst [vmem:[#allocation169_spill] sm:$0xff] %v8699_v29  ;;  %v8710_v5 = vunpack.c.h.bf16 %v6859_v30  ;;  %v8712_v13 = vunpack.c.l.bf16 %v6860_v7  ;;  %v926_v45 = vrot.slane %v925_v0, 1  ;;  %v8714_v62 = vunpack.c.h.bf16 %v6860_v7 }
 0x2d4   : > { %12536 = vst [vmem:[#allocation170_spill] sm:$0xff] %v8702_v38  ;;  %12537 = vst [vmem:[#allocation171_spill] sm:$0xff] %v8704_v48  ;;  %v8716_v4 = vunpack.c.l.bf16 %v6861_v49  ;;  %v8718_v17 = vunpack.c.h.bf16 %v6861_v49  ;;  %v953_v16 = vmax.f32 %v951_v26, %v952_v3  ;;  %v933_v15 = vrot.slane %v932_v10, 1 }
 0x2d5   : > { %12538 = vst [vmem:[#allocation172_spill] sm:$0xff] %v8706_v31  ;;  %12539 = vst [vmem:[#allocation173_spill] sm:$0xff] %v8708_v25  ;;  %v940_v57 = vrot.slane %v939_v41, 1  ;;  %v8720_v47 = vmax.f32 %v958_v6, %v959_v18  ;;  %v963_v51 = vmax.f32 %v8672_v22, %v8674_v9  ;;  %v947_v34 = vrot.slane %v946_v11, 1 }
 0x2d6   : > { %12540 = vst [vmem:[#allocation174_spill] sm:$0xff] %v8710_v5  ;;  %12541 = vst [vmem:[#allocation175_spill] sm:$0xff] %v8712_v13  ;;  %v970_v59 = vmax.f32 %v8678_v52, %v8681_v60  ;;  %v977_v30 = vmax.f32 %v8684_v20, %v8686_v24  ;;  %v984_v7 = vmax.f32 %v8688_v8, %v8691_v27  ;;  %v954_v3 = vrot.slane %v953_v16, 1 }
 0x2d7   : > { %12542 = vst [vmem:[#allocation176_spill] sm:$0xff] %v8714_v62  ;;  %12543 = vst [vmem:[#allocation177_spill] sm:$0xff] %v8716_v4  ;;  %v927_v49 = vmax.f32 %v925_v0, %v926_v45  ;;  %v964_v21 = vrot.slane %v963_v51, 4  ;;  %v991_v26 = vmax.f32 %v8693_v44, %v8695_v61  ;;  %v998_v6 = vmax.f32 %v8699_v29, %v8702_v38 }
 0x2d8   : > { %12544 = vst [vmem:[#allocation178_spill] sm:$0xff] %v8718_v17  ;;  %v971_v18 = vrot.slane %v970_v59, 4  ;;  %v978_v9 = vrot.slane %v977_v30, 4  ;;  %v985_v22 = vrot.slane %v984_v7, 4  ;;  %v1005_v24 = vmax.f32 %v8704_v48, %v8706_v31 }
 0x2d9   : > { %v965_v56 = vmax.f32 %v963_v51, %v964_v21  ;;  %v992_v60 = vrot.slane %v991_v26, 4  ;;  %v999_v52 = vrot.slane %v998_v6, 4  ;;  %v961_v27 = vrot.slane %v8720_v47, 1 }
 0x2da   : > { %v979_v45 = vmax.f32 %v977_v30, %v978_v9  ;;  %v986_v0 = vmax.f32 %v984_v7, %v985_v22  ;;  %v1012_v61 = vmax.f32 %v8708_v25, %v8710_v5  ;;  %v972_v44 = vmax.f32 %v970_v59, %v971_v18 }
 0x2db   : > { %v993_v8 = vmax.f32 %v991_v26, %v992_v60  ;;  %v1000_v38 = vmax.f32 %v998_v6, %v999_v52  ;;  %v1006_v29 = vrot.slane %v1005_v24, 4  ;;  %v934_v20 = vmax.f32 %v932_v10, %v933_v15 }
 0x2dc   : > { %v980_v14 = vrot.slane %v979_v45, 2  ;;  %v987_v55 = vrot.slane %v986_v0, 2  ;;  %v1013_v21 = vrot.slane %v1012_v61, 4  ;;  %v966_v51 = vrot.slane %v965_v56, 2 }
 0x2dd   : > { %v994_v36 = vrot.slane %v993_v8, 2  ;;  %v1001_v42 = vrot.slane %v1000_v38, 2  ;;  %v1007_v39 = vmax.f32 %v1005_v24, %v1006_v29  ;;  %v941_v31 = vmax.f32 %v939_v41, %v940_v57 }
 0x2de   : > { %v981_v48 = vmax.f32 %v979_v45, %v980_v14  ;;  %v988_v43 = vmax.f32 %v986_v0, %v987_v55  ;;  %v1014_v9 = vmax.f32 %v1012_v61, %v1013_v21  ;;  %v973_v22 = vrot.slane %v972_v44, 2 }
 0x2df   : > { %v995_v30 = vmax.f32 %v993_v8, %v994_v36  ;;  %v1002_v7 = vmax.f32 %v1000_v38, %v1001_v42  ;;  %v1008_v5 = vrot.slane %v1007_v39, 2  ;;  %v948_v59 = vmax.f32 %v946_v11, %v947_v34 }
 0x2e0   : > { %v982_v60 = vrot.slane %v981_v48, 1  ;;  %v989_v52 = vrot.slane %v988_v43, 1  ;;  %v1015_v26 = vrot.slane %v1014_v9, 2  ;;  %v967_v10 = vmax.f32 %v965_v56, %v966_v51 }
 0x2e1   : > { %v996_v15 = vrot.slane %v995_v30, 1  ;;  %v1003_v6 = vrot.slane %v1002_v7, 1  ;;  %v1009_v18 = vmax.f32 %v1007_v39, %v1008_v5  ;;  %v955_v25 = vmax.f32 %v953_v16, %v954_v3 }
 0x2e2   : > { %v983_v32 = vmax.f32 %v981_v48, %v982_v60  ;;  %v990_v40 = vmax.f32 %v988_v43, %v989_v52  ;;  %v1016_v24 = vmax.f32 %v1014_v9, %v1015_v26  ;;  %v974_v41 = vmax.f32 %v972_v44, %v973_v22  ;;  %v6863_v26 = vld [vmem:[%s7703_s13 + $0x108] sm:$0xff]  }
 0x2e3   : > { %v997_v14 = vmax.f32 %v995_v30, %v996_v15  ;;  %v1010_v55 = vrot.slane %v1009_v18, 1  ;;  %v1019_v36 = vmax.f32 %v8712_v13, %v8714_v62  ;;  %v1004_v42 = vmax.f32 %v1002_v7, %v1003_v6  ;;  %v6864_v15 = vld [vmem:[%s7703_s13 + $0x110] sm:$0xff]   ;;  %v6865_v6 = vld [vmem:[%s7703_s13 + $0x118] sm:$0xff]  }
 0x2e4   : > { %v1026_v38 = vmax.f32 %v8716_v4, %v8718_v17  ;;  %v1615_v8 = vsel %vm1594_vm0, %v934_v20, %v927_v49  ;;  %v1622_v56 = vsel %vm1594_vm0, %v990_v40, %v983_v32  ;;  %v968_v61 = vrot.slane %v967_v10, 1 }
 0x2e5   : > { %v1020_v39 = vrot.slane %v1019_v36, 4  ;;  %v1616_v48 = vsel %vm1596_vm1, %v941_v31, %v1615_v8  ;;  %v1623_v43 = vsel %vm1596_vm1, %v997_v14, %v1622_v56  ;;  %v962_v44 = vmax.f32 %v8720_v47, %v961_v27  ;;  %v6867_v14 = vld [vmem:[%s7703_s13 + $0x128] sm:$0xff]  }
 0x2e6   : > { %v1017_v29 = vrot.slane %v1016_v24, 1  ;;  %v1027_v11 = vrot.slane %v1026_v38, 4  ;;  %v1617_v5 = vsel %vm1598_vm2, %v948_v59, %v1616_v48  ;;  %v1011_v16 = vmax.f32 %v1009_v18, %v1010_v55  ;;  %v6862_v59 = vld [vmem:[%s7703_s13 + $0x100] sm:$0xff]   ;;  %v6868_v48 = vld [vmem:[%s7703_s13 + $0x130] sm:$0xff]  }
 0x2e7   : > { %v1021_v57 = vmax.f32 %v1019_v36, %v1020_v39  ;;  %v1618_v34 = vsel %vm1600_vm3, %v955_v25, %v1617_v5  ;;  %v975_v3 = vrot.slane %v974_v41, 1  ;;  %v1624_v40 = vsel %vm1598_vm2, %v1004_v42, %v1623_v43  ;;  %v6869_v5 = vld [vmem:[%s7703_s13 + $0x138] sm:$0xff]  }
 0x2e8   : > { %v1028_v20 = vmax.f32 %v1026_v38, %v1027_v11  ;;  %v969_v32 = vmax.f32 %v967_v10, %v968_v61  ;;  %v1018_v31 = vmax.f32 %v1016_v24, %v1017_v29  ;;  %v1619_v27 = vsel %vm1602_vm4, %v962_v44, %v1618_v34 }
 0x2e9   : > { %v1022_v49 = vrot.slane %v1021_v57, 2  ;;  %v1625_v0 = vsel %vm1600_vm3, %v1011_v16, %v1624_v40  ;;  %v976_v21 = vmax.f32 %v974_v41, %v975_v3  ;;  %v8762_v24 = vunpack.c.l.bf16 %v6862_v59  ;;  %v6866_v41 = vld [vmem:[%s7703_s13 + $0x120] sm:$0xff]  }
 0x2ea   : > { %v1029_v45 = vrot.slane %v1028_v20, 2  ;;  %v1620_v9 = vsel %vm1604_vm5, %v969_v32, %v1619_v27  ;;  %v1626_v30 = vsel %vm1602_vm4, %v1018_v31, %v1625_v0  ;;  %v8766_v36 = vunpack.c.h.bf16 %v6862_v59  ;;  %v6870_v3 = vld [vmem:[%s7703_s13 + $0x140] sm:$0xff]   ;;  %v6871_v0 = vld [vmem:[%s7703_s13 + $0x148] sm:$0xff]  }
 0x2eb   : > { %v1023_v47 = vmax.f32 %v1021_v57, %v1022_v49  ;;  %v1621_v52 = vsel %vm1606_vm6, %v976_v21, %v1620_v9  ;;  %12545 = vst [vmem:[#allocation179_spill] sm:$0xff] %v8762_v24  ;;  %v8768_v42 = vunpack.c.l.bf16 %v6863_v26  ;;  %v8770_v38 = vunpack.c.h.bf16 %v6863_v26 }
 0x2ec   : > { %v1030_v25 = vmax.f32 %v1028_v20, %v1029_v45  ;;  %12546 = vst [vmem:[#allocation180_spill] sm:$0xff] %v8766_v36  ;;  %v8772_v8 = vunpack.c.l.bf16 %v6864_v15  ;;  %v8774_v56 = vunpack.c.h.bf16 %v6864_v15  ;;  %v8776_v61 = vunpack.c.l.bf16 %v6865_v6 }
 0x2ed   : > { %v1024_v51 = vrot.slane %v1023_v47, 1  ;;  %12547 = vst [vmem:[#allocation181_spill] sm:$0xff] %v8768_v42  ;;  %12548 = vst [vmem:[#allocation182_spill] sm:$0xff] %v8770_v38  ;;  %v8778_v39 = vunpack.c.h.bf16 %v6865_v6  ;;  %v8781_v43 = vunpack.c.l.bf16 %v6866_v41  ;;  %v8783_v44 = vunpack.c.h.bf16 %v6866_v41 }
 0x2ee   : > { %v1031_v22 = vrot.slane %v1030_v25, 1  ;;  %12549 = vst [vmem:[#allocation183_spill] sm:$0xff] %v8772_v8  ;;  %12550 = vst [vmem:[#allocation184_spill] sm:$0xff] %v8774_v56  ;;  %v8785_v29 = vunpack.c.l.bf16 %v6867_v14  ;;  %v8787_v11 = vunpack.c.h.bf16 %v6867_v14  ;;  %v8792_v57 = vunpack.c.l.bf16 %v6868_v48 }
 0x2ef   : > { %v1025_v7 = vmax.f32 %v1023_v47, %v1024_v51  ;;  %12551 = vst [vmem:[#allocation185_spill] sm:$0xff] %v8776_v61  ;;  %12552 = vst [vmem:[#allocation186_spill] sm:$0xff] %v8778_v39  ;;  %v8794_v34 = vunpack.c.h.bf16 %v6868_v48  ;;  %v1033_v20 = vmax.f32 %v8762_v24, %v8766_v36  ;;  %v1040_v40 = vmax.f32 %v8768_v42, %v8770_v38 }
 0x2f0   : > { %v1032_v60 = vmax.f32 %v1030_v25, %v1031_v22  ;;  %12553 = vst [vmem:[#allocation187_spill] sm:$0xff] %v8781_v43  ;;  %12554 = vst [vmem:[#allocation188_spill] sm:$0xff] %v8783_v44  ;;  %v1047_v32 = vmax.f32 %v8772_v8, %v8774_v56  ;;  %v8803_v49 = vunpack.c.l.bf16 %v6869_v5  ;;  %v1054_v31 = vmax.f32 %v8776_v61, %v8778_v39 }
 0x2f1   : > { %v1627_v10 = vsel %vm1604_vm5, %v1025_v7, %v1626_v30  ;;  %12555 = vst [vmem:[#allocation189_spill] sm:$0xff] %v8785_v29  ;;  %12556 = vst [vmem:[#allocation190_spill] sm:$0xff] %v8787_v11  ;;  %v1061_v45 = vmax.f32 %v8781_v43, %v8783_v44  ;;  %v1068_v27 = vmax.f32 %v8785_v29, %v8787_v11  ;;  %v8811_v47 = vunpack.c.h.bf16 %v6869_v5  ;;  %v6874_v11 = vld [vmem:[%s7703_s13 + $0x160] sm:$0xff]   ;;  %v6875_v29 = vld [vmem:[%s7703_s13 + $0x168] sm:$0xff]  }
 0x2f2   : > { %v1628_v18 = vsel %vm1606_vm6, %v1032_v60, %v1627_v10  ;;  %12557 = vst [vmem:[#allocation191_spill] sm:$0xff] %v8792_v57  ;;  %12558 = vst [vmem:[#allocation192_spill] sm:$0xff] %v8794_v34  ;;  %v1034_v21 = vrot.slane %v1033_v20, 4  ;;  %v1041_v25 = vrot.slane %v1040_v40, 4  ;;  %v1048_v51 = vrot.slane %v1047_v32, 4  ;;  %v6872_v60 = vld [vmem:[%s7703_s13 + $0x150] sm:$0xff]  }
 0x2f3   : > { %v7157_v55 = vpack.c.bf16 %v1628_v18, %v1621_v52  ;;  %12559 = vst [vmem:[#allocation193_spill] sm:$0xff] %v8803_v49  ;;  %12560 = vst [vmem:[#allocation194_spill] sm:$0xff] %v8811_v47  ;;  %v8814_v9 = vunpack.c.l.bf16 %v6870_v3  ;;  %v1055_v22 = vrot.slane %v1054_v31, 4  ;;  %v1062_v30 = vrot.slane %v1061_v45, 4 }
 0x2f4   : > { %v1069_v7 = vrot.slane %v1068_v27, 4  ;;  %v8816_v59 = vunpack.c.h.bf16 %v6870_v3  ;;  %v1035_v52 = vmax.f32 %v1033_v20, %v1034_v21  ;;  %v1042_v26 = vmax.f32 %v1040_v40, %v1041_v25  ;;  %v6876_v25 = vld [vmem:[%s7703_s13 + $0x170] sm:$0xff]  }
 0x2f5   : > { %7158 = vmatpush3.bf16.msra.mxu0 %v7157_v55  ;;  %12561 = vst [vmem:[#allocation195_spill] sm:$0xff] %v8814_v9  ;;  %v1049_v10 = vmax.f32 %v1047_v32, %v1048_v51  ;;  %v8819_v15 = vunpack.c.l.bf16 %v6871_v0  ;;  %v1056_v6 = vmax.f32 %v1054_v31, %v1055_v22  ;;  %v1063_v18 = vmax.f32 %v1061_v45, %v1062_v30  ;;  %v6873_v55 = vld [vmem:[%s7703_s13 + $0x158] sm:$0xff]  }
 0x2f6   : > { %7159 = vmatprep.subr.bf16.mxu0 %v12512_v33  ;;  %12562 = vst [vmem:[#allocation196_spill] sm:$0xff] %v8816_v59  ;;  %v1070_v41 = vmax.f32 %v1068_v27, %v1069_v7  ;;  %v8821_v14 = vunpack.c.h.bf16 %v6871_v0  ;;  %v1036_v48 = vrot.slane %v1035_v52, 2  ;;  %v1043_v5 = vrot.slane %v1042_v26, 2  ;;  %v6877_v31 = vld [vmem:[%s7703_s13 + $0x178] sm:$0xff]  }
 0x2f7   : > { %12563 = vst [vmem:[#allocation197_spill] sm:$0xff] %v8819_v15  ;;  %v1050_v16 = vrot.slane %v1049_v10, 2  ;;  %v8824_v3 = vunpack.c.l.bf16 %v6872_v60  ;;  %v1057_v20 = vrot.slane %v1056_v6, 2  ;;  %v1064_v40 = vrot.slane %v1063_v18, 2 }
 0x2f8   : > { %12564 = vst [vmem:[#allocation198_spill] sm:$0xff] %v8821_v14  ;;  %v1071_v32 = vrot.slane %v1070_v41, 2  ;;  %v8828_v21 = vunpack.c.h.bf16 %v6872_v60  ;;  %v1037_v51 = vmax.f32 %v1035_v52, %v1036_v48  ;;  %v1044_v45 = vmax.f32 %v1042_v26, %v1043_v5 }
 0x2f9   : > { %12565 = vst [vmem:[#allocation199_spill] sm:$0xff] %v8824_v3  ;;  %v1051_v27 = vmax.f32 %v1049_v10, %v1050_v16  ;;  %v8832_v0 = vunpack.c.l.bf16 %v6873_v55  ;;  %v8834_v22 = vmax.f32 %v1056_v6, %v1057_v20  ;;  %v8836_v30 = vmax.f32 %v1063_v18, %v1064_v40 }
 0x2fa   : > { %12566 = vst [vmem:[#allocation200_spill] sm:$0xff] %v8828_v21  ;;  %v8838_v7 = vmax.f32 %v1070_v41, %v1071_v32  ;;  %v8840_v44 = vunpack.c.h.bf16 %v6873_v55  ;;  %v8842_v43 = vunpack.c.l.bf16 %v6874_v11  ;;  %v8844_v39 = vunpack.c.h.bf16 %v6874_v11 }
 0x2fb   : > { %12567 = vst [vmem:[#allocation201_spill] sm:$0xff] %v8832_v0  ;;  %v8846_v60 = vunpack.c.l.bf16 %v6875_v29  ;;  %v8848_v61 = vunpack.c.h.bf16 %v6875_v29  ;;  %v8850_v52 = vunpack.c.l.bf16 %v6876_v25  ;;  %v8852_v16 = vunpack.c.h.bf16 %v6876_v25 }
 0x2fc   : > { %12568 = vst [vmem:[#allocation202_spill] sm:$0xff] %v8840_v44  ;;  %12569 = vst [vmem:[#allocation203_spill] sm:$0xff] %v8842_v43  ;;  %v8854_v26 = vunpack.c.l.bf16 %v6877_v31  ;;  %v8856_v10 = vunpack.c.h.bf16 %v6877_v31  ;;  %v1038_v6 = vrot.slane %v1037_v51, 1  ;;  %v1045_v18 = vrot.slane %v1044_v45, 1 }
 0x2fd   : > { %12570 = vst [vmem:[#allocation204_spill] sm:$0xff] %v8844_v39  ;;  %12571 = vst [vmem:[#allocation205_spill] sm:$0xff] %v8846_v60  ;;  %v1052_v41 = vrot.slane %v1051_v27, 1  ;;  %v1059_v55 = vrot.slane %v8834_v22, 1  ;;  %v1066_v11 = vrot.slane %v8836_v30, 1  ;;  %v1075_v29 = vmax.f32 %v8792_v57, %v8794_v34 }
 0x2fe   : > { %12572 = vst [vmem:[#allocation206_spill] sm:$0xff] %v8848_v61  ;;  %12573 = vst [vmem:[#allocation207_spill] sm:$0xff] %v8850_v52  ;;  %v1082_v5 = vmax.f32 %v8803_v49, %v8811_v47  ;;  %v1089_v20 = vmax.f32 %v8814_v9, %v8816_v59  ;;  %v1096_v40 = vmax.f32 %v8819_v15, %v8821_v14 }
 0x2ff   : > { %12574 = vst [vmem:[#allocation208_spill] sm:$0xff] %v8852_v16  ;;  %12575 = vst [vmem:[#allocation209_spill] sm:$0xff] %v8854_v26  ;;  %v1103_v32 = vmax.f32 %v8824_v3, %v8828_v21  ;;  %v1076_v25 = vrot.slane %v1075_v29, 4  ;;  %v1110_v31 = vmax.f32 %v8832_v0, %v8840_v44  ;;  %v1117_v48 = vmax.f32 %v8842_v43, %v8844_v39 }
 0x300   : > { %12576 = vst [vmem:[#allocation210_spill] sm:$0xff] %v8856_v10  ;;  %v1124_v34 = vmax.f32 %v8846_v60, %v8848_v61  ;;  %v1083_v47 = vrot.slane %v1082_v5, 4  ;;  %v1090_v49 = vrot.slane %v1089_v20, 4  ;;  %v1097_v57 = vrot.slane %v1096_v40, 4 }
 0x301   : > { %v1104_v59 = vrot.slane %v1103_v32, 4  ;;  %v1077_v9 = vmax.f32 %v1075_v29, %v1076_v25  ;;  %v1111_v56 = vrot.slane %v1110_v31, 4  ;;  %v1118_v14 = vrot.slane %v1117_v48, 4 }
 0x302   : > { %v1125_v15 = vrot.slane %v1124_v34, 4  ;;  %v1039_v8 = vmax.f32 %v1037_v51, %v1038_v6  ;;  %v1091_v21 = vmax.f32 %v1089_v20, %v1090_v49  ;;  %v1098_v3 = vmax.f32 %v1096_v40, %v1097_v57 }
 0x303   : > { %v1105_v38 = vmax.f32 %v1103_v32, %v1104_v59  ;;  %v1046_v42 = vmax.f32 %v1044_v45, %v1045_v18  ;;  %v1084_v44 = vmax.f32 %v1082_v5, %v1083_v47  ;;  %v1112_v0 = vmax.f32 %v1110_v31, %v1111_v56  ;;  %v3831_v45 = vld [vmem:[%s11607_s6 + $0x8] sm:$0x3f] }
 0x304   : > { %v1119_v36 = vmax.f32 %v1117_v48, %v1118_v14  ;;  %v1078_v43 = vrot.slane %v1077_v9, 2  ;;  %v1092_v24 = vrot.slane %v1091_v21, 2  ;;  %v1099_v61 = vrot.slane %v1098_v3, 2 }
 0x305   : > { %v1106_v60 = vrot.slane %v1105_v38, 2  ;;  %v1113_v62 = vrot.slane %v1112_v0, 2  ;;  %v1126_v25 = vmax.f32 %v1124_v34, %v1125_v15  ;;  %v1053_v13 = vmax.f32 %v1051_v27, %v1052_v41 }
 0x306   : > { %v1120_v29 = vrot.slane %v1119_v36, 2  ;;  %v1093_v35 = vmax.f32 %v1091_v21, %v1092_v24  ;;  %v1100_v51 = vmax.f32 %v1098_v3, %v1099_v61  ;;  %v12577_v57 = vmax.f32 %v8555_v1, 0.0 }
 0x307   : > { %v1107_v49 = vmax.f32 %v1105_v38, %v1106_v60  ;;  %v1085_v47 = vrot.slane %v1084_v44, 2  ;;  %v1114_v56 = vmax.f32 %v1112_v0, %v1113_v62  ;;  %v1079_v6 = vmax.f32 %v1077_v9, %v1078_v43 }
 0x308   : > { %v1121_v14 = vmax.f32 %v1119_v36, %v1120_v29  ;;  %v1060_v34 = vmax.f32 %v8834_v22, %v1059_v55  ;;  %v1067_v24 = vmax.f32 %v8836_v30, %v1066_v11  ;;  %v1127_v61 = vrot.slane %v1126_v25, 2 }
 0x309   : > { %v1108_v18 = vrot.slane %v1107_v49, 1  ;;  %v1115_v38 = vrot.slane %v1114_v56, 1  ;;  %v1086_v15 = vmax.f32 %v1084_v44, %v1085_v47  ;;  %v1131_v9 = vmax.f32 %v8850_v52, %v8852_v16 }
 0x30a   : > { %v1122_v36 = vrot.slane %v1121_v14, 1  ;;  %v1128_v43 = vmax.f32 %v1126_v25, %v1127_v61  ;;  %v1080_v21 = vrot.slane %v1079_v6, 1  ;;  %v1138_v27 = vmax.f32 %v8854_v26, %v8856_v10 }
 0x30b   : > { %v1109_v62 = vmax.f32 %v1107_v49, %v1108_v18  ;;  %v1116_v3 = vmax.f32 %v1114_v56, %v1115_v38  ;;  %v1629_v0 = vsel %vm1594_vm0, %v1046_v42, %v1039_v8  ;;  %v12578_v22 = vrot.slane %v8838_v7, 1  ;;  %v6878_v8 = vld [vmem:[%s7703_s13 + $0x180] sm:$0xff]   ;;  %s7404_s13 = sshll.u32 %s7482_s3, 4  ;;  %s7405_s13 = int_to_ptr.vmem [resolvable:$false] %s7404_s13 }
 0x30c   : > { %v1132_v30 = vrot.slane %v1131_v9, 4  ;;  %v1630_v60 = vsel %vm1596_vm1, %v1053_v13, %v1629_v0  ;;  %v12579_v55 = vmov 0.0   ;;  %v1123_v11 = vmax.f32 %v1121_v14, %v1122_v36  ;;  %s7406_s26 = scalar_lea.vmem %s7405_s13, 3072  ;;  %p7407_p5 = scmp.lt.s32.totalorder %s11556_s20, %s7405_s13 }
 0x30d   : > { %v1074_v44 = vmax.f32 %v8838_v7, %v12578_v22  ;;  %v1129_v48 = vrot.slane %v1128_v43, 1  ;;  %v1139_v5 = vrot.slane %v1138_v27, 4  ;;  %v1631_v42 = vsel %vm1598_vm2, %v1060_v34, %v1630_v60  ;;  %p7408_p7 = scmp.lt.s32.totalorder %s7406_s26, %s7400_s11 }
 0x30e   : > { %v1133_v20 = vmax.f32 %v1131_v9, %v1132_v30  ;;  %v1632_v40 = vsel %vm1600_vm3, %v1067_v24, %v1631_v42  ;;  %v1081_v7 = vmax.f32 %v1079_v6, %v1080_v21  ;;  %v1087_v31 = vrot.slane %v1086_v15, 1 }
 0x30f   : > { %v1140_v29 = vmax.f32 %v1138_v27, %v1139_v5  ;;  %v1633_v25 = vsel %vm1602_vm4, %v1074_v44, %v1632_v40  ;;  %v1130_v49 = vmax.f32 %v1128_v43, %v1129_v48  ;;  %v8907_v56 = vunpack.c.h.bf16 %v6878_v8  ;;  %p7409_p10 = por %p7408_p7, %p7407_p5 }
 0x310   : > { %v1134_v13 = vrot.slane %v1133_v20, 2  ;;  %v1152_v14 = vadd.f32 %v8479_v54, %v8477_v53  ;;  %v1088_v6 = vmax.f32 %v1086_v15, %v1087_v31  ;;  %v1166_v18 = vadd.f32 %v8489_v46, %v8487_v28 }
 0x311   : > { %12581 = vst [vmem:[#allocation212_spill] sm:$0xff] %v8907_v56  ;;  %p7410_p11 = pnand %p7409_p10, %p7403_p9 }
 0x312   : > { %v1135_v47 = vmax.f32 %v1133_v20, %v1134_v13  ;;  %v1153_v38 = vrot.slane %v1152_v14, 4 }
 0x314   : > { %v1136_v34 = vrot.slane %v1135_v47, 1  ;;  %v1154_v43 = vadd.f32 %v1153_v38, %v1152_v14 }
 0x316   : > { %v1137_v36 = vmax.f32 %v1135_v47, %v1136_v34  ;;  %v1155_v22 = vrot.slane %v1154_v43, 2  ;;  %v1187_v47 = vadd.f32 %v8505_v23, %v8503_v63  ;;  %v12585_v34 = vld [vmem:[#allocation130_spill] sm:$0xff] }
 0x318   : > { %v1156_v48 = vadd.f32 %v1155_v22, %v1154_v43 }
 0x31a   : > { %v1157_v40 = vrot.slane %v1156_v48, 1 }
 0x31f   : > { %v3824_v39 = vpop.f32.mrb[6].mxu1 }
 0x320   : > { %v3828_v17 = vmax.f32 %v3824_v39, 0.0  ;;  %v7092_v4 = vpop.f32.mrb[7].mxu1  ;;  %v1094_v39 = vrot.slane %v1093_v35, 1 }
 0x321   : > { %v1101_v4 = vrot.slane %v1100_v51, 1 }
 0x322   : > { %v3829_v59 = vadd.f32 %v3828_v17, %v12577_v57  ;;  %v1095_v1 = vmax.f32 %v1093_v35, %v1094_v39  ;;  %v1141_v57 = vrot.slane %v1140_v29, 2 }
 0x323   : > { %v1102_v17 = vmax.f32 %v1100_v51, %v1101_v4  ;;  %v8904_v51 = vunpack.c.l.bf16 %v6878_v8  ;;  %v1634_v4 = vsel %vm1604_vm5, %v1081_v7, %v1633_v25  ;;  %v1173_v8 = vadd.f32 %v8495_v58, %v8493_v50 }
 0x324   : > { %7093 = vmatprep.subr.mxu1 %v3829_v59  ;;  %v1142_v39 = vmax.f32 %v1140_v29, %v1141_v57  ;;  %v1635_v21 = vsel %vm1606_vm6, %v1088_v6, %v1634_v4  ;;  %v1180_v7 = vadd.f32 %v8499_v19, %v8497_v2  ;;  %v12582_v6 = vld [vmem:[#allocation127_spill] sm:$0xff] }
 0x325   : > { %7094 = vmatpush3.msra.mxu1 %v3829_v59  ;;  %v1636_v35 = vsel %vm1594_vm0, %v1102_v17, %v1095_v1  ;;  %12580 = vst [vmem:[#allocation211_spill] sm:$0xff] %v8904_v51  ;;  %v1145_v24 = vmax.f32 %v8904_v51, %v8907_v56  ;;  %v1174_v29 = vrot.slane %v1173_v8, 4 }
 0x326   : > { %7096 = vmatmul.mubr.msk.f32.vlgmr.msra.gmra.mrb[8].mxu1 %vm3832_vm14, %v3831_v45  ;;  %7203 = vmatprep.subr.bf16.mxu1 %v12512_v33  ;;  %v1637_v41 = vsel %vm1596_vm1, %v1109_v62, %v1636_v35  ;;  %v1159_v45 = vadd.f32 %v8485_v37, %v8483_v12  ;;  %v1143_v1 = vrot.slane %v1142_v39, 1  ;;  %v1167_v62 = vrot.slane %v1166_v18, 4 }
 0x327   : > { %7102 = vmatprep.mubr.msk.f32.mxu1 %vm7478_vm9, %v12579_v55  ;;  %v1638_v32 = vsel %vm1598_vm2, %v1116_v3, %v1637_v41  ;;  %v1146_v3 = vrot.slane %v1145_v24, 4  ;;  %v1181_v25 = vrot.slane %v1180_v7, 4 }
 0x328   : > { %v1639_v59 = vsel %vm1600_vm3, %v1123_v11, %v1638_v32  ;;  %v1160_v61 = vrot.slane %v1159_v45, 4  ;;  %v1144_v9 = vmax.f32 %v1142_v39, %v1143_v1  ;;  %v1168_v27 = vadd.f32 %v1167_v62, %v1166_v18  ;;  %v12583_v39 = vld [vmem:[#allocation128_spill] sm:$0xff]  ;;  %v12584_v18 = vld [vmem:[#allocation129_spill] sm:$0xff] }
 0x329   : > { %v1640_v17 = vsel %vm1602_vm4, %v1130_v49, %v1639_v59  ;;  %v1147_v35 = vmax.f32 %v1145_v24, %v1146_v3  ;;  %v8927_v49 = vadd.f32 %v1157_v40, %v1156_v48  ;;  %v1175_v59 = vadd.f32 %v1174_v29, %v1173_v8  ;;  %v12587_v62 = vld [vmem:[#allocation132_spill] sm:$0xff] }
 0x32a   : > { %v1161_v15 = vadd.f32 %v1160_v61, %v1159_v45  ;;  %v1641_v0 = vsel %vm1604_vm5, %v1137_v36, %v1640_v17  ;;  %v1169_v60 = vrot.slane %v1168_v27, 2  ;;  %v1182_v45 = vadd.f32 %v1181_v25, %v1180_v7  ;;  %v12586_v17 = vld [vmem:[#allocation131_spill] sm:$0xff] }
 0x32b   : > { %v1642_v30 = vsel %vm1606_vm6, %v1144_v9, %v1641_v0  ;;  %v1148_v11 = vrot.slane %v1147_v35, 2  ;;  %v1194_v4 = vadd.f32 %v12583_v39, %v12582_v6  ;;  %v1201_v24 = vadd.f32 %v12585_v34, %v12584_v18  ;;  %v12588_v9 = vld [vmem:[#allocation133_spill] sm:$0xff] }
 0x32c   : > { %v1162_v44 = vrot.slane %v1161_v15, 2  ;;  %v7160_v41 = vpack.c.bf16 %v1642_v30, %v1635_v21  ;;  %v1170_v42 = vadd.f32 %v1169_v60, %v1168_v27  ;;  %v1176_v61 = vrot.slane %v1175_v59, 2  ;;  %v12589_v21 = vld [vmem:[#allocation134_spill] sm:$0xff]  ;;  %v12591_v30 = vld [vmem:[#allocation136_spill] sm:$0xff] }
 0x32d   : > { %v1149_v20 = vmax.f32 %v1147_v35, %v1148_v11  ;;  %v1188_v1 = vrot.slane %v1187_v47, 4  ;;  %v1208_v36 = vadd.f32 %v12587_v62, %v12586_v17  ;;  %v1183_v3 = vrot.slane %v1182_v45, 2  ;;  %v12595_v62 = vld [vmem:[#allocation140_spill] sm:$0xff] }
 0x32e   : > { %v1163_v5 = vadd.f32 %v1162_v44, %v1161_v15  ;;  %7161 = vmatpush3.bf16.msra.mxu0 %v7160_v41  ;;  %v1171_v31 = vrot.slane %v1170_v42, 1  ;;  %v1195_v43 = vrot.slane %v1194_v4, 4  ;;  %v1202_v15 = vrot.slane %v1201_v24, 4  ;;  %v12590_v44 = vld [vmem:[#allocation135_spill] sm:$0xff] }
 0x32f   : > { %7162 = vmatprep.subr.bf16.mxu0 %v12512_v33  ;;  %v1150_v13 = vrot.slane %v1149_v20, 1  ;;  %v1215_v27 = vadd.f32 %v12589_v21, %v12588_v9  ;;  %v1177_v0 = vadd.f32 %v1176_v61, %v1175_v59  ;;  %v1189_v35 = vadd.f32 %v1188_v1, %v1187_v47  ;;  %v12594_v9 = vld [vmem:[#allocation139_spill] sm:$0xff] }
 0x330   : > { %v1164_v32 = vrot.slane %v1163_v5, 1  ;;  %v8933_v14 = vadd.f32 %v1171_v31, %v1170_v42  ;;  %v1209_v22 = vrot.slane %v1208_v36, 4  ;;  %v1222_v60 = vadd.f32 %v12591_v30, %v12590_v44 }
 0x331   : > { %v8939_v38 = vmax.f32 %v1149_v20, %v1150_v13  ;;  %v1184_v41 = vadd.f32 %v1183_v3, %v1182_v45  ;;  %v1196_v11 = vadd.f32 %v1195_v43, %v1194_v4  ;;  %v1203_v48 = vadd.f32 %v1202_v15, %v1201_v24  ;;  %v12592_v3 = vld [vmem:[#allocation137_spill] sm:$0xff]  ;;  %v12593_v43 = vld [vmem:[#allocation138_spill] sm:$0xff] }
 0x332   : > { %v8929_v57 = vadd.f32 %v1164_v32, %v1163_v5  ;;  %v1216_v5 = vrot.slane %v1215_v27, 4  ;;  %v1178_v42 = vrot.slane %v1177_v0, 1  ;;  %v1190_v8 = vrot.slane %v1189_v35, 2 }
 0x333   : > { %v1210_v20 = vadd.f32 %v1209_v22, %v1208_v36  ;;  %v1223_v40 = vrot.slane %v1222_v60, 4  ;;  %v1185_v32 = vrot.slane %v1184_v41, 1  ;;  %v1197_v7 = vrot.slane %v1196_v11, 2 }
 0x334   : > { %v1204_v31 = vrot.slane %v1203_v48, 2  ;;  %v1217_v29 = vadd.f32 %v1216_v5, %v1215_v27  ;;  %v1179_v13 = vadd.f32 %v1178_v42, %v1177_v0  ;;  %v1191_v25 = vadd.f32 %v1190_v8, %v1189_v35 }
 0x335   : > { %v1211_v59 = vrot.slane %v1210_v20, 2  ;;  %v1224_v47 = vadd.f32 %v1223_v40, %v1222_v60  ;;  %v1186_v61 = vadd.f32 %v1185_v32, %v1184_v41  ;;  %v1198_v1 = vadd.f32 %v1197_v7, %v1196_v11  ;;  %v12596_v32 = vld [vmem:[#allocation141_spill] sm:$0xff]  ;;  %v12597_v7 = vld [vmem:[#allocation142_spill] sm:$0xff] }
 0x336   : > { %v1205_v21 = vadd.f32 %v1204_v31, %v1203_v48  ;;  %v1218_v30 = vrot.slane %v1217_v29, 2  ;;  %v1192_v45 = vrot.slane %v1191_v25, 1  ;;  %v1229_v15 = vadd.f32 %v12593_v43, %v12592_v3 }
 0x337   : > { %v1212_v4 = vadd.f32 %v1211_v59, %v1210_v20  ;;  %v1225_v24 = vrot.slane %v1224_v47, 2  ;;  %v1199_v36 = vrot.slane %v1198_v1, 1  ;;  %v1236_v27 = vadd.f32 %v12595_v62, %v12594_v9 }
 0x338   : > { %v1206_v22 = vrot.slane %v1205_v21, 1  ;;  %v1219_v44 = vadd.f32 %v1218_v30, %v1217_v29  ;;  %v1193_v0 = vadd.f32 %v1192_v45, %v1191_v25  ;;  %v1230_v60 = vrot.slane %v1229_v15, 4  ;;  %v12598_v30 = vld [vmem:[#allocation143_spill] sm:$0xff]  ;;  %v12599_v29 = vld [vmem:[#allocation144_spill] sm:$0xff] }
 0x339   : > { %v1213_v35 = vrot.slane %v1212_v4, 1  ;;  %v1226_v5 = vadd.f32 %v1225_v24, %v1224_v47  ;;  %v1200_v41 = vadd.f32 %v1199_v36, %v1198_v1  ;;  %v1237_v42 = vrot.slane %v1236_v27, 4 }
 0x33a   : > { %v1207_v11 = vadd.f32 %v1206_v22, %v1205_v21  ;;  %v1220_v48 = vrot.slane %v1219_v44, 1  ;;  %v1231_v40 = vadd.f32 %v1230_v60, %v1229_v15  ;;  %v1243_v31 = vadd.f32 %v12597_v7, %v12596_v32 }
 0x33b   : > { %v1214_v8 = vadd.f32 %v1213_v35, %v1212_v4  ;;  %v1227_v20 = vrot.slane %v1226_v5, 1  ;;  %v1238_v43 = vadd.f32 %v1237_v42, %v1236_v27  ;;  %v1250_v3 = vadd.f32 %v12599_v29, %v12598_v30 }
 0x33c   : > { %v1221_v59 = vadd.f32 %v1220_v48, %v1219_v44  ;;  %v1496_v25 = vmul.f32 0.0625, %v8927_v49  ;;  %v1232_v47 = vrot.slane %v1231_v40, 2  ;;  %v1244_v24 = vrot.slane %v1243_v31, 4 }
 0x33d   : > { %v1228_v45 = vadd.f32 %v1227_v20, %v1226_v5  ;;  %v1497_v21 = vmul.f32 0.0625, %v8929_v57  ;;  %v1239_v1 = vrot.slane %v1238_v43, 2  ;;  %v1251_v36 = vrot.slane %v1250_v3, 4 }
 0x33e   : > { %v1498_v4 = vmul.f32 0.0625, %v8933_v14  ;;  %v1499_v15 = vmul.f32 0.0625, %v1179_v13  ;;  %v1233_v22 = vadd.f32 %v1232_v47, %v1231_v40  ;;  %v1245_v35 = vadd.f32 %v1244_v24, %v1243_v31  ;;  %v12602_v24 = vld [vmem:[#allocation147_spill] sm:$0xff] }
 0x33f   : > { %v1500_v60 = vmul.f32 0.0625, %v1186_v61  ;;  %v1501_v44 = vmul.f32 0.0625, %v1193_v0  ;;  %v1240_v27 = vadd.f32 %v1239_v1, %v1238_v43  ;;  %v1252_v48 = vadd.f32 %v1251_v36, %v1250_v3 }
 0x340   : > { %v1502_v42 = vmul.f32 0.0625, %v1200_v41  ;;  %v1503_v29 = vmul.f32 0.0625, %v1207_v11  ;;  %v1234_v30 = vrot.slane %v1233_v22, 1  ;;  %v1246_v49 = vrot.slane %v1245_v35, 2 }
 0x341   : > { %v1504_v5 = vmul.f32 0.0625, %v1214_v8  ;;  %v1505_v20 = vmul.f32 0.0625, %v1221_v59  ;;  %v1241_v7 = vrot.slane %v1240_v27, 1  ;;  %v1253_v32 = vrot.slane %v1252_v48, 2 }
 0x342   : > { %v1506_v57 = vmul.f32 0.0625, %v1228_v45  ;;  %v1699_v62 = vsel %vm1596_vm1, %v1497_v21, %v1496_v25  ;;  %v1235_v9 = vadd.f32 %v1234_v30, %v1233_v22  ;;  %v1247_v14 = vadd.f32 %v1246_v49, %v1245_v35  ;;  %v12600_v45 = vld [vmem:[#allocation145_spill] sm:$0xff]  ;;  %v12603_v21 = vld [vmem:[#allocation148_spill] sm:$0xff] }
 0x343   : > { %v1700_v13 = vsel %vm1598_vm2, %v1498_v4, %v1699_v62  ;;  %v1705_v61 = vsel %vm1594_vm0, %v1504_v5, %v1503_v29  ;;  %v1242_v0 = vadd.f32 %v1241_v7, %v1240_v27  ;;  %v1254_v43 = vadd.f32 %v1253_v32, %v1252_v48  ;;  %v12601_v62 = vld [vmem:[#allocation146_spill] sm:$0xff]  ;;  %v12606_v48 = vld [vmem:[#allocation151_spill] sm:$0xff]  ;;  %v12607_v49 = vld [vmem:[#allocation152_spill] sm:$0xff] }
 0x344   : > { %v1701_v3 = vsel %vm1600_vm3, %v1499_v15, %v1700_v13  ;;  %v1706_v41 = vsel %vm1596_vm1, %v1505_v20, %v1705_v61  ;;  %v1248_v11 = vrot.slane %v1247_v14, 1  ;;  %v1507_v8 = vmul.f32 0.0625, %v1235_v9  ;;  %v12610_v61 = vld [vmem:[#allocation155_spill] sm:$0xff] }
 0x345   : > { %v1702_v40 = vsel %vm1602_vm4, %v1500_v60, %v1701_v3  ;;  %v1707_v31 = vsel %vm1598_vm2, %v1506_v57, %v1706_v41  ;;  %v1255_v59 = vrot.slane %v1254_v43, 1  ;;  %v1508_v25 = vmul.f32 0.0625, %v1242_v0  ;;  %v12604_v60 = vld [vmem:[#allocation149_spill] sm:$0xff]  ;;  %v12611_v0 = vld [vmem:[#allocation156_spill] sm:$0xff] }
 0x346   : > { %v1703_v30 = vsel %vm1604_vm5, %v1501_v44, %v1702_v40  ;;  %v1257_v47 = vadd.f32 %v12601_v62, %v12600_v45  ;;  %v1249_v29 = vadd.f32 %v1248_v11, %v1247_v14  ;;  %v1708_v7 = vsel %vm1600_vm3, %v1507_v8, %v1707_v31  ;;  %v12605_v44 = vld [vmem:[#allocation150_spill] sm:$0xff]  ;;  %v12608_v57 = vld [vmem:[#allocation153_spill] sm:$0xff] }
 0x347   : > { %v1704_v32 = vsel %vm1606_vm6, %v1502_v42, %v1703_v30  ;;  %v1264_v1 = vadd.f32 %v12603_v21, %v12602_v24  ;;  %v1256_v9 = vadd.f32 %v1255_v59, %v1254_v43  ;;  %v1709_v36 = vsel %vm1602_vm4, %v1508_v25, %v1708_v7  ;;  %v12609_v14 = vld [vmem:[#allocation154_spill] sm:$0xff]  ;;  %v12628_v21 = vld [vmem:[#allocation173_spill] sm:$0xff] }
 0x348   : > { %v1748_v4 = vsel %vm1747_vm8, %v8939_v38, %v1704_v32  ;;  %v1258_v15 = vrot.slane %v1257_v47, 4  ;;  %v1509_v22 = vmul.f32 0.0625, %v1249_v29  ;;  %v1271_v27 = vadd.f32 %v12605_v44, %v12604_v60  ;;  %v12626_v44 = vld [vmem:[#allocation171_spill] sm:$0xff]  ;;  %v12627_v60 = vld [vmem:[#allocation172_spill] sm:$0xff] }
 0x349   : > { %v1265_v35 = vrot.slane %v1264_v1, 4  ;;  %v1278_v42 = vadd.f32 %v12607_v49, %v12606_v48  ;;  %v1510_v5 = vmul.f32 0.0625, %v1256_v9  ;;  %v1285_v13 = vadd.f32 %v12609_v14, %v12608_v57  ;;  %v12613_v14 = vld [vmem:[#allocation158_spill] sm:$0xff] }
 0x34a   : > { %v1259_v20 = vadd.f32 %v1258_v15, %v1257_v47  ;;  %v1292_v43 = vadd.f32 %v12611_v0, %v12610_v61  ;;  %v1710_v3 = vsel %vm1604_vm5, %v1509_v22, %v1709_v36  ;;  %v1272_v41 = vrot.slane %v1271_v27, 4  ;;  %v12612_v15 = vld [vmem:[#allocation157_spill] sm:$0xff]  ;;  %v12615_v61 = vld [vmem:[#allocation160_spill] sm:$0xff]  ;;  %v12617_v57 = vld [vmem:[#allocation162_spill] sm:$0xff] }
 0x34b   : > { %v1266_v38 = vadd.f32 %v1265_v35, %v1264_v1  ;;  %v1279_v11 = vrot.slane %v1278_v42, 4  ;;  %v1711_v8 = vsel %vm1606_vm6, %v1510_v5, %v1710_v3  ;;  %v1286_v31 = vrot.slane %v1285_v13, 4  ;;  %v12614_v35 = vld [vmem:[#allocation159_spill] sm:$0xff] }
 0x34c   : > { %v1260_v40 = vrot.slane %v1259_v20, 2  ;;  %v1293_v59 = vrot.slane %v1292_v43, 4  ;;  %v7163_v25 = vpack.c.bf16 %v1711_v8, %v1748_v4  ;;  %v1273_v29 = vadd.f32 %v1272_v41, %v1271_v27 }
 0x34d   : > { %v1267_v30 = vrot.slane %v1266_v38, 2  ;;  %v1280_v47 = vadd.f32 %v1279_v11, %v1278_v42  ;;  %v1287_v7 = vadd.f32 %v1286_v31, %v1285_v13  ;;  %v1299_v0 = vadd.f32 %v12613_v14, %v12612_v15  ;;  %v12616_v15 = vld [vmem:[#allocation161_spill] sm:$0xff] }
 0x34e   : > { %v1261_v32 = vadd.f32 %v1260_v40, %v1259_v20  ;;  %v1294_v9 = vadd.f32 %v1293_v59, %v1292_v43  ;;  %7164 = vmatpush3.bf16.msra.mxu0 %v7163_v25  ;;  %v1274_v1 = vrot.slane %v1273_v29, 2  ;;  %v1306_v5 = vadd.f32 %v12615_v61, %v12614_v35 }
 0x34f   : > { %v1268_v36 = vadd.f32 %v1267_v30, %v1266_v38  ;;  %v1281_v22 = vrot.slane %v1280_v47, 2  ;;  %7165 = vmatprep.subr.bf16.mxu0 %v12512_v33  ;;  %v1288_v4 = vrot.slane %v1287_v7, 2  ;;  %v1300_v27 = vrot.slane %v1299_v0, 4 }
 0x350   : > { %v1262_v3 = vrot.slane %v1261_v32, 1  ;;  %v1295_v8 = vrot.slane %v1294_v9, 2  ;;  %v1275_v20 = vadd.f32 %v1274_v1, %v1273_v29  ;;  %v1307_v43 = vrot.slane %v1306_v5, 4 }
 0x351   : > { %v1269_v42 = vrot.slane %v1268_v36, 1  ;;  %v1282_v13 = vadd.f32 %v1281_v22, %v1280_v47  ;;  %v1289_v11 = vadd.f32 %v1288_v4, %v1287_v7  ;;  %v1301_v38 = vadd.f32 %v1300_v27, %v1299_v0  ;;  %v12619_v7 = vld [vmem:[#allocation164_spill] sm:$0xff]  ;;  %v12620_v4 = vld [vmem:[#allocation165_spill] sm:$0xff] }
 0x352   : > { %v8990_v41 = vadd.f32 %v1262_v3, %v1261_v32  ;;  %v1296_v40 = vadd.f32 %v1295_v8, %v1294_v9  ;;  %v1276_v59 = vrot.slane %v1275_v20, 1  ;;  %v1308_v30 = vadd.f32 %v1307_v43, %v1306_v5  ;;  %v12618_v32 = vld [vmem:[#allocation163_spill] sm:$0xff]  ;;  %v12621_v8 = vld [vmem:[#allocation166_spill] sm:$0xff]  ;;  %v12623_v43 = vld [vmem:[#allocation168_spill] sm:$0xff] }
 0x353   : > { %v8992_v31 = vadd.f32 %v1269_v42, %v1268_v36  ;;  %v1283_v25 = vrot.slane %v1282_v13, 1  ;;  %v1290_v61 = vrot.slane %v1289_v11, 1  ;;  %v1302_v14 = vrot.slane %v1301_v38, 2  ;;  %v12622_v42 = vld [vmem:[#allocation167_spill] sm:$0xff] }
 0x354   : > { %v1297_v35 = vrot.slane %v1296_v40, 1  ;;  %v1313_v49 = vadd.f32 %v12617_v57, %v12616_v15  ;;  %v8996_v48 = vadd.f32 %v1276_v59, %v1275_v20  ;;  %v1309_v47 = vrot.slane %v1308_v30, 2 }
 0x355   : > { %v8998_v29 = vadd.f32 %v1283_v25, %v1282_v13  ;;  %v1320_v9 = vadd.f32 %v12619_v7, %v12618_v32  ;;  %v1291_v0 = vadd.f32 %v1290_v61, %v1289_v11  ;;  %v1303_v1 = vadd.f32 %v1302_v14, %v1301_v38  ;;  %v12624_v13 = vld [vmem:[#allocation169_spill] sm:$0xff]  ;;  %v12625_v25 = vld [vmem:[#allocation170_spill] sm:$0xff] }
 0x356   : > { %v1298_v36 = vadd.f32 %v1297_v35, %v1296_v40  ;;  %v1314_v22 = vrot.slane %v1313_v49, 4  ;;  %v1310_v3 = vadd.f32 %v1309_v47, %v1308_v30  ;;  %v1327_v27 = vadd.f32 %v12621_v8, %v12620_v4 }
 0x357   : > { %v1321_v5 = vrot.slane %v1320_v9, 4  ;;  %v1334_v57 = vadd.f32 %v12623_v43, %v12622_v42  ;;  %v1304_v20 = vrot.slane %v1303_v1, 1  ;;  %v1341_v15 = vadd.f32 %v12625_v25, %v12624_v13  ;;  %v12629_v25 = vld [vmem:[#allocation174_spill] sm:$0xff] }
 0x358   : > { %v1315_v59 = vadd.f32 %v1314_v22, %v1313_v49  ;;  %v1348_v7 = vadd.f32 %v12627_v60, %v12626_v44  ;;  %v1311_v61 = vrot.slane %v1310_v3, 1  ;;  %v1328_v14 = vrot.slane %v1327_v27, 4 }
 0x359   : > { %v1322_v35 = vadd.f32 %v1321_v5, %v1320_v9  ;;  %v1335_v11 = vrot.slane %v1334_v57, 4  ;;  %v1305_v40 = vadd.f32 %v1304_v20, %v1303_v1  ;;  %v1342_v30 = vrot.slane %v1341_v15, 4  ;;  %v12630_v9 = vld [vmem:[#allocation175_spill] sm:$0xff]  ;;  %v12631_v5 = vld [vmem:[#allocation176_spill] sm:$0xff] }
 0x35a   : > { %v1316_v38 = vrot.slane %v1315_v59, 2  ;;  %v1349_v47 = vrot.slane %v1348_v7, 4  ;;  %v1312_v8 = vadd.f32 %v1311_v61, %v1310_v3  ;;  %v1329_v32 = vadd.f32 %v1328_v14, %v1327_v27 }
 0x35b   : > { %v1323_v4 = vrot.slane %v1322_v35, 2  ;;  %v1336_v43 = vadd.f32 %v1335_v11, %v1334_v57  ;;  %v1343_v49 = vadd.f32 %v1342_v30, %v1341_v15  ;;  %v1355_v13 = vadd.f32 %v12629_v25, %v12628_v21 }
 0x35c   : > { %v1317_v42 = vadd.f32 %v1316_v38, %v1315_v59  ;;  %v1350_v22 = vadd.f32 %v1349_v47, %v1348_v7  ;;  %v1330_v60 = vrot.slane %v1329_v32, 2  ;;  %v1362_v62 = vadd.f32 %v12631_v5, %v12630_v9 }
 0x35d   : > { %v1324_v24 = vadd.f32 %v1323_v4, %v1322_v35  ;;  %v1337_v44 = vrot.slane %v1336_v43, 2  ;;  %v1344_v20 = vrot.slane %v1343_v49, 2  ;;  %v1356_v17 = vrot.slane %v1355_v13, 4 }
 0x35e   : > { %v1318_v1 = vrot.slane %v1317_v42, 1  ;;  %v1351_v45 = vrot.slane %v1350_v22, 2  ;;  %v1331_v61 = vadd.f32 %v1330_v60, %v1329_v32  ;;  %v1363_v57 = vrot.slane %v1362_v62, 4 }
 0x35f   : > { %v1325_v3 = vrot.slane %v1324_v24, 1  ;;  %v1338_v27 = vadd.f32 %v1337_v44, %v1336_v43  ;;  %v1345_v15 = vadd.f32 %v1344_v20, %v1343_v49  ;;  %v1357_v14 = vadd.f32 %v1356_v17, %v1355_v13 }
 0x360   : > { %v1319_v59 = vadd.f32 %v1318_v1, %v1317_v42  ;;  %v1352_v7 = vadd.f32 %v1351_v45, %v1350_v22  ;;  %v1332_v38 = vrot.slane %v1331_v61, 1  ;;  %v1364_v35 = vadd.f32 %v1363_v57, %v1362_v62 }
 0x361   : > { %v1326_v11 = vadd.f32 %v1325_v3, %v1324_v24  ;;  %v1339_v4 = vrot.slane %v1338_v27, 1  ;;  %v1346_v30 = vrot.slane %v1345_v15, 1  ;;  %v1358_v25 = vrot.slane %v1357_v14, 2 }
 0x362   : > { %v1353_v47 = vrot.slane %v1352_v7, 1  ;;  %v1511_v5 = vmul.f32 0.0625, %v8990_v41  ;;  %v1333_v9 = vadd.f32 %v1332_v38, %v1331_v61  ;;  %v1365_v34 = vrot.slane %v1364_v35, 2 }
 0x363   : > { %v1340_v21 = vadd.f32 %v1339_v4, %v1338_v27  ;;  %v1512_v60 = vmul.f32 0.0625, %v8992_v31  ;;  %v1347_v44 = vadd.f32 %v1346_v30, %v1345_v15  ;;  %v1359_v42 = vadd.f32 %v1358_v25, %v1357_v14 }
 0x364   : > { %v1354_v32 = vadd.f32 %v1353_v47, %v1352_v7  ;;  %v1513_v45 = vmul.f32 0.0625, %v8996_v48  ;;  %v1366_v17 = vadd.f32 %v1365_v34, %v1364_v35  ;;  %v1514_v24 = vmul.f32 0.0625, %v8998_v29  ;;  %v12632_v29 = vld [vmem:[#allocation177_spill] sm:$0xff] }
 0x365   : > { %v1515_v43 = vmul.f32 0.0625, %v1291_v0  ;;  %v1516_v62 = vmul.f32 0.0625, %v1298_v36  ;;  %v1360_v13 = vrot.slane %v1359_v42, 1  ;;  %v1517_v49 = vmul.f32 0.0625, %v1305_v40  ;;  %v12633_v0 = vld [vmem:[#allocation178_spill] sm:$0xff]  ;;  %v12636_v47 = vld [vmem:[#allocation181_spill] sm:$0xff] }
 0x366   : > { %v1518_v22 = vmul.f32 0.0625, %v1312_v8  ;;  %v1519_v1 = vmul.f32 0.0625, %v1319_v59  ;;  %v1367_v41 = vrot.slane %v1366_v17, 1  ;;  %v1520_v20 = vmul.f32 0.0625, %v1326_v11 }
 0x367   : > { %v1521_v3 = vmul.f32 0.0625, %v1333_v9  ;;  %v1522_v61 = vmul.f32 0.0625, %v1340_v21  ;;  %v1361_v27 = vadd.f32 %v1360_v13, %v1359_v42  ;;  %v1523_v31 = vmul.f32 0.0625, %v1347_v44  ;;  %v12634_v9 = vld [vmem:[#allocation179_spill] sm:$0xff]  ;;  %v12635_v21 = vld [vmem:[#allocation180_spill] sm:$0xff] }
 0x368   : > { %v1524_v57 = vmul.f32 0.0625, %v1354_v32  ;;  %v1712_v25 = vsel %vm1594_vm0, %v1512_v60, %v1511_v5  ;;  %v1368_v15 = vadd.f32 %v1367_v41, %v1366_v17  ;;  %v1719_v48 = vsel %vm1594_vm0, %v1520_v20, %v1519_v1  ;;  %v12637_v60 = vld [vmem:[#allocation182_spill] sm:$0xff]  ;;  %v12638_v17 = vld [vmem:[#allocation183_spill] sm:$0xff] }
 0x369   : > { %v1713_v34 = vsel %vm1596_vm1, %v1513_v45, %v1712_v25  ;;  %v1369_v36 = vadd.f32 %v12633_v0, %v12632_v29  ;;  %v1525_v40 = vmul.f32 0.0625, %v1361_v27  ;;  %v1720_v59 = vsel %vm1596_vm1, %v1521_v3, %v1719_v48  ;;  %v12640_v27 = vld [vmem:[#allocation185_spill] sm:$0xff]  ;;  %v12643_v48 = vld [vmem:[#allocation188_spill] sm:$0xff] }
 0x36a   : > { %v1714_v8 = vsel %vm1598_vm2, %v1514_v24, %v1713_v34  ;;  %v1376_v7 = vadd.f32 %v12635_v21, %v12634_v9  ;;  %v1526_v14 = vmul.f32 0.0625, %v1368_v15  ;;  %v1721_v5 = vsel %vm1598_vm2, %v1522_v61, %v1720_v59  ;;  %v12639_v24 = vld [vmem:[#allocation184_spill] sm:$0xff]  ;;  %v12642_v34 = vld [vmem:[#allocation187_spill] sm:$0xff] }
 0x36b   : > { %v1715_v11 = vsel %vm1600_vm3, %v1515_v43, %v1714_v8  ;;  %v1370_v38 = vrot.slane %v1369_v36, 4  ;;  %v1722_v35 = vsel %vm1600_vm3, %v1523_v31, %v1721_v5  ;;  %v1383_v44 = vadd.f32 %v12637_v60, %v12636_v47  ;;  %v12641_v31 = vld [vmem:[#allocation186_spill] sm:$0xff] }
 0x36c   : > { %v1716_v4 = vsel %vm1602_vm4, %v1516_v62, %v1715_v11  ;;  %v1377_v30 = vrot.slane %v1376_v7, 4  ;;  %v1723_v42 = vsel %vm1602_vm4, %v1524_v57, %v1722_v35  ;;  %v1390_v13 = vadd.f32 %v12639_v24, %v12638_v17  ;;  %v12644_v11 = vld [vmem:[#allocation189_spill] sm:$0xff]  ;;  %v12647_v35 = vld [vmem:[#allocation192_spill] sm:$0xff] }
 0x36d   : > { %v1717_v32 = vsel %vm1604_vm5, %v1517_v49, %v1716_v4  ;;  %v1371_v45 = vadd.f32 %v1370_v38, %v1369_v36  ;;  %v1724_v1 = vsel %vm1604_vm5, %v1525_v40, %v1723_v42  ;;  %v1384_v62 = vrot.slane %v1383_v44, 4  ;;  %v12645_v40 = vld [vmem:[#allocation190_spill] sm:$0xff]  ;;  %v12646_v4 = vld [vmem:[#allocation191_spill] sm:$0xff] }
 0x36e   : > { %v1718_v43 = vsel %vm1606_vm6, %v1518_v22, %v1717_v32  ;;  %v1378_v41 = vadd.f32 %v1377_v30, %v1376_v7  ;;  %v1725_v20 = vsel %vm1606_vm6, %v1526_v14, %v1724_v1  ;;  %v1391_v61 = vrot.slane %v1390_v13, 4 }
 0x36f   : > { %v1372_v3 = vrot.slane %v1371_v45, 2  ;;  %v1397_v25 = vadd.f32 %v12641_v31, %v12640_v27  ;;  %v7166_v49 = vpack.c.bf16 %v1725_v20, %v1718_v43  ;;  %v1385_v57 = vadd.f32 %v1384_v62, %v1383_v44 }
 0x370   : > { %v1379_v15 = vrot.slane %v1378_v41, 2  ;;  %v1404_v36 = vadd.f32 %v12643_v48, %v12642_v34  ;;  %v1392_v59 = vadd.f32 %v1391_v61, %v1390_v13  ;;  %v1411_v7 = vadd.f32 %v12645_v40, %v12644_v11  ;;  %v12648_v48 = vld [vmem:[#allocation193_spill] sm:$0xff]  ;;  %v12649_v34 = vld [vmem:[#allocation194_spill] sm:$0xff] }
 0x371   : > { %v1373_v8 = vadd.f32 %v1372_v3, %v1371_v45  ;;  %v1398_v22 = vrot.slane %v1397_v25, 4  ;;  %7167 = vmatpush3.bf16.msra.mxu0 %v7166_v49  ;;  %v1386_v14 = vrot.slane %v1385_v57, 2  ;;  %v1418_v30 = vadd.f32 %v12647_v35, %v12646_v4 }
 0x372   : > { %v1380_v5 = vadd.f32 %v1379_v15, %v1378_v41  ;;  %v1405_v38 = vrot.slane %v1404_v36, 4  ;;  %7168 = vmatprep.subr.bf16.mxu0 %v12512_v33  ;;  %v1393_v44 = vrot.slane %v1392_v59, 2  ;;  %v1412_v43 = vrot.slane %v1411_v7, 4 }
 0x373   : > { %v1374_v32 = vrot.slane %v1373_v8, 1  ;;  %v1399_v42 = vadd.f32 %v1398_v22, %v1397_v25  ;;  %v1387_v45 = vadd.f32 %v1386_v14, %v1385_v57  ;;  %v1419_v62 = vrot.slane %v1418_v30, 4  ;;  %v12651_v14 = vld [vmem:[#allocation196_spill] sm:$0xff] }
 0x374   : > { %v1381_v1 = vrot.slane %v1380_v5, 1  ;;  %v1406_v13 = vadd.f32 %v1405_v38, %v1404_v36  ;;  %v1394_v20 = vadd.f32 %v1393_v44, %v1392_v59  ;;  %v1413_v61 = vadd.f32 %v1412_v43, %v1411_v7  ;;  %v12650_v36 = vld [vmem:[#allocation195_spill] sm:$0xff] }
 0x375   : > { %v1400_v3 = vrot.slane %v1399_v42, 2  ;;  %v9049_v49 = vadd.f32 %v1374_v32, %v1373_v8  ;;  %v1388_v41 = vrot.slane %v1387_v45, 1  ;;  %v1420_v40 = vadd.f32 %v1419_v62, %v1418_v30  ;;  %v12652_v62 = vld [vmem:[#allocation197_spill] sm:$0xff] }
 0x376   : > { %v1407_v15 = vrot.slane %v1406_v13, 2  ;;  %v1395_v11 = vrot.slane %v1394_v20, 1  ;;  %v1414_v4 = vrot.slane %v1413_v61, 2  ;;  %v1425_v31 = vadd.f32 %v12649_v34, %v12648_v48 }
 0x377   : > { %v1401_v35 = vadd.f32 %v1400_v3, %v1399_v42  ;;  %v9053_v25 = vadd.f32 %v1381_v1, %v1380_v5  ;;  %v1421_v57 = vrot.slane %v1420_v40, 2  ;;  %v1432_v59 = vadd.f32 %v12651_v14, %v12650_v36  ;;  %v12653_v42 = vld [vmem:[#allocation198_spill] sm:$0xff]  ;;  %v12654_v5 = vld [vmem:[#allocation199_spill] sm:$0xff]  ;;  %v12655_v1 = vld [vmem:[#allocation200_spill] sm:$0xff] }
 0x378   : > { %v1408_v22 = vadd.f32 %v1407_v15, %v1406_v13  ;;  %v1389_v38 = vadd.f32 %v1388_v41, %v1387_v45  ;;  %v1415_v8 = vadd.f32 %v1414_v4, %v1413_v61  ;;  %v1426_v32 = vrot.slane %v1425_v31, 4  ;;  %v12656_v61 = vld [vmem:[#allocation201_spill] sm:$0xff]  ;;  %v12657_v36 = vld [vmem:[#allocation202_spill] sm:$0xff] }
 0x379   : > { %v1402_v7 = vrot.slane %v1401_v35, 1  ;;  %v1422_v43 = vadd.f32 %v1421_v57, %v1420_v40  ;;  %v1433_v30 = vrot.slane %v1432_v59, 4  ;;  %v1439_v3 = vadd.f32 %v12653_v42, %v12652_v62  ;;  %v12658_v42 = vld [vmem:[#allocation203_spill] sm:$0xff] }
 0x37a   : > { %v1409_v44 = vrot.slane %v1408_v22, 1  ;;  %v1396_v27 = vadd.f32 %v1395_v11, %v1394_v20  ;;  %v1416_v24 = vrot.slane %v1415_v8, 1  ;;  %v1427_v34 = vadd.f32 %v1426_v32, %v1425_v31  ;;  %v12659_v11 = vld [vmem:[#allocation204_spill] sm:$0xff] }
 0x37b   : > { %v1446_v13 = vadd.f32 %v12655_v1, %v12654_v5  ;;  %v1403_v15 = vadd.f32 %v1402_v7, %v1401_v35  ;;  %v1434_v17 = vadd.f32 %v1433_v30, %v1432_v59  ;;  %v1440_v14 = vrot.slane %v1439_v3, 4  ;;  %v12660_v1 = vld [vmem:[#allocation205_spill] sm:$0xff]  ;;  %v12661_v35 = vld [vmem:[#allocation206_spill] sm:$0xff] }
 0x37c   : > { %v1410_v48 = vadd.f32 %v1409_v44, %v1408_v22  ;;  %v1423_v45 = vrot.slane %v1422_v43, 1  ;;  %v1428_v41 = vrot.slane %v1427_v34, 2  ;;  %v1453_v40 = vadd.f32 %v12657_v36, %v12656_v61 }
 0x37d   : > { %v1447_v4 = vrot.slane %v1446_v13, 4  ;;  %v1417_v57 = vadd.f32 %v1416_v24, %v1415_v8  ;;  %v1435_v60 = vrot.slane %v1434_v17, 2  ;;  %v1441_v47 = vadd.f32 %v1440_v14, %v1439_v3 }
 0x37e   : > { %v1460_v20 = vadd.f32 %v12659_v11, %v12658_v42  ;;  %v1429_v31 = vadd.f32 %v1428_v41, %v1427_v34  ;;  %v1454_v62 = vrot.slane %v1453_v40, 4  ;;  %v1467_v22 = vadd.f32 %v12661_v35, %v12660_v1 }
 0x37f   : > { %v1448_v32 = vadd.f32 %v1447_v4, %v1446_v13  ;;  %v1436_v59 = vadd.f32 %v1435_v60, %v1434_v17  ;;  %v1442_v7 = vrot.slane %v1441_v47, 2  ;;  %v1474_v30 = vadd.f32 %v8852_v16, %v8850_v52 }
 0x380   : > { %v1461_v44 = vrot.slane %v1460_v20, 4  ;;  %v1430_v5 = vrot.slane %v1429_v31, 1  ;;  %v1455_v24 = vadd.f32 %v1454_v62, %v1453_v40  ;;  %v1468_v8 = vrot.slane %v1467_v22, 4 }
 0x381   : > { %v1449_v36 = vrot.slane %v1448_v32, 2  ;;  %v1437_v14 = vrot.slane %v1436_v59, 1  ;;  %v1443_v3 = vadd.f32 %v1442_v7, %v1441_v47  ;;  %v1475_v11 = vrot.slane %v1474_v30, 4 }
 0x382   : > { %v1462_v61 = vadd.f32 %v1461_v44, %v1460_v20  ;;  %v1424_v34 = vadd.f32 %v1423_v45, %v1422_v43  ;;  %v1456_v41 = vrot.slane %v1455_v24, 2  ;;  %v1469_v4 = vadd.f32 %v1468_v8, %v1467_v22 }
 0x383   : > { %v1450_v13 = vadd.f32 %v1449_v36, %v1448_v32  ;;  %v1431_v42 = vadd.f32 %v1430_v5, %v1429_v31  ;;  %v1444_v35 = vrot.slane %v1443_v3, 1  ;;  %v1476_v17 = vadd.f32 %v1475_v11, %v1474_v30 }
 0x384   : > { %v1463_v60 = vrot.slane %v1462_v61, 2  ;;  %v1438_v1 = vadd.f32 %v1437_v14, %v1436_v59  ;;  %v1457_v9 = vadd.f32 %v1456_v41, %v1455_v24  ;;  %v1470_v16 = vrot.slane %v1469_v4, 2 }
 0x385   : > { %v1451_v21 = vrot.slane %v1450_v13, 1  ;;  %v1445_v52 = vadd.f32 %v1444_v35, %v1443_v3  ;;  %v1477_v62 = vrot.slane %v1476_v17, 2  ;;  %v1527_v40 = vmul.f32 0.0625, %v9049_v49 }
 0x386   : > { %v1464_v0 = vadd.f32 %v1463_v60, %v1462_v61  ;;  %v1458_v20 = vrot.slane %v1457_v9, 1  ;;  %v1471_v7 = vadd.f32 %v1470_v16, %v1469_v4  ;;  %v1528_v36 = vmul.f32 0.0625, %v9053_v25 }
 0x387   : > { %v1452_v47 = vadd.f32 %v1451_v21, %v1450_v13  ;;  %v1478_v45 = vadd.f32 %v1477_v62, %v1476_v17  ;;  %v1529_v5 = vmul.f32 0.0625, %v1389_v38  ;;  %v1530_v31 = vmul.f32 0.0625, %v1396_v27 }
 0x388   : > { %v1465_v43 = vrot.slane %v1464_v0, 1  ;;  %v1459_v32 = vadd.f32 %v1458_v20, %v1457_v9  ;;  %v1472_v11 = vrot.slane %v1471_v7, 1  ;;  %v1531_v22 = vmul.f32 0.0625, %v1403_v15 }
 0x389   : > { %v1532_v59 = vmul.f32 0.0625, %v1410_v48  ;;  %v1479_v30 = vrot.slane %v1478_v45, 1  ;;  %v1533_v35 = vmul.f32 0.0625, %v1417_v57  ;;  %v1535_v61 = vmul.f32 0.0625, %v1431_v42 }
 0x38a   : > { %v1466_v44 = vadd.f32 %v1465_v43, %v1464_v0  ;;  %v1473_v24 = vadd.f32 %v1472_v11, %v1471_v7  ;;  %v1536_v8 = vmul.f32 0.0625, %v1438_v1  ;;  %v1537_v49 = vmul.f32 0.0625, %v1445_v52 }
 0x38b   : > { %v1538_v21 = vmul.f32 0.0625, %v1452_v47  ;;  %v1480_v14 = vadd.f32 %v1479_v30, %v1478_v45  ;;  %v1534_v16 = vmul.f32 0.0625, %v1424_v34  ;;  %v1539_v3 = vmul.f32 0.0625, %v1459_v32 }
 0x38c   : > { %v1726_v25 = vsel %vm1594_vm0, %v1528_v36, %v1527_v40  ;;  %v1540_v13 = vmul.f32 0.0625, %v1466_v44  ;;  %v1733_v9 = vsel %vm1594_vm0, %v1536_v8, %v1535_v61  ;;  %v1481_v0 = vadd.f32 %v8856_v10, %v8854_v26  ;;  %v1749_v61 = vld [vmem:[%s11603_s2] sm:$0xff]  ;;  %v1750_v8 = vld [vmem:[%s11603_s2 + $0x8] sm:$0xff]  ;;  %v12696_v26 = vld [vmem:[#allocation30_spill] sm:$0xff] }
 0x38d   : > { %v1727_v27 = vsel %vm1596_vm1, %v1529_v5, %v1726_v25  ;;  %v1541_v48 = vmul.f32 0.0625, %v1473_v24  ;;  %v1734_v42 = vsel %vm1596_vm1, %v1537_v49, %v1733_v9  ;;  %v1488_v52 = vadd.f32 %v8907_v56, %v8904_v51  ;;  %v1751_v49 = vld [vmem:[%s11603_s2 + $0x10] sm:$0xff]  ;;  %v12693_v56 = vld [vmem:[#allocation27_spill] sm:$0xff]  ;;  %v12695_v10 = vld [vmem:[#allocation148_spill] sm:$0xff] }
 0x38e   : > { %v1728_v38 = vsel %vm1598_vm2, %v1530_v31, %v1727_v27  ;;  %v1542_v1 = vmul.f32 0.0625, %v1480_v14  ;;  %v1735_v57 = vsel %vm1598_vm2, %v1538_v21, %v1734_v42  ;;  %v1482_v34 = vrot.slane %v1481_v0, 4  ;;  %v1752_v21 = vld [vmem:[%s11603_s2 + $0x18] sm:$0xff]  ;;  %v1753_v14 = vld [vmem:[%s11603_s2 + $0x20] sm:$0xff] }
 0x38f   : > { %v1729_v15 = vsel %vm1600_vm3, %v1531_v22, %v1728_v38  ;;  %v1736_v4 = vsel %vm1600_vm3, %v1539_v3, %v1735_v57  ;;  %v1489_v60 = vrot.slane %v1488_v52, 4  ;;  %vm1758_vm1 = vcmask 801792   ;;  %v1755_v3 = vld [vmem:[%s11603_s2 + $0x30] sm:$0x1]  ;;  %v12694_v51 = vld [vmem:[#allocation147_spill] sm:$0xff] }
 0x390   : > { %v1730_v41 = vsel %vm1602_vm4, %v1532_v59, %v1729_v15  ;;  %v1737_v62 = vsel %vm1602_vm4, %v1540_v13, %v1736_v4  ;;  %v1483_v40 = vadd.f32 %v1482_v34, %v1481_v0  ;;  %v5773_v0 = vadd.f32 %v8483_v12, %v8477_v53 }
 0x391   : > { %v1731_v17 = vsel %vm1604_vm5, %v1533_v35, %v1730_v41  ;;  %v1738_v20 = vsel %vm1604_vm5, %v1541_v48, %v1737_v62  ;;  %v1490_v7 = vadd.f32 %v1489_v60, %v1488_v52  ;;  %v5821_v48 = vadd.f32 %v8485_v37, %v8479_v54 }
 0x392   : > { %v1732_v47 = vsel %vm1606_vm6, %v1534_v16, %v1731_v17  ;;  %v1739_v36 = vsel %vm1606_vm6, %v1542_v1, %v1738_v20  ;;  %v1484_v43 = vrot.slane %v1483_v40, 2  ;;  %v1754_v16 = vld [vmem:[%s11603_s2 + $0x28] sm:$0xff]  ;;  %v5774_v38 = vadd.f32 %v8487_v28, %v5773_v0 }
 0x393   : > { %v7169_v45 = vpack.c.bf16 %v1739_v36, %v1732_v47  ;;  %v1491_v5 = vrot.slane %v1490_v7, 2  ;;  %v5822_v1 = vadd.f32 %v8489_v46, %v5821_v48  ;;  %v12672_v48 = vld [vmem:[#allocation17_spill] sm:$0xff]  ;;  %vm5256_vm2 = vcmask 15360  }
 0x394   : > { %v1485_v31 = vadd.f32 %v1484_v43, %v1483_v40  ;;  %v5775_v34 = vadd.f32 %v8493_v50, %v5774_v38  ;;  %v12673_v38 = vld [vmem:[#allocation23_spill] sm:$0xff] }
 0x395   : > { %7170 = vmatpush3.bf16.msra.mxu0 %v7169_v45  ;;  %v1492_v32 = vadd.f32 %v1491_v5, %v1490_v7  ;;  %v5823_v41 = vadd.f32 %v8495_v58, %v5822_v1  ;;  %v3926_v45 = vld [vmem:[%s11608_s7] sm:$0xff] }
 0x396   : > { %7022 = vmatprep.subr.mxu0 %v12579_v55  ;;  %v1486_v11 = vrot.slane %v1485_v31, 1  ;;  %v5776_v4 = vadd.f32 %v8497_v2, %v5775_v34  ;;  %v3931_v34 = vld [vmem:[%s11608_s7 + $0x28] sm:$0xff] }
 0x397   : > { %v1493_v22 = vrot.slane %v1492_v32, 1  ;;  %v5824_v60 = vadd.f32 %v8499_v19, %v5823_v41  ;;  %v12676_v41 = vld [vmem:[#allocation24_spill] sm:$0xff] }
 0x398   : > { %v1487_v59 = vadd.f32 %v1486_v11, %v1485_v31  ;;  %v5777_v17 = vadd.f32 %v8503_v63, %v5776_v4  ;;  %v12663_v31 = vld [vmem:[#allocation130_spill] sm:$0xff]  ;;  %v3927_v11 = vld [vmem:[%s11608_s7 + $0x8] sm:$0xff] }
 0x399   : > { %v1494_v44 = vadd.f32 %v1493_v22, %v1492_v32  ;;  %v5825_v40 = vadd.f32 %v8505_v23, %v5824_v60  ;;  %v12664_v22 = vld [vmem:[#allocation131_spill] sm:$0xff]  ;;  %v12677_v60 = vld [vmem:[#allocation25_spill] sm:$0xff] }
 0x39a   : > { %v1543_v30 = vmul.f32 0.0625, %v1487_v59  ;;  %v5778_v20 = vadd.f32 %v12582_v6, %v5777_v17 }
 0x39b   : > { %v1544_v35 = vmul.f32 0.0625, %v1494_v44  ;;  %v5826_v36 = vadd.f32 %v12583_v39, %v5825_v40  ;;  %v12665_v44 = vld [vmem:[#allocation132_spill] sm:$0xff] }
 0x39c   : > { %v5779_v5 = vadd.f32 %v12584_v18, %v5778_v20 }
 0x39d   : > { %v1740_v24 = vsel %vm1594_vm0, %v1544_v35, %v1543_v30  ;;  %v5827_v32 = vadd.f32 %v12663_v31, %v5826_v36  ;;  %v3928_v35 = vld [vmem:[%s11608_s7 + $0x10] sm:$0xff]  ;;  %v12680_v36 = vld [vmem:[#allocation28_spill] sm:$0xff]  ;;  %vm5105_vm0 = vcmask 261120  }
 0x39e   : > { %7023 = vmatpush3.msk.msra.mxu0 %vm1780_vm15, %v1740_v24  ;;  %v5780_v59 = vadd.f32 %v12664_v22, %v5779_v5 }
 0x39f   : > { %7025 = vmatmul.mubr.msk.f32.vlgmr.msra.gmra.mrb[0].mxu0 %vm1758_vm1, %v1749_v61  ;;  %7207 = vmatprep.subr.bf16.mxu0 %v12512_v33  ;;  %v5828_v30 = vadd.f32 %v12665_v44, %v5827_v32  ;;  %v12666_v61 = vld [vmem:[#allocation133_spill] sm:$0xff]  ;;  %v12692_v33 = vld [vmem:[#allocation26_spill] sm:$0xff] }
 0x3a0   : > { %7027 = vmatprep.mubr.msk.f32.mxu0 %vm7478_vm9, %v12579_v55  ;;  %v5781_v24 = vadd.f32 %v12666_v61, %v5780_v59  ;;  %v12682_v32 = vld [vmem:[#allocation141_spill] sm:$0xff]  ;;  %v12683_v59 = vld [vmem:[#allocation142_spill] sm:$0xff] }
 0x3a3   : > { %7028 = vmatmul.mubr.msk.f32.gmra.mrb[2].mxu0 %vm1758_vm1, %v1750_v8  ;;  %v12667_v8 = vld [vmem:[#allocation134_spill] sm:$0xff] }
 0x3a4   : > { %7030 = vmatprep.mubr.msk.f32.mxu0 %vm7478_vm9, %v12579_v55 }
 0x3a7   : > { %7031 = vmatmul.mubr.msk.f32.gmra.mrb[4].mxu0 %vm1758_vm1, %v1751_v49  ;;  %v5829_v49 = vadd.f32 %v12667_v8, %v5828_v30 }
 0x3a8   : > { %7033 = vmatprep.mubr.msk.f32.mxu0 %vm7478_vm9, %v12579_v55 }
 0x3ab   : > { %7034 = vmatmul.mubr.msk.f32.gmra.mrb[6].mxu0 %vm1758_vm1, %v1752_v21  ;;  %v3929_v21 = vld [vmem:[%s11608_s7 + $0x18] sm:$0xff] }
 0x3ac   : > { %7036 = vmatprep.mubr.msk.f32.mxu0 %vm7478_vm9, %v12579_v55 }
 0x3af   : > { %7037 = vmatmul.mubr.msk.f32.gmra.mrb[8].mxu0 %vm1758_vm1, %v1753_v14  ;;  %v12668_v14 = vld [vmem:[#allocation135_spill] sm:$0xff] }
 0x3b0   : > { %7039 = vmatprep.mubr.msk.f32.mxu0 %vm7478_vm9, %v12579_v55 }
 0x3b3   : > { %7040 = vmatmul.mubr.msk.f32.gmra.mrb[10].mxu0 %vm1758_vm1, %v1754_v16  ;;  %v5782_v16 = vadd.f32 %v12668_v14, %v5781_v24 }
 0x3b4   : > { %7042 = vmatprep.mubr.msk.f32.mxu0 %vm7478_vm9, %v12579_v55 }
 0x3b7   : > { %7043 = vmatmul.mubr.msk.f32.gmra.mrb[12].mxu0 %vm1758_vm1, %v1755_v3  ;;  %v12669_v3 = vld [vmem:[#allocation136_spill] sm:$0xff] }
 0x3b8   : > { %7131 = vmatprep.mubr.msk.f32.mxu0 %vm7478_vm9, %v12579_v55 }
 0x3f9   : > { %v7097_v25 = vpop.f32.mrb[8].mxu1 }
 0x3fa   : > { %v6416_v13 = vmul.f32 -1.442695, %v7097_v25  ;;  %v3905_v27 = vpop.f32.mrb[9].mxu1  ;;  %v5830_v25 = vadd.f32 %v12669_v3, %v5829_v49  ;;  %v12685_v49 = vld [vmem:[#allocation19_spill] sm:$0xff] }
 0x3fb   : > { %v6415_v9 = vmul.f32 -1.442695, %v3905_v27  ;;  %v12670_v27 = vld [vmem:[#allocation16_spill] sm:$0xff] }
 0x3fc   : > { %7285 = vpow2.f32 %v6416_v13  ;;  %v3930_v13 = vld [vmem:[%s11608_s7 + $0x20] sm:$0xff] }
 0x3fd   : > { %7287 = vpow2.f32 %v6415_v9  ;;  %v12671_v9 = vld [vmem:[#allocation22_spill] sm:$0xff] }
 0x3fe   : > { %v5871_v0 = vadd.f32 %v12671_v9, %v12670_v27  ;;  %v12709_v9 = vld [vmem:[#allocation37_spill] sm:$0xff] }
 0x3ff   : > { %v12714_v27 = vld [vmem:[#allocation157_spill] sm:$0xff] }
 0x400   : > { %v5872_v4 = vadd.f32 %v12676_v41, %v5871_v0  ;;  %v12710_v41 = vld [vmem:[#allocation155_spill] sm:$0xff] }
 0x402   : > { %v5873_v43 = vadd.f32 %v12680_v36, %v5872_v4  ;;  %v12690_v4 = vld [vmem:[#allocation145_spill] sm:$0xff]  ;;  %v12705_v36 = vld [vmem:[#allocation35_spill] sm:$0xff] }
 0x406   : > { %v7286_v42 = vpop.eup %7285 }
 0x407   : > { %v7288_v52 = vpop.eup %7287  ;;  %v3921_v15 = vadd.f32 1.0, %v7286_v42  ;;  %v5919_v42 = vadd.f32 %v12673_v38, %v12672_v48  ;;  %v12706_v38 = vld [vmem:[#allocation153_spill] sm:$0xff]  ;;  %v12713_v48 = vld [vmem:[#allocation39_spill] sm:$0xff] }
 0x408   : > { %v3920_v57 = vadd.f32 1.0, %v7288_v52  ;;  %v12674_v52 = vld [vmem:[#allocation137_spill] sm:$0xff] }
 0x409   : > { %7289 = vrcp.f32 %v3921_v15  ;;  %v5783_v1 = vadd.f32 %v12674_v52, %v5782_v16  ;;  %v12675_v15 = vld [vmem:[#allocation138_spill] sm:$0xff]  ;;  %v5920_v17 = vadd.f32 %v12677_v60, %v5919_v42  ;;  %v12686_v16 = vld [vmem:[#allocation143_spill] sm:$0xff]  ;;  %v12688_v42 = vld [vmem:[#allocation20_spill] sm:$0xff] }
 0x40a   : > { %7291 = vrcp.f32 %v3920_v57  ;;  %v5831_v57 = vadd.f32 %v12675_v15, %v5830_v25  ;;  %v12702_v60 = vld [vmem:[#allocation151_spill] sm:$0xff] }
 0x413   : > { %v7290_v62 = vpop.eup %7289 }
 0x414   : > { %v7292_v47 = vpop.eup %7291 }
 0x415   : > { %v7204_v7 = vpack.c.bf16 %v7290_v62, %v7292_v47  ;;  %v12678_v62 = vld [vmem:[#allocation139_spill] sm:$0xff]  ;;  %v12679_v47 = vld [vmem:[#allocation140_spill] sm:$0xff] }
 0x416   : > { %v5784_v40 = vadd.f32 %v12678_v62, %v5783_v1  ;;  %v5832_v20 = vadd.f32 %v12679_v47, %v5831_v57  ;;  %v12689_v57 = vld [vmem:[#allocation21_spill] sm:$0xff] }
 0x417   : > { %7206 = vmatpush3.bf16.msk.msra.mxu1 %vm8452_vm12, %v7204_v7  ;;  %v3932_v7 = vld [vmem:[%s11608_s7 + $0x30] sm:$0x1] }
 0x418   : > { %v5833_v30 = vadd.f32 %v12683_v59, %v5832_v20 }
 0x41a   : > { %7103 = vmatmul.mubr.msk.f32.vlgmr.msra.gmra.mrb[10].mxu1 %vm3676_vm13, %v3926_v45  ;;  %v12681_v45 = vld [vmem:[#allocation29_spill] sm:$0xff] }
 0x41b   : > { %7105 = vmatprep.mubr.msk.f32.mxu1 %vm7478_vm9, %v12579_v55  ;;  %v5921_v5 = vadd.f32 %v12681_v45, %v5920_v17  ;;  %v12701_v45 = vld [vmem:[#allocation33_spill] sm:$0xff] }
 0x41e   : > { %7106 = vmatmul.mubr.msk.f32.gmra.mrb[12].mxu1 %vm3676_vm13, %v3927_v11  ;;  %v5785_v11 = vadd.f32 %v12682_v32, %v5784_v40 }
 0x41f   : > { %7108 = vmatprep.mubr.msk.f32.mxu1 %vm7478_vm9, %v12579_v55 }
 0x420   : > { %v5786_v25 = vadd.f32 %v12686_v16, %v5785_v11 }
 0x422   : > { %7109 = vmatmul.mubr.msk.f32.gmra.mrb[14].mxu1 %vm3676_vm13, %v3928_v35  ;;  %v12684_v35 = vld [vmem:[#allocation18_spill] sm:$0xff]  ;;  %v5787_v17 = vadd.f32 %v12690_v4, %v5786_v25 }
 0x423   : > { %7111 = vmatprep.mubr.msk.f32.mxu1 %vm7478_vm9, %v12579_v55  ;;  %v5874_v24 = vadd.f32 %v12684_v35, %v5873_v43  ;;  %v12698_v35 = vld [vmem:[#allocation149_spill] sm:$0xff] }
 0x424   : > { %v5788_v43 = vadd.f32 %v12694_v51, %v5787_v17 }
 0x425   : > { %v5875_v1 = vadd.f32 %v12688_v42, %v5874_v24  ;;  %v12699_v42 = vld [vmem:[#allocation150_spill] sm:$0xff] }
 0x426   : > { %7112 = vmatmul.mubr.msk.f32.gmra.mrb[16].mxu1 %vm3676_vm13, %v3929_v21  ;;  %v5922_v21 = vadd.f32 %v12685_v49, %v5921_v5  ;;  %v12697_v49 = vld [vmem:[#allocation31_spill] sm:$0xff]  ;;  %v5789_v24 = vadd.f32 %v12698_v35, %v5788_v43 }
 0x427   : > { %7114 = vmatprep.mubr.msk.f32.mxu1 %vm7478_vm9, %v12579_v55 }
 0x42a   : > { %7115 = vmatmul.mubr.msk.f32.gmra.mrb[18].mxu1 %vm3676_vm13, %v3930_v13  ;;  %v12687_v13 = vld [vmem:[#allocation144_spill] sm:$0xff] }
 0x42b   : > { %7117 = vmatprep.mubr.msk.f32.mxu1 %vm7478_vm9, %v12579_v55  ;;  %v5834_v0 = vadd.f32 %v12687_v13, %v5833_v30 }
 0x42e   : > { %7118 = vmatmul.mubr.msk.f32.gmra.mrb[20].mxu1 %vm3676_vm13, %v3931_v34  ;;  %v5923_v34 = vadd.f32 %v12689_v57, %v5922_v21  ;;  %v12700_v57 = vld [vmem:[#allocation32_spill] sm:$0xff] }
 0x42f   : > { %7120 = vmatprep.mubr.msk.f32.mxu1 %vm7478_vm9, %v12579_v55  ;;  %v12691_v55 = vld [vmem:[#allocation146_spill] sm:$0xff] }
 0x430   : > { %v5835_v40 = vadd.f32 %v12691_v55, %v5834_v0  ;;  %v5924_v20 = vadd.f32 %v12693_v56, %v5923_v34  ;;  %v12704_v56 = vld [vmem:[#allocation34_spill] sm:$0xff] }
 0x432   : > { %7121 = vmatmul.mubr.msk.f32.gmra.mrb[22].mxu1 %vm3676_vm13, %v3932_v7  ;;  %v5876_v7 = vadd.f32 %v12692_v33, %v5875_v1  ;;  %v5836_v5 = vadd.f32 %v12695_v10, %v5835_v40  ;;  %v5925_v30 = vadd.f32 %v12697_v49, %v5924_v20  ;;  %v5790_v1 = vadd.f32 %v12702_v60, %v5789_v24  ;;  %v12703_v33 = vld [vmem:[#allocation152_spill] sm:$0xff]  ;;  %v12788_v60 = vld [vmem:[#allocation77_spill] sm:$0xff] }
 0x433   : > { %v12708_v49 = vld [vmem:[#allocation36_spill] sm:$0xff] }
 0x434   : > { %v5877_v11 = vadd.f32 %v12696_v26, %v5876_v7  ;;  %v5837_v21 = vadd.f32 %v12699_v42, %v5836_v5  ;;  %v5926_v0 = vadd.f32 %v12701_v45, %v5925_v30  ;;  %v5791_v7 = vadd.f32 %v12706_v38, %v5790_v1  ;;  %v12707_v26 = vld [vmem:[#allocation154_spill] sm:$0xff]  ;;  %v12717_v38 = vld [vmem:[#allocation41_spill] sm:$0xff] }
 0x435   : > { %v12712_v45 = vld [vmem:[#allocation38_spill] sm:$0xff] }
 0x436   : > { %v5878_v25 = vadd.f32 %v12700_v57, %v5877_v11  ;;  %v5838_v34 = vadd.f32 %v12703_v33, %v5837_v21  ;;  %v5927_v40 = vadd.f32 %v12705_v36, %v5926_v0  ;;  %v5792_v11 = vadd.f32 %v12710_v41, %v5791_v7  ;;  %v12711_v57 = vld [vmem:[#allocation156_spill] sm:$0xff]  ;;  %v12721_v41 = vld [vmem:[#allocation43_spill] sm:$0xff] }
 0x437   : > { %v12716_v36 = vld [vmem:[#allocation40_spill] sm:$0xff] }
 0x438   : > { %v5879_v17 = vadd.f32 %v12704_v56, %v5878_v25  ;;  %v5839_v20 = vadd.f32 %v12707_v26, %v5838_v34  ;;  %v5928_v5 = vadd.f32 %v12709_v9, %v5927_v40  ;;  %v5793_v25 = vadd.f32 %v12714_v27, %v5792_v11  ;;  %v12715_v56 = vld [vmem:[#allocation158_spill] sm:$0xff]  ;;  %v12718_v26 = vld [vmem:[#allocation159_spill] sm:$0xff]  ;;  %v12725_v27 = vld [vmem:[#allocation45_spill] sm:$0xff] }
 0x439   : > { %v12720_v9 = vld [vmem:[#allocation42_spill] sm:$0xff] }
 0x43a   : > { %v5880_v43 = vadd.f32 %v12708_v49, %v5879_v17  ;;  %v5840_v30 = vadd.f32 %v12711_v57, %v5839_v20  ;;  %v5929_v21 = vadd.f32 %v12713_v48, %v5928_v5  ;;  %v5794_v17 = vadd.f32 %v12718_v26, %v5793_v25  ;;  %v12719_v49 = vld [vmem:[#allocation160_spill] sm:$0xff]  ;;  %v12722_v57 = vld [vmem:[#allocation161_spill] sm:$0xff]  ;;  %v12729_v26 = vld [vmem:[#allocation47_spill] sm:$0xff] }
 0x43b   : > { %v12724_v48 = vld [vmem:[#allocation44_spill] sm:$0xff] }
 0x43c   : > { %v5881_v24 = vadd.f32 %v12712_v45, %v5880_v43  ;;  %v5841_v0 = vadd.f32 %v12715_v56, %v5840_v30  ;;  %v5930_v34 = vadd.f32 %v12717_v38, %v5929_v21  ;;  %v5795_v43 = vadd.f32 %v12722_v57, %v5794_v17  ;;  %v12723_v45 = vld [vmem:[#allocation162_spill] sm:$0xff]  ;;  %v12726_v56 = vld [vmem:[#allocation163_spill] sm:$0xff]  ;;  %v12733_v57 = vld [vmem:[#allocation49_spill] sm:$0xff] }
 0x43d   : > { %v12728_v38 = vld [vmem:[#allocation46_spill] sm:$0xff] }
 0x43e   : > { %v5882_v1 = vadd.f32 %v12716_v36, %v5881_v24  ;;  %v5842_v40 = vadd.f32 %v12719_v49, %v5841_v0  ;;  %v5931_v20 = vadd.f32 %v12721_v41, %v5930_v34  ;;  %v5796_v24 = vadd.f32 %v12726_v56, %v5795_v43  ;;  %v12727_v36 = vld [vmem:[#allocation164_spill] sm:$0xff]  ;;  %v12730_v49 = vld [vmem:[#allocation165_spill] sm:$0xff]  ;;  %v12737_v56 = vld [vmem:[#allocation51_spill] sm:$0xff] }
 0x43f   : > { %v12732_v41 = vld [vmem:[#allocation48_spill] sm:$0xff] }
 0x440   : > { %v5883_v7 = vadd.f32 %v12720_v9, %v5882_v1  ;;  %v5843_v5 = vadd.f32 %v12723_v45, %v5842_v40  ;;  %v5932_v30 = vadd.f32 %v12725_v27, %v5931_v20  ;;  %v5797_v1 = vadd.f32 %v12730_v49, %v5796_v24  ;;  %v12731_v9 = vld [vmem:[#allocation166_spill] sm:$0xff]  ;;  %v12734_v45 = vld [vmem:[#allocation167_spill] sm:$0xff]  ;;  %v12741_v49 = vld [vmem:[#allocation53_spill] sm:$0xff] }
 0x441   : > { %v12736_v27 = vld [vmem:[#allocation50_spill] sm:$0xff] }
 0x442   : > { %v5884_v11 = vadd.f32 %v12724_v48, %v5883_v7  ;;  %v5844_v21 = vadd.f32 %v12727_v36, %v5843_v5  ;;  %v5933_v0 = vadd.f32 %v12729_v26, %v5932_v30  ;;  %v5798_v7 = vadd.f32 %v12734_v45, %v5797_v1  ;;  %v12735_v48 = vld [vmem:[#allocation168_spill] sm:$0xff]  ;;  %v12738_v36 = vld [vmem:[#allocation169_spill] sm:$0xff]  ;;  %v12745_v45 = vld [vmem:[#allocation55_spill] sm:$0xff] }
 0x443   : > { %v12740_v26 = vld [vmem:[#allocation52_spill] sm:$0xff] }
 0x444   : > { %v5885_v25 = vadd.f32 %v12728_v38, %v5884_v11  ;;  %v5845_v34 = vadd.f32 %v12731_v9, %v5844_v21  ;;  %v5934_v40 = vadd.f32 %v12733_v57, %v5933_v0  ;;  %v5799_v11 = vadd.f32 %v12738_v36, %v5798_v7  ;;  %v12739_v38 = vld [vmem:[#allocation170_spill] sm:$0xff]  ;;  %v12742_v9 = vld [vmem:[#allocation171_spill] sm:$0xff]  ;;  %v12749_v36 = vld [vmem:[#allocation57_spill] sm:$0xff] }
 0x445   : > { %v12744_v57 = vld [vmem:[#allocation54_spill] sm:$0xff] }
 0x446   : > { %v5886_v17 = vadd.f32 %v12732_v41, %v5885_v25  ;;  %v5846_v20 = vadd.f32 %v12735_v48, %v5845_v34  ;;  %v5935_v5 = vadd.f32 %v12737_v56, %v5934_v40  ;;  %v5800_v25 = vadd.f32 %v12742_v9, %v5799_v11  ;;  %v12743_v41 = vld [vmem:[#allocation172_spill] sm:$0xff]  ;;  %v12746_v48 = vld [vmem:[#allocation173_spill] sm:$0xff]  ;;  %v12752_v11 = vld [vmem:[#allocation58_spill] sm:$0xff] }
 0x447   : > { %v12748_v56 = vld [vmem:[#allocation56_spill] sm:$0xff] }
 0x448   : > { %v5887_v43 = vadd.f32 %v12736_v27, %v5886_v17  ;;  %v5847_v30 = vadd.f32 %v12739_v38, %v5846_v20  ;;  %v5936_v21 = vadd.f32 %v12741_v49, %v5935_v5  ;;  %v5801_v17 = vadd.f32 %v12746_v48, %v5800_v25  ;;  %v12747_v27 = vld [vmem:[#allocation174_spill] sm:$0xff]  ;;  %v12750_v38 = vld [vmem:[#allocation175_spill] sm:$0xff]  ;;  %v12755_v25 = vld [vmem:[#allocation60_spill] sm:$0xff] }
 0x44a   : > { %v5888_v24 = vadd.f32 %v12740_v26, %v5887_v43  ;;  %v5848_v0 = vadd.f32 %v12743_v41, %v5847_v30  ;;  %v5937_v34 = vadd.f32 %v12745_v45, %v5936_v21  ;;  %v5802_v43 = vadd.f32 %v12750_v38, %v5801_v17  ;;  %v12751_v26 = vld [vmem:[#allocation176_spill] sm:$0xff]  ;;  %v12753_v30 = vld [vmem:[#allocation59_spill] sm:$0xff]  ;;  %v12754_v21 = vld [vmem:[#allocation178_spill] sm:$0xff] }
 0x44b   : > { %v9289_v17 = vstv %s1756_s19  ;;  %v12760_v38 = vld [vmem:[#allocation63_spill] sm:$0xff]  ;;  %s11554_s19 = scalar_lea.hbm %s11611_s10, %s6436_s0 }
 0x44c   : > { %v5889_v1 = vadd.f32 %v12744_v57, %v5888_v24  ;;  %v5849_v40 = vadd.f32 %v12747_v27, %v5848_v0  ;;  %v5938_v20 = vadd.f32 %v12749_v36, %v5937_v34  ;;  %v5803_v24 = vadd.f32 %v12632_v29, %v5802_v43  ;;  %v12756_v0 = vld [vmem:[#allocation61_spill] sm:$0xff]  ;;  %v12758_v34 = vld [vmem:[#allocation180_spill] sm:$0xff] }
 0x44e   : > { %v5890_v7 = vadd.f32 %v12748_v56, %v5889_v1  ;;  %v5850_v5 = vadd.f32 %v12751_v26, %v5849_v40  ;;  %v5939_v41 = vadd.f32 %v12753_v30, %v5938_v20  ;;  %v12757_v1 = vld [vmem:[#allocation179_spill] sm:$0xff]  ;;  %v12759_v40 = vld [vmem:[#allocation62_spill] sm:$0xff] }
 0x44f   : > { %v5804_v56 = vadd.f32 %v12757_v1, %v5803_v24  ;;  %v12764_v24 = vld [vmem:[#allocation65_spill] sm:$0xff] }
 0x450   : > { %v5891_v49 = vadd.f32 %v12752_v11, %v5890_v7  ;;  %v5851_v45 = vadd.f32 %v12754_v21, %v5850_v5  ;;  %v5940_v27 = vadd.f32 %v12756_v0, %v5939_v41  ;;  %v12761_v11 = vld [vmem:[#allocation181_spill] sm:$0xff]  ;;  %v12762_v21 = vld [vmem:[#allocation182_spill] sm:$0xff]  ;;  %v12763_v41 = vld [vmem:[#allocation64_spill] sm:$0xff] }
 0x451   : > { %v5805_v20 = vadd.f32 %v12761_v11, %v5804_v56  ;;  %v12767_v11 = vld [vmem:[#allocation66_spill] sm:$0xff] }
 0x452   : > { %v5892_v57 = vadd.f32 %v12755_v25, %v5891_v49  ;;  %v5852_v36 = vadd.f32 %v12758_v34, %v5851_v45  ;;  %v5941_v7 = vadd.f32 %v12760_v38, %v5940_v27  ;;  %v12765_v45 = vld [vmem:[#allocation183_spill] sm:$0xff]  ;;  %v12766_v38 = vld [vmem:[#allocation184_spill] sm:$0xff] }
 0x453   : > { %v5806_v34 = vadd.f32 %v12765_v45, %v5805_v20  ;;  %v12770_v20 = vld [vmem:[#allocation186_spill] sm:$0xff] }
 0x454   : > { %v5893_v26 = vadd.f32 %v12759_v40, %v5892_v57  ;;  %v5853_v49 = vadd.f32 %v12762_v21, %v5852_v36  ;;  %v5942_v1 = vadd.f32 %v12764_v24, %v5941_v7  ;;  %v12769_v36 = vld [vmem:[#allocation185_spill] sm:$0xff] }
 0x456   : > { %v5894_v0 = vadd.f32 %v12763_v41, %v5893_v26  ;;  %v5854_v56 = vadd.f32 %v12766_v38, %v5853_v49  ;;  %v12771_v41 = vld [vmem:[#allocation68_spill] sm:$0xff]  ;;  %v12773_v49 = vld [vmem:[#allocation187_spill] sm:$0xff] }
 0x458   : > { %v5855_v24 = vadd.f32 %v12770_v20, %v5854_v56 }
 0x472   : > { %v1849_v30 = vpop.f32.mrb[0].mxu0 }
 0x473   : > { %v1850_v43 = vadd.f32 %v1849_v30, %v9289_v17  ;;  %v7026_v5 = vpop.f32.mrb[1].mxu0  ;;  %v5895_v30 = vadd.f32 %v12767_v11, %v5894_v0 }
 0x474   : > { %v12768_v5 = vld [vmem:[#allocation67_spill] sm:$0xff] }
 0x475   : > { %v6396_v25 = vmul.f32 -1.442695, %v1850_v43  ;;  %v5943_v48 = vadd.f32 %v12768_v5, %v5942_v1  ;;  %v5807_v43 = vadd.f32 %v12769_v36, %v5806_v34  ;;  %v12774_v5 = vld [vmem:[#allocation188_spill] sm:$0xff]  ;;  %v12776_v36 = vld [vmem:[#allocation71_spill] sm:$0xff] }
 0x476   : > { %v1854_v29 = vpop.f32.mrb[2].mxu0  ;;  %v5856_v34 = vadd.f32 %v12774_v5, %v5855_v24  ;;  %v12779_v5 = vld [vmem:[#allocation72_spill] sm:$0xff] }
 0x477   : > { %7293 = vpow2.f32 %v6396_v25  ;;  %v1855_v57 = vadd.f32 %v1854_v29, %v9289_v17  ;;  %v7029_v27 = vpop.f32.mrb[3].mxu0  ;;  %v5896_v29 = vadd.f32 %v12771_v41, %v5895_v30 }
 0x478   : > { %v12772_v27 = vld [vmem:[#allocation69_spill] sm:$0xff] }
 0x479   : > { %v6397_v40 = vmul.f32 -1.442695, %v1855_v57  ;;  %v5944_v45 = vadd.f32 %v12772_v27, %v5943_v48  ;;  %v5808_v57 = vadd.f32 %v12773_v49, %v5807_v43  ;;  %v7481_v48 = vmov 1966171168   ;;  %v12778_v49 = vld [vmem:[#allocation190_spill] sm:$0xff] }
 0x47a   : > { %v1859_v21 = vpop.f32.mrb[4].mxu0  ;;  %v1934_v27 = vunpack.c.l.s4 %v7481_v48  ;;  %v1936_v43 = vlaneseq  ;;  %v5857_v24 = vadd.f32 %v12778_v49, %v5856_v34  ;;  %v12784_v49 = vld [vmem:[#allocation75_spill] sm:$0xff] }
 0x47b   : > { %7295 = vpow2.f32 %v6397_v40  ;;  %v1860_v26 = vadd.f32 %v1859_v21, %v9289_v17  ;;  %v7032_v7 = vpop.f32.mrb[5].mxu0  ;;  %v12775_v21 = vld [vmem:[#allocation70_spill] sm:$0xff]  ;;  %v5945_v56 = vadd.f32 %v12776_v36, %v5944_v45  ;;  %v12781_v36 = vld [vmem:[#allocation191_spill] sm:$0xff] }
 0x47c   : > { %v5897_v7 = vadd.f32 %v12775_v21, %v5896_v29  ;;  %v12780_v21 = vld [vmem:[#allocation73_spill] sm:$0xff]  ;;  %v1935_v9 = vunpack.c.0.s8 %v1934_v27  ;;  %v1937_v48 = vshrl.u32 %v1936_v43, 7 }
 0x47d   : > { %v6398_v25 = vmul.f32 -1.442695, %v1860_v26  ;;  %v12777_v26 = vld [vmem:[#allocation189_spill] sm:$0xff]  ;;  %v5946_v45 = vadd.f32 %v12780_v21, %v5945_v56 }
 0x47e   : > { %v1864_v38 = vpop.f32.mrb[6].mxu0  ;;  %v5809_v20 = vadd.f32 %v12777_v26, %v5808_v57  ;;  %v5898_v29 = vadd.f32 %v12779_v5, %v5897_v7  ;;  %v12785_v5 = vld [vmem:[#allocation193_spill] sm:$0xff] }
 0x47f   : > { %v1865_v0 = vadd.f32 %v1864_v38, %v9289_v17  ;;  %v7035_v1 = vpop.f32.mrb[7].mxu0  ;;  %7297 = vpow2.f32 %v6398_v25  ;;  %v5947_v7 = vadd.f32 %v12784_v49, %v5946_v45 }
 0x480   : > { %v5810_v57 = vadd.f32 %v12781_v36, %v5809_v20  ;;  %v9324_v20 = vsub.s32 %v1935_v9, %v1937_v48 }
 0x481   : > { %v7294_v40 = vpop.eup %7293  ;;  %v6399_v11 = vmul.f32 -1.442695, %v1865_v0 }
 0x482   : > { %v1904_v30 = vadd.f32 1.0, %v7294_v40  ;;  %v1869_v41 = vpop.f32.mrb[8].mxu0  ;;  %v5811_v56 = vadd.f32 %v12785_v5, %v5810_v57  ;;  %v12790_v5 = vld [vmem:[#allocation196_spill] sm:$0xff] }
 0x483   : > { %7299 = vpow2.f32 %v6399_v11  ;;  %v1870_v38 = vadd.f32 %v1869_v41, %v9289_v17  ;;  %v7038_v1 = vpop.f32.mrb[9].mxu0 }
 0x484   : > { %7301 = vrcp.f32 %v1904_v30  ;;  %v12782_v1 = vld [vmem:[#allocation192_spill] sm:$0xff]  ;;  %v12783_v30 = vld [vmem:[#allocation74_spill] sm:$0xff] }
 0x485   : > { %v7296_v25 = vpop.eup %7295  ;;  %v6400_v0 = vmul.f32 -1.442695, %v1870_v38  ;;  %v5858_v33 = vadd.f32 %v12782_v1, %v5857_v24  ;;  %v5899_v38 = vadd.f32 %v12783_v30, %v5898_v29  ;;  %v5948_v29 = vadd.f32 %v12788_v60, %v5947_v7  ;;  %v12789_v30 = vld [vmem:[#allocation195_spill] sm:$0xff]  ;;  %v12791_v7 = vld [vmem:[#allocation78_spill] sm:$0xff] }
 0x486   : > { %v1905_v40 = vadd.f32 1.0, %v7296_v25  ;;  %v1874_v26 = vpop.f32.mrb[10].mxu0  ;;  %v12786_v25 = vld [vmem:[#allocation194_spill] sm:$0xff]  ;;  %v5812_v45 = vadd.f32 %v12789_v30, %v5811_v56  ;;  %v12792_v56 = vld [vmem:[#allocation79_spill] sm:$0xff] }
 0x487   : > { %7303 = vpow2.f32 %v6400_v0  ;;  %v1875_v11 = vadd.f32 %v1874_v26, %v9289_v17  ;;  %v7041_v41 = vpop.f32.mrb[11].mxu0  ;;  %v5859_v0 = vadd.f32 %v12786_v25, %v5858_v33 }
 0x488   : > { %7305 = vrcp.f32 %v1905_v40  ;;  %v12787_v40 = vld [vmem:[#allocation76_spill] sm:$0xff] }
 0x489   : > { %v7298_v34 = vpop.eup %7297  ;;  %v6401_v26 = vmul.f32 -1.442695, %v1875_v11  ;;  %v5900_v1 = vadd.f32 %v12787_v40, %v5899_v38  ;;  %v5860_v42 = vadd.f32 %v12790_v5, %v5859_v0  ;;  %v12795_v40 = vld [vmem:[#allocation198_spill] sm:$0xff] }
 0x48a   : > { %v1879_v21 = vpop.f32.mrb[12].mxu0  ;;  %v1906_v36 = vadd.f32 1.0, %v7298_v34 }
 0x48b   : > { %v1880_v27 = vadd.f32 %v1879_v21, %v9289_v17  ;;  %v7044_v43 = vpop.f32.mrb[13].mxu0  ;;  %v9333_v17 = vsub.s32 0, %v1937_v48  ;;  %7307 = vpow2.f32 %v6401_v26 }
 0x48c   : > { %7309 = vrcp.f32 %v1906_v36  ;;  %v9338_v43 = vadd.f32 %v12791_v7, %v5900_v1 }
 0x48d   : > { %v7300_v41 = vpop.eup %7299  ;;  %v6402_v49 = vmul.f32 -1.442695, %v1880_v27  ;;  %v9341_v27 = vadd.f32 %v12792_v56, %v5948_v29 }
 0x48e   : > { %v7302_v24 = vpop.eup %7301  ;;  %v1907_v21 = vadd.f32 1.0, %v7300_v41 }
 0x48f   : > { %v1932_v57 = vcombine.high %v7302_v24, %v7302_v24  ;;  %v1939_v9 = vrot.slane %v7302_v24, %v9324_v20  ;;  %v12793_v24 = vld [vmem:[#allocation197_spill] sm:$0xff]  ;;  %7311 = vpow2.f32 %v6402_v49 }
 0x490   : > { %v9344_v60 = vadd.f32 %v12793_v24, %v5812_v45  ;;  %7313 = vrcp.f32 %v1907_v21 }
 0x491   : > { %v7304_v33 = vpop.eup %7303  ;;  %v1946_v11 = vrot.slane %v1932_v57, %v9324_v20  ;;  %v1947_v34 = vcombine.high %v1939_v9, %v1939_v9  ;;  %v1955_v38 = vrot.slane %v1939_v9, %v9324_v20  ;;  %v9349_v9 = vadd.f32 %v12795_v40, %v5860_v42 }
 0x492   : > { %12794 = vst [vmem:[#allocation114_spill] sm:$0xff] %v9344_v60  ;;  %v7306_v48 = vpop.eup %7305  ;;  %v1908_v1 = vadd.f32 1.0, %v7304_v33 }
 0x493   : > { %v1948_v0 = vcombine.high %v1946_v11, %v1946_v11  ;;  %v1962_v26 = vrot.slane %v1946_v11, %v9324_v20  ;;  %v1969_v41 = vrot.slane %v1947_v34, %v9324_v20  ;;  %v1977_v57 = vcombine.high %v1955_v38, %v1955_v38  ;;  %12796 = vst [vmem:[#allocation213_spill] sm:$0xff] %v9349_v9  ;;  %v12976_v9 = vld [vmem:[#allocation37_spill] sm:$0xff] }
 0x494   : > { %v2243_v36 = vrot.slane %v1955_v38, %v9333_v17  ;;  %v1981_v24 = vcombine.high %v7306_v48, %v7306_v48  ;;  %v1988_v34 = vrot.slane %v7306_v48, %v9324_v20  ;;  %7315 = vrcp.f32 %v1908_v1 }
 0x495   : > { %v1976_v29 = vrot.slane %v1948_v0, %v9324_v20  ;;  %v1978_v56 = vcombine.high %v1962_v26, %v1962_v26  ;;  %v1979_v45 = vcombine.high %v1969_v41, %v1969_v41  ;;  %v2247_v49 = vrot.slane %v1969_v41, %v9333_v17 }
 0x496   : > { %v2251_v60 = vrot.slane %v1977_v57, %v9333_v17  ;;  %v2259_v11 = vrot.slane %v1962_v26, %v9333_v17  ;;  %v9361_v33 = vmul.f32 %v8477_v53, %v2243_v36  ;;  %v9364_v0 = vmul.f32 %v8479_v54, %v2243_v36 }
 0x497   : > { %v1980_v7 = vcombine.high %v1976_v29, %v1976_v29  ;;  %v2255_v42 = vrot.slane %v1979_v45, %v9333_v17  ;;  %v2263_v38 = vrot.slane %v1976_v29, %v9333_v17  ;;  %v2267_v21 = vrot.slane %v1978_v56, %v9333_v17  ;;  %v9379_v29 = vpop.eup %7307 }
 0x498   : > { %12797 = vst [vmem:[#allocation214_spill] sm:$0xff] %v9361_v33  ;;  %12798 = vst [vmem:[#allocation215_spill] sm:$0xff] %v9364_v0  ;;  %v9367_v41 = vmul.f32 %v8483_v12, %v2247_v49  ;;  %v9371_v48 = vmul.f32 %v8485_v37, %v2247_v49  ;;  %v9374_v57 = vmul.f32 %v8487_v28, %v2251_v60  ;;  %v9393_v49 = vpop.eup %7309 }
 0x499   : > { %v2271_v26 = vrot.slane %v1980_v7, %v9333_v17  ;;  %v9377_v56 = vmul.f32 %v8489_v46, %v2251_v60  ;;  %v9382_v36 = vmul.f32 %v8493_v50, %v2255_v42  ;;  %v9385_v45 = vmul.f32 %v8495_v58, %v2255_v42  ;;  %v9406_v12 = vpop.eup %7311 }
 0x49a   : > { %12799 = vst [vmem:[#allocation216_spill] sm:$0xff] %v9367_v41  ;;  %12800 = vst [vmem:[#allocation217_spill] sm:$0xff] %v9371_v48  ;;  %v9388_v1 = vmul.f32 %v8497_v2, %v2259_v11  ;;  %v9391_v7 = vmul.f32 %v8499_v19, %v2259_v11  ;;  %v9396_v28 = vmul.f32 %v8503_v63, %v2263_v38 }
 0x49b   : > { %12801 = vst [vmem:[#allocation218_spill] sm:$0xff] %v9374_v57  ;;  %12802 = vst [vmem:[#allocation219_spill] sm:$0xff] %v9377_v56  ;;  %v9399_v60 = vmul.f32 %v8505_v23, %v2263_v38  ;;  %v9402_v50 = vmul.f32 %v12582_v6, %v2267_v21  ;;  %v4715_v42 = vmax.f32 %v9361_v33, %v9374_v57 }
 0x49c   : > { %12803 = vst [vmem:[#allocation220_spill] sm:$0xff] %v9382_v36  ;;  %12804 = vst [vmem:[#allocation221_spill] sm:$0xff] %v9385_v45  ;;  %v9409_v53 = vmul.f32 %v12583_v39, %v2267_v21  ;;  %v4716_v11 = vmax.f32 %v9367_v41, %v9382_v36  ;;  %v4763_v58 = vmax.f32 %v9364_v0, %v9377_v56  ;;  %v9423_v21 = vpop.eup %7313 }
 0x49d   : > { %12805 = vst [vmem:[#allocation222_spill] sm:$0xff] %v9388_v1  ;;  %12806 = vst [vmem:[#allocation223_spill] sm:$0xff] %v9391_v7  ;;  %v4907_v38 = vadd.f32 %v9367_v41, %v9361_v33  ;;  %v9418_v46 = vmul.f32 %v12584_v18, %v2271_v26  ;;  %v4955_v37 = vadd.f32 %v9371_v48, %v9364_v0 }
 0x49e   : > { %12807 = vst [vmem:[#allocation224_spill] sm:$0xff] %v9396_v28  ;;  %12808 = vst [vmem:[#allocation225_spill] sm:$0xff] %v9399_v60  ;;  %v1995_v54 = vrot.slane %v1981_v24, %v9324_v20  ;;  %v1996_v6 = vcombine.high %v1988_v34, %v1988_v34  ;;  %v9426_v63 = vmul.f32 %v12663_v31, %v2271_v26 }
 0x49f   : > { %12809 = vst [vmem:[#allocation226_spill] sm:$0xff] %v9402_v50  ;;  %12810 = vst [vmem:[#allocation227_spill] sm:$0xff] %v9409_v53  ;;  %v4717_v2 = vmax.f32 %v4715_v42, %v9388_v1  ;;  %v4764_v39 = vmax.f32 %v9371_v48, %v9385_v45  ;;  %v4908_v41 = vadd.f32 %v4907_v38, %v9374_v57 }
 0x4a0   : > { %12811 = vst [vmem:[#allocation228_spill] sm:$0xff] %v9418_v46  ;;  %12812 = vst [vmem:[#allocation229_spill] sm:$0xff] %v9426_v63  ;;  %v4956_v33 = vadd.f32 %v4955_v37, %v9377_v56  ;;  %v1997_v18 = vcombine.high %v1995_v54, %v1995_v54  ;;  %v2004_v0 = vrot.slane %v1988_v34, %v9324_v20  ;;  %v9441_v37 = vpop.eup %7315 }
 0x4a1   : > { %v2011_v24 = vrot.slane %v1995_v54, %v9324_v20  ;;  %v4718_v23 = vmax.f32 %v4716_v11, %v9396_v28  ;;  %v4765_v19 = vmax.f32 %v4763_v58, %v9391_v7  ;;  %v4909_v26 = vadd.f32 %v4908_v41, %v9382_v36 }
 0x4a2   : > { %v2018_v42 = vrot.slane %v1996_v6, %v9324_v20  ;;  %v4957_v31 = vadd.f32 %v4956_v33, %v9385_v45  ;;  %v2025_v48 = vrot.slane %v1997_v18, %v9324_v20  ;;  %v2026_v38 = vcombine.high %v2004_v0, %v2004_v0 }
 0x4a3   : > { %v2027_v57 = vcombine.high %v2011_v24, %v2011_v24  ;;  %v4910_v34 = vadd.f32 %v4909_v26, %v9388_v1  ;;  %v2275_v54 = vrot.slane %v2004_v0, %v9333_v17  ;;  %v4766_v58 = vmax.f32 %v4764_v39, %v9399_v60 }
 0x4a4   : > { %v2028_v56 = vcombine.high %v2018_v42, %v2018_v42  ;;  %v2279_v11 = vrot.slane %v2018_v42, %v9333_v17  ;;  %v4958_v41 = vadd.f32 %v4957_v31, %v9391_v7  ;;  %v2029_v6 = vcombine.high %v2025_v48, %v2025_v48  ;;  %v12950_v7 = vld [vmem:[#allocation19_spill] sm:$0xff] }
 0x4a5   : > { %v2283_v33 = vrot.slane %v2026_v38, %v9333_v17  ;;  %v2291_v36 = vrot.slane %v2011_v24, %v9333_v17  ;;  %v2295_v45 = vrot.slane %v2025_v48, %v9333_v17  ;;  %v4719_v26 = vmax.f32 %v4717_v2, %v9402_v50 }
 0x4a6   : > { %v2287_v18 = vrot.slane %v2028_v56, %v9333_v17  ;;  %v4911_v1 = vadd.f32 %v4910_v34, %v9396_v28  ;;  %v2299_v0 = vrot.slane %v2027_v57, %v9333_v17  ;;  %v9456_v42 = vmul.f32 %v12664_v22, %v2275_v54 }
 0x4a7   : > { %v4720_v39 = vmax.f32 %v4718_v23, %v9418_v46  ;;  %v4959_v31 = vadd.f32 %v4958_v41, %v9399_v60  ;;  %v2303_v38 = vrot.slane %v2029_v6, %v9333_v17  ;;  %v9462_v56 = vmul.f32 %v12665_v44, %v2275_v54 }
 0x4a8   : > { %12813 = vst [vmem:[#allocation230_spill] sm:$0xff] %v9456_v42  ;;  %v9465_v48 = vmul.f32 %v12666_v61, %v2279_v11  ;;  %v9468_v2 = vmul.f32 %v12667_v8, %v2279_v11  ;;  %v9471_v57 = vmul.f32 %v12668_v14, %v2283_v33  ;;  %v9474_v24 = vmul.f32 %v12669_v3, %v2283_v33 }
 0x4a9   : > { %12814 = vst [vmem:[#allocation231_spill] sm:$0xff] %v9462_v56  ;;  %v9477_v23 = vmul.f32 %v12674_v52, %v2287_v18  ;;  %v9480_v34 = vmul.f32 %v12675_v15, %v2287_v18  ;;  %v9483_v54 = vmul.f32 %v12678_v62, %v2291_v36  ;;  %v9486_v41 = vmul.f32 %v12679_v47, %v2291_v36 }
 0x4aa   : > { %12815 = vst [vmem:[#allocation232_spill] sm:$0xff] %v9465_v48  ;;  %12816 = vst [vmem:[#allocation233_spill] sm:$0xff] %v9468_v2  ;;  %v9489_v11 = vmul.f32 %v12682_v32, %v2295_v45  ;;  %v9492_v6 = vmul.f32 %v12683_v59, %v2295_v45  ;;  %v9495_v33 = vmul.f32 %v12686_v16, %v2299_v0 }
 0x4ab   : > { %12817 = vst [vmem:[#allocation234_spill] sm:$0xff] %v9471_v57  ;;  %12818 = vst [vmem:[#allocation235_spill] sm:$0xff] %v9474_v24  ;;  %v4721_v52 = vmax.f32 %v4719_v26, %v9456_v42  ;;  %v4722_v18 = vmax.f32 %v4720_v39, %v9465_v48  ;;  %v4767_v14 = vmax.f32 %v4765_v19, %v9409_v53 }
 0x4ac   : > { %12819 = vst [vmem:[#allocation236_spill] sm:$0xff] %v9477_v23  ;;  %12820 = vst [vmem:[#allocation237_spill] sm:$0xff] %v9480_v34  ;;  %v4768_v62 = vmax.f32 %v4766_v58, %v9426_v63  ;;  %v4912_v36 = vadd.f32 %v4911_v1, %v9402_v50  ;;  %v4960_v61 = vadd.f32 %v4959_v31, %v9409_v53 }
 0x4ad   : > { %12821 = vst [vmem:[#allocation238_spill] sm:$0xff] %v9483_v54  ;;  %12822 = vst [vmem:[#allocation239_spill] sm:$0xff] %v9486_v41  ;;  %v9504_v32 = vmul.f32 %v12687_v13, %v2299_v0  ;;  %v4723_v45 = vmax.f32 %v4721_v52, %v9471_v57  ;;  %v2030_v16 = vcombine.high %v9393_v49, %v9393_v49 }
 0x4ae   : > { %12823 = vst [vmem:[#allocation240_spill] sm:$0xff] %v9489_v11  ;;  %12824 = vst [vmem:[#allocation241_spill] sm:$0xff] %v9492_v6  ;;  %v2037_v26 = vrot.slane %v9393_v49, %v9324_v20  ;;  %v4769_v39 = vmax.f32 %v4767_v14, %v9462_v56  ;;  %v4770_v19 = vmax.f32 %v4768_v62, %v9468_v2 }
 0x4af   : > { %12825 = vst [vmem:[#allocation242_spill] sm:$0xff] %v9495_v33  ;;  %12826 = vst [vmem:[#allocation243_spill] sm:$0xff] %v9504_v32  ;;  %v4913_v58 = vadd.f32 %v4912_v36, %v9418_v46  ;;  %v4961_v1 = vadd.f32 %v4960_v61, %v9426_v63  ;;  %v9516_v31 = vmul.f32 %v12690_v4, %v2303_v38 }
 0x4b0   : > { %v9519_v0 = vmul.f32 %v12691_v55, %v2303_v38  ;;  %v2044_v52 = vrot.slane %v2030_v16, %v9324_v20  ;;  %v2045_v22 = vcombine.high %v2037_v26, %v2037_v26  ;;  %v4724_v13 = vmax.f32 %v4722_v18, %v9477_v23 }
 0x4b1   : > { %12827 = vst [vmem:[#allocation244_spill] sm:$0xff] %v9516_v31  ;;  %v4771_v49 = vmax.f32 %v4769_v39, %v9474_v24  ;;  %v4914_v14 = vadd.f32 %v4913_v58, %v9456_v42  ;;  %v4962_v62 = vadd.f32 %v4961_v1, %v9462_v56  ;;  %v2053_v61 = vrot.slane %v2037_v26, %v9324_v20  ;;  %v12936_v56 = vld [vmem:[#allocation22_spill] sm:$0xff] }
 0x4b2   : > { %12828 = vst [vmem:[#allocation245_spill] sm:$0xff] %v9519_v0  ;;  %v2046_v36 = vcombine.high %v2044_v52, %v2044_v52  ;;  %v2060_v4 = vrot.slane %v2044_v52, %v9324_v20  ;;  %v2067_v59 = vrot.slane %v2045_v22, %v9324_v20  ;;  %v4725_v38 = vmax.f32 %v4723_v45, %v9483_v54 }
 0x4b3   : > { %v4772_v16 = vmax.f32 %v4770_v19, %v9480_v34  ;;  %v4915_v55 = vadd.f32 %v4914_v14, %v9465_v48  ;;  %v4963_v18 = vadd.f32 %v4962_v62, %v9468_v2  ;;  %v2075_v58 = vcombine.high %v2053_v61, %v2053_v61 }
 0x4b4   : > { %v2074_v39 = vrot.slane %v2046_v36, %v9324_v20  ;;  %v2076_v42 = vcombine.high %v2060_v4, %v2060_v4  ;;  %v2077_v1 = vcombine.high %v2067_v59, %v2067_v59  ;;  %v4726_v47 = vmax.f32 %v4724_v13, %v9489_v11 }
 0x4b5   : > { %v4916_v26 = vadd.f32 %v4915_v55, %v9471_v57  ;;  %v4964_v52 = vadd.f32 %v4963_v18, %v9474_v24  ;;  %v2307_v22 = vrot.slane %v2053_v61, %v9333_v17  ;;  %v4773_v45 = vmax.f32 %v4771_v49, %v9486_v41 }
 0x4b6   : > { %v2078_v19 = vcombine.high %v2074_v39, %v2074_v39  ;;  %v2311_v14 = vrot.slane %v2067_v59, %v9333_v17  ;;  %v2315_v62 = vrot.slane %v2075_v58, %v9333_v17  ;;  %v4774_v36 = vmax.f32 %v4772_v16, %v9492_v6 }
 0x4b7   : > { %v4917_v48 = vadd.f32 %v4916_v26, %v9477_v23  ;;  %v4965_v46 = vadd.f32 %v4964_v52, %v9480_v34  ;;  %v2319_v13 = vrot.slane %v2077_v1, %v9333_v17  ;;  %v2323_v55 = vrot.slane %v2060_v4, %v9333_v17  ;;  %v12832_v4 = vld [vmem:[#allocation150_spill] sm:$0xff]  ;;  %v12930_v34 = vld [vmem:[#allocation16_spill] sm:$0xff] }
 0x4b8   : > { %v2327_v18 = vrot.slane %v2074_v39, %v9333_v17  ;;  %v2331_v61 = vrot.slane %v2076_v42, %v9333_v17  ;;  %v2335_v49 = vrot.slane %v2078_v19, %v9333_v17  ;;  %v9552_v16 = vmul.f32 %v12694_v51, %v2307_v22  ;;  %v12834_v39 = vld [vmem:[#allocation151_spill] sm:$0xff]  ;;  %v12836_v19 = vld [vmem:[#allocation152_spill] sm:$0xff]  ;;  %v12838_v51 = vld [vmem:[#allocation153_spill] sm:$0xff] }
 0x4b9   : > { %v4918_v59 = vadd.f32 %v4917_v48, %v9483_v54  ;;  %v4966_v58 = vadd.f32 %v4965_v46, %v9486_v41  ;;  %v9555_v26 = vmul.f32 %v12695_v10, %v2307_v22  ;;  %v9558_v1 = vmul.f32 %v12698_v35, %v2311_v14  ;;  %v12840_v22 = vld [vmem:[#allocation154_spill] sm:$0xff]  ;;  %v12842_v35 = vld [vmem:[#allocation155_spill] sm:$0xff] }
 0x4ba   : > { %12829 = vst [vmem:[#allocation246_spill] sm:$0xff] %v9552_v16  ;;  %v9561_v52 = vmul.f32 %v12832_v4, %v2311_v14  ;;  %v9564_v42 = vmul.f32 %v12834_v39, %v2315_v62  ;;  %v9567_v23 = vmul.f32 %v12836_v19, %v2315_v62  ;;  %v9572_v54 = vmul.f32 %v12838_v51, %v2319_v13  ;;  %v12844_v14 = vld [vmem:[#allocation156_spill] sm:$0xff]  ;;  %v12846_v39 = vld [vmem:[#allocation157_spill] sm:$0xff]  ;;  %v12848_v62 = vld [vmem:[#allocation158_spill] sm:$0xff] }
 0x4bb   : > { %12830 = vst [vmem:[#allocation247_spill] sm:$0xff] %v9555_v26  ;;  %12831 = vst [vmem:[#allocation248_spill] sm:$0xff] %v9558_v1  ;;  %v4919_v46 = vadd.f32 %v4918_v59, %v9489_v11  ;;  %v4967_v48 = vadd.f32 %v4966_v58, %v9492_v6  ;;  %v9575_v10 = vmul.f32 %v12840_v22, %v2319_v13  ;;  %v12850_v59 = vld [vmem:[#allocation159_spill] sm:$0xff] }
 0x4bc   : > { %12833 = vst [vmem:[#allocation249_spill] sm:$0xff] %v9561_v52  ;;  %12835 = vst [vmem:[#allocation250_spill] sm:$0xff] %v9564_v42  ;;  %v9578_v57 = vmul.f32 %v12842_v35, %v2323_v55  ;;  %v9581_v4 = vmul.f32 %v12844_v14, %v2323_v55  ;;  %v9584_v15 = vmul.f32 %v12846_v39, %v2327_v18 }
 0x4bd   : > { %12837 = vst [vmem:[#allocation251_spill] sm:$0xff] %v9567_v23  ;;  %12839 = vst [vmem:[#allocation252_spill] sm:$0xff] %v9572_v54  ;;  %v9587_v19 = vmul.f32 %v12848_v62, %v2327_v18  ;;  %v9590_v58 = vmul.f32 %v12850_v59, %v2331_v61  ;;  %v4727_v51 = vmax.f32 %v4725_v38, %v9495_v33 }
 0x4be   : > { %12841 = vst [vmem:[#allocation253_spill] sm:$0xff] %v9575_v10  ;;  %12843 = vst [vmem:[#allocation254_spill] sm:$0xff] %v9578_v57  ;;  %v4728_v13 = vmax.f32 %v4726_v47, %v9516_v31  ;;  %v4775_v22 = vmax.f32 %v4773_v45, %v9504_v32  ;;  %v4776_v35 = vmax.f32 %v4774_v36, %v9519_v0 }
 0x4bf   : > { %12845 = vst [vmem:[#allocation255_spill] sm:$0xff] %v9581_v4  ;;  %12847 = vst [vmem:[#allocation256_spill] sm:$0xff] %v9584_v15  ;;  %v4920_v55 = vadd.f32 %v4919_v46, %v9495_v33  ;;  %v4968_v14 = vadd.f32 %v4967_v48, %v9504_v32  ;;  %v2079_v39 = vcombine.high %v9423_v21, %v9423_v21  ;;  %v12852_v48 = vld [vmem:[#allocation160_spill] sm:$0xff] }
 0x4c0   : > { %12849 = vst [vmem:[#allocation257_spill] sm:$0xff] %v9587_v19  ;;  %12851 = vst [vmem:[#allocation258_spill] sm:$0xff] %v9590_v58  ;;  %v4729_v18 = vmax.f32 %v4727_v51, %v9552_v16  ;;  %v4730_v59 = vmax.f32 %v4728_v13, %v9558_v1  ;;  %v4777_v62 = vmax.f32 %v4775_v22, %v9555_v26  ;;  %v12854_v22 = vld [vmem:[#allocation161_spill] sm:$0xff] }
 0x4c1   : > { %v2086_v47 = vrot.slane %v9423_v21, %v9324_v20  ;;  %v4778_v38 = vmax.f32 %v4776_v35, %v9561_v52  ;;  %v4921_v45 = vadd.f32 %v4920_v55, %v9516_v31  ;;  %v4969_v36 = vadd.f32 %v4968_v14, %v9519_v0  ;;  %v12856_v31 = vld [vmem:[#allocation162_spill] sm:$0xff] }
 0x4c2   : > { %v2093_v46 = vrot.slane %v2079_v39, %v9324_v20  ;;  %v9610_v33 = vmul.f32 %v12852_v48, %v2331_v61  ;;  %v4731_v51 = vmax.f32 %v4729_v18, %v9564_v42  ;;  %v4732_v13 = vmax.f32 %v4730_v59, %v9572_v54 }
 0x4c3   : > { %v2094_v11 = vcombine.high %v2086_v47, %v2086_v47  ;;  %v9615_v32 = vmul.f32 %v12854_v22, %v2335_v49  ;;  %v4922_v21 = vadd.f32 %v4921_v45, %v9552_v16  ;;  %v4970_v35 = vadd.f32 %v4969_v36, %v9555_v26 }
 0x4c4   : > { %12853 = vst [vmem:[#allocation259_spill] sm:$0xff] %v9610_v33  ;;  %v2095_v55 = vcombine.high %v2093_v46, %v2093_v46  ;;  %v9620_v14 = vmul.f32 %v12856_v31, %v2335_v49  ;;  %v4779_v39 = vmax.f32 %v4777_v62, %v9567_v23  ;;  %v4780_v61 = vmax.f32 %v4778_v38, %v9575_v10 }
 0x4c5   : > { %12855 = vst [vmem:[#allocation260_spill] sm:$0xff] %v9615_v32  ;;  %v2102_v18 = vrot.slane %v2086_v47, %v9324_v20  ;;  %v4733_v59 = vmax.f32 %v4731_v51, %v9578_v57  ;;  %v4923_v48 = vadd.f32 %v4922_v21, %v9558_v1  ;;  %v4971_v22 = vadd.f32 %v4970_v35, %v9561_v52 }
 0x4c6   : > { %12857 = vst [vmem:[#allocation261_spill] sm:$0xff] %v9620_v14  ;;  %v2109_v45 = vrot.slane %v2093_v46, %v9324_v20  ;;  %v4734_v36 = vmax.f32 %v4732_v13, %v9584_v15  ;;  %v2116_v16 = vrot.slane %v2094_v11, %v9324_v20  ;;  %v2123_v49 = vrot.slane %v2095_v55, %v9324_v20 }
 0x4c7   : > { %v2124_v31 = vcombine.high %v2102_v18, %v2102_v18  ;;  %v4924_v62 = vadd.f32 %v4923_v48, %v9564_v42  ;;  %v4972_v38 = vadd.f32 %v4971_v22, %v9567_v23  ;;  %v2339_v51 = vrot.slane %v2102_v18, %v9333_v17  ;;  %v12858_v23 = vld [vmem:[#allocation163_spill] sm:$0xff] }
 0x4c8   : > { %v2125_v47 = vcombine.high %v2109_v45, %v2109_v45  ;;  %v2126_v26 = vcombine.high %v2116_v16, %v2116_v16  ;;  %v2127_v21 = vcombine.high %v2123_v49, %v2123_v49  ;;  %v2343_v35 = vrot.slane %v2116_v16, %v9333_v17 }
 0x4c9   : > { %v2347_v46 = vrot.slane %v2124_v31, %v9333_v17  ;;  %v4781_v13 = vmax.f32 %v4779_v39, %v9581_v4  ;;  %v4782_v11 = vmax.f32 %v4780_v61, %v9587_v19  ;;  %v4925_v55 = vadd.f32 %v4924_v62, %v9572_v54  ;;  %v12860_v62 = vld [vmem:[#allocation164_spill] sm:$0xff] }
 0x4ca   : > { %v4973_v1 = vadd.f32 %v4972_v38, %v9575_v10  ;;  %v2351_v48 = vrot.slane %v2126_v26, %v9333_v17  ;;  %v2355_v22 = vrot.slane %v2109_v45, %v9333_v17  ;;  %v2359_v18 = vrot.slane %v2123_v49, %v9333_v17  ;;  %v12862_v38 = vld [vmem:[#allocation165_spill] sm:$0xff]  ;;  %v12864_v45 = vld [vmem:[#allocation166_spill] sm:$0xff]  ;;  %v12866_v49 = vld [vmem:[#allocation167_spill] sm:$0xff] }
 0x4cb   : > { %v2363_v42 = vrot.slane %v2125_v47, %v9333_v17  ;;  %v4926_v16 = vadd.f32 %v4925_v55, %v9578_v57  ;;  %v2367_v39 = vrot.slane %v2127_v21, %v9333_v17  ;;  %v9649_v61 = vmul.f32 %v12858_v23, %v2339_v51  ;;  %v12868_v21 = vld [vmem:[#allocation168_spill] sm:$0xff]  ;;  %v12870_v23 = vld [vmem:[#allocation169_spill] sm:$0xff] }
 0x4cc   : > { %v4974_v31 = vadd.f32 %v4973_v1, %v9581_v4  ;;  %v9652_v54 = vmul.f32 %v12860_v62, %v2339_v51  ;;  %v9655_v26 = vmul.f32 %v12862_v38, %v2343_v35  ;;  %v9658_v10 = vmul.f32 %v12864_v45, %v2343_v35  ;;  %v12872_v51 = vld [vmem:[#allocation170_spill] sm:$0xff]  ;;  %v12874_v38 = vld [vmem:[#allocation171_spill] sm:$0xff]  ;;  %v12876_v35 = vld [vmem:[#allocation172_spill] sm:$0xff] }
 0x4cd   : > { %12859 = vst [vmem:[#allocation262_spill] sm:$0xff] %v9649_v61  ;;  %v9661_v47 = vmul.f32 %v12866_v49, %v2347_v46  ;;  %v4927_v55 = vadd.f32 %v4926_v16, %v9584_v15  ;;  %v9666_v57 = vmul.f32 %v12868_v21, %v2347_v46  ;;  %v9669_v4 = vmul.f32 %v12870_v23, %v2351_v48  ;;  %v12878_v49 = vld [vmem:[#allocation173_spill] sm:$0xff]  ;;  %v12880_v16 = vld [vmem:[#allocation174_spill] sm:$0xff]  ;;  %v12882_v46 = vld [vmem:[#allocation175_spill] sm:$0xff] }
 0x4ce   : > { %12861 = vst [vmem:[#allocation263_spill] sm:$0xff] %v9652_v54  ;;  %12863 = vst [vmem:[#allocation264_spill] sm:$0xff] %v9655_v26  ;;  %v4975_v1 = vadd.f32 %v4974_v31, %v9587_v19  ;;  %v9672_v62 = vmul.f32 %v12872_v51, %v2351_v48  ;;  %v9675_v52 = vmul.f32 %v12874_v38, %v2355_v22 }
 0x4cf   : > { %12865 = vst [vmem:[#allocation265_spill] sm:$0xff] %v9658_v10  ;;  %12867 = vst [vmem:[#allocation266_spill] sm:$0xff] %v9661_v47  ;;  %v9678_v45 = vmul.f32 %v12876_v35, %v2355_v22  ;;  %v9681_v0 = vmul.f32 %v12878_v49, %v2359_v18  ;;  %v9684_v31 = vmul.f32 %v12880_v16, %v2359_v18 }
 0x4d0   : > { %12869 = vst [vmem:[#allocation267_spill] sm:$0xff] %v9666_v57  ;;  %12871 = vst [vmem:[#allocation268_spill] sm:$0xff] %v9669_v4  ;;  %v9687_v21 = vmul.f32 %v12882_v46, %v2363_v42  ;;  %v4735_v23 = vmax.f32 %v4733_v59, %v9590_v58  ;;  %v4736_v48 = vmax.f32 %v4734_v36, %v9615_v32  ;;  %v12884_v36 = vld [vmem:[#allocation176_spill] sm:$0xff] }
 0x4d1   : > { %12873 = vst [vmem:[#allocation269_spill] sm:$0xff] %v9672_v62  ;;  %12875 = vst [vmem:[#allocation270_spill] sm:$0xff] %v9675_v52  ;;  %v4783_v51 = vmax.f32 %v4781_v13, %v9610_v33  ;;  %v4784_v38 = vmax.f32 %v4782_v11, %v9620_v14  ;;  %v4928_v22 = vadd.f32 %v4927_v55, %v9590_v58 }
 0x4d2   : > { %12877 = vst [vmem:[#allocation271_spill] sm:$0xff] %v9678_v45  ;;  %12879 = vst [vmem:[#allocation272_spill] sm:$0xff] %v9681_v0  ;;  %v4976_v35 = vadd.f32 %v4975_v1, %v9610_v33  ;;  %v4737_v49 = vmax.f32 %v4735_v23, %v9649_v61  ;;  %v9697_v18 = vmax.f32 %v4736_v48, %v9655_v26  ;;  %v12886_v1 = vld [vmem:[#allocation177_spill] sm:$0xff]  ;;  %v12889_v33 = vld [vmem:[#allocation178_spill] sm:$0xff] }
 0x4d3   : > { %12881 = vst [vmem:[#allocation273_spill] sm:$0xff] %v9684_v31  ;;  %12883 = vst [vmem:[#allocation274_spill] sm:$0xff] %v9687_v21  ;;  %v2128_v46 = vcombine.high %v9441_v37, %v9441_v37  ;;  %v2135_v59 = vrot.slane %v9441_v37, %v9324_v20  ;;  %v9704_v16 = vmul.f32 %v12884_v36, %v2363_v42 }
 0x4d4   : > { %v4785_v13 = vmax.f32 %v4783_v51, %v9652_v54  ;;  %v4929_v11 = vadd.f32 %v4928_v22, %v9615_v32  ;;  %v4977_v55 = vadd.f32 %v4976_v35, %v9620_v14  ;;  %v9710_v23 = vmul.f32 %v12886_v1, %v2367_v39 }
 0x4d5   : > { %12885 = vst [vmem:[#allocation275_spill] sm:$0xff] %v9704_v16  ;;  %v9713_v48 = vmax.f32 %v4784_v38, %v9658_v10  ;;  %v2142_v58 = vrot.slane %v2128_v46, %v9324_v20  ;;  %v2143_v15 = vcombine.high %v2135_v59, %v2135_v59  ;;  %v9717_v37 = vmul.f32 %v12889_v33, %v2367_v39 }
 0x4d6   : > { %12887 = vst [vmem:[#allocation276_spill] sm:$0xff] %v9710_v23  ;;  %v4739_v42 = vmax.f32 %v4737_v49, %v9661_v47  ;;  %v4930_v51 = vadd.f32 %v4929_v11, %v9649_v61  ;;  %v4978_v22 = vadd.f32 %v4977_v55, %v9652_v54  ;;  %v2151_v36 = vrot.slane %v2135_v59, %v9324_v20 }
 0x4d7   : > { %12888 = vst [vmem:[#allocation277_spill] sm:$0xff] %v9713_v48  ;;  %12890 = vst [vmem:[#allocation278_spill] sm:$0xff] %v9717_v37  ;;  %v2144_v1 = vcombine.high %v2142_v58, %v2142_v58  ;;  %v2158_v38 = vrot.slane %v2142_v58, %v9324_v20  ;;  %v4787_v46 = vmax.f32 %v4785_v13, %v9666_v57  ;;  %v13086_v48 = vld [vmem:[#allocation94_spill] sm:$0xff] }
 0x4d8   : > { %v4931_v32 = vadd.f32 %v4930_v51, %v9655_v26  ;;  %v4979_v39 = vadd.f32 %v4978_v22, %v9658_v10  ;;  %v2165_v49 = vrot.slane %v2143_v15, %v9324_v20  ;;  %v2173_v33 = vcombine.high %v2151_v36, %v2151_v36 }
 0x4d9   : > { %v2172_v55 = vrot.slane %v2144_v1, %v9324_v20  ;;  %v2174_v35 = vcombine.high %v2158_v38, %v2158_v38  ;;  %v2371_v13 = vrot.slane %v2151_v36, %v9333_v17  ;;  %v4741_v51 = vmax.f32 %v4739_v42, %v9675_v52 }
 0x4da   : > { %v4932_v61 = vadd.f32 %v4931_v32, %v9661_v47  ;;  %v4980_v59 = vadd.f32 %v4979_v39, %v9666_v57  ;;  %v2175_v58 = vcombine.high %v2165_v49, %v2165_v49  ;;  %v2375_v22 = vrot.slane %v2165_v49, %v9333_v17  ;;  %v12891_v57 = vld [vmem:[#allocation179_spill] sm:$0xff] }
 0x4db   : > { %v2176_v26 = vcombine.high %v2172_v55, %v2172_v55  ;;  %v2379_v15 = vrot.slane %v2173_v33, %v9333_v17  ;;  %v4789_v11 = vmax.f32 %v4787_v46, %v9678_v45  ;;  %v2387_v39 = vrot.slane %v2158_v38, %v9333_v17  ;;  %v12897_v38 = vld [vmem:[#allocation182_spill] sm:$0xff] }
 0x4dc   : > { %v4933_v1 = vadd.f32 %v4932_v61, %v9669_v4  ;;  %v4981_v10 = vadd.f32 %v4980_v59, %v9672_v62  ;;  %v2383_v32 = vrot.slane %v2175_v58, %v9333_v17  ;;  %v2391_v47 = vrot.slane %v2172_v55, %v9333_v17  ;;  %v12893_v61 = vld [vmem:[#allocation180_spill] sm:$0xff]  ;;  %v12895_v59 = vld [vmem:[#allocation181_spill] sm:$0xff]  ;;  %v12899_v55 = vld [vmem:[#allocation183_spill] sm:$0xff] }
 0x4dd   : > { %v2395_v36 = vrot.slane %v2174_v35, %v9333_v17  ;;  %v2399_v42 = vrot.slane %v2176_v26, %v9333_v17  ;;  %v9750_v46 = vmul.f32 %v12891_v57, %v2371_v13  ;;  %v9753_v54 = vmul.f32 %v12893_v61, %v2371_v13  ;;  %v12901_v26 = vld [vmem:[#allocation184_spill] sm:$0xff]  ;;  %v12903_v57 = vld [vmem:[#allocation185_spill] sm:$0xff]  ;;  %v12905_v13 = vld [vmem:[#allocation186_spill] sm:$0xff] }
 0x4de   : > { %v4934_v49 = vadd.f32 %v4933_v1, %v9675_v52  ;;  %v4982_v33 = vadd.f32 %v4981_v10, %v9678_v45  ;;  %v9756_v58 = vmul.f32 %v12895_v59, %v2375_v22  ;;  %v9759_v14 = vmul.f32 %v12897_v38, %v2375_v22  ;;  %v12907_v59 = vld [vmem:[#allocation187_spill] sm:$0xff]  ;;  %v12909_v22 = vld [vmem:[#allocation188_spill] sm:$0xff] }
 0x4df   : > { %12892 = vst [vmem:[#allocation279_spill] sm:$0xff] %v9750_v46  ;;  %12894 = vst [vmem:[#allocation280_spill] sm:$0xff] %v9753_v54  ;;  %v9762_v35 = vmul.f32 %v12899_v55, %v2379_v15  ;;  %v9765_v19 = vmul.f32 %v12901_v26, %v2379_v15  ;;  %v9770_v52 = vmul.f32 %v12903_v57, %v2383_v32  ;;  %v12911_v55 = vld [vmem:[#allocation189_spill] sm:$0xff] }
 0x4e0   : > { %12896 = vst [vmem:[#allocation281_spill] sm:$0xff] %v9756_v58  ;;  %12898 = vst [vmem:[#allocation282_spill] sm:$0xff] %v9759_v14  ;;  %v4935_v10 = vadd.f32 %v4934_v49, %v9681_v0  ;;  %v4983_v1 = vadd.f32 %v4982_v33, %v9684_v31  ;;  %v9773_v61 = vmul.f32 %v12905_v13, %v2383_v32  ;;  %v1909_v32 = vadd.f32 1.0, %v9379_v29  ;;  %v12913_v13 = vld [vmem:[#allocation190_spill] sm:$0xff] }
 0x4e1   : > { %12900 = vst [vmem:[#allocation283_spill] sm:$0xff] %v9762_v35  ;;  %12902 = vst [vmem:[#allocation284_spill] sm:$0xff] %v9765_v19  ;;  %v9776_v45 = vmul.f32 %v12907_v59, %v2387_v39  ;;  %v9779_v38 = vmul.f32 %v12909_v22, %v2387_v39  ;;  %v9782_v50 = vmul.f32 %v12911_v55, %v2391_v47  ;;  %v12915_v59 = vld [vmem:[#allocation191_spill] sm:$0xff]  ;;  %v1910_v39 = vadd.f32 1.0, %v9406_v12  ;;  %v12917_v55 = vld [vmem:[#allocation80_spill] sm:$0xff] }
 0x4e2   : > { %12904 = vst [vmem:[#allocation285_spill] sm:$0xff] %v9770_v52  ;;  %12906 = vst [vmem:[#allocation286_spill] sm:$0xff] %v9773_v61  ;;  %v4743_v15 = vmax.f32 %v4741_v51, %v9687_v21  ;;  %v4791_v49 = vmax.f32 %v4789_v11, %v9704_v16  ;;  %v4936_v33 = vadd.f32 %v4935_v10, %v9687_v21  ;;  %v12918_v51 = vld [vmem:[#allocation192_spill] sm:$0xff]  ;;  %v12922_v21 = vld [vmem:[#allocation193_spill] sm:$0xff]  ;;  %7317 = vrcp.f32 %v1909_v32 }
 0x4e3   : > { %12908 = vst [vmem:[#allocation287_spill] sm:$0xff] %v9776_v45  ;;  %12910 = vst [vmem:[#allocation288_spill] sm:$0xff] %v9779_v38  ;;  %v4984_v57 = vadd.f32 %v4983_v1, %v9704_v16  ;;  %v9790_v26 = vmul.f32 %v12913_v13, %v2391_v47  ;;  %v9793_v6 = vmul.f32 %v12915_v59, %v2395_v36  ;;  %7319 = vrcp.f32 %v1910_v39 }
 0x4e4   : > { %12912 = vst [vmem:[#allocation289_spill] sm:$0xff] %v9782_v50  ;;  %v5902_v22 = vadd.f32 %v12917_v55, %v9338_v43  ;;  %v9799_v3 = vmul.f32 %v12918_v51, %v2395_v36  ;;  %v9802_v11 = vmax.f32 %v4743_v15, %v9750_v46  ;;  %v4937_v10 = vadd.f32 %v4936_v33, %v9710_v23  ;;  %v12924_v51 = vld [vmem:[#allocation82_spill] sm:$0xff]  ;;  %v13106_v23 = vld [vmem:[#allocation104_spill] sm:$0xff] }
 0x4e5   : > { %12914 = vst [vmem:[#allocation290_spill] sm:$0xff] %v9790_v26  ;;  %12916 = vst [vmem:[#allocation291_spill] sm:$0xff] %v9793_v6  ;;  %v4985_v29 = vadd.f32 %v4984_v57, %v9717_v37  ;;  %v9807_v1 = vmax.f32 %v4791_v49, %v9753_v54  ;;  %v9811_v43 = vmul.f32 %v12922_v21, %v2399_v42 }
 0x4e6   : > { %12919 = vst [vmem:[#allocation292_spill] sm:$0xff] %v9799_v3  ;;  %12920 = vst [vmem:[#allocation293_spill] sm:$0xff] %v9802_v11  ;;  %v4938_v36 = vadd.f32 %v4937_v10, %v9750_v46  ;;  %v5903_v33 = vadd.f32 %v12924_v51, %v5902_v22  ;;  %v9823_v21 = vmul.f32 %v12786_v25, %v2399_v42  ;;  %v12928_v46 = vld [vmem:[#allocation84_spill] sm:$0xff]  ;;  %v12929_v25 = vld [vmem:[#allocation81_spill] sm:$0xff] }
 0x4e7   : > { %12921 = vst [vmem:[#allocation294_spill] sm:$0xff] %v9807_v1  ;;  %12923 = vst [vmem:[#allocation295_spill] sm:$0xff] %v9811_v43  ;;  %v4986_v15 = vadd.f32 %v4985_v29, %v9753_v54  ;;  %v12926_v32 = vmax.f32 %v9697_v18, %v9669_v4  ;;  %v9840_v54 = vadd.f32 %v12929_v25, %v9341_v27  ;;  %v12978_v1 = vld [vmem:[#allocation38_spill] sm:$0xff] }
 0x4e8   : > { %v4939_v28 = vadd.f32 %v4938_v36, %v9756_v58  ;;  %12925 = vst [vmem:[#allocation296_spill] sm:$0xff] %v9823_v21  ;;  %v9836_v42 = vadd.f32 %v12928_v46, %v5903_v33 }
 0x4e9   : > { %v9829_v22 = vmax.f32 %v12926_v32, %v9681_v0 }
 0x4ea   : > { %v4940_v36 = vadd.f32 %v4939_v28, %v9762_v35 }
 0x4eb   : > { %12927 = vst [vmem:[#allocation297_spill] sm:$0xff] %v9829_v22 }
 0x4ed   : > { %v4023_v47 = vpop.f32.mrb[10].mxu1 }
 0x4ee   : > { %v4064_v59 = vcombine.high %v4023_v47, %v4023_v47  ;;  %v4071_v12 = vrot.slane %v4023_v47, %v9324_v20  ;;  %v7104_v13 = vpop.f32.mrb[11].mxu1 }
 0x4ef   : > { %v4987_v13 = vadd.f32 %v4986_v15, %v9759_v14 }
 0x4f0   : > { %v4078_v57 = vrot.slane %v4064_v59, %v9324_v20  ;;  %v4079_v16 = vcombine.high %v4071_v12, %v4071_v12  ;;  %v4087_v49 = vrot.slane %v4071_v12, %v9324_v20 }
 0x4f1   : > { %v9820_v47 = vpop.f32.mrb[12].mxu1  ;;  %v4988_v15 = vadd.f32 %v4987_v13, %v9765_v19 }
 0x4f2   : > { %v4080_v59 = vcombine.high %v4078_v57, %v4078_v57  ;;  %v4094_v10 = vrot.slane %v4078_v57, %v9324_v20  ;;  %v4101_v39 = vrot.slane %v4079_v16, %v9324_v20  ;;  %v4109_v29 = vcombine.high %v4087_v49, %v4087_v49  ;;  %v7107_v12 = vpop.f32.mrb[13].mxu1 }
 0x4f3   : > { %v4375_v57 = vrot.slane %v4087_v49, %v9333_v17  ;;  %v4941_v16 = vadd.f32 %v4940_v36, %v9770_v52  ;;  %v4989_v12 = vadd.f32 %v4988_v15, %v9773_v61  ;;  %v7318_v49 = vpop.eup %7317  ;;  %v12952_v61 = vld [vmem:[#allocation20_spill] sm:$0xff] }
 0x4f4   : > { %v4108_v18 = vrot.slane %v4080_v59, %v9324_v20  ;;  %v4110_v32 = vcombine.high %v4094_v10, %v4094_v10  ;;  %v4111_v0 = vcombine.high %v4101_v39, %v4101_v39  ;;  %v4379_v28 = vrot.slane %v4101_v39, %v9333_v17  ;;  %v9881_v53 = vpop.eup %7319 }
 0x4f5   : > { %v4383_v13 = vrot.slane %v4109_v29, %v9333_v17  ;;  %v9848_v33 = vpop.f32.mrb[14].mxu1  ;;  %v4113_v59 = vcombine.high %v9820_v47, %v9820_v47  ;;  %v4942_v36 = vadd.f32 %v4941_v16, %v9776_v45  ;;  %v4990_v15 = vadd.f32 %v4989_v12, %v9779_v38 }
 0x4f6   : > { %v4112_v4 = vcombine.high %v4108_v18, %v4108_v18  ;;  %v4387_v27 = vrot.slane %v4111_v0, %v9333_v17  ;;  %v7110_v41 = vpop.f32.mrb[15].mxu1  ;;  %v4391_v39 = vrot.slane %v4094_v10, %v9333_v17  ;;  %v4395_v29 = vrot.slane %v4108_v18, %v9333_v17  ;;  %v12932_v0 = vld [vmem:[#allocation17_spill] sm:$0xff]  ;;  %v12938_v10 = vld [vmem:[#allocation23_spill] sm:$0xff]  ;;  %v12940_v18 = vld [vmem:[#allocation28_spill] sm:$0xff] }
 0x4f7   : > { %v4399_v8 = vrot.slane %v4110_v32, %v9333_v17  ;;  %v9861_v44 = vmul.f32 %v12930_v34, %v4375_v57  ;;  %v9864_v24 = vmul.f32 %v12932_v0, %v4375_v57  ;;  %v12934_v41 = vld [vmem:[#allocation24_spill] sm:$0xff]  ;;  %v9871_v12 = vmul.f32 %v12936_v56, %v4379_v28  ;;  %v12946_v56 = vld [vmem:[#allocation29_spill] sm:$0xff] }
 0x4f8   : > { %v9867_v2 = vmul.f32 %v12934_v41, %v4383_v13  ;;  %v4403_v16 = vrot.slane %v4112_v4, %v9333_v17  ;;  %v9874_v63 = vmul.f32 %v12938_v10, %v4379_v28  ;;  %v9877_v32 = vmul.f32 %v12940_v18, %v4387_v27  ;;  %v12944_v4 = vld [vmem:[#allocation25_spill] sm:$0xff]  ;;  %v12948_v10 = vld [vmem:[#allocation18_spill] sm:$0xff] }
 0x4f9   : > { %12931 = vst [vmem:[#allocation298_spill] sm:$0xff] %v9861_v44  ;;  %12933 = vst [vmem:[#allocation299_spill] sm:$0xff] %v9864_v24  ;;  %v9879_v34 = vpop.f32.mrb[16].mxu1  ;;  %v9884_v57 = vadd.f32 %v4942_v36, %v9782_v50  ;;  %v9887_v41 = vadd.f32 %v4990_v15, %v9790_v26  ;;  %v9890_v0 = vmul.f32 %v12944_v4, %v4383_v13  ;;  %v12954_v36 = vld [vmem:[#allocation21_spill] sm:$0xff]  ;;  %v12956_v15 = vld [vmem:[#allocation26_spill] sm:$0xff] }
 0x4fa   : > { %12935 = vst [vmem:[#allocation300_spill] sm:$0xff] %v9867_v2  ;;  %12937 = vst [vmem:[#allocation301_spill] sm:$0xff] %v9871_v12  ;;  %v9893_v60 = vmul.f32 %v12946_v56, %v4387_v27  ;;  %v7113_v28 = vpop.f32.mrb[17].mxu1  ;;  %v9896_v18 = vmul.f32 %v12948_v10, %v4391_v39  ;;  %v9899_v21 = vmul.f32 %v12950_v7, %v4391_v39  ;;  %v12958_v13 = vld [vmem:[#allocation27_spill] sm:$0xff]  ;;  %v12960_v39 = vld [vmem:[#allocation30_spill] sm:$0xff] }
 0x4fb   : > { %12939 = vst [vmem:[#allocation302_spill] sm:$0xff] %v9874_v63  ;;  %12941 = vst [vmem:[#allocation303_spill] sm:$0xff] %v9877_v32  ;;  %v9902_v3 = vmul.f32 %v12952_v61, %v4395_v29  ;;  %v9911_v4 = vmul.f32 %v12958_v13, %v4399_v8  ;;  %v4811_v27 = vmax.f32 %v9861_v44, %v9867_v2 }
 0x4fc   : > { %12942 = vst [vmem:[#allocation304_spill] sm:$0xff] %v9884_v57  ;;  %12943 = vst [vmem:[#allocation305_spill] sm:$0xff] %v9887_v41  ;;  %v9905_v57 = vmul.f32 %v12954_v36, %v4395_v29  ;;  %v9908_v41 = vmul.f32 %v12956_v15, %v4399_v8  ;;  %v4812_v28 = vmax.f32 %v9871_v12, %v9877_v32  ;;  %v12962_v8 = vld [vmem:[#allocation31_spill] sm:$0xff] }
 0x4fd   : > { %12945 = vst [vmem:[#allocation306_spill] sm:$0xff] %v9890_v0  ;;  %12947 = vst [vmem:[#allocation307_spill] sm:$0xff] %v9893_v60  ;;  %v9918_v56 = vmul.f32 %v12960_v39, %v4403_v16  ;;  %v5006_v61 = vadd.f32 %v9871_v12, %v9861_v44  ;;  %v5054_v29 = vadd.f32 %v9874_v63, %v9864_v24  ;;  %v9924_v10 = vpop.f32.mrb[18].mxu1 }
 0x4fe   : > { %12949 = vst [vmem:[#allocation308_spill] sm:$0xff] %v9896_v18  ;;  %12951 = vst [vmem:[#allocation309_spill] sm:$0xff] %v9899_v21  ;;  %v2177_v15 = vcombine.high %v7318_v49, %v7318_v49  ;;  %v9927_v13 = vmul.f32 %v12962_v8, %v4403_v16  ;;  %v4859_v36 = vmax.f32 %v9864_v24, %v9890_v0  ;;  %v7116_v26 = vpop.f32.mrb[19].mxu1 }
 0x4ff   : > { %12953 = vst [vmem:[#allocation310_spill] sm:$0xff] %v9902_v3  ;;  %12955 = vst [vmem:[#allocation311_spill] sm:$0xff] %v9905_v57  ;;  %v4860_v7 = vmax.f32 %v9874_v63, %v9893_v60  ;;  %v2184_v39 = vrot.slane %v7318_v49, %v9324_v20  ;;  %v9935_v12 = vmax.f32 %v4811_v27, %v9896_v18 }
 0x500   : > { %12957 = vst [vmem:[#allocation312_spill] sm:$0xff] %v9908_v41  ;;  %12959 = vst [vmem:[#allocation313_spill] sm:$0xff] %v9911_v4  ;;  %v5007_v44 = vadd.f32 %v5006_v61, %v9867_v2  ;;  %v5055_v43 = vadd.f32 %v5054_v29, %v9890_v0  ;;  %v2191_v14 = vrot.slane %v2177_v15, %v9324_v20 }
 0x501   : > { %12961 = vst [vmem:[#allocation314_spill] sm:$0xff] %v9918_v56  ;;  %12963 = vst [vmem:[#allocation315_spill] sm:$0xff] %v9927_v13  ;;  %v9941_v16 = vmax.f32 %v4812_v28, %v9902_v3  ;;  %v2192_v8 = vcombine.high %v2184_v39, %v2184_v39  ;;  %v2200_v24 = vrot.slane %v2184_v39, %v9324_v20  ;;  %v9951_v29 = vpop.f32.mrb[20].mxu1 }
 0x502   : > { %v4120_v63 = vrot.slane %v9820_v47, %v9324_v20  ;;  %v5008_v26 = vadd.f32 %v5007_v44, %v9877_v32  ;;  %v5056_v49 = vadd.f32 %v5055_v43, %v9893_v60  ;;  %v2193_v27 = vcombine.high %v2191_v14, %v2191_v14  ;;  %v7119_v0 = vpop.f32.mrb[21].mxu1 }
 0x503   : > { %v9949_v61 = vrot.slane %v2191_v14, %v9324_v20  ;;  %v9954_v15 = vrot.slane %v2192_v8, %v9324_v20  ;;  %v2222_v28 = vcombine.high %v2200_v24, %v2200_v24  ;;  %v4127_v2 = vrot.slane %v4113_v59, %v9324_v20 }
 0x504   : > { %v4128_v39 = vcombine.high %v4120_v63, %v4120_v63  ;;  %v4861_v47 = vmax.f32 %v4859_v36, %v9899_v21  ;;  %v5009_v44 = vadd.f32 %v5008_v26, %v9896_v18  ;;  %v5057_v43 = vadd.f32 %v5056_v49, %v9899_v21 }
 0x505   : > { %v2403_v32 = vrot.slane %v2200_v24, %v9333_v17  ;;  %v4862_v14 = vmax.f32 %v4860_v7, %v9905_v57  ;;  %v9963_v60 = vrot.slane %v2193_v27, %v9324_v20  ;;  %v9972_v36 = vrot.slane %v9954_v15, %v9333_v17  ;;  %v9981_v24 = vpop.f32.mrb[22].mxu1 }
 0x506   : > { %v5010_v0 = vadd.f32 %v5009_v44, %v9902_v3  ;;  %v9975_v26 = vrot.slane %v2222_v28, %v9333_v17  ;;  %v9979_v7 = vrot.slane %v9949_v61, %v9333_v17  ;;  %v4129_v49 = vcombine.high %v4127_v2, %v4127_v2  ;;  %v7122_v59 = vpop.f32.mrb[23].mxu1 }
 0x507   : > { %v4136_v27 = vrot.slane %v4120_v63, %v9324_v20  ;;  %v4143_v8 = vrot.slane %v4127_v2, %v9324_v20  ;;  %v4150_v44 = vrot.slane %v4128_v39, %v9324_v20  ;;  %v5058_v3 = vadd.f32 %v5057_v43, %v9905_v57  ;;  %v12966_v57 = vld [vmem:[#allocation32_spill] sm:$0xff] }
 0x508   : > { %v9988_v18 = vmul.f32 %v12789_v30, %v2403_v32  ;;  %v9991_v28 = vmul.f32 %v12790_v5, %v2403_v32  ;;  %v4815_v21 = vmax.f32 %v9935_v12, %v9908_v41  ;;  %v4157_v6 = vrot.slane %v4129_v49, %v9324_v20 }
 0x509   : > { %v4158_v38 = vcombine.high %v4136_v27, %v4136_v27  ;;  %v4159_v63 = vcombine.high %v4143_v8, %v4143_v8  ;;  %v4160_v50 = vcombine.high %v4150_v44, %v4150_v44  ;;  %v4407_v2 = vrot.slane %v4136_v27, %v9333_v17  ;;  %v12968_v27 = vld [vmem:[#allocation34_spill] sm:$0xff] }
 0x50a   : > { %12964 = vst [vmem:[#allocation316_spill] sm:$0xff] %v9988_v18  ;;  %12965 = vst [vmem:[#allocation317_spill] sm:$0xff] %v9991_v28  ;;  %v4411_v39 = vrot.slane %v4150_v44, %v9333_v17  ;;  %v4423_v43 = vrot.slane %v4143_v8, %v9333_v17  ;;  %v4816_v59 = vmax.f32 %v9941_v16, %v9918_v56  ;;  %v12970_v44 = vld [vmem:[#allocation33_spill] sm:$0xff]  ;;  %v12972_v16 = vld [vmem:[#allocation35_spill] sm:$0xff] }
 0x50b   : > { %v4161_v30 = vcombine.high %v4157_v6, %v4157_v6  ;;  %v4415_v32 = vrot.slane %v4158_v38, %v9333_v17  ;;  %v4419_v5 = vrot.slane %v4160_v50, %v9333_v17  ;;  %v4427_v12 = vrot.slane %v4157_v6, %v9333_v17 }
 0x50c   : > { %v4431_v49 = vrot.slane %v4159_v63, %v9333_v17  ;;  %v10006_v28 = vmul.f32 %v12966_v57, %v4407_v2  ;;  %v10009_v18 = vmul.f32 %v12968_v27, %v4411_v39  ;;  %v4863_v8 = vmax.f32 %v4861_v47, %v9911_v4  ;;  %v12974_v63 = vld [vmem:[#allocation36_spill] sm:$0xff] }
 0x50d   : > { %v10013_v37 = vmul.f32 %v12970_v44, %v4407_v2  ;;  %v10016_v45 = vmul.f32 %v12972_v16, %v4411_v39  ;;  %v4864_v50 = vmax.f32 %v4862_v14, %v9927_v13  ;;  %v5011_v6 = vadd.f32 %v5010_v0, %v9908_v41  ;;  %v12980_v2 = vld [vmem:[#allocation39_spill] sm:$0xff]  ;;  %v12982_v39 = vld [vmem:[#allocation40_spill] sm:$0xff]  ;;  %v12984_v14 = vld [vmem:[#allocation41_spill] sm:$0xff] }
 0x50e   : > { %12967 = vst [vmem:[#allocation318_spill] sm:$0xff] %v10006_v28  ;;  %12969 = vst [vmem:[#allocation319_spill] sm:$0xff] %v10009_v18  ;;  %v4435_v38 = vrot.slane %v4161_v30, %v9333_v17  ;;  %v10022_v57 = vmul.f32 %v12974_v63, %v4415_v32  ;;  %v10025_v27 = vmul.f32 %v12976_v9, %v4415_v32  ;;  %v12986_v0 = vld [vmem:[#allocation42_spill] sm:$0xff]  ;;  %v12988_v63 = vld [vmem:[#allocation43_spill] sm:$0xff] }
 0x50f   : > { %12971 = vst [vmem:[#allocation320_spill] sm:$0xff] %v10013_v37  ;;  %12973 = vst [vmem:[#allocation321_spill] sm:$0xff] %v10016_v45  ;;  %v10028_v47 = vmul.f32 %v12978_v1, %v4419_v5  ;;  %v10031_v44 = vmul.f32 %v12980_v2, %v4419_v5  ;;  %v10034_v16 = vmul.f32 %v12982_v39, %v4423_v43  ;;  %v12990_v32 = vld [vmem:[#allocation44_spill] sm:$0xff] }
 0x510   : > { %12975 = vst [vmem:[#allocation322_spill] sm:$0xff] %v10022_v57  ;;  %12977 = vst [vmem:[#allocation323_spill] sm:$0xff] %v10025_v27  ;;  %v10037_v19 = vmul.f32 %v12984_v14, %v4423_v43  ;;  %v10040_v30 = vmul.f32 %v12986_v0, %v4427_v12  ;;  %v10043_v41 = vmul.f32 %v12988_v63, %v4427_v12 }
 0x511   : > { %12979 = vst [vmem:[#allocation324_spill] sm:$0xff] %v10028_v47  ;;  %12981 = vst [vmem:[#allocation325_spill] sm:$0xff] %v10031_v44  ;;  %v10046_v9 = vmul.f32 %v12990_v32, %v4431_v49  ;;  %v4817_v1 = vmax.f32 %v4815_v21, %v10006_v28  ;;  %v4818_v5 = vmax.f32 %v4816_v59, %v10009_v18 }
 0x512   : > { %12983 = vst [vmem:[#allocation326_spill] sm:$0xff] %v10034_v16  ;;  %12985 = vst [vmem:[#allocation327_spill] sm:$0xff] %v10037_v19  ;;  %v4865_v2 = vmax.f32 %v4863_v8, %v10013_v37  ;;  %v4866_v39 = vmax.f32 %v4864_v50, %v10016_v45  ;;  %v5012_v43 = vadd.f32 %v5011_v6, %v9918_v56  ;;  %v12992_v56 = vld [vmem:[#allocation45_spill] sm:$0xff] }
 0x513   : > { %12987 = vst [vmem:[#allocation328_spill] sm:$0xff] %v10040_v30  ;;  %12989 = vst [vmem:[#allocation329_spill] sm:$0xff] %v10043_v41  ;;  %v5059_v14 = vadd.f32 %v5058_v3, %v9911_v4  ;;  %v4819_v0 = vmax.f32 %v4817_v1, %v10022_v57  ;;  %v4820_v12 = vmax.f32 %v4818_v5, %v10028_v47  ;;  %v12994_v1 = vld [vmem:[#allocation46_spill] sm:$0xff]  ;;  %v12996_v5 = vld [vmem:[#allocation47_spill] sm:$0xff] }
 0x514   : > { %12991 = vst [vmem:[#allocation330_spill] sm:$0xff] %v10046_v9  ;;  %v2232_v32 = vrot.slane %v9881_v53, %v9324_v20  ;;  %v4162_v21 = vcombine.high %v9848_v33, %v9848_v33  ;;  %v4867_v59 = vmax.f32 %v4865_v2, %v10025_v27  ;;  %v4868_v8 = vmax.f32 %v4866_v39, %v10031_v44 }
 0x515   : > { %v5013_v50 = vadd.f32 %v5012_v43, %v10006_v28  ;;  %v5060_v6 = vadd.f32 %v5059_v14, %v9927_v13  ;;  %v10065_v3 = vmul.f32 %v12992_v56, %v4431_v49  ;;  %v10068_v63 = vmul.f32 %v12994_v1, %v4435_v38 }
 0x516   : > { %v10071_v4 = vmul.f32 %v12996_v5, %v4435_v38  ;;  %v4169_v53 = vrot.slane %v9848_v33, %v9324_v20  ;;  %v4821_v2 = vmax.f32 %v4819_v0, %v10034_v16  ;;  %v4822_v39 = vmax.f32 %v4820_v12, %v10040_v30 }
 0x517   : > { %12993 = vst [vmem:[#allocation331_spill] sm:$0xff] %v10065_v3  ;;  %12995 = vst [vmem:[#allocation332_spill] sm:$0xff] %v10068_v63  ;;  %v5014_v43 = vadd.f32 %v5013_v50, %v10009_v18  ;;  %v5061_v14 = vadd.f32 %v5060_v6, %v10013_v37  ;;  %v10080_v49 = vrot.slane %v2232_v32, %v9324_v20 }
 0x518   : > { %12997 = vst [vmem:[#allocation333_spill] sm:$0xff] %v10071_v4  ;;  %v4176_v1 = vrot.slane %v4162_v21, %v9324_v20  ;;  %v4177_v28 = vcombine.high %v4169_v53, %v4169_v53  ;;  %v4185_v38 = vrot.slane %v4169_v53, %v9324_v20  ;;  %v4869_v5 = vmax.f32 %v4867_v59, %v10037_v19 }
 0x519   : > { %v4870_v33 = vmax.f32 %v4868_v8, %v10043_v41  ;;  %v5015_v0 = vadd.f32 %v5014_v43, %v10022_v57  ;;  %v5062_v12 = vadd.f32 %v5061_v14, %v10016_v45  ;;  %v4823_v59 = vmax.f32 %v4821_v2, %v10046_v9 }
 0x51a   : > { %v4178_v56 = vcombine.high %v4176_v1, %v4176_v1  ;;  %v4192_v50 = vrot.slane %v4176_v1, %v9324_v20  ;;  %v4199_v6 = vrot.slane %v4177_v28, %v9324_v20  ;;  %v4207_v32 = vcombine.high %v4185_v38, %v4185_v38 }
 0x51b   : > { %v5016_v18 = vadd.f32 %v5015_v0, %v10028_v47  ;;  %v5063_v21 = vadd.f32 %v5062_v12, %v10025_v27  ;;  %v4439_v53 = vrot.slane %v4185_v38, %v9333_v17  ;;  %v4824_v0 = vmax.f32 %v4822_v39, %v10068_v63 }
 0x51c   : > { %v4206_v8 = vrot.slane %v4178_v56, %v9324_v20  ;;  %v4208_v37 = vcombine.high %v4192_v50, %v4192_v50  ;;  %v4209_v43 = vcombine.high %v4199_v6, %v4199_v6  ;;  %v4443_v14 = vrot.slane %v4199_v6, %v9333_v17 }
 0x51d   : > { %v5017_v57 = vadd.f32 %v5016_v18, %v10034_v16  ;;  %v5064_v1 = vadd.f32 %v5063_v21, %v10031_v44  ;;  %v4447_v28 = vrot.slane %v4207_v32, %v9333_v17  ;;  %v4455_v38 = vrot.slane %v4192_v50, %v9333_v17  ;;  %v12998_v21 = vld [vmem:[#allocation48_spill] sm:$0xff]  ;;  %v13000_v32 = vld [vmem:[#allocation49_spill] sm:$0xff]  ;;  %v13002_v44 = vld [vmem:[#allocation50_spill] sm:$0xff] }
 0x51e   : > { %v4210_v47 = vcombine.high %v4206_v8, %v4206_v8  ;;  %v4451_v12 = vrot.slane %v4209_v43, %v9333_v17  ;;  %v4871_v2 = vmax.f32 %v4869_v5, %v10065_v3  ;;  %v4459_v27 = vrot.slane %v4206_v8, %v9333_v17  ;;  %v13004_v50 = vld [vmem:[#allocation51_spill] sm:$0xff] }
 0x51f   : > { %v5065_v56 = vadd.f32 %v5064_v1, %v10037_v19  ;;  %v4463_v6 = vrot.slane %v4208_v37, %v9333_v17  ;;  %v4872_v18 = vmax.f32 %v4870_v33, %v10071_v4  ;;  %v10108_v16 = vmul.f32 %v12998_v21, %v4439_v53  ;;  %v13006_v1 = vld [vmem:[#allocation52_spill] sm:$0xff]  ;;  %v13008_v21 = vld [vmem:[#allocation53_spill] sm:$0xff] }
 0x520   : > { %v10111_v39 = vmul.f32 %v13000_v32, %v4439_v53  ;;  %v10114_v43 = vmul.f32 %v13002_v44, %v4443_v14  ;;  %v10117_v45 = vmul.f32 %v13004_v50, %v4443_v14  ;;  %v5018_v5 = vadd.f32 %v5017_v57, %v10040_v30  ;;  %v13010_v53 = vld [vmem:[#allocation54_spill] sm:$0xff]  ;;  %v13012_v44 = vld [vmem:[#allocation55_spill] sm:$0xff]  ;;  %v13014_v14 = vld [vmem:[#allocation56_spill] sm:$0xff] }
 0x521   : > { %12999 = vst [vmem:[#allocation334_spill] sm:$0xff] %v10108_v16  ;;  %v5066_v8 = vadd.f32 %v5065_v56, %v10043_v41  ;;  %v4467_v37 = vrot.slane %v4210_v47, %v9333_v17  ;;  %v10123_v33 = vmul.f32 %v13006_v1, %v4447_v28  ;;  %v10126_v19 = vmul.f32 %v13008_v21, %v4447_v28  ;;  %v13016_v57 = vld [vmem:[#allocation57_spill] sm:$0xff]  ;;  %v13018_v56 = vld [vmem:[#allocation58_spill] sm:$0xff]  ;;  %v13020_v1 = vld [vmem:[#allocation59_spill] sm:$0xff] }
 0x522   : > { %13001 = vst [vmem:[#allocation335_spill] sm:$0xff] %v10111_v39  ;;  %13003 = vst [vmem:[#allocation336_spill] sm:$0xff] %v10114_v43  ;;  %v10129_v32 = vmul.f32 %v13010_v53, %v4451_v12  ;;  %v10132_v13 = vmul.f32 %v13012_v44, %v4451_v12  ;;  %v10135_v50 = vmul.f32 %v13014_v14, %v4455_v38  ;;  %v13022_v28 = vld [vmem:[#allocation60_spill] sm:$0xff] }
 0x523   : > { %13005 = vst [vmem:[#allocation337_spill] sm:$0xff] %v10117_v45  ;;  %13007 = vst [vmem:[#allocation338_spill] sm:$0xff] %v10123_v33  ;;  %v10138_v30 = vmul.f32 %v13016_v57, %v4455_v38  ;;  %v10141_v47 = vmul.f32 %v13018_v56, %v4459_v27  ;;  %v10144_v41 = vmul.f32 %v13020_v1, %v4459_v27 }
 0x524   : > { %13009 = vst [vmem:[#allocation339_spill] sm:$0xff] %v10126_v19  ;;  %13011 = vst [vmem:[#allocation340_spill] sm:$0xff] %v10129_v32  ;;  %v10147_v21 = vmul.f32 %v13022_v28, %v4463_v6  ;;  %v4825_v53 = vmax.f32 %v4823_v59, %v10108_v16  ;;  %v4826_v12 = vmax.f32 %v4824_v0, %v10114_v43  ;;  %v13024_v28 = vld [vmem:[#allocation61_spill] sm:$0xff] }
 0x525   : > { %13013 = vst [vmem:[#allocation341_spill] sm:$0xff] %v10132_v13  ;;  %13015 = vst [vmem:[#allocation342_spill] sm:$0xff] %v10135_v50  ;;  %v4873_v44 = vmax.f32 %v4871_v2, %v10111_v39  ;;  %v4874_v14 = vmax.f32 %v4872_v18, %v10117_v45  ;;  %v5019_v38 = vadd.f32 %v5018_v5, %v10046_v9 }
 0x526   : > { %13017 = vst [vmem:[#allocation343_spill] sm:$0xff] %v10138_v30  ;;  %13019 = vst [vmem:[#allocation344_spill] sm:$0xff] %v10141_v47  ;;  %v5067_v57 = vadd.f32 %v5066_v8, %v10065_v3  ;;  %v4211_v56 = vcombine.high %v9879_v34, %v9879_v34  ;;  %v4218_v27 = vrot.slane %v9879_v34, %v9324_v20  ;;  %v13026_v3 = vld [vmem:[#allocation62_spill] sm:$0xff]  ;;  %v13028_v34 = vld [vmem:[#allocation63_spill] sm:$0xff] }
 0x527   : > { %13021 = vst [vmem:[#allocation345_spill] sm:$0xff] %v10144_v41  ;;  %13023 = vst [vmem:[#allocation346_spill] sm:$0xff] %v10147_v21  ;;  %v10160_v1 = vmul.f32 %v13024_v28, %v4463_v6  ;;  %v4827_v59 = vmax.f32 %v4825_v53, %v10123_v33  ;;  %v4828_v0 = vmax.f32 %v4826_v12, %v10129_v32 }
 0x528   : > { %v4875_v2 = vmax.f32 %v4873_v44, %v10126_v19  ;;  %v5020_v18 = vadd.f32 %v5019_v38, %v10068_v63  ;;  %v5068_v5 = vadd.f32 %v5067_v57, %v10071_v4  ;;  %v4225_v8 = vrot.slane %v4211_v56, %v9324_v20 }
 0x529   : > { %13025 = vst [vmem:[#allocation347_spill] sm:$0xff] %v10160_v1  ;;  %v4226_v9 = vcombine.high %v4218_v27, %v4218_v27  ;;  %v10169_v52 = vmul.f32 %v13026_v3, %v4467_v37  ;;  %v10172_v62 = vmul.f32 %v13028_v34, %v4467_v37  ;;  %v4829_v6 = vmax.f32 %v4827_v59, %v10135_v50 }
 0x52a   : > { %v4876_v53 = vmax.f32 %v4874_v14, %v10132_v13  ;;  %v5021_v12 = vadd.f32 %v5020_v18, %v10108_v16  ;;  %v5069_v44 = vadd.f32 %v5068_v5, %v10111_v39  ;;  %v4227_v38 = vcombine.high %v4225_v8, %v4225_v8 }
 0x52b   : > { %13027 = vst [vmem:[#allocation348_spill] sm:$0xff] %v10169_v52  ;;  %13029 = vst [vmem:[#allocation349_spill] sm:$0xff] %v10172_v62  ;;  %v4234_v57 = vrot.slane %v4218_v27, %v9324_v20  ;;  %v4830_v56 = vmax.f32 %v4828_v0, %v10141_v47  ;;  %v4877_v63 = vmax.f32 %v4875_v2, %v10138_v30 }
 0x52c   : > { %v4241_v3 = vrot.slane %v4225_v8, %v9324_v20  ;;  %v4248_v37 = vrot.slane %v4226_v9, %v9324_v20  ;;  %v5022_v34 = vadd.f32 %v5021_v12, %v10114_v43  ;;  %v5070_v59 = vadd.f32 %v5069_v44, %v10117_v45 }
 0x52d   : > { %v4255_v14 = vrot.slane %v4227_v38, %v9324_v20  ;;  %v4256_v18 = vcombine.high %v4234_v57, %v4234_v57  ;;  %v4878_v5 = vmax.f32 %v4876_v53, %v10144_v41  ;;  %v4471_v27 = vrot.slane %v4234_v57, %v9333_v17 }
 0x52e   : > { %v4257_v16 = vcombine.high %v4241_v3, %v4241_v3  ;;  %v4258_v28 = vcombine.high %v4248_v37, %v4248_v37  ;;  %v5023_v0 = vadd.f32 %v5022_v34, %v10123_v33  ;;  %v5071_v2 = vadd.f32 %v5070_v59, %v10126_v19  ;;  %v13030_v33 = vld [vmem:[#allocation64_spill] sm:$0xff] }
 0x52f   : > { %v4259_v8 = vcombine.high %v4255_v14, %v4255_v14  ;;  %v4475_v9 = vrot.slane %v4248_v37, %v9333_v17  ;;  %v4479_v12 = vrot.slane %v4256_v18, %v9333_v17  ;;  %v4831_v38 = vmax.f32 %v4829_v6, %v10147_v21 }
 0x530   : > { %v4483_v44 = vrot.slane %v4258_v28, %v9333_v17  ;;  %v4832_v43 = vmax.f32 %v4830_v56, %v10169_v52  ;;  %v5024_v53 = vadd.f32 %v5023_v0, %v10129_v32  ;;  %v5072_v45 = vadd.f32 %v5071_v2, %v10132_v13  ;;  %v13032_v28 = vld [vmem:[#allocation65_spill] sm:$0xff]  ;;  %v13034_v0 = vld [vmem:[#allocation66_spill] sm:$0xff] }
 0x531   : > { %v4487_v57 = vrot.slane %v4241_v3, %v9333_v17  ;;  %v4491_v34 = vrot.slane %v4255_v14, %v9333_v17  ;;  %v4495_v59 = vrot.slane %v4257_v16, %v9333_v17  ;;  %v4499_v37 = vrot.slane %v4259_v8, %v9333_v17  ;;  %v13036_v3 = vld [vmem:[#allocation67_spill] sm:$0xff]  ;;  %v13038_v14 = vld [vmem:[#allocation68_spill] sm:$0xff]  ;;  %v13040_v8 = vld [vmem:[#allocation69_spill] sm:$0xff] }
 0x532   : > { %v10202_v18 = vmul.f32 %v13030_v33, %v4471_v27  ;;  %v10205_v19 = vmul.f32 %v13032_v28, %v4471_v27  ;;  %v5025_v6 = vadd.f32 %v5024_v53, %v10135_v50  ;;  %v5073_v56 = vadd.f32 %v5072_v45, %v10138_v30  ;;  %v13042_v33 = vld [vmem:[#allocation70_spill] sm:$0xff]  ;;  %v13044_v27 = vld [vmem:[#allocation71_spill] sm:$0xff] }
 0x533   : > { %v10210_v2 = vmul.f32 %v13034_v0, %v4475_v9  ;;  %v10213_v32 = vmul.f32 %v13036_v3, %v4475_v9  ;;  %v10216_v16 = vmul.f32 %v13038_v14, %v4479_v12  ;;  %v10219_v13 = vmul.f32 %v13040_v8, %v4479_v12  ;;  %v13046_v0 = vld [vmem:[#allocation72_spill] sm:$0xff]  ;;  %v13048_v9 = vld [vmem:[#allocation73_spill] sm:$0xff]  ;;  %v13050_v14 = vld [vmem:[#allocation74_spill] sm:$0xff] }
 0x534   : > { %13031 = vst [vmem:[#allocation350_spill] sm:$0xff] %v10202_v18  ;;  %13033 = vst [vmem:[#allocation351_spill] sm:$0xff] %v10205_v19  ;;  %v10222_v39 = vmul.f32 %v13042_v33, %v4483_v44  ;;  %v10225_v28 = vmul.f32 %v13044_v27, %v4483_v44  ;;  %v5026_v45 = vadd.f32 %v5025_v6, %v10141_v47  ;;  %v13052_v12 = vld [vmem:[#allocation75_spill] sm:$0xff]  ;;  %v13054_v33 = vld [vmem:[#allocation76_spill] sm:$0xff] }
 0x535   : > { %13035 = vst [vmem:[#allocation352_spill] sm:$0xff] %v10210_v2  ;;  %13037 = vst [vmem:[#allocation353_spill] sm:$0xff] %v10213_v32  ;;  %v5074_v53 = vadd.f32 %v5073_v56, %v10144_v41  ;;  %v10230_v50 = vmul.f32 %v13046_v0, %v4487_v57  ;;  %v10233_v3 = vmul.f32 %v13048_v9, %v4487_v57  ;;  %v13060_v27 = vld [vmem:[#allocation79_spill] sm:$0xff] }
 0x536   : > { %13039 = vst [vmem:[#allocation354_spill] sm:$0xff] %v10216_v16  ;;  %13041 = vst [vmem:[#allocation355_spill] sm:$0xff] %v10219_v13  ;;  %v10236_v30 = vmul.f32 %v13050_v14, %v4491_v34  ;;  %v10239_v8 = vmul.f32 %v13052_v12, %v4491_v34  ;;  %v10242_v4 = vmul.f32 %v13054_v33, %v4495_v59  ;;  %v13056_v12 = vld [vmem:[#allocation77_spill] sm:$0xff] }
 0x537   : > { %13043 = vst [vmem:[#allocation356_spill] sm:$0xff] %v10222_v39  ;;  %13045 = vst [vmem:[#allocation357_spill] sm:$0xff] %v10225_v28  ;;  %v4833_v44 = vmax.f32 %v4831_v38, %v10202_v18  ;;  %v4834_v6 = vmax.f32 %v4832_v43, %v10210_v2  ;;  %v4879_v56 = vmax.f32 %v4877_v63, %v10160_v1 }
 0x538   : > { %13047 = vst [vmem:[#allocation358_spill] sm:$0xff] %v10230_v50  ;;  %13049 = vst [vmem:[#allocation359_spill] sm:$0xff] %v10233_v3  ;;  %v4880_v0 = vmax.f32 %v4878_v5, %v10172_v62  ;;  %v5027_v57 = vadd.f32 %v5026_v45, %v10147_v21  ;;  %v5075_v14 = vadd.f32 %v5074_v53, %v10160_v1  ;;  %v13058_v45 = vld [vmem:[#allocation78_spill] sm:$0xff] }
 0x539   : > { %13051 = vst [vmem:[#allocation360_spill] sm:$0xff] %v10236_v30  ;;  %13053 = vst [vmem:[#allocation361_spill] sm:$0xff] %v10239_v8  ;;  %v4835_v47 = vmax.f32 %v4833_v44, %v10216_v16  ;;  %v4260_v34 = vcombine.high %v9924_v10, %v9924_v10  ;;  %v4267_v33 = vrot.slane %v9924_v10, %v9324_v20 }
 0x53a   : > { %13055 = vst [vmem:[#allocation362_spill] sm:$0xff] %v10242_v4  ;;  %v10256_v38 = vmul.f32 %v13056_v12, %v4495_v59  ;;  %v4881_v43 = vmax.f32 %v4879_v56, %v10205_v19  ;;  %v4882_v63 = vmax.f32 %v4880_v0, %v10213_v32  ;;  %v5028_v5 = vadd.f32 %v5027_v57, %v10169_v52 }
 0x53b   : > { %v10262_v21 = vmul.f32 %v13058_v45, %v4499_v37  ;;  %v5076_v53 = vadd.f32 %v5075_v14, %v10172_v62  ;;  %v4274_v44 = vrot.slane %v4260_v34, %v9324_v20  ;;  %v4275_v9 = vcombine.high %v4267_v33, %v4267_v33 }
 0x53c   : > { %13057 = vst [vmem:[#allocation363_spill] sm:$0xff] %v10256_v38  ;;  %v10267_v1 = vmul.f32 %v13060_v27, %v4499_v37  ;;  %v4836_v10 = vmax.f32 %v4834_v6, %v10222_v39  ;;  %v4837_v59 = vmax.f32 %v4835_v47, %v10230_v50  ;;  %v5029_v56 = vadd.f32 %v5028_v5, %v10202_v18 }
 0x53d   : > { %13059 = vst [vmem:[#allocation364_spill] sm:$0xff] %v10262_v21  ;;  %v5077_v0 = vadd.f32 %v5076_v53, %v10205_v19  ;;  %v4276_v57 = vcombine.high %v4274_v44, %v4274_v44  ;;  %v4283_v45 = vrot.slane %v4267_v33, %v9324_v20  ;;  %v4290_v52 = vrot.slane %v4274_v44, %v9324_v20 }
 0x53e   : > { %13061 = vst [vmem:[#allocation365_spill] sm:$0xff] %v10267_v1  ;;  %v4883_v14 = vmax.f32 %v4881_v43, %v10219_v13  ;;  %v4884_v34 = vmax.f32 %v4882_v63, %v10225_v28  ;;  %v5030_v37 = vadd.f32 %v5029_v56, %v10210_v2  ;;  %v4297_v27 = vrot.slane %v4275_v9, %v9324_v20 }
 0x53f   : > { %v5078_v6 = vadd.f32 %v5077_v0, %v10213_v32  ;;  %v4304_v47 = vrot.slane %v4276_v57, %v9324_v20  ;;  %v4305_v5 = vcombine.high %v4283_v45, %v4283_v45  ;;  %v4306_v18 = vcombine.high %v4290_v52, %v4290_v52 }
 0x540   : > { %v4838_v53 = vmax.f32 %v4836_v10, %v10236_v30  ;;  %v5031_v33 = vadd.f32 %v5030_v37, %v10216_v16  ;;  %v4307_v12 = vcombine.high %v4297_v27, %v4297_v27  ;;  %v4503_v44 = vrot.slane %v4283_v45, %v9333_v17 }
 0x541   : > { %v5079_v43 = vadd.f32 %v5078_v6, %v10219_v13  ;;  %v4308_v63 = vcombine.high %v4304_v47, %v4304_v47  ;;  %v4507_v56 = vrot.slane %v4297_v27, %v9333_v17  ;;  %v4511_v9 = vrot.slane %v4305_v5, %v9333_v17 }
 0x542   : > { %v4885_v0 = vmax.f32 %v4883_v14, %v10233_v3  ;;  %v4886_v57 = vmax.f32 %v4884_v34, %v10239_v8  ;;  %v5032_v2 = vadd.f32 %v5031_v33, %v10222_v39  ;;  %v4515_v10 = vrot.slane %v4307_v12, %v9333_v17 }
 0x543   : > { %v5080_v37 = vadd.f32 %v5079_v43, %v10225_v28  ;;  %v4519_v16 = vrot.slane %v4290_v52, %v9333_v17  ;;  %v4523_v45 = vrot.slane %v4304_v47, %v9333_v17  ;;  %v4527_v6 = vrot.slane %v4306_v18, %v9333_v17  ;;  %v13065_v52 = vld [vmem:[#allocation83_spill] sm:$0xff]  ;;  %v13068_v47 = vld [vmem:[#allocation85_spill] sm:$0xff] }
 0x544   : > { %v5033_v27 = vadd.f32 %v5032_v2, %v10230_v50  ;;  %v4531_v5 = vrot.slane %v4308_v63, %v9333_v17  ;;  %v10298_v14 = vmul.f32 %v12917_v55, %v4503_v44  ;;  %v10301_v34 = vmul.f32 %v12929_v25, %v4503_v44  ;;  %v13070_v55 = vld [vmem:[#allocation86_spill] sm:$0xff]  ;;  %v13072_v44 = vld [vmem:[#allocation87_spill] sm:$0xff] }
 0x545   : > { %v5081_v12 = vadd.f32 %v5080_v37, %v10233_v3  ;;  %v10305_v33 = vmul.f32 %v12924_v51, %v4507_v56  ;;  %v10308_v43 = vmul.f32 %v13065_v52, %v4507_v56  ;;  %v10311_v18 = vmul.f32 %v12928_v46, %v4511_v9  ;;  %v13074_v51 = vld [vmem:[#allocation88_spill] sm:$0xff]  ;;  %v13076_v56 = vld [vmem:[#allocation89_spill] sm:$0xff]  ;;  %v13078_v46 = vld [vmem:[#allocation90_spill] sm:$0xff] }
 0x546   : > { %13062 = vst [vmem:[#allocation366_spill] sm:$0xff] %v10298_v14  ;;  %13063 = vst [vmem:[#allocation367_spill] sm:$0xff] %v10301_v34  ;;  %v5034_v2 = vadd.f32 %v5033_v27, %v10236_v30  ;;  %v10315_v63 = vmul.f32 %v13068_v47, %v4511_v9  ;;  %v10318_v50 = vmul.f32 %v13070_v55, %v4515_v10  ;;  %v13080_v27 = vld [vmem:[#allocation91_spill] sm:$0xff]  ;;  %v13082_v30 = vld [vmem:[#allocation92_spill] sm:$0xff] }
 0x547   : > { %13064 = vst [vmem:[#allocation368_spill] sm:$0xff] %v10305_v33  ;;  %13066 = vst [vmem:[#allocation369_spill] sm:$0xff] %v10308_v43  ;;  %v10321_v39 = vmul.f32 %v13072_v44, %v4515_v10  ;;  %v5082_v37 = vadd.f32 %v5081_v12, %v10239_v8  ;;  %v10325_v25 = vmul.f32 %v13074_v51, %v4519_v16 }
 0x548   : > { %13067 = vst [vmem:[#allocation370_spill] sm:$0xff] %v10311_v18  ;;  %13069 = vst [vmem:[#allocation371_spill] sm:$0xff] %v10315_v63  ;;  %v10328_v3 = vmul.f32 %v13076_v56, %v4519_v16  ;;  %v10331_v28 = vmul.f32 %v13078_v46, %v4523_v45  ;;  %v10334_v9 = vmul.f32 %v13080_v27, %v4523_v45 }
 0x549   : > { %13071 = vst [vmem:[#allocation372_spill] sm:$0xff] %v10318_v50  ;;  %13073 = vst [vmem:[#allocation373_spill] sm:$0xff] %v10321_v39  ;;  %v10337_v13 = vmul.f32 %v13082_v30, %v4527_v6  ;;  %v4839_v10 = vmax.f32 %v4837_v59, %v10242_v4  ;;  %v4840_v32 = vmax.f32 %v4838_v53, %v10262_v21 }
 0x54a   : > { %13075 = vst [vmem:[#allocation374_spill] sm:$0xff] %v10325_v25  ;;  %13077 = vst [vmem:[#allocation375_spill] sm:$0xff] %v10328_v3  ;;  %v4887_v12 = vmax.f32 %v4885_v0, %v10256_v38  ;;  %v4888_v8 = vmax.f32 %v4886_v57, %v10267_v1  ;;  %v5035_v16 = vadd.f32 %v5034_v2, %v10242_v4  ;;  %v13084_v4 = vld [vmem:[#allocation93_spill] sm:$0xff] }
 0x54b   : > { %13079 = vst [vmem:[#allocation376_spill] sm:$0xff] %v10331_v28  ;;  %13081 = vst [vmem:[#allocation377_spill] sm:$0xff] %v10334_v9  ;;  %v5083_v19 = vadd.f32 %v5082_v37, %v10256_v38  ;;  %v4841_v62 = vmax.f32 %v4839_v10, %v10298_v14  ;;  %v4842_v45 = vmax.f32 %v4840_v32, %v10305_v33 }
 0x54c   : > { %13083 = vst [vmem:[#allocation378_spill] sm:$0xff] %v10337_v13  ;;  %v4309_v41 = vcombine.high %v9951_v29, %v9951_v29  ;;  %v4316_v59 = vrot.slane %v9951_v29, %v9324_v20  ;;  %v4889_v53 = vmax.f32 %v4887_v12, %v10301_v34  ;;  %v4890_v0 = vmax.f32 %v4888_v8, %v10308_v43 }
 0x54d   : > { %v5036_v57 = vadd.f32 %v5035_v16, %v10262_v21  ;;  %v5084_v2 = vadd.f32 %v5083_v19, %v10267_v1  ;;  %v10356_v37 = vmul.f32 %v13084_v4, %v4527_v6  ;;  %v4843_v10 = vmax.f32 %v4841_v62, %v10311_v18  ;;  %v13088_v16 = vld [vmem:[#allocation95_spill] sm:$0xff] }
 0x54e   : > { %v4323_v32 = vrot.slane %v4309_v41, %v9324_v20  ;;  %v4324_v38 = vcombine.high %v4316_v59, %v4316_v59  ;;  %v10361_v31 = vmul.f32 %v13086_v48, %v4531_v5  ;;  %v4844_v29 = vmax.f32 %v4842_v45, %v10318_v50 }
 0x54f   : > { %13085 = vst [vmem:[#allocation379_spill] sm:$0xff] %v10356_v37  ;;  %v5037_v12 = vadd.f32 %v5036_v57, %v10298_v14  ;;  %v5085_v8 = vadd.f32 %v5084_v2, %v10301_v34  ;;  %v10367_v21 = vmul.f32 %v13088_v16, %v4531_v5  ;;  %v4891_v19 = vmax.f32 %v4889_v53, %v10315_v63 }
 0x550   : > { %13087 = vst [vmem:[#allocation380_spill] sm:$0xff] %v10361_v31  ;;  %v4325_v6 = vcombine.high %v4323_v32, %v4323_v32  ;;  %v4332_v62 = vrot.slane %v4316_v59, %v9324_v20  ;;  %v4845_v41 = vmax.f32 %v4843_v10, %v10325_v25  ;;  %v4892_v1 = vmax.f32 %v4890_v0, %v10321_v39 }
 0x551   : > { %13089 = vst [vmem:[#allocation381_spill] sm:$0xff] %v10367_v21  ;;  %v5038_v11 = vadd.f32 %v5037_v12, %v10305_v33  ;;  %v5086_v45 = vadd.f32 %v5085_v8, %v10308_v43  ;;  %v4339_v57 = vrot.slane %v4323_v32, %v9324_v20  ;;  %v4346_v2 = vrot.slane %v4324_v38, %v9324_v20 }
 0x552   : > { %v4353_v5 = vrot.slane %v4325_v6, %v9324_v20  ;;  %v4354_v14 = vcombine.high %v4332_v62, %v4332_v62  ;;  %v10379_v53 = vmax.f32 %v4844_v29, %v10331_v28  ;;  %v4535_v0 = vrot.slane %v4332_v62, %v9333_v17 }
 0x553   : > { %v5039_v59 = vadd.f32 %v5038_v11, %v10311_v18  ;;  %v5087_v10 = vadd.f32 %v5086_v45, %v10315_v63  ;;  %v4355_v34 = vcombine.high %v4339_v57, %v4339_v57  ;;  %v4356_v12 = vcombine.high %v4346_v2, %v4346_v2  ;;  %v13102_v63 = vld [vmem:[#allocation102_spill] sm:$0xff] }
 0x554   : > { %v4357_v33 = vcombine.high %v4353_v5, %v4353_v5  ;;  %v4539_v8 = vrot.slane %v4346_v2, %v9333_v17  ;;  %v4893_v32 = vmax.f32 %v4891_v19, %v10328_v3  ;;  %v4543_v29 = vrot.slane %v4354_v14, %v9333_v17 }
 0x555   : > { %v5040_v38 = vadd.f32 %v5039_v59, %v10318_v50  ;;  %v5088_v6 = vadd.f32 %v5087_v10, %v10321_v39  ;;  %v4894_v43 = vmax.f32 %v4892_v1, %v10334_v9  ;;  %v4547_v11 = vrot.slane %v4356_v12, %v9333_v17  ;;  %v13090_v50 = vld [vmem:[#allocation96_spill] sm:$0xff]  ;;  %v13092_v1 = vld [vmem:[#allocation97_spill] sm:$0xff]  ;;  %v13094_v12 = vld [vmem:[#allocation98_spill] sm:$0xff] }
 0x556   : > { %v4551_v45 = vrot.slane %v4339_v57, %v9333_v17  ;;  %v4847_v62 = vmax.f32 %v4845_v41, %v10337_v13  ;;  %v4555_v19 = vrot.slane %v4353_v5, %v9333_v17  ;;  %v4559_v59 = vrot.slane %v4355_v34, %v9333_v17  ;;  %v13098_v5 = vld [vmem:[#allocation100_spill] sm:$0xff] }
 0x557   : > { %v5041_v18 = vadd.f32 %v5040_v38, %v10325_v25  ;;  %v5089_v2 = vadd.f32 %v5088_v6, %v10328_v3  ;;  %v4563_v10 = vrot.slane %v4357_v33, %v9333_v17  ;;  %v10399_v14 = vmul.f32 %v13090_v50, %v4535_v0  ;;  %v13096_v6 = vld [vmem:[#allocation99_spill] sm:$0xff]  ;;  %v13100_v33 = vld [vmem:[#allocation101_spill] sm:$0xff] }
 0x558   : > { %v10402_v39 = vmul.f32 %v13092_v1, %v4535_v0  ;;  %v10405_v57 = vmul.f32 %v13094_v12, %v4539_v8  ;;  %v10410_v25 = vmul.f32 %v13096_v6, %v4539_v8  ;;  %v10413_v34 = vmul.f32 %v13098_v5, %v4543_v29  ;;  %v13104_v0 = vld [vmem:[#allocation103_spill] sm:$0xff]  ;;  %v13110_v8 = vld [vmem:[#allocation106_spill] sm:$0xff] }
 0x559   : > { %13091 = vst [vmem:[#allocation382_spill] sm:$0xff] %v10399_v14  ;;  %v5042_v41 = vadd.f32 %v5041_v18, %v10331_v28  ;;  %v5090_v38 = vadd.f32 %v5089_v2, %v10334_v9  ;;  %v10416_v3 = vmul.f32 %v13100_v33, %v4543_v29  ;;  %v10419_v35 = vmul.f32 %v13102_v63, %v4547_v11  ;;  %v13108_v18 = vld [vmem:[#allocation105_spill] sm:$0xff]  ;;  %v13112_v9 = vld [vmem:[#allocation107_spill] sm:$0xff]  ;;  %v13114_v29 = vld [vmem:[#allocation108_spill] sm:$0xff] }
 0x55a   : > { %13093 = vst [vmem:[#allocation383_spill] sm:$0xff] %v10402_v39  ;;  %13095 = vst [vmem:[#allocation384_spill] sm:$0xff] %v10405_v57  ;;  %v10422_v1 = vmul.f32 %v13104_v0, %v4547_v11  ;;  %v10425_v22 = vmul.f32 %v13106_v23, %v4551_v45  ;;  %v10428_v2 = vmul.f32 %v13108_v18, %v4551_v45  ;;  %v13116_v63 = vld [vmem:[#allocation109_spill] sm:$0xff]  ;;  %v13118_v11 = vld [vmem:[#allocation110_spill] sm:$0xff] }
 0x55b   : > { %13097 = vst [vmem:[#allocation385_spill] sm:$0xff] %v10410_v25  ;;  %13099 = vst [vmem:[#allocation386_spill] sm:$0xff] %v10413_v34  ;;  %v10431_v28 = vmul.f32 %v13110_v8, %v4555_v19  ;;  %v10434_v6 = vmul.f32 %v13112_v9, %v4555_v19  ;;  %v10437_v33 = vmul.f32 %v13114_v29, %v4559_v59  ;;  %v13120_v9 = vld [vmem:[#allocation111_spill] sm:$0xff] }
 0x55c   : > { %13101 = vst [vmem:[#allocation387_spill] sm:$0xff] %v10416_v3  ;;  %13103 = vst [vmem:[#allocation388_spill] sm:$0xff] %v10419_v35  ;;  %v10440_v58 = vmul.f32 %v13116_v63, %v4559_v59  ;;  %v4849_v0 = vmax.f32 %v4847_v62, %v10399_v14  ;;  %v4895_v45 = vmax.f32 %v4893_v32, %v10356_v37 }
 0x55d   : > { %13105 = vst [vmem:[#allocation389_spill] sm:$0xff] %v10422_v1  ;;  %13107 = vst [vmem:[#allocation390_spill] sm:$0xff] %v10425_v22  ;;  %v10443_v1 = vmul.f32 %v13118_v11, %v4563_v10  ;;  %v5043_v18 = vadd.f32 %v5042_v41, %v10337_v13  ;;  %v4364_v19 = vrot.slane %v9981_v24, %v9324_v20 }
 0x55e   : > { %13109 = vst [vmem:[#allocation391_spill] sm:$0xff] %v10428_v2  ;;  %13111 = vst [vmem:[#allocation392_spill] sm:$0xff] %v10431_v28  ;;  %v5091_v28 = vadd.f32 %v5090_v38, %v10356_v37  ;;  %v10454_v59 = vmul.f32 %v13120_v9, %v4563_v10  ;;  %v4851_v62 = vmax.f32 %v4849_v0, %v10413_v34  ;;  %v13146_v37 = vld [vmem:[#allocation211_spill] sm:$0xff] }
 0x55f   : > { %13113 = vst [vmem:[#allocation393_spill] sm:$0xff] %v10434_v6  ;;  %13115 = vst [vmem:[#allocation394_spill] sm:$0xff] %v10437_v33  ;;  %v5905_v6 = vadd.f32 %v13070_v55, %v9836_v42  ;;  %v4897_v32 = vmax.f32 %v4895_v45, %v10402_v39  ;;  %v5044_v41 = vadd.f32 %v5043_v18, %v10361_v31 }
 0x560   : > { %13117 = vst [vmem:[#allocation395_spill] sm:$0xff] %v10440_v58  ;;  %13119 = vst [vmem:[#allocation396_spill] sm:$0xff] %v10443_v1  ;;  %v4848_v1 = vmax.f32 %v10379_v53, %v10361_v31  ;;  %v5092_v38 = vadd.f32 %v5091_v28, %v10367_v21  ;;  %v4371_v13 = vrot.slane %v4364_v19, %v9324_v20 }
 0x561   : > { %13121 = vst [vmem:[#allocation397_spill] sm:$0xff] %v10454_v59  ;;  %v5906_v24 = vadd.f32 %v13074_v51, %v5905_v6  ;;  %v4853_v42 = vmax.f32 %v4851_v62, %v10425_v22  ;;  %v4896_v10 = vmax.f32 %v4894_v43, %v10367_v21  ;;  %v4899_v55 = vmax.f32 %v4897_v32, %v10416_v3  ;;  %v13122_v32 = vld [vmem:[#allocation112_spill] sm:$0xff]  ;;  %v13163_v22 = vld [vmem:[#allocation294_spill] sm:$0xff] }
 0x562   : > { %v5951_v53 = vadd.f32 %v13065_v52, %v9840_v54  ;;  %v5045_v0 = vadd.f32 %v5044_v41, %v10399_v14  ;;  %v5093_v45 = vadd.f32 %v5092_v38, %v10402_v39  ;;  %v4567_v18 = vrot.slane %v4371_v13, %v9333_v17  ;;  %v13124_v38 = vld [vmem:[#allocation113_spill] sm:$0xff] }
 0x563   : > { %v5907_v28 = vadd.f32 %v13078_v46, %v5906_v24  ;;  %v4901_v20 = vmax.f32 %v4899_v55, %v10428_v2  ;;  %v4855_v6 = vmax.f32 %v4853_v42, %v10437_v33  ;;  %v2225_v43 = vcombine.high %v9963_v60, %v9963_v60  ;;  %v13137_v46 = vld [vmem:[#allocation204_spill] sm:$0xff]  ;;  %v13149_v52 = vld [vmem:[#allocation281_spill] sm:$0xff] }
 0x564   : > { %v5952_v19 = vadd.f32 %v13068_v47, %v5951_v53  ;;  %v5046_v62 = vadd.f32 %v5045_v0, %v10405_v57  ;;  %v5094_v54 = vadd.f32 %v5093_v45, %v10410_v25  ;;  %v10481_v41 = vmul.f32 %v13122_v32, %v4567_v18 }
 0x565   : > { %v10484_v13 = vmul.f32 %v13124_v38, %v4567_v18  ;;  %v10487_v24 = vmax.f32 %v4848_v1, %v10405_v57  ;;  %v4903_v55 = vmax.f32 %v4901_v20, %v10440_v58  ;;  %v5908_v42 = vadd.f32 %v13082_v30, %v5907_v28  ;;  %v13156_v58 = vld [vmem:[#allocation293_spill] sm:$0xff] }
 0x566   : > { %13123 = vst [vmem:[#allocation398_spill] sm:$0xff] %v10481_v41  ;;  %v5953_v53 = vadd.f32 %v13072_v44, %v5952_v19  ;;  %v10493_v14 = vmax.f32 %v4896_v10, %v10410_v25  ;;  %v5047_v0 = vadd.f32 %v5046_v62, %v10413_v34  ;;  %v13126_v45 = vcombine.high %v9954_v15, %v9954_v15  ;;  %v13135_v34 = vld [vmem:[#allocation202_spill] sm:$0xff] }
 0x567   : > { %13125 = vst [vmem:[#allocation399_spill] sm:$0xff] %v10484_v13  ;;  %v2423_v1 = vrot.slane %v9963_v60, %v9333_v17  ;;  %v10503_v57 = vadd.f32 %v5094_v54, %v10416_v3  ;;  %v10506_v28 = vmax.f32 %v4855_v6, %v10481_v41  ;;  %v5909_v20 = vadd.f32 %v13086_v48, %v5908_v42  ;;  %v13139_v3 = vld [vmem:[#allocation206_spill] sm:$0xff]  ;;  %v13155_v41 = vld [vmem:[#allocation283_spill] sm:$0xff] }
 0x568   : > { %v2415_v18 = vrot.slane %v13126_v45, %v9333_v17  ;;  %v5954_v10 = vadd.f32 %v13076_v56, %v5953_v53  ;;  %v10511_v19 = vadd.f32 %v5047_v0, %v10419_v35  ;;  %v10514_v62 = vmax.f32 %v4903_v55, %v10484_v13  ;;  %v13131_v53 = vld [vmem:[#allocation197_spill] sm:$0xff] }
 0x569   : > { %13127 = vst [vmem:[#allocation400_spill] sm:$0xff] %v10506_v28  ;;  %v13130_v60 = vcombine.high %v9949_v61, %v9949_v61  ;;  %v2431_v54 = vrot.slane %v2225_v43, %v9333_v17  ;;  %v5910_v6 = vadd.f32 %v13090_v50, %v5909_v20  ;;  %v2435_v42 = vrot.slane %v10080_v49, %v9333_v17  ;;  %v13132_v61 = vld [vmem:[#allocation199_spill] sm:$0xff]  ;;  %v13133_v43 = vld [vmem:[#allocation200_spill] sm:$0xff]  ;;  %v13159_v28 = vld [vmem:[#allocation269_spill] sm:$0xff] }
 0x56a   : > { %13128 = vst [vmem:[#allocation401_spill] sm:$0xff] %v10511_v19  ;;  %13129 = vst [vmem:[#allocation402_spill] sm:$0xff] %v10514_v62  ;;  %v5955_v45 = vadd.f32 %v13080_v27, %v5954_v10  ;;  %v10527_v0 = vmul.f32 %v13131_v53, %v9972_v36  ;;  %v10531_v55 = vmul.f32 %v12795_v40, %v9972_v36  ;;  %v13134_v10 = vld [vmem:[#allocation201_spill] sm:$0xff]  ;;  %v13136_v36 = vld [vmem:[#allocation203_spill] sm:$0xff] }
 0x56b   : > { %v2427_v15 = vrot.slane %v13130_v60, %v9333_v17  ;;  %v10535_v60 = vmul.f32 %v13132_v61, %v9975_v26  ;;  %v10539_v20 = vmul.f32 %v13133_v43, %v9975_v26  ;;  %v10542_v50 = vmul.f32 %v13134_v10, %v2415_v18  ;;  %v13138_v26 = vld [vmem:[#allocation205_spill] sm:$0xff]  ;;  %v13162_v19 = vld [vmem:[#allocation284_spill] sm:$0xff] }
 0x56c   : > { %v5911_v17 = vadd.f32 %v13094_v12, %v5910_v6  ;;  %v5956_v49 = vadd.f32 %v13084_v4, %v5955_v45  ;;  %v10547_v48 = vmul.f32 %v13135_v34, %v2415_v18  ;;  %v10551_v30 = vmul.f32 %v13136_v36, %v9979_v7  ;;  %v13141_v6 = vld [vmem:[#allocation207_spill] sm:$0xff]  ;;  %v13142_v4 = vld [vmem:[#allocation208_spill] sm:$0xff]  ;;  %v13143_v27 = vld [vmem:[#allocation209_spill] sm:$0xff] }
 0x56d   : > { %v10555_v31 = vmul.f32 %v13137_v46, %v9979_v7  ;;  %v10558_v51 = vmul.f32 %v13138_v26, %v2423_v1  ;;  %v10561_v25 = vmul.f32 %v13139_v3, %v2423_v1  ;;  %v10564_v12 = vmul.f32 %v13141_v6, %v2427_v15  ;;  %v13144_v7 = vld [vmem:[#allocation210_spill] sm:$0xff]  ;;  %v13147_v1 = vld [vmem:[#allocation212_spill] sm:$0xff]  ;;  %v13150_v53 = vld [vmem:[#allocation297_spill] sm:$0xff] }
 0x56e   : > { %v5912_v18 = vadd.f32 %v13098_v5, %v5911_v17  ;;  %v5957_v45 = vadd.f32 %v13088_v16, %v5956_v49  ;;  %v10569_v39 = vmul.f32 %v13142_v4, %v2427_v15  ;;  %v10572_v21 = vmul.f32 %v13143_v27, %v2431_v54  ;;  %v13151_v17 = vld [vmem:[#allocation276_spill] sm:$0xff]  ;;  %v13153_v16 = vld [vmem:[#allocation102_spill] sm:$0xff]  ;;  %v13154_v40 = vld [vmem:[#allocation97_spill] sm:$0xff] }
 0x56f   : > { %13140 = vst [vmem:[#allocation403_spill] sm:$0xff] %v10561_v25  ;;  %v10575_v56 = vmul.f32 %v13144_v7, %v2431_v54  ;;  %v10578_v44 = vmul.f32 %v13146_v37, %v2435_v42  ;;  %v10581_v47 = vmul.f32 %v13147_v1, %v2435_v42  ;;  %v13152_v5 = vmax.f32 %v13150_v53, %v13151_v17  ;;  %v13157_v54 = vld [vmem:[#allocation273_spill] sm:$0xff]  ;;  %v13164_v25 = vld [vmem:[#allocation114_spill] sm:$0xff] }
 0x570   : > { %v5913_v15 = vadd.f32 %v13153_v16, %v5912_v18  ;;  %v5958_v13 = vadd.f32 %v13154_v40, %v5957_v45  ;;  %v4747_v33 = vmax.f32 %v13156_v58, %v13155_v41  ;;  %v13158_v62 = vld [vmem:[#allocation277_spill] sm:$0xff]  ;;  %v13166_v16 = vld [vmem:[#allocation99_spill] sm:$0xff] }
 0x571   : > { %13145 = vst [vmem:[#allocation404_spill] sm:$0xff] %v10575_v56  ;;  %13148 = vst [vmem:[#allocation405_spill] sm:$0xff] %v10581_v47  ;;  %v4746_v49 = vmax.f32 %v13152_v5, %v13149_v52  ;;  %v13160_v59 = vmax.f32 %v13158_v62, %v13159_v28  ;;  %v13161_v56 = vld [vmem:[#allocation285_spill] sm:$0xff]  ;;  %v4795_v47 = vmax.f32 %v13163_v22, %v13162_v19  ;;  %v13167_v40 = vld [vmem:[#allocation287_spill] sm:$0xff] }
 0x572   : > { %v5814_v5 = vadd.f32 %v13132_v61, %v13164_v25  ;;  %v13165_v53 = vld [vmem:[#allocation213_spill] sm:$0xff]  ;;  %v5914_v45 = vadd.f32 %v13106_v23, %v5913_v15  ;;  %v5959_v58 = vadd.f32 %v13166_v16, %v5958_v13  ;;  %v4749_v41 = vmax.f32 %v4747_v33, %v13167_v40  ;;  %v13168_v52 = vld [vmem:[#allocation278_spill] sm:$0xff]  ;;  %v13174_v16 = vld [vmem:[#allocation295_spill] sm:$0xff] }
 0x573   : > { %v4790_v2 = vmax.f32 %v13160_v59, %v13157_v54  ;;  %v4748_v42 = vmax.f32 %v4746_v49, %v13161_v56  ;;  %v5862_v18 = vadd.f32 %v13133_v43, %v13165_v53  ;;  %v13169_v59 = vld [vmem:[#allocation289_spill] sm:$0xff]  ;;  %v13170_v49 = vld [vmem:[#allocation288_spill] sm:$0xff]  ;;  %v13172_v43 = vld [vmem:[#allocation291_spill] sm:$0xff] }
 0x574   : > { %v4797_v56 = vmax.f32 %v4795_v47, %v13170_v49  ;;  %v5815_v22 = vadd.f32 %v13134_v10, %v5814_v5  ;;  %v5915_v25 = vadd.f32 %v13110_v8, %v5914_v45  ;;  %v13171_v61 = vld [vmem:[#allocation101_spill] sm:$0xff]  ;;  %v4751_v15 = vmax.f32 %v4749_v41, %v13172_v43  ;;  %v13173_v23 = vld [vmem:[#allocation282_spill] sm:$0xff]  ;;  %v13175_v40 = vld [vmem:[#allocation292_spill] sm:$0xff] }
 0x575   : > { %v4792_v62 = vmax.f32 %v4790_v2, %v13168_v52  ;;  %v4750_v17 = vmax.f32 %v4748_v42, %v13169_v59  ;;  %v5863_v19 = vadd.f32 %v13135_v34, %v5862_v18  ;;  %v5960_v53 = vadd.f32 %v13171_v61, %v5959_v58  ;;  %v13176_v10 = vld [vmem:[#allocation103_spill] sm:$0xff]  ;;  %v13177_v34 = vld [vmem:[#allocation316_spill] sm:$0xff]  ;;  %v13178_v8 = vld [vmem:[#allocation286_spill] sm:$0xff] }
 0x576   : > { %v4799_v2 = vmax.f32 %v4797_v56, %v13175_v40  ;;  %v5816_v42 = vadd.f32 %v13136_v36, %v5815_v22  ;;  %v5916_v5 = vadd.f32 %v13114_v29, %v5915_v25  ;;  %v4753_v45 = vmax.f32 %v4751_v15, %v13177_v34  ;;  %v13179_v61 = vld [vmem:[#allocation317_spill] sm:$0xff]  ;;  %v13181_v29 = vld [vmem:[#allocation290_spill] sm:$0xff] }
 0x577   : > { %v4794_v13 = vmax.f32 %v4792_v62, %v13173_v23  ;;  %v4752_v33 = vmax.f32 %v4750_v17, %v13174_v16  ;;  %v5864_v47 = vadd.f32 %v13137_v46, %v5863_v19  ;;  %v5961_v18 = vadd.f32 %v13176_v10, %v5960_v53  ;;  %v13180_v36 = vld [vmem:[#allocation105_spill] sm:$0xff]  ;;  %v13182_v10 = vld [vmem:[#allocation107_spill] sm:$0xff]  ;;  %v13257_v46 = vld [vmem:[#allocation236_spill] sm:$0xff] }
 0x578   : > { %v4801_v62 = vmax.f32 %v4799_v2, %v13179_v61  ;;  %v5817_v17 = vadd.f32 %v13138_v26, %v5816_v42  ;;  %v5917_v22 = vadd.f32 %v13118_v11, %v5916_v5  ;;  %v4755_v25 = vmax.f32 %v4753_v45, %v10535_v60 }
 0x579   : > { %v4796_v58 = vmax.f32 %v4794_v13, %v13178_v8  ;;  %v4754_v41 = vmax.f32 %v4752_v33, %v10527_v0  ;;  %v5865_v56 = vadd.f32 %v13139_v3, %v5864_v47  ;;  %v5962_v19 = vadd.f32 %v13180_v36, %v5961_v18  ;;  %v13183_v18 = vld [vmem:[#allocation296_spill] sm:$0xff] }
 0x57a   : > { %v4803_v13 = vmax.f32 %v4801_v62, %v10539_v20  ;;  %v5818_v33 = vadd.f32 %v13141_v6, %v5817_v17  ;;  %v5918_v42 = vadd.f32 %v13122_v32, %v5917_v22  ;;  %v4757_v5 = vmax.f32 %v4755_v25, %v10551_v30  ;;  %v13195_v36 = vld [vmem:[#allocation396_spill] sm:$0xff]  ;;  %v13199_v6 = vld [vmem:[#allocation402_spill] sm:$0xff] }
 0x57b   : > { %v4798_v53 = vmax.f32 %v4796_v58, %v13181_v29  ;;  %v4756_v15 = vmax.f32 %v4754_v41, %v10542_v50  ;;  %v5866_v2 = vadd.f32 %v13142_v4, %v5865_v56  ;;  %v5963_v47 = vadd.f32 %v13182_v10, %v5962_v19  ;;  %v13194_v10 = vld [vmem:[#allocation404_spill] sm:$0xff]  ;;  %v13250_v4 = vld [vmem:[#allocation234_spill] sm:$0xff] }
 0x57c   : > { %v4805_v58 = vmax.f32 %v4803_v13, %v10555_v31  ;;  %v5819_v41 = vadd.f32 %v13143_v27, %v5818_v33  ;;  %v5967_v56 = vmul.f32 0.020408163, %v5918_v42  ;;  %v4759_v22 = vmax.f32 %v4757_v5, %v10564_v12  ;;  %v13184_v42 = vld [vmem:[#allocation389_spill] sm:$0xff]  ;;  %v13198_v27 = vld [vmem:[#allocation400_spill] sm:$0xff] }
 0x57d   : > { %v4800_v11 = vmax.f32 %v4798_v53, %v13183_v18  ;;  %v4758_v45 = vmax.f32 %v4756_v15, %v10558_v51  ;;  %v5867_v62 = vadd.f32 %v13144_v7, %v5866_v2  ;;  %v5964_v17 = vadd.f32 %v13116_v63, %v5963_v47  ;;  %v13189_v63 = vld [vmem:[#allocation390_spill] sm:$0xff]  ;;  %v13249_v7 = vld [vmem:[#allocation255_spill] sm:$0xff] }
 0x57e   : > { %v4807_v25 = vmax.f32 %v4805_v58, %v10569_v39  ;;  %v5820_v53 = vadd.f32 %v13146_v37, %v5819_v41  ;;  %6267 = vst [vmem:[%s8240_s29 + $0x30] sm:$0xff] %v5967_v56  ;;  %v4761_v33 = vmax.f32 %v4759_v22, %v10578_v44  ;;  %v5096_v47 = vadd.f32 %v10503_v57, %v13184_v42  ;;  %v13187_v56 = vld [vmem:[#allocation405_spill] sm:$0xff] }
 0x57f   : > { %v4802_v19 = vmax.f32 %v4800_v11, %v10531_v55  ;;  %v4760_v32 = vmax.f32 %v4758_v45, %v10572_v21  ;;  %v5868_v15 = vadd.f32 %v13147_v1, %v5867_v62  ;;  %v5965_v13 = vadd.f32 %v13120_v9, %v5964_v17  ;;  %v13186_v62 = vld [vmem:[#allocation403_spill] sm:$0xff]  ;;  %v13188_v9 = vld [vmem:[#allocation392_spill] sm:$0xff]  ;;  %v13191_v57 = vld [vmem:[#allocation393_spill] sm:$0xff] }
 0x580   : > { %v4852_v11 = vmax.f32 %v10487_v24, %v10419_v35  ;;  %v5869_v5 = vmul.f32 0.020408163, %v5820_v53  ;;  %v4900_v58 = vmax.f32 %v10493_v14, %v13184_v42  ;;  %v4809_v22 = vmax.f32 %v4807_v25, %v13187_v56  ;;  %v13190_v24 = vld [vmem:[#allocation401_spill] sm:$0xff] }
 0x581   : > { %v4804_v2 = vmax.f32 %v4802_v19, %v10547_v48  ;;  %v10657_v45 = vmul.f32 0.020408163, %v5868_v15  ;;  %v5966_v41 = vadd.f32 %v13124_v38, %v5965_v13  ;;  %v5049_v35 = vadd.f32 %v13190_v24, %v13189_v63  ;;  %v13192_v15 = vld [vmem:[#allocation304_spill] sm:$0xff]  ;;  %v13193_v13 = vld [vmem:[#allocation305_spill] sm:$0xff]  ;;  %v13196_v24 = vld [vmem:[#allocation391_spill] sm:$0xff] }
 0x582   : > { %v4854_v19 = vmax.f32 %v4852_v11, %v13188_v9  ;;  %6265 = vst [vmem:[%s8240_s29 + $0x20] sm:$0xff] %v5869_v5  ;;  %v4902_v53 = vmax.f32 %v4900_v58, %v13191_v57  ;;  %v4944_v14 = vadd.f32 %v13192_v15, %v13172_v43  ;;  %v4992_v38 = vadd.f32 %v13193_v13, %v13175_v40  ;;  %v13197_v63 = vld [vmem:[#allocation397_spill] sm:$0xff] }
 0x583   : > { %13185 = vst [vmem:[#allocation297_spill] sm:$0xff] %v10657_v45  ;;  %v4806_v17 = vmax.f32 %v4804_v2, %v13186_v62  ;;  %6266 = vst [vmem:[%s8240_s29 + $0x28] sm:$0xff] %v10657_v45  ;;  %v5968_v2 = vmul.f32 0.020408163, %v5966_v41  ;;  %v4762_v25 = vmax.f32 %v4761_v33, %v4760_v32  ;;  %v5097_v5 = vadd.f32 %v5096_v47, %v13196_v24  ;;  %v13243_v24 = vld [vmem:[#allocation249_spill] sm:$0xff] }
 0x584   : > { %v4856_v42 = vmax.f32 %v4854_v19, %v13195_v36  ;;  %v4904_v45 = vmax.f32 %v4902_v53, %v13197_v63  ;;  %v4945_v58 = vadd.f32 %v4944_v14, %v13174_v16  ;;  %v4993_v37 = vadd.f32 %v4992_v38, %v13183_v18 }
 0x585   : > { %v4808_v11 = vmax.f32 %v4806_v17, %v13194_v10  ;;  %6268 = vst [vmem:[%s8240_s29 + $0x38] sm:$0xff] %v5968_v2  ;;  %v5050_v47 = vadd.f32 %v5049_v35, %v13188_v9  ;;  %v5098_v38 = vadd.f32 %v5097_v5, %v13191_v57  ;;  %v13202_v2 = vld [vmem:[#allocation395_spill] sm:$0xff] }
 0x586   : > { %v4858_v13 = vmax.f32 %v13198_v27, %v4856_v42  ;;  %v4906_v41 = vmax.f32 %v13199_v6, %v4904_v45  ;;  %v4946_v32 = vadd.f32 %v4945_v58, %v13177_v34  ;;  %v4994_v33 = vadd.f32 %v4993_v37, %v13179_v61  ;;  %v13201_v37 = vld [vmem:[#allocation394_spill] sm:$0xff]  ;;  %v13216_v9 = vld [vmem:[#allocation235_spill] sm:$0xff] }
 0x587   : > { %v4810_v15 = vmax.f32 %v4809_v22, %v4808_v11  ;;  %v13200_v27 = vmov 0.0|0.0   ;;  %v5051_v45 = vadd.f32 %v5050_v47, %v13201_v37  ;;  %v5104_v11 = vld [vmem:[%s11609_s8] sm:$0x3] }
 0x588   : > { %6271 = vst [vmem:[%s8240_s29 + $0x50] sm:$0xff] %v4858_v13  ;;  %6272 = vst [vmem:[%s8240_s29 + $0x58] sm:$0xff] %v4906_v41  ;;  %v4947_v19 = vadd.f32 %v4946_v32, %v10527_v0  ;;  %v4995_v53 = vadd.f32 %v4994_v33, %v10531_v55  ;;  %v7211_v22 = vpack.c.bf16 %v4906_v41, %v4858_v13  ;;  %v13203_v33 = vmov 0.0  }
 0x589   : > { %v7208_v17 = vpack.c.bf16 %v4810_v15, %v4762_v25  ;;  %v5099_v25 = vadd.f32 %v5098_v38, %v13202_v2  ;;  %v5052_v15 = vadd.f32 %v5051_v45, %v13195_v36  ;;  %v13215_v36 = vld [vmem:[#allocation130_spill] sm:$0xff] }
 0x58a   : > { %v4948_v6 = vadd.f32 %v4947_v19, %v10535_v60  ;;  %v4996_v42 = vadd.f32 %v4995_v53, %v10539_v20  ;;  %v13204_v19 = vld [vmem:[#allocation398_spill] sm:$0xff] }
 0x58b   : > { %7209 = vmatpush3.bf16.msra.mxu0 %v7208_v17  ;;  %v5100_v32 = vadd.f32 %v5099_v25, %v13197_v63  ;;  %v5053_v53 = vadd.f32 %v5052_v15, %v13204_v19  ;;  %v5252_v15 = vld [vmem:[%s11610_s9] sm:$0xff] }
 0x58c   : > { %7210 = vmatprep.subr.bf16.mxu0 %v13200_v27  ;;  %v4949_v14 = vadd.f32 %v4948_v6, %v10542_v50  ;;  %v4997_v35 = vadd.f32 %v4996_v42, %v10547_v48  ;;  %v13205_v6 = vld [vmem:[#allocation399_spill] sm:$0xff] }
 0x58d   : > { %v5101_v42 = vadd.f32 %v5100_v32, %v13205_v6 }
 0x58e   : > { %v4950_v5 = vadd.f32 %v4949_v14, %v10551_v30  ;;  %v4998_v58 = vadd.f32 %v4997_v35, %v10555_v31  ;;  %v5102_v35 = vmul.f32 0.020408163, %v5053_v53 }
 0x58f   : > { %7212 = vmatpush3.bf16.msra.mxu0 %v7211_v22 }
 0x590   : > { %7213 = vmatprep.subr.bf16.mxu0 %v13200_v27  ;;  %v4951_v13 = vadd.f32 %v4950_v5, %v10558_v51  ;;  %v4999_v41 = vadd.f32 %v4998_v58, %v13186_v62  ;;  %v5103_v58 = vmul.f32 0.020408163, %v5101_v42  ;;  %v5255_v42 = vld [vmem:[%s11610_s9 + $0x18] sm:$0xff] }
 0x592   : > { %7132 = vmatmul.mubr.msk.f32.vlgmr.msra.gmra.mrb[14].mxu0 %vm5105_vm0, %v5104_v11  ;;  %v4952_v17 = vadd.f32 %v4951_v13, %v10564_v12  ;;  %v5000_v47 = vadd.f32 %v4999_v41, %v10569_v39  ;;  %v7217_v13 = vpack.c.bf16 %v5103_v58, %v5102_v35 }
 0x593   : > { %7142 = vmatprep.mubr.msk.f32.mxu0 %vm7478_vm9, %v13203_v33 }
 0x594   : > { %v4953_v38 = vadd.f32 %v4952_v17, %v10572_v21  ;;  %v5001_v22 = vadd.f32 %v5000_v47, %v13194_v10 }
 0x596   : > { %v4954_v45 = vadd.f32 %v4953_v38, %v10578_v44  ;;  %v5002_v14 = vadd.f32 %v5001_v22, %v13187_v56 }
 0x598   : > { %v5004_v25 = vmul.f32 0.020408163, %v4954_v45  ;;  %v5005_v5 = vmul.f32 0.020408163, %v5002_v14 }
 0x59a   : > { %v7214_v33 = vpack.c.bf16 %v5005_v5, %v5004_v25 }
 0x59c   : > { %7215 = vmatpush3.bf16.msra.mxu0 %v7214_v33 }
 0x59d   : > { %7216 = vmatprep.subr.bf16.mxu0 %v13200_v27  ;;  %v5253_v27 = vld [vmem:[%s11610_s9 + $0x8] sm:$0xff] }
 0x5a0   : > { %7218 = vmatpush3.bf16.msra.mxu0 %v7217_v13 }
 0x5a3   : > { %7143 = vmatmul.mubr.msk.f32.vlgmr.msra.gmra.mrb[16].mxu0 %vm5105_vm0, %v5104_v11  ;;  %v5254_v11 = vld [vmem:[%s11610_s9 + $0x10] sm:$0xff] }
 0x5a4   : > { %7147 = vmatprep.mubr.msk.f32.mxu0 %vm5256_vm2, %v5252_v15 }
 0x665   : > { %v5175_v41 = vpop.f32.mrb[14].mxu0 }
 0x666   : > { %v7133_v32 = vpop.f32.mrb[15].mxu0  ;;  %v5179_v47 = vmax.f32 %v5175_v41, 0.0 }
 0x676   : > { %v5246_v17 = vpop.f32.mrb[16].mxu0 }
 0x677   : > { %v5250_v53 = vmax.f32 %v5246_v17, 0.0  ;;  %v7144_v38 = vpop.f32.mrb[17].mxu0 }
 0x679   : > { %v5251_v22 = vadd.f32 %v5250_v53, %v5179_v47  ;;  %v13206_v53 = vld [vmem:[#allocation223_spill] sm:$0xff] }
 0x67b   : > { %7145 = vmatprep.subr.msk.mxu0 %vm1780_vm15, %v5251_v22 }
 0x67c   : > { %7146 = vmatpush3.msk.msra.mxu0 %vm1780_vm15, %v5251_v22  ;;  %v13207_v22 = vld [vmem:[#allocation225_spill] sm:$0xff] }
 0x67d   : > { %7148 = vmatmul.mubr.msk.f32.vlgmr.msra.gmra.mrb[18].mxu0 %vm5256_vm2, %v5253_v27 }
 0x67e   : > { %7150 = vmatprep.mubr.msk.f32.mxu0 %vm5256_vm2, %v5254_v11  ;;  %v13208_v11 = vld [vmem:[#allocation227_spill] sm:$0xff] }
 0x681   : > { %7151 = vmatmul.mubr.msk.f32.gmra.mrb[20].mxu0 %vm5256_vm2, %v5255_v42 }
 0x750   : > { %v7149_v45 = vpop.f32.mrb[18].mxu0 }
 0x751   : > { %v5338_v14 = vpop.f32.mrb[19].mxu0  ;;  %v6433_v5 = vmul.f32 -1.442695, %v7149_v45  ;;  %v13209_v45 = vld [vmem:[#allocation229_spill] sm:$0xff] }
 0x752   : > { %v6432_v33 = vmul.f32 -1.442695, %v5338_v14 }
 0x753   : > { %7321 = vpow2.f32 %v6433_v5  ;;  %v13211_v5 = vld [vmem:[#allocation126_spill] sm:$0xff] }
 0x754   : > { %v7152_v35 = vpop.f32.mrb[20].mxu0  ;;  %7323 = vpow2.f32 %v6432_v33  ;;  %v13212_v33 = vld [vmem:[#allocation231_spill] sm:$0xff] }
 0x755   : > { %v5348_v25 = vpop.f32.mrb[21].mxu0  ;;  %v6435_v41 = vmul.f32 -1.442695, %v7152_v35  ;;  %v13210_v35 = vld [vmem:[#allocation124_spill] sm:$0xff] }
 0x756   : > { %v6434_v32 = vmul.f32 -1.442695, %v5348_v25 }
 0x75d   : > { %v7322_v58 = vpop.eup %7321 }
 0x75e   : > { %v5370_v13 = vadd.f32 1.0, %v7322_v58  ;;  %v7324_v15 = vpop.eup %7323 }
 0x75f   : > { %v5369_v47 = vadd.f32 1.0, %v7324_v15 }
 0x760   : > { %7325 = vrcp.f32 %v5370_v13 }
 0x761   : > { %7327 = vpow2.f32 %v6435_v41  ;;  %v13213_v41 = vld [vmem:[#allocation128_spill] sm:$0xff] }
 0x762   : > { %7329 = vpow2.f32 %v6434_v32 }
 0x763   : > { %7331 = vrcp.f32 %v5369_v47 }
 0x76a   : > { %v10740_v17 = vpop.eup %7325 }
 0x76b   : > { %v5390_v38 = vmul.f32 %v10740_v17, %v13206_v53  ;;  %v5392_v27 = vmul.f32 %v10740_v17, %v13207_v22  ;;  %v5394_v42 = vmul.f32 %v10740_v17, %v13208_v11  ;;  %v5396_v14 = vmul.f32 %v10740_v17, %v13209_v45  ;;  %v7328_v19 = vpop.eup %7327  ;;  %v13214_v22 = vld [vmem:[#allocation233_spill] sm:$0xff] }
 0x76c   : > { %v5398_v13 = vmul.f32 %v10740_v17, %v13212_v33  ;;  %v5400_v32 = vmul.f32 %v10740_v17, %v13214_v22  ;;  %v7330_v37 = vpop.eup %7329  ;;  %v5402_v45 = vmul.f32 %v10740_v17, %v13216_v9  ;;  %v5372_v33 = vadd.f32 1.0, %v7328_v19  ;;  %v13220_v22 = vld [vmem:[#allocation239_spill] sm:$0xff]  ;;  %v13222_v9 = vld [vmem:[#allocation224_spill] sm:$0xff]  ;;  %v13224_v19 = vld [vmem:[#allocation241_spill] sm:$0xff] }
 0x76d   : > { %v5488_v25 = vadd.f32 %v13210_v35, %v5390_v38  ;;  %v5490_v58 = vadd.f32 %v13211_v5, %v5392_v27  ;;  %v5492_v53 = vadd.f32 %v13213_v41, %v5394_v42  ;;  %v5494_v11 = vadd.f32 %v13215_v36, %v5396_v14  ;;  %v13217_v35 = vld [vmem:[#allocation132_spill] sm:$0xff]  ;;  %v10761_v5 = vpop.eup %7331  ;;  %v13219_v41 = vld [vmem:[#allocation134_spill] sm:$0xff] }
 0x76e   : > { %v5496_v27 = vadd.f32 %v13217_v35, %v5398_v13  ;;  %v5498_v6 = vadd.f32 %v13219_v41, %v5400_v32  ;;  %v5371_v36 = vadd.f32 1.0, %v7330_v37  ;;  %v13221_v14 = vld [vmem:[#allocation222_spill] sm:$0xff]  ;;  %7333 = vrcp.f32 %v5372_v33  ;;  %v13227_v37 = vld [vmem:[#allocation215_spill] sm:$0xff] }
 0x76f   : > { %v6019_v15 = vmax.f32 %v5490_v58, %v5488_v25  ;;  %v13218_v25 = vld [vmem:[#allocation237_spill] sm:$0xff]  ;;  %v13226_v41 = vld [vmem:[#allocation138_spill] sm:$0xff]  ;;  %v10780_v63 = vmul.f32 %v10740_v17, %v13227_v37  ;;  %v5416_v26 = vmul.f32 %v10740_v17, %v13243_v24  ;;  %v5401_v24 = vmul.f32 %v10761_v5, %v13250_v4 }
 0x770   : > { %v5404_v42 = vmul.f32 %v10740_v17, %v13218_v25  ;;  %v5408_v25 = vmul.f32 %v10740_v17, %v13224_v19  ;;  %7335 = vrcp.f32 %v5371_v36  ;;  %v13231_v19 = vld [vmem:[#allocation123_spill] sm:$0xff]  ;;  %v5403_v4 = vmul.f32 %v10761_v5, %v13257_v46  ;;  %v13264_v46 = vld [vmem:[#allocation238_spill] sm:$0xff] }
 0x771   : > { %v6020_v47 = vmax.f32 %v5492_v53, %v6019_v15  ;;  %v5406_v15 = vmul.f32 %v10740_v17, %v13220_v22  ;;  %v5389_v53 = vmul.f32 %v10761_v5, %v13221_v14  ;;  %v13228_v14 = vld [vmem:[#allocation243_spill] sm:$0xff] }
 0x772   : > { %v5502_v22 = vadd.f32 %v13226_v41, %v5404_v42  ;;  %v13234_v41 = vld [vmem:[#allocation219_spill] sm:$0xff] }
 0x773   : > { %v6021_v38 = vmax.f32 %v5494_v11, %v6020_v47  ;;  %v5391_v47 = vmul.f32 %v10761_v5, %v13222_v9  ;;  %v13223_v11 = vld [vmem:[#allocation136_spill] sm:$0xff]  ;;  %v5410_v9 = vmul.f32 %v10740_v17, %v13228_v14  ;;  %v5487_v2 = vadd.f32 %v13231_v19, %v5389_v53  ;;  %v13236_v14 = vld [vmem:[#allocation245_spill] sm:$0xff] }
 0x774   : > { %v5500_v35 = vadd.f32 %v13223_v11, %v5402_v45  ;;  %v10795_v37 = vmul.f32 %v10740_v17, %v13234_v41  ;;  %v5412_v57 = vmul.f32 %v10740_v17, %v13236_v14  ;;  %v13240_v19 = vld [vmem:[#allocation221_spill] sm:$0xff]  ;;  %v13244_v14 = vld [vmem:[#allocation232_spill] sm:$0xff] }
 0x775   : > { %v6022_v58 = vmax.f32 %v5496_v27, %v6021_v38  ;;  %v13225_v38 = vld [vmem:[#allocation226_spill] sm:$0xff]  ;;  %v5399_v1 = vmul.f32 %v10761_v5, %v13244_v14 }
 0x776   : > { %v5393_v32 = vmul.f32 %v10761_v5, %v13225_v38  ;;  %v13232_v38 = vld [vmem:[#allocation125_spill] sm:$0xff]  ;;  %13235 = vst [vmem:[#allocation293_spill] sm:$0xff] %v10795_v37  ;;  %v13251_v14 = vld [vmem:[#allocation146_spill] sm:$0xff] }
 0x777   : > { %v6023_v13 = vmax.f32 %v5498_v6, %v6022_v58  ;;  %v13229_v6 = vld [vmem:[#allocation228_spill] sm:$0xff]  ;;  %v13273_v37 = vld [vmem:[#allocation242_spill] sm:$0xff] }
 0x778   : > { %v5395_v45 = vmul.f32 %v10761_v5, %v13229_v6  ;;  %v13230_v58 = vld [vmem:[#allocation140_spill] sm:$0xff]  ;;  %v13237_v6 = vld [vmem:[#allocation230_spill] sm:$0xff] }
 0x779   : > { %v6024_v27 = vmax.f32 %v5500_v35, %v6023_v13  ;;  %v5504_v11 = vadd.f32 %v13230_v58, %v5406_v15  ;;  %v5489_v13 = vadd.f32 %v13232_v38, %v5391_v47  ;;  %v13233_v35 = vld [vmem:[#allocation217_spill] sm:$0xff]  ;;  %v5397_v36 = vmul.f32 %v10761_v5, %v13237_v6  ;;  %v13238_v15 = vld [vmem:[#allocation142_spill] sm:$0xff]  ;;  %v13239_v58 = vld [vmem:[#allocation127_spill] sm:$0xff] }
 0x77a   : > { %v10791_v42 = vmul.f32 %v10740_v17, %v13233_v35  ;;  %v5491_v47 = vadd.f32 %v13239_v58, %v5393_v32  ;;  %v10805_v38 = vmul.f32 %v10740_v17, %v13240_v19  ;;  %v13242_v35 = vld [vmem:[#allocation247_spill] sm:$0xff]  ;;  %v13248_v58 = vld [vmem:[#allocation253_spill] sm:$0xff] }
 0x77b   : > { %v6025_v33 = vmax.f32 %v5502_v22, %v6024_v27  ;;  %v5506_v22 = vadd.f32 %v13238_v15, %v5408_v25  ;;  %v5971_v53 = vmax.f32 %v5489_v13, %v5487_v2  ;;  %v5414_v41 = vmul.f32 %v10740_v17, %v13242_v35  ;;  %v13246_v2 = vld [vmem:[#allocation129_spill] sm:$0xff]  ;;  %v13247_v32 = vld [vmem:[#allocation251_spill] sm:$0xff] }
 0x77c   : > { %13241 = vst [vmem:[#allocation273_spill] sm:$0xff] %v10805_v38  ;;  %v5493_v13 = vadd.f32 %v13246_v2, %v5395_v45  ;;  %v5418_v15 = vmul.f32 %v10740_v17, %v13247_v32  ;;  %v5420_v19 = vmul.f32 %v10740_v17, %v13248_v58  ;;  %v5422_v35 = vmul.f32 %v10740_v17, %v13249_v7  ;;  %v13254_v45 = vld [vmem:[#allocation257_spill] sm:$0xff]  ;;  %v13255_v2 = vld [vmem:[#allocation259_spill] sm:$0xff] }
 0x77d   : > { %v6026_v27 = vmax.f32 %v5504_v11, %v6025_v33  ;;  %v13245_v33 = vld [vmem:[#allocation144_spill] sm:$0xff]  ;;  %v5972_v25 = vmax.f32 %v5491_v47, %v5971_v53  ;;  %v10825_v47 = vpop.eup %7333  ;;  %v5426_v32 = vmul.f32 %v10740_v17, %v13255_v2  ;;  %v13256_v58 = vld [vmem:[#allocation261_spill] sm:$0xff]  ;;  %v13263_v38 = vld [vmem:[#allocation267_spill] sm:$0xff] }
 0x77e   : > { %v5508_v11 = vadd.f32 %v13245_v33, %v5410_v9  ;;  %v13252_v9 = vld [vmem:[#allocation131_spill] sm:$0xff]  ;;  %13253 = vst [vmem:[#allocation277_spill] sm:$0xff] %v10825_v47  ;;  %v5424_v33 = vmul.f32 %v10740_v17, %v13254_v45  ;;  %v5428_v7 = vmul.f32 %v10740_v17, %v13256_v58  ;;  %v13262_v47 = vld [vmem:[#allocation265_spill] sm:$0xff]  ;;  %v10847_v58 = vmul.f32 %v10740_v17, %v13263_v38 }
 0x77f   : > { %v6027_v6 = vmax.f32 %v5506_v22, %v6026_v27  ;;  %v5510_v27 = vadd.f32 %v13251_v14, %v5412_v57  ;;  %v5973_v22 = vmax.f32 %v5493_v13, %v5972_v25  ;;  %v5495_v53 = vadd.f32 %v13252_v9, %v5397_v36  ;;  %v13259_v13 = vld [vmem:[#allocation133_spill] sm:$0xff]  ;;  %v10837_v14 = vpop.eup %7335  ;;  %v13261_v9 = vld [vmem:[#allocation263_spill] sm:$0xff] }
 0x780   : > { %v5497_v36 = vadd.f32 %v13259_v13, %v5399_v1  ;;  %13260 = vst [vmem:[#allocation269_spill] sm:$0xff] %v10837_v14  ;;  %v5430_v45 = vmul.f32 %v10740_v17, %v13261_v9  ;;  %v10843_v2 = vmul.f32 %v10740_v17, %v13262_v47  ;;  %v10855_v13 = vmul.f32 %v10740_v17, %v13159_v28  ;;  %v13267_v9 = vld [vmem:[#allocation271_spill] sm:$0xff]  ;;  %v13268_v14 = vld [vmem:[#allocation240_spill] sm:$0xff] }
 0x781   : > { %v6028_v3 = vmax.f32 %v5508_v11, %v6027_v6  ;;  %v13258_v11 = vld [vmem:[#allocation148_spill] sm:$0xff]  ;;  %v5974_v25 = vmax.f32 %v5495_v53, %v5973_v22  ;;  %v13266_v53 = vld [vmem:[#allocation135_spill] sm:$0xff]  ;;  %v10859_v47 = vmul.f32 %v10740_v17, %v13267_v9  ;;  %v10863_v38 = vmul.f32 %v10740_v17, %v13157_v54 }
 0x782   : > { %v5512_v57 = vadd.f32 %v13258_v11, %v5414_v41  ;;  %v5499_v11 = vadd.f32 %v13266_v53, %v5401_v24  ;;  %v13270_v24 = vld [vmem:[#allocation137_spill] sm:$0xff]  ;;  %v10875_v53 = vmul.f32 %v10740_v17, %v13168_v52  ;;  %v13272_v9 = vld [vmem:[#allocation280_spill] sm:$0xff] }
 0x783   : > { %v6029_v6 = vmax.f32 %v5510_v27, %v6028_v3  ;;  %v5405_v3 = vmul.f32 %v10761_v5, %v13264_v46  ;;  %v13265_v27 = vld [vmem:[#allocation150_spill] sm:$0xff]  ;;  %v5975_v1 = vmax.f32 %v5497_v36, %v5974_v25  ;;  %v5501_v46 = vadd.f32 %v13270_v24, %v5403_v4  ;;  %v13275_v4 = vld [vmem:[#allocation139_spill] sm:$0xff]  ;;  %v13276_v24 = vld [vmem:[#allocation284_spill] sm:$0xff] }
 0x784   : > { %v5514_v22 = vadd.f32 %v13265_v27, %v5416_v26  ;;  %v13269_v26 = vld [vmem:[#allocation152_spill] sm:$0xff]  ;;  %v13271_v27 = vld [vmem:[#allocation275_spill] sm:$0xff]  ;;  %v10879_v54 = vmul.f32 %v10740_v17, %v13272_v9  ;;  %v10891_v52 = vmul.f32 %v10740_v17, %v13276_v24 }
 0x785   : > { %v6030_v41 = vmax.f32 %v5512_v57, %v6029_v6  ;;  %v5407_v6 = vmul.f32 %v10761_v5, %v13268_v14  ;;  %v5516_v25 = vadd.f32 %v13269_v26, %v5418_v15  ;;  %v5976_v36 = vmax.f32 %v5499_v11, %v5975_v1  ;;  %v13274_v15 = vld [vmem:[#allocation154_spill] sm:$0xff]  ;;  %v13277_v9 = vld [vmem:[#allocation244_spill] sm:$0xff] }
 0x786   : > { %v10871_v28 = vmul.f32 %v10740_v17, %v13271_v27  ;;  %v5409_v14 = vmul.f32 %v10761_v5, %v13273_v37  ;;  %v5503_v11 = vadd.f32 %v13275_v4, %v5405_v3  ;;  %v10887_v26 = vmul.f32 %v10740_v17, %v13173_v23  ;;  %v13279_v3 = vld [vmem:[#allocation141_spill] sm:$0xff]  ;;  %v13280_v4 = vld [vmem:[#allocation246_spill] sm:$0xff] }
 0x787   : > { %v6031_v57 = vmax.f32 %v5514_v22, %v6030_v41  ;;  %v5518_v22 = vadd.f32 %v13274_v15, %v5420_v19  ;;  %v5977_v1 = vmax.f32 %v5501_v46, %v5976_v36  ;;  %v10895_v27 = vmul.f32 %v10740_v17, %v13178_v8  ;;  %v13278_v19 = vld [vmem:[#allocation156_spill] sm:$0xff] }
 0x788   : > { %v5411_v37 = vmul.f32 %v10761_v5, %v13277_v9  ;;  %v5505_v46 = vadd.f32 %v13279_v3, %v5407_v6  ;;  %v10903_v23 = vmul.f32 %v10740_v17, %v13170_v49  ;;  %v10907_v15 = vmul.f32 %v10740_v17, %v13181_v29  ;;  %v13282_v6 = vld [vmem:[#allocation143_spill] sm:$0xff]  ;;  %v13283_v9 = vld [vmem:[#allocation248_spill] sm:$0xff] }
 0x789   : > { %v6032_v41 = vmax.f32 %v5516_v25, %v6031_v57  ;;  %v5520_v25 = vadd.f32 %v13278_v19, %v5422_v35  ;;  %v5978_v36 = vmax.f32 %v5503_v11, %v5977_v1  ;;  %v10911_v8 = vmul.f32 %v10740_v17, %v13175_v40  ;;  %v13281_v35 = vld [vmem:[#allocation158_spill] sm:$0xff] }
 0x78a   : > { %v5522_v1 = vadd.f32 %v13281_v35, %v5424_v33  ;;  %v5507_v24 = vadd.f32 %v13282_v6, %v5409_v14  ;;  %v10919_v49 = vmul.f32 %v10740_v17, %v13183_v18  ;;  %v10923_v29 = vmul.f32 %v10740_v17, %v13179_v61  ;;  %v13284_v33 = vld [vmem:[#allocation160_spill] sm:$0xff]  ;;  %v13285_v14 = vld [vmem:[#allocation145_spill] sm:$0xff] }
 0x78b   : > { %v6033_v57 = vmax.f32 %v5518_v22, %v6032_v41  ;;  %v5413_v41 = vmul.f32 %v10761_v5, %v13280_v4  ;;  %v5979_v11 = vmax.f32 %v5505_v46, %v5978_v36  ;;  %v10927_v40 = vmul.f32 %v10740_v17, %v10531_v55  ;;  %v13286_v46 = vld [vmem:[#allocation250_spill] sm:$0xff]  ;;  %v13289_v6 = vld [vmem:[#allocation252_spill] sm:$0xff] }
 0x78c   : > { %v5509_v3 = vadd.f32 %v13285_v14, %v5411_v37  ;;  %v10935_v18 = vmul.f32 %v10740_v17, %v10539_v20  ;;  %v10939_v61 = vmul.f32 %v10740_v17, %v10547_v48  ;;  %v10943_v55 = vmul.f32 %v10740_v17, %v10555_v31  ;;  %v13288_v37 = vld [vmem:[#allocation147_spill] sm:$0xff]  ;;  %v13293_v14 = vld [vmem:[#allocation216_spill] sm:$0xff] }
 0x78d   : > { %v6034_v22 = vmax.f32 %v5520_v25, %v6033_v57  ;;  %v5415_v57 = vmul.f32 %v10761_v5, %v13283_v9  ;;  %v5524_v25 = vadd.f32 %v13284_v33, %v5426_v32  ;;  %v5980_v36 = vmax.f32 %v5507_v24, %v5979_v11  ;;  %v13287_v32 = vld [vmem:[#allocation162_spill] sm:$0xff] }
 0x78e   : > { %v5417_v4 = vmul.f32 %v10761_v5, %v13286_v46  ;;  %v5526_v35 = vadd.f32 %v13287_v32, %v5428_v7  ;;  %v5511_v11 = vadd.f32 %v13288_v37, %v5413_v41  ;;  %v10951_v20 = vmul.f32 %v10740_v17, %v13186_v62  ;;  %v13290_v7 = vld [vmem:[#allocation164_spill] sm:$0xff]  ;;  %v13291_v41 = vld [vmem:[#allocation149_spill] sm:$0xff] }
 0x78f   : > { %v6035_v19 = vmax.f32 %v5522_v1, %v6034_v22  ;;  %v5981_v1 = vmax.f32 %v5509_v3, %v5980_v36  ;;  %v10955_v48 = vmul.f32 %v10740_v17, %v10569_v39  ;;  %v10959_v31 = vmul.f32 %v10740_v17, %v13194_v10  ;;  %v13292_v36 = vld [vmem:[#allocation214_spill] sm:$0xff]  ;;  %v13300_v37 = vld [vmem:[#allocation220_spill] sm:$0xff] }
 0x790   : > { %v5419_v24 = vmul.f32 %v10761_v5, %v13289_v6  ;;  %v10967_v62 = vmul.f32 %v10740_v17, %v13187_v56  ;;  %v10971_v39 = vmul.f32 %v10761_v5, %v13292_v36  ;;  %v10975_v10 = vmul.f32 %v10761_v5, %v13293_v14  ;;  %v13295_v3 = vld [vmem:[#allocation254_spill] sm:$0xff]  ;;  %v13302_v6 = vld [vmem:[#allocation256_spill] sm:$0xff] }
 0x791   : > { %v6036_v22 = vmax.f32 %v5524_v25, %v6035_v19  ;;  %v5528_v19 = vadd.f32 %v13290_v7, %v5430_v45  ;;  %v5982_v33 = vmax.f32 %v5511_v11, %v5981_v1  ;;  %v5513_v25 = vadd.f32 %v13291_v41, %v5415_v57  ;;  %v13296_v45 = vld [vmem:[#allocation166_spill] sm:$0xff]  ;;  %v13306_v14 = vld [vmem:[#allocation260_spill] sm:$0xff] }
 0x792   : > { %13294 = vst [vmem:[#allocation294_spill] sm:$0xff] %v10975_v10  ;;  %v5421_v46 = vmul.f32 %v10761_v5, %v13295_v3  ;;  %v5530_v32 = vadd.f32 %v13296_v45, %v10843_v2  ;;  %v13298_v56 = vld [vmem:[#allocation218_spill] sm:$0xff]  ;;  %v10988_v11 = vmul.f32 %v10761_v5, %v13300_v37  ;;  %v5423_v7 = vmul.f32 %v10761_v5, %v13302_v6  ;;  %v13304_v2 = vld [vmem:[#allocation168_spill] sm:$0xff] }
 0x793   : > { %v6037_v9 = vmax.f32 %v5526_v35, %v6036_v22  ;;  %v5983_v57 = vmax.f32 %v5513_v25, %v5982_v33  ;;  %v13297_v35 = vld [vmem:[#allocation151_spill] sm:$0xff]  ;;  %v10984_v17 = vmul.f32 %v10761_v5, %v13298_v56  ;;  %v13303_v41 = vld [vmem:[#allocation258_spill] sm:$0xff]  ;;  %v5532_v33 = vadd.f32 %v13304_v2, %v10847_v58  ;;  %v13308_v56 = vld [vmem:[#allocation264_spill] sm:$0xff] }
 0x794   : > { %v5515_v1 = vadd.f32 %v13297_v35, %v5417_v4  ;;  %13301 = vst [vmem:[#allocation213_spill] sm:$0xff] %v10988_v11  ;;  %v13305_v4 = vld [vmem:[#allocation153_spill] sm:$0xff]  ;;  %v5427_v3 = vmul.f32 %v10761_v5, %v13306_v14  ;;  %v13307_v45 = vld [vmem:[#allocation262_spill] sm:$0xff]  ;;  %v5431_v37 = vmul.f32 %v10761_v5, %v13308_v56 }
 0x795   : > { %v6038_v22 = vmax.f32 %v5528_v19, %v6037_v9  ;;  %13299 = vst [vmem:[#allocation114_spill] sm:$0xff] %v10984_v17  ;;  %v5425_v9 = vmul.f32 %v10761_v5, %v13303_v41  ;;  %v5517_v36 = vadd.f32 %v13305_v4, %v5419_v24  ;;  %v5429_v35 = vmul.f32 %v10761_v5, %v13307_v45  ;;  %v13309_v6 = vld [vmem:[#allocation266_spill] sm:$0xff]  ;;  %v13312_v24 = vld [vmem:[#allocation268_spill] sm:$0xff] }
 0x796   : > { %v5984_v25 = vmax.f32 %v5515_v1, %v5983_v57  ;;  %v5433_v11 = vmul.f32 %v10761_v5, %v13309_v6  ;;  %v13311_v57 = vld [vmem:[#allocation155_spill] sm:$0xff]  ;;  %v5435_v2 = vmul.f32 %v10761_v5, %v13312_v24  ;;  %v13313_v4 = vld [vmem:[#allocation270_spill] sm:$0xff]  ;;  %v13314_v45 = vld [vmem:[#allocation272_spill] sm:$0xff] }
 0x797   : > { %v6039_v19 = vmax.f32 %v5530_v32, %v6038_v22  ;;  %v13310_v22 = vld [vmem:[#allocation170_spill] sm:$0xff]  ;;  %v5519_v1 = vadd.f32 %v13311_v57, %v5421_v46  ;;  %v5437_v14 = vmul.f32 %v10761_v5, %v13313_v4  ;;  %v11014_v17 = vmul.f32 %v10761_v5, %v13314_v45  ;;  %v13317_v46 = vld [vmem:[#allocation157_spill] sm:$0xff]  ;;  %v13319_v24 = vld [vmem:[#allocation279_spill] sm:$0xff] }
 0x798   : > { %v5534_v32 = vadd.f32 %v13310_v22, %v10855_v13  ;;  %v5985_v58 = vmax.f32 %v5517_v36, %v5984_v25  ;;  %v13315_v56 = vld [vmem:[#allocation274_spill] sm:$0xff]  ;;  %v13316_v13 = vld [vmem:[#allocation172_spill] sm:$0xff]  ;;  %v5521_v36 = vadd.f32 %v13317_v46, %v5423_v7  ;;  %v11029_v4 = vmul.f32 %v10761_v5, %v13319_v24  ;;  %v13321_v45 = vld [vmem:[#allocation281_spill] sm:$0xff] }
 0x799   : > { %v6040_v41 = vmax.f32 %v5532_v33, %v6039_v19  ;;  %v11018_v6 = vmul.f32 %v10761_v5, %v13315_v56  ;;  %v5536_v33 = vadd.f32 %v13316_v13, %v10859_v47  ;;  %v13318_v22 = vld [vmem:[#allocation276_spill] sm:$0xff]  ;;  %v11033_v10 = vmul.f32 %v10761_v5, %v13321_v45  ;;  %v13322_v56 = vld [vmem:[#allocation283_spill] sm:$0xff]  ;;  %v13325_v46 = vld [vmem:[#allocation285_spill] sm:$0xff] }
 0x79a   : > { %v5986_v25 = vmax.f32 %v5519_v1, %v5985_v58  ;;  %v11025_v57 = vmul.f32 %v10761_v5, %v13318_v22  ;;  %13320 = vst [vmem:[#allocation278_spill] sm:$0xff] %v11029_v4  ;;  %v13324_v1 = vld [vmem:[#allocation159_spill] sm:$0xff]  ;;  %v11044_v22 = vmul.f32 %v10761_v5, %v13325_v46  ;;  %v11052_v45 = vmul.f32 %v10761_v5, %v13169_v59  ;;  %v13331_v46 = vld [vmem:[#allocation180_spill] sm:$0xff] }
 0x79b   : > { %v6041_v19 = vmax.f32 %v5534_v32, %v6040_v41  ;;  %v11037_v41 = vmul.f32 %v10761_v5, %v13322_v56  ;;  %v13323_v32 = vld [vmem:[#allocation174_spill] sm:$0xff]  ;;  %v5523_v13 = vadd.f32 %v13324_v1, %v5425_v9  ;;  %v13326_v24 = vld [vmem:[#allocation287_spill] sm:$0xff]  ;;  %v11067_v1 = vmul.f32 %v10761_v5, %v13177_v34 }
 0x79c   : > { %v5538_v7 = vadd.f32 %v13323_v32, %v10863_v38  ;;  %v5987_v58 = vmax.f32 %v5521_v36, %v5986_v25  ;;  %v11048_v4 = vmul.f32 %v10761_v5, %v13326_v24  ;;  %v13328_v36 = vld [vmem:[#allocation161_spill] sm:$0xff]  ;;  %v11063_v32 = vmul.f32 %v10761_v5, %v13174_v16 }
 0x79d   : > { %v6042_v47 = vmax.f32 %v5536_v33, %v6041_v19  ;;  %v11056_v19 = vmul.f32 %v10761_v5, %v13172_v43  ;;  %v13327_v33 = vld [vmem:[#allocation176_spill] sm:$0xff]  ;;  %v5525_v56 = vadd.f32 %v13328_v36, %v5427_v3  ;;  %v11071_v59 = vmul.f32 %v10761_v5, %v10527_v0  ;;  %v13335_v36 = vld [vmem:[#allocation182_spill] sm:$0xff] }
 0x79e   : > { %v5540_v9 = vadd.f32 %v13327_v33, %v10871_v28  ;;  %v5988_v25 = vmax.f32 %v5523_v13, %v5987_v58  ;;  %v11075_v43 = vmul.f32 %v10761_v5, %v10535_v60  ;;  %v13330_v58 = vld [vmem:[#allocation163_spill] sm:$0xff]  ;;  %v11082_v13 = vmul.f32 %v10761_v5, %v10542_v50 }
 0x79f   : > { %v6043_v38 = vmax.f32 %v5538_v7, %v6042_v47  ;;  %v13329_v47 = vld [vmem:[#allocation178_spill] sm:$0xff]  ;;  %v5527_v16 = vadd.f32 %v13330_v58, %v5429_v35  ;;  %v11086_v34 = vmul.f32 %v10761_v5, %v10551_v30  ;;  %v11090_v0 = vmul.f32 %v10761_v5, %v10558_v51  ;;  %v13333_v51 = vld [vmem:[#allocation116_spill] sm:$0xff] }
 0x7a0   : > { %v5542_v3 = vadd.f32 %v13329_v47, %v10875_v53  ;;  %v5989_v7 = vmax.f32 %v5525_v56, %v5988_v25  ;;  %v11094_v60 = vmul.f32 %v10761_v5, %v10564_v12  ;;  %v5544_v35 = vadd.f32 %v13331_v46, %v10879_v54  ;;  %v13334_v12 = vld [vmem:[#allocation118_spill] sm:$0xff]  ;;  %v13337_v47 = vld [vmem:[#allocation293_spill] sm:$0xff] }
 0x7a1   : > { %v6044_v28 = vmax.f32 %v5540_v9, %v6043_v38  ;;  %v13332_v38 = vld [vmem:[#allocation165_spill] sm:$0xff]  ;;  %v11101_v33 = vmul.f32 %v10761_v5, %v10572_v21  ;;  %v11105_v30 = vmul.f32 %v10761_v5, %v10578_v44  ;;  %v11109_v9 = vadd.f32 %v13333_v51, %v10780_v63  ;;  %v13340_v5 = vld [vmem:[#allocation122_spill] sm:$0xff]  ;;  %v13341_v63 = vld [vmem:[#allocation184_spill] sm:$0xff] }
 0x7a2   : > { %v5990_v24 = vmax.f32 %v5527_v16, %v5989_v7  ;;  %v5529_v50 = vadd.f32 %v13332_v38, %v5431_v37  ;;  %v11113_v25 = vadd.f32 %v13334_v12, %v10791_v42  ;;  %v5546_v37 = vadd.f32 %v13335_v36, %v10887_v26  ;;  %v13339_v44 = vld [vmem:[#allocation273_spill] sm:$0xff]  ;;  %v13342_v42 = vld [vmem:[#allocation186_spill] sm:$0xff]  ;;  %v13343_v26 = vld [vmem:[#allocation188_spill] sm:$0xff] }
 0x7a3   : > { %v6045_v53 = vmax.f32 %v5542_v3, %v6044_v28  ;;  %v13336_v28 = vld [vmem:[#allocation167_spill] sm:$0xff]  ;;  %v13338_v3 = vld [vmem:[#allocation120_spill] sm:$0xff]  ;;  %v11124_v58 = vadd.f32 %v13340_v5, %v13339_v44  ;;  %v5548_v16 = vadd.f32 %v13341_v63, %v10891_v52  ;;  %v13348_v52 = vld [vmem:[#allocation309_spill] sm:$0xff] }
 0x7a4   : > { %v5991_v56 = vmax.f32 %v5529_v50, %v5990_v24  ;;  %v5531_v21 = vadd.f32 %v13336_v28, %v5433_v11  ;;  %v11120_v7 = vadd.f32 %v13338_v3, %v13337_v47  ;;  %v13344_v11 = vld [vmem:[#allocation169_spill] sm:$0xff]  ;;  %v13345_v50 = vld [vmem:[#allocation190_spill] sm:$0xff]  ;;  %v13346_v12 = vld [vmem:[#allocation192_spill] sm:$0xff] }
 0x7a5   : > { %v6046_v54 = vmax.f32 %v5544_v35, %v6045_v53  ;;  %v5550_v53 = vadd.f32 %v13342_v42, %v10895_v27  ;;  %v5552_v35 = vadd.f32 %v13343_v26, %v10903_v23  ;;  %v5533_v38 = vadd.f32 %v13344_v11, %v5435_v2  ;;  %v13347_v28 = vld [vmem:[#allocation194_spill] sm:$0xff]  ;;  %v13349_v3 = vld [vmem:[#allocation277_spill] sm:$0xff]  ;;  %v13351_v23 = vld [vmem:[#allocation311_spill] sm:$0xff] }
 0x7a6   : > { %v5992_v24 = vmax.f32 %v5531_v21, %v5991_v56  ;;  %v5554_v51 = vadd.f32 %v13345_v50, %v10907_v15  ;;  %v5556_v36 = vadd.f32 %v13346_v12, %v10911_v8  ;;  %v5558_v47 = vadd.f32 %v13347_v28, %v10919_v49  ;;  %v13352_v2 = vld [vmem:[#allocation196_spill] sm:$0xff]  ;;  %v13353_v15 = vld [vmem:[#allocation198_spill] sm:$0xff]  ;;  %v13357_v11 = vld [vmem:[#allocation313_spill] sm:$0xff] }
 0x7a7   : > { %v6047_v46 = vmax.f32 %v5546_v37, %v6046_v54  ;;  %v5586_v44 = vmul.f32 %v13349_v3, %v13348_v52  ;;  %v13350_v37 = vld [vmem:[#allocation171_spill] sm:$0xff]  ;;  %v5588_v56 = vmul.f32 %v13349_v3, %v13351_v23  ;;  %v5560_v21 = vadd.f32 %v13352_v2, %v10923_v29  ;;  %v13354_v8 = vld [vmem:[#allocation200_spill] sm:$0xff]  ;;  %v13355_v49 = vld [vmem:[#allocation202_spill] sm:$0xff] }
 0x7a8   : > { %v5993_v54 = vmax.f32 %v5533_v38, %v5992_v24  ;;  %v5535_v5 = vadd.f32 %v13350_v37, %v5437_v14  ;;  %v5562_v63 = vadd.f32 %v13353_v15, %v10927_v40  ;;  %v5564_v42 = vadd.f32 %v13354_v8, %v10935_v18  ;;  %v13356_v14 = vld [vmem:[#allocation173_spill] sm:$0xff]  ;;  %v13358_v29 = vld [vmem:[#allocation204_spill] sm:$0xff]  ;;  %v13359_v40 = vld [vmem:[#allocation206_spill] sm:$0xff] }
 0x7a9   : > { %v6048_v27 = vmax.f32 %v5548_v16, %v6047_v46  ;;  %v11152_v26 = vadd.f32 %v13355_v49, %v10939_v61  ;;  %v5537_v24 = vadd.f32 %v13356_v14, %v11014_v17  ;;  %v5590_v38 = vmul.f32 %v13349_v3, %v13357_v11  ;;  %v13360_v18 = vld [vmem:[#allocation175_spill] sm:$0xff]  ;;  %v13363_v37 = vld [vmem:[#allocation21_spill] sm:$0xff]  ;;  %v13364_v23 = vld [vmem:[#allocation208_spill] sm:$0xff] }
 0x7aa   : > { %v5994_v46 = vmax.f32 %v5535_v5, %v5993_v54  ;;  %v11160_v50 = vadd.f32 %v13358_v29, %v10943_v55  ;;  %v11164_v12 = vadd.f32 %v13359_v40, %v10951_v20  ;;  %v5539_v61 = vadd.f32 %v13360_v18, %v11018_v6  ;;  %v13361_v28 = vld [vmem:[#allocation19_spill] sm:$0xff]  ;;  %v13365_v2 = vld [vmem:[#allocation210_spill] sm:$0xff]  ;;  %v13366_v15 = vld [vmem:[#allocation177_spill] sm:$0xff] }
 0x7ab   : > { %v6049_v16 = vmax.f32 %v5550_v53, %v6048_v27  ;;  %v5684_v53 = vadd.f32 %v13361_v28, %v5586_v44  ;;  %v13362_v54 = vld [vmem:[#allocation315_spill] sm:$0xff]  ;;  %v5686_v5 = vadd.f32 %v13363_v37, %v5588_v56  ;;  %v11174_v55 = vadd.f32 %v13364_v23, %v10955_v48  ;;  %v13367_v8 = vld [vmem:[#allocation320_spill] sm:$0xff] }
 0x7ac   : > { %v5995_v27 = vmax.f32 %v5537_v24, %v5994_v46  ;;  %v5592_v17 = vmul.f32 %v13349_v3, %v13362_v54  ;;  %v11178_v20 = vadd.f32 %v13365_v2, %v10959_v31  ;;  %v5541_v6 = vadd.f32 %v13366_v15, %v11025_v57  ;;  %v13368_v46 = vld [vmem:[#allocation27_spill] sm:$0xff]  ;;  %v13369_v56 = vld [vmem:[#allocation212_spill] sm:$0xff]  ;;  %v13371_v31 = vld [vmem:[#allocation278_spill] sm:$0xff] }
 0x7ad   : > { %v6050_v52 = vmax.f32 %v5552_v35, %v6049_v16  ;;  %v5594_v35 = vmul.f32 %v13349_v3, %v13367_v8  ;;  %v6117_v16 = vmax.f32 %v5686_v5, %v5684_v53  ;;  %v5688_v14 = vadd.f32 %v13368_v46, %v5590_v38  ;;  %v13370_v48 = vld [vmem:[#allocation115_spill] sm:$0xff]  ;;  %v13373_v57 = vld [vmem:[#allocation321_spill] sm:$0xff]  ;;  %v13375_v38 = vld [vmem:[#allocation294_spill] sm:$0xff] }
 0x7ae   : > { %v5996_v49 = vmax.f32 %v5539_v61, %v5995_v27  ;;  %v11187_v24 = vadd.f32 %v13369_v56, %v10967_v62  ;;  %v11191_v11 = vadd.f32 %v13370_v48, %v10971_v39  ;;  %v13372_v29 = vld [vmem:[#allocation179_spill] sm:$0xff]  ;;  %v5596_v18 = vmul.f32 %v13349_v3, %v13373_v57  ;;  %v13376_v27 = vld [vmem:[#allocation117_spill] sm:$0xff]  ;;  %v13377_v62 = vld [vmem:[#allocation114_spill] sm:$0xff] }
 0x7af   : > { %v6051_v44 = vmax.f32 %v5554_v51, %v6050_v52  ;;  %v5543_v40 = vadd.f32 %v13372_v29, %v13371_v31  ;;  %v6118_v61 = vmax.f32 %v5688_v14, %v6117_v16  ;;  %v13374_v53 = vld [vmem:[#allocation31_spill] sm:$0xff]  ;;  %v11200_v54 = vadd.f32 %v13376_v27, %v13375_v38  ;;  %v13379_v39 = vld [vmem:[#allocation181_spill] sm:$0xff] }
 0x7b0   : > { %v5997_v51 = vmax.f32 %v5541_v6, %v5996_v49  ;;  %v5690_v52 = vadd.f32 %v13374_v53, %v5592_v17  ;;  %v13378_v37 = vld [vmem:[#allocation119_spill] sm:$0xff]  ;;  %v5545_v23 = vadd.f32 %v13379_v39, %v11033_v10  ;;  %v13382_v17 = vld [vmem:[#allocation213_spill] sm:$0xff] }
 0x7b1   : > { %v6052_v28 = vmax.f32 %v5556_v36, %v6051_v44  ;;  %v11204_v5 = vadd.f32 %v13378_v37, %v13377_v62  ;;  %v13380_v2 = vld [vmem:[#allocation323_spill] sm:$0xff]  ;;  %v13381_v44 = vld [vmem:[#allocation33_spill] sm:$0xff] }
 0x7b2   : > { %v5598_v15 = vmul.f32 %v13349_v3, %v13380_v2  ;;  %v5998_v36 = vmax.f32 %v5543_v40, %v5997_v51  ;;  %v6119_v6 = vmax.f32 %v5690_v52, %v6118_v61  ;;  %v5692_v49 = vadd.f32 %v13381_v44, %v5594_v35  ;;  %v13383_v16 = vld [vmem:[#allocation121_spill] sm:$0xff]  ;;  %v13384_v14 = vld [vmem:[#allocation183_spill] sm:$0xff] }
 0x7b3   : > { %v6053_v8 = vmax.f32 %v5558_v47, %v6052_v28  ;;  %v11213_v46 = vadd.f32 %v13383_v16, %v13382_v17  ;;  %v5547_v56 = vadd.f32 %v13384_v14, %v11037_v41  ;;  %v13385_v48 = vld [vmem:[#allocation185_spill] sm:$0xff]  ;;  %v13387_v40 = vld [vmem:[#allocation35_spill] sm:$0xff] }
 0x7b4   : > { %v5549_v31 = vadd.f32 %v13385_v48, %v11044_v22  ;;  %v13386_v29 = vld [vmem:[#allocation325_spill] sm:$0xff]  ;;  %v5999_v53 = vmax.f32 %v5545_v23, %v5998_v36  ;;  %v6120_v47 = vmax.f32 %v5692_v49, %v6119_v6  ;;  %v5694_v28 = vadd.f32 %v13387_v40, %v5596_v18  ;;  %v13388_v35 = vld [vmem:[#allocation187_spill] sm:$0xff] }
 0x7b5   : > { %v5600_v10 = vmul.f32 %v13349_v3, %v13386_v29  ;;  %v6054_v57 = vmax.f32 %v5560_v21, %v6053_v8  ;;  %v5551_v51 = vadd.f32 %v13388_v35, %v11048_v4  ;;  %v13389_v61 = vld [vmem:[#allocation189_spill] sm:$0xff]  ;;  %v13390_v38 = vld [vmem:[#allocation191_spill] sm:$0xff] }
 0x7b6   : > { %v5553_v52 = vadd.f32 %v13389_v61, %v11052_v45  ;;  %v5555_v41 = vadd.f32 %v13390_v38, %v11056_v19  ;;  %v13391_v27 = vld [vmem:[#allocation327_spill] sm:$0xff]  ;;  %v6000_v37 = vmax.f32 %v5547_v56, %v5999_v53  ;;  %v6121_v39 = vmax.f32 %v5694_v28, %v6120_v47  ;;  %v13392_v21 = vld [vmem:[#allocation37_spill] sm:$0xff]  ;;  %v13405_v28 = vld [vmem:[#allocation308_spill] sm:$0xff] }
 0x7b7   : > { %v5602_v22 = vmul.f32 %v13349_v3, %v13391_v27  ;;  %v6055_v62 = vmax.f32 %v5562_v63, %v6054_v57  ;;  %v5696_v23 = vadd.f32 %v13392_v21, %v5598_v15  ;;  %v13393_v2 = vld [vmem:[#allocation193_spill] sm:$0xff]  ;;  %v13394_v8 = vld [vmem:[#allocation195_spill] sm:$0xff]  ;;  %v13407_v61 = vld [vmem:[#allocation310_spill] sm:$0xff] }
 0x7b8   : > { %v5557_v18 = vadd.f32 %v13393_v2, %v11063_v32  ;;  %v5559_v4 = vadd.f32 %v13394_v8, %v11067_v1  ;;  %v13395_v36 = vld [vmem:[#allocation197_spill] sm:$0xff]  ;;  %v6001_v49 = vmax.f32 %v5549_v31, %v6000_v37  ;;  %v13397_v63 = vld [vmem:[#allocation39_spill] sm:$0xff]  ;;  %v13412_v8 = vld [vmem:[#allocation312_spill] sm:$0xff] }
 0x7b9   : > { %v5561_v45 = vadd.f32 %v13395_v36, %v11071_v59  ;;  %v13396_v6 = vld [vmem:[#allocation329_spill] sm:$0xff]  ;;  %v6056_v44 = vmax.f32 %v5564_v42, %v6055_v62  ;;  %v6122_v17 = vmax.f32 %v5696_v23, %v6121_v39  ;;  %v5698_v16 = vadd.f32 %v13397_v63, %v5600_v10  ;;  %v13398_v14 = vld [vmem:[#allocation199_spill] sm:$0xff]  ;;  %v13415_v63 = vld [vmem:[#allocation314_spill] sm:$0xff] }
 0x7ba   : > { %v5604_v19 = vmul.f32 %v13349_v3, %v13396_v6  ;;  %v5563_v15 = vadd.f32 %v13398_v14, %v11075_v43  ;;  %v13399_v56 = vld [vmem:[#allocation201_spill] sm:$0xff]  ;;  %v13400_v1 = vld [vmem:[#allocation203_spill] sm:$0xff]  ;;  %v6002_v31 = vmax.f32 %v5551_v51, %v6001_v49 }
 0x7bb   : > { %v11244_v32 = vadd.f32 %v13399_v56, %v11082_v13  ;;  %v11248_v48 = vadd.f32 %v13400_v1, %v11086_v34  ;;  %v13401_v59 = vld [vmem:[#allocation331_spill] sm:$0xff]  ;;  %v6057_v42 = vmax.f32 %v11152_v26, %v6056_v44  ;;  %v6123_v57 = vmax.f32 %v5698_v16, %v6122_v17  ;;  %v13402_v53 = vld [vmem:[#allocation41_spill] sm:$0xff]  ;;  %v13417_v1 = vld [vmem:[#allocation18_spill] sm:$0xff] }
 0x7bc   : > { %v5606_v29 = vmul.f32 %v13349_v3, %v13401_v59  ;;  %v5700_v10 = vadd.f32 %v13402_v53, %v5602_v22  ;;  %v13403_v47 = vld [vmem:[#allocation205_spill] sm:$0xff]  ;;  %v6003_v26 = vmax.f32 %v5553_v52, %v6002_v31  ;;  %v13408_v62 = vld [vmem:[#allocation43_spill] sm:$0xff]  ;;  %v13418_v53 = vld [vmem:[#allocation20_spill] sm:$0xff] }
 0x7bd   : > { %v11256_v43 = vadd.f32 %v13403_v47, %v11090_v0  ;;  %v13404_v40 = vld [vmem:[#allocation333_spill] sm:$0xff]  ;;  %v6058_v27 = vmax.f32 %v11160_v50, %v6057_v42  ;;  %v5702_v37 = vadd.f32 %v13408_v62, %v5604_v19  ;;  %v13409_v22 = vld [vmem:[#allocation335_spill] sm:$0xff] }
 0x7be   : > { %v5608_v13 = vmul.f32 %v13349_v3, %v13404_v40  ;;  %v13406_v35 = vld [vmem:[#allocation269_spill] sm:$0xff]  ;;  %v6124_v51 = vmax.f32 %v5700_v10, %v6123_v57  ;;  %v5610_v39 = vmul.f32 %v13349_v3, %v13409_v22  ;;  %v13411_v23 = vld [vmem:[#allocation339_spill] sm:$0xff]  ;;  %v6004_v44 = vmax.f32 %v5555_v41, %v6003_v26  ;;  %v13425_v22 = vld [vmem:[#allocation30_spill] sm:$0xff] }
 0x7bf   : > { %v5585_v34 = vmul.f32 %v13406_v35, %v13405_v28  ;;  %v5587_v38 = vmul.f32 %v13406_v35, %v13407_v61  ;;  %v13410_v0 = vld [vmem:[#allocation337_spill] sm:$0xff]  ;;  %v5614_v2 = vmul.f32 %v13349_v3, %v13411_v23  ;;  %v5589_v36 = vmul.f32 %v13406_v35, %v13412_v8  ;;  %v13416_v14 = vld [vmem:[#allocation47_spill] sm:$0xff]  ;;  %v13422_v61 = vld [vmem:[#allocation26_spill] sm:$0xff] }
 0x7c0   : > { %v5612_v21 = vmul.f32 %v13349_v3, %v13410_v0  ;;  %v6059_v6 = vmax.f32 %v11164_v12, %v6058_v27  ;;  %v6125_v50 = vmax.f32 %v5702_v37, %v6124_v51  ;;  %v13413_v52 = vld [vmem:[#allocation45_spill] sm:$0xff]  ;;  %v5591_v16 = vmul.f32 %v13406_v35, %v13415_v63  ;;  %v13419_v41 = vld [vmem:[#allocation343_spill] sm:$0xff] }
 0x7c1   : > { %v5704_v49 = vadd.f32 %v13413_v52, %v5606_v29  ;;  %v13414_v17 = vld [vmem:[#allocation341_spill] sm:$0xff]  ;;  %v5706_v56 = vadd.f32 %v13416_v14, %v5608_v13  ;;  %v5683_v59 = vadd.f32 %v13417_v1, %v5585_v34  ;;  %v6005_v31 = vmax.f32 %v5557_v18, %v6004_v44  ;;  %v13420_v29 = vld [vmem:[#allocation318_spill] sm:$0xff]  ;;  %v13423_v18 = vld [vmem:[#allocation319_spill] sm:$0xff] }
 0x7c2   : > { %v5616_v19 = vmul.f32 %v13349_v3, %v13414_v17  ;;  %v6060_v42 = vmax.f32 %v11174_v55, %v6059_v6  ;;  %v5685_v12 = vadd.f32 %v13418_v53, %v5587_v38  ;;  %v5618_v10 = vmul.f32 %v13349_v3, %v13419_v41  ;;  %v13421_v40 = vld [vmem:[#allocation49_spill] sm:$0xff]  ;;  %v13424_v62 = vld [vmem:[#allocation51_spill] sm:$0xff] }
 0x7c3   : > { %v6126_v57 = vmax.f32 %v5704_v49, %v6125_v50  ;;  %v5593_v47 = vmul.f32 %v13406_v35, %v13420_v29  ;;  %v5708_v28 = vadd.f32 %v13421_v40, %v5610_v39  ;;  %v5687_v27 = vadd.f32 %v13422_v61, %v5589_v36  ;;  %v13427_v44 = vld [vmem:[#allocation53_spill] sm:$0xff]  ;;  %v13431_v14 = vld [vmem:[#allocation55_spill] sm:$0xff]  ;;  %v13437_v61 = vld [vmem:[#allocation36_spill] sm:$0xff] }
 0x7c4   : > { %v6061_v13 = vmax.f32 %v11178_v20, %v6060_v42  ;;  %v6006_v26 = vmax.f32 %v5559_v4, %v6005_v31  ;;  %v6069_v51 = vmax.f32 %v5685_v12, %v5683_v59  ;;  %v6017_v55 = vmax.f32 %v11109_v9, %v11120_v7  ;;  %v13426_v4 = vld [vmem:[#allocation322_spill] sm:$0xff]  ;;  %v13428_v7 = vld [vmem:[#allocation32_spill] sm:$0xff]  ;;  %v13429_v63 = vld [vmem:[#allocation345_spill] sm:$0xff] }
 0x7c5   : > { %v6127_v34 = vmax.f32 %v5706_v56, %v6126_v57  ;;  %v5595_v38 = vmul.f32 %v13406_v35, %v13423_v18  ;;  %v5710_v37 = vadd.f32 %v13424_v62, %v5612_v21  ;;  %v5689_v0 = vadd.f32 %v13425_v22, %v5591_v16  ;;  %v13434_v57 = vld [vmem:[#allocation347_spill] sm:$0xff]  ;;  %v13435_v12 = vld [vmem:[#allocation326_spill] sm:$0xff]  ;;  %v13436_v29 = vld [vmem:[#allocation57_spill] sm:$0xff] }
 0x7c6   : > { %v6062_v23 = vmax.f32 %v11187_v24, %v6061_v13  ;;  %v6007_v39 = vmax.f32 %v5561_v45, %v6006_v26  ;;  %v6070_v36 = vmax.f32 %v5687_v27, %v6069_v51  ;;  %v6018_v20 = vmax.f32 %v11113_v25, %v11124_v58  ;;  %v13430_v45 = vld [vmem:[#allocation324_spill] sm:$0xff]  ;;  %v13432_v25 = vld [vmem:[#allocation34_spill] sm:$0xff]  ;;  %v13438_v27 = vld [vmem:[#allocation209_spill] sm:$0xff] }
 0x7c7   : > { %v6128_v8 = vmax.f32 %v5708_v28, %v6127_v34  ;;  %v5597_v6 = vmul.f32 %v13406_v35, %v13426_v4  ;;  %v5712_v9 = vadd.f32 %v13427_v44, %v5614_v2  ;;  %v5691_v50 = vadd.f32 %v13428_v7, %v5593_v47  ;;  %v13439_v26 = vld [vmem:[#allocation349_spill] sm:$0xff]  ;;  %v13440_v34 = vld [vmem:[#allocation328_spill] sm:$0xff]  ;;  %v13443_v22 = vld [vmem:[#allocation211_spill] sm:$0xff] }
 0x7c8   : > { %v6008_v52 = vmax.f32 %v5563_v15, %v6007_v39  ;;  %v6063_v49 = vmax.f32 %v6017_v55, %v6062_v23  ;;  %v6071_v17 = vmax.f32 %v5689_v0, %v6070_v36  ;;  %v5620_v24 = vmul.f32 %v13349_v3, %v13429_v63  ;;  %v13433_v15 = vld [vmem:[#allocation207_spill] sm:$0xff]  ;;  %v13445_v39 = vld [vmem:[#allocation330_spill] sm:$0xff]  ;;  %v13446_v36 = vld [vmem:[#allocation61_spill] sm:$0xff] }
 0x7c9   : > { %v6129_v21 = vmax.f32 %v5710_v37, %v6128_v8  ;;  %v5599_v16 = vmul.f32 %v13406_v35, %v13430_v45  ;;  %v5714_v56 = vadd.f32 %v13431_v14, %v5616_v19  ;;  %v5693_v58 = vadd.f32 %v13432_v25, %v5595_v38  ;;  %v13441_v55 = vld [vmem:[#allocation59_spill] sm:$0xff]  ;;  %v13448_v7 = vld [vmem:[#allocation353_spill] sm:$0xff]  ;;  %v13452_v14 = vld [vmem:[#allocation42_spill] sm:$0xff] }
 0x7ca   : > { %v6009_v1 = vmax.f32 %v11244_v32, %v6008_v52  ;;  %v6064_v59 = vmax.f32 %v6063_v49, %v6018_v20  ;;  %v6072_v42 = vmax.f32 %v5691_v50, %v6071_v17  ;;  %v5571_v31 = vadd.f32 %v13433_v15, %v11094_v60  ;;  %v13444_v23 = vld [vmem:[#allocation351_spill] sm:$0xff]  ;;  %v13453_v25 = vld [vmem:[#allocation357_spill] sm:$0xff] }
 0x7cb   : > { %v6130_v2 = vmax.f32 %v5712_v9, %v6129_v21  ;;  %v5622_v53 = vmul.f32 %v13349_v3, %v13434_v57  ;;  %v5601_v41 = vmul.f32 %v13406_v35, %v13435_v12  ;;  %v5716_v47 = vadd.f32 %v13436_v29, %v5618_v10  ;;  %v13447_v9 = vld [vmem:[#allocation40_spill] sm:$0xff]  ;;  %v13449_v52 = vld [vmem:[#allocation355_spill] sm:$0xff] }
 0x7cc   : > { %v6010_v19 = vmax.f32 %v11248_v48, %v6009_v1  ;;  %v6073_v28 = vmax.f32 %v5693_v58, %v6072_v42  ;;  %v5695_v32 = vadd.f32 %v13437_v61, %v5597_v6  ;;  %v5573_v13 = vadd.f32 %v13438_v27, %v11101_v33  ;;  %v13442_v48 = vld [vmem:[#allocation38_spill] sm:$0xff]  ;;  %v13451_v17 = vld [vmem:[#allocation63_spill] sm:$0xff]  ;;  %v13455_v42 = vld [vmem:[#allocation65_spill] sm:$0xff] }
 0x7cd   : > { %v6131_v40 = vmax.f32 %v5714_v56, %v6130_v2  ;;  %v5624_v60 = vmul.f32 %v13349_v3, %v13439_v26  ;;  %v5603_v51 = vmul.f32 %v13406_v35, %v13440_v34  ;;  %v5718_v18 = vadd.f32 %v13441_v55, %v5620_v24  ;;  %v13454_v1 = vld [vmem:[#allocation334_spill] sm:$0xff]  ;;  %v13461_v34 = vld [vmem:[#allocation359_spill] sm:$0xff] }
 0x7ce   : > { %v6011_v38 = vmax.f32 %v11256_v43, %v6010_v19  ;;  %v6074_v62 = vmax.f32 %v5695_v32, %v6073_v28  ;;  %v5697_v37 = vadd.f32 %v13442_v48, %v5599_v16  ;;  %v5575_v0 = vadd.f32 %v13443_v22, %v11105_v30  ;;  %v13450_v30 = vld [vmem:[#allocation332_spill] sm:$0xff]  ;;  %v13459_v32 = vld [vmem:[#allocation297_spill] sm:$0xff]  ;;  %v13462_v55 = vld [vmem:[#allocation338_spill] sm:$0xff] }
 0x7cf   : > { %v6132_v10 = vmax.f32 %v5716_v47, %v6131_v40  ;;  %v5626_v33 = vmul.f32 %v13349_v3, %v13444_v23  ;;  %v5605_v8 = vmul.f32 %v13406_v35, %v13445_v39  ;;  %v5720_v20 = vadd.f32 %v13446_v36, %v5622_v53  ;;  %v13457_v47 = vld [vmem:[#allocation336_spill] sm:$0xff]  ;;  %v13458_v40 = vld [vmem:[#allocation67_spill] sm:$0xff] }
 0x7d0   : > { %v6012_v4 = vmax.f32 %v5571_v31, %v6011_v38  ;;  %v6075_v44 = vmax.f32 %v5697_v37, %v6074_v62  ;;  %v5699_v43 = vadd.f32 %v13447_v9, %v5601_v41  ;;  %v5628_v50 = vmul.f32 %v13349_v3, %v13448_v7  ;;  %v13456_v41 = vld [vmem:[#allocation44_spill] sm:$0xff]  ;;  %v13463_v38 = vld [vmem:[#allocation69_spill] sm:$0xff]  ;;  %v13469_v9 = vld [vmem:[#allocation363_spill] sm:$0xff] }
 0x7d1   : > { %v6133_v6 = vmax.f32 %v5718_v18, %v6132_v10  ;;  %v5630_v49 = vmul.f32 %v13349_v3, %v13449_v52  ;;  %v5607_v21 = vmul.f32 %v13406_v35, %v13450_v30  ;;  %v5722_v63 = vadd.f32 %v13451_v17, %v5624_v60  ;;  %v13465_v37 = vld [vmem:[#allocation361_spill] sm:$0xff]  ;;  %v13470_v7 = vld [vmem:[#allocation342_spill] sm:$0xff]  ;;  %v13472_v17 = vld [vmem:[#allocation52_spill] sm:$0xff] }
 0x7d2   : > { %v6013_v24 = vmax.f32 %v5573_v13, %v6012_v4  ;;  %v6076_v16 = vmax.f32 %v5699_v43, %v6075_v44  ;;  %v5701_v56 = vadd.f32 %v13452_v14, %v5603_v51  ;;  %v5632_v58 = vmul.f32 %v13349_v3, %v13453_v25  ;;  %v13475_v25 = vld [vmem:[#allocation75_spill] sm:$0xff] }
 0x7d3   : > { %v6134_v45 = vmax.f32 %v5720_v20, %v6133_v6  ;;  %v5609_v2 = vmul.f32 %v13406_v35, %v13454_v1  ;;  %v5724_v15 = vadd.f32 %v13455_v42, %v5626_v33  ;;  %v5969_v31 = vmax.f32 %v11191_v11, %v11204_v5  ;;  %v13460_v11 = vld [vmem:[#allocation46_spill] sm:$0xff]  ;;  %v13467_v33 = vld [vmem:[#allocation71_spill] sm:$0xff]  ;;  %v7337_v6 = vld [vmem:[%s8240_s29 + $0x20] sm:$0xff] }
 0x7d4   : > { %v6014_v57 = vmax.f32 %v5575_v0, %v6013_v24  ;;  %v6077_v12 = vmax.f32 %v5701_v56, %v6076_v16  ;;  %v5703_v29 = vadd.f32 %v13456_v41, %v5605_v8  ;;  %v5611_v19 = vmul.f32 %v13406_v35, %v13457_v47  ;;  %v13466_v0 = vld [vmem:[#allocation340_spill] sm:$0xff]  ;;  %v13468_v20 = vld [vmem:[#allocation50_spill] sm:$0xff]  ;;  %v13473_v24 = vld [vmem:[#allocation365_spill] sm:$0xff] }
 0x7d5   : > { %v6135_v53 = vmax.f32 %v5722_v63, %v6134_v45  ;;  %v5726_v28 = vadd.f32 %v13458_v40, %v5628_v50  ;;  %v5970_v61 = vmax.f32 %v11200_v54, %v11213_v46  ;;  %v6066_v27 = vadd.f32 %v6064_v59, %v13459_v32  ;;  %v13464_v46 = vld [vmem:[#allocation48_spill] sm:$0xff]  ;;  %v13479_v41 = vld [vmem:[#allocation77_spill] sm:$0xff] }
 0x7d6   : > { %v6015_v26 = vmax.f32 %v5969_v31, %v6014_v57  ;;  %v6078_v60 = vmax.f32 %v5703_v29, %v6077_v12  ;;  %v5705_v5 = vadd.f32 %v13460_v11, %v5607_v21  ;;  %v5634_v51 = vmul.f32 %v13349_v3, %v13461_v34  ;;  %v13474_v16 = vld [vmem:[#allocation344_spill] sm:$0xff]  ;;  %v13478_v57 = vld [vmem:[#allocation346_spill] sm:$0xff] }
 0x7d7   : > { %v6136_v13 = vmax.f32 %v5724_v15, %v6135_v53  ;;  %v5613_v18 = vmul.f32 %v13406_v35, %v13462_v55  ;;  %v5728_v10 = vadd.f32 %v13463_v38, %v5630_v49  ;;  %6262 = vst [vmem:[%s8240_s29 + $0x8] sm:$0xff] %v6066_v27  ;;  %v5707_v59 = vadd.f32 %v13464_v46, %v5609_v2  ;;  %v13471_v49 = vld [vmem:[#allocation73_spill] sm:$0xff]  ;;  %v13476_v2 = vld [vmem:[#allocation54_spill] sm:$0xff]  ;;  %v13477_v15 = vld [vmem:[#allocation367_spill] sm:$0xff] }
 0x7d8   : > { %v6016_v48 = vmax.f32 %v6015_v26, %v5970_v61  ;;  %v6079_v54 = vmax.f32 %v5705_v5, %v6078_v60  ;;  %v5636_v22 = vmul.f32 %v13349_v3, %v13465_v37  ;;  %v5615_v23 = vmul.f32 %v13406_v35, %v13466_v0  ;;  %v13482_v32 = vld [vmem:[#allocation348_spill] sm:$0xff]  ;;  %v13483_v26 = vld [vmem:[#allocation79_spill] sm:$0xff]  ;;  %v13484_v5 = vld [vmem:[#allocation58_spill] sm:$0xff] }
 0x7d9   : > { %v6137_v62 = vmax.f32 %v5726_v28, %v6136_v13  ;;  %v5730_v39 = vadd.f32 %v13467_v33, %v5632_v58  ;;  %v5709_v4 = vadd.f32 %v13468_v20, %v5611_v19  ;;  %v5638_v43 = vmul.f32 %v13349_v3, %v13469_v9  ;;  %v13480_v19 = vld [vmem:[#allocation56_spill] sm:$0xff]  ;;  %v13481_v28 = vld [vmem:[#allocation369_spill] sm:$0xff]  ;;  %v13492_v20 = vld [vmem:[#allocation62_spill] sm:$0xff] }
 0x7da   : > { %v6080_v36 = vmax.f32 %v5707_v59, %v6079_v54  ;;  %v6065_v44 = vadd.f32 %v7337_v6, %v6016_v48  ;;  %v5617_v50 = vmul.f32 %v13406_v35, %v13470_v7  ;;  %v5732_v30 = vadd.f32 %v13471_v49, %v5634_v51  ;;  %v13485_v51 = vld [vmem:[#allocation371_spill] sm:$0xff]  ;;  %v13488_v46 = vld [vmem:[#allocation60_spill] sm:$0xff]  ;;  %v13489_v37 = vld [vmem:[#allocation373_spill] sm:$0xff] }
 0x7db   : > { %v6138_v8 = vmax.f32 %v5728_v10, %v6137_v62  ;;  %v5711_v63 = vadd.f32 %v13472_v17, %v5613_v18  ;;  %v5640_v45 = vmul.f32 %v13349_v3, %v13473_v24  ;;  %v5619_v14 = vmul.f32 %v13406_v35, %v13474_v16  ;;  %v13486_v18 = vld [vmem:[#allocation350_spill] sm:$0xff]  ;;  %v13487_v62 = vld [vmem:[#allocation81_spill] sm:$0xff]  ;;  %v13490_v0 = vld [vmem:[#allocation352_spill] sm:$0xff] }
 0x7dc   : > { %v6081_v21 = vmax.f32 %v5709_v4, %v6080_v36  ;;  %6261 = vst [vmem:[%s8240_s29] sm:$0xff] %v6065_v44  ;;  %v5734_v58 = vadd.f32 %v13475_v25, %v5636_v22  ;;  %v5713_v42 = vadd.f32 %v13476_v2, %v5615_v23  ;;  %v5642_v31 = vmul.f32 %v13349_v3, %v13477_v15  ;;  %v13493_v6 = vld [vmem:[#allocation375_spill] sm:$0xff]  ;;  %v13494_v9 = vld [vmem:[#allocation354_spill] sm:$0xff]  ;;  %v13497_v17 = vld [vmem:[#allocation377_spill] sm:$0xff] }
 0x7dd   : > { %v6139_v52 = vmax.f32 %v5730_v39, %v6138_v8  ;;  %v5621_v53 = vmul.f32 %v13406_v35, %v13478_v57  ;;  %v5736_v29 = vadd.f32 %v13479_v41, %v5638_v43  ;;  %v5715_v40 = vadd.f32 %v13480_v19, %v5617_v50  ;;  %v13491_v39 = vld [vmem:[#allocation83_spill] sm:$0xff]  ;;  %v13495_v50 = vld [vmem:[#allocation85_spill] sm:$0xff]  ;;  %v13498_v24 = vld [vmem:[#allocation356_spill] sm:$0xff] }
 0x7de   : > { %v6082_v1 = vmax.f32 %v5711_v63, %v6081_v21  ;;  %v5644_v61 = vmul.f32 %v13349_v3, %v13481_v28  ;;  %v5623_v27 = vmul.f32 %v13406_v35, %v13482_v32  ;;  %v5738_v60 = vadd.f32 %v13483_v26, %v5640_v45  ;;  %v13501_v2 = vld [vmem:[#allocation379_spill] sm:$0xff]  ;;  %v13502_v15 = vld [vmem:[#allocation358_spill] sm:$0xff]  ;;  %v13505_v19 = vld [vmem:[#allocation381_spill] sm:$0xff] }
 0x7df   : > { %v6140_v56 = vmax.f32 %v5732_v30, %v6139_v52  ;;  %v5717_v34 = vadd.f32 %v13484_v5, %v5619_v14  ;;  %v5646_v55 = vmul.f32 %v13349_v3, %v13485_v51  ;;  %v5625_v38 = vmul.f32 %v13406_v35, %v13486_v18  ;;  %v13496_v30 = vld [vmem:[#allocation64_spill] sm:$0xff]  ;;  %v13499_v14 = vld [vmem:[#allocation87_spill] sm:$0xff]  ;;  %v13510_v51 = vld [vmem:[#allocation362_spill] sm:$0xff] }
 0x7e0   : > { %v6083_v47 = vmax.f32 %v5713_v42, %v6082_v1  ;;  %v5740_v48 = vadd.f32 %v13487_v62, %v5642_v31  ;;  %v5719_v59 = vadd.f32 %v13488_v46, %v5621_v53  ;;  %v5648_v22 = vmul.f32 %v13349_v3, %v13489_v37  ;;  %v13503_v53 = vld [vmem:[#allocation89_spill] sm:$0xff]  ;;  %v13506_v28 = vld [vmem:[#allocation360_spill] sm:$0xff]  ;;  %v13509_v5 = vld [vmem:[#allocation383_spill] sm:$0xff] }
 0x7e1   : > { %v6141_v12 = vmax.f32 %v5734_v58, %v6140_v56  ;;  %v5627_v23 = vmul.f32 %v13406_v35, %v13490_v0  ;;  %v5742_v8 = vadd.f32 %v13491_v39, %v5644_v61  ;;  %v5721_v4 = vadd.f32 %v13492_v20, %v5623_v27  ;;  %v13500_v58 = vld [vmem:[#allocation66_spill] sm:$0xff]  ;;  %v13507_v27 = vld [vmem:[#allocation91_spill] sm:$0xff]  ;;  %v13513_v46 = vld [vmem:[#allocation385_spill] sm:$0xff] }
 0x7e2   : > { %v6084_v11 = vmax.f32 %v5715_v40, %v6083_v47  ;;  %v5650_v44 = vmul.f32 %v13349_v3, %v13493_v6  ;;  %v5629_v43 = vmul.f32 %v13406_v35, %v13494_v9  ;;  %v5744_v52 = vadd.f32 %v13495_v50, %v5646_v55  ;;  %v13514_v37 = vld [vmem:[#allocation364_spill] sm:$0xff]  ;;  %v13517_v20 = vld [vmem:[#allocation387_spill] sm:$0xff]  ;;  %v13518_v6 = vld [vmem:[#allocation366_spill] sm:$0xff] }
 0x7e3   : > { %v6142_v13 = vmax.f32 %v5736_v29, %v6141_v12  ;;  %v5723_v21 = vadd.f32 %v13496_v30, %v5625_v38  ;;  %v5652_v63 = vmul.f32 %v13349_v3, %v13497_v17  ;;  %v5631_v45 = vmul.f32 %v13406_v35, %v13498_v24  ;;  %v13504_v29 = vld [vmem:[#allocation68_spill] sm:$0xff]  ;;  %v13511_v38 = vld [vmem:[#allocation93_spill] sm:$0xff] }
 0x7e4   : > { %v6085_v54 = vmax.f32 %v5717_v34, %v6084_v11  ;;  %v5746_v56 = vadd.f32 %v13499_v14, %v5648_v22  ;;  %v5725_v1 = vadd.f32 %v13500_v58, %v5627_v23  ;;  %v5654_v42 = vmul.f32 %v13349_v3, %v13501_v2  ;;  %v13515_v23 = vld [vmem:[#allocation95_spill] sm:$0xff]  ;;  %v13521_v30 = vld [vmem:[#allocation389_spill] sm:$0xff]  ;;  %v13522_v17 = vld [vmem:[#allocation368_spill] sm:$0xff] }
 0x7e5   : > { %v6143_v10 = vmax.f32 %v5738_v60, %v6142_v13  ;;  %v5633_v31 = vmul.f32 %v13406_v35, %v13502_v15  ;;  %v5748_v12 = vadd.f32 %v13503_v53, %v5650_v44  ;;  %v5727_v47 = vadd.f32 %v13504_v29, %v5629_v43  ;;  %v13508_v60 = vld [vmem:[#allocation70_spill] sm:$0xff]  ;;  %v13519_v43 = vld [vmem:[#allocation97_spill] sm:$0xff]  ;;  %v13525_v58 = vld [vmem:[#allocation391_spill] sm:$0xff] }
 0x7e6   : > { %v6086_v36 = vmax.f32 %v5719_v59, %v6085_v54  ;;  %v5656_v40 = vmul.f32 %v13349_v3, %v13505_v19  ;;  %v5635_v61 = vmul.f32 %v13406_v35, %v13506_v28  ;;  %v5750_v13 = vadd.f32 %v13507_v27, %v5652_v63  ;;  %v13526_v2 = vld [vmem:[#allocation370_spill] sm:$0xff]  ;;  %v13529_v29 = vld [vmem:[#allocation393_spill] sm:$0xff]  ;;  %v13530_v19 = vld [vmem:[#allocation372_spill] sm:$0xff] }
 0x7e7   : > { %v6144_v33 = vmax.f32 %v5740_v48, %v6143_v10  ;;  %v5729_v11 = vadd.f32 %v13508_v60, %v5631_v45  ;;  %v5658_v34 = vmul.f32 %v13349_v3, %v13509_v5  ;;  %v5637_v55 = vmul.f32 %v13406_v35, %v13510_v51  ;;  %v13512_v48 = vld [vmem:[#allocation72_spill] sm:$0xff]  ;;  %v13523_v45 = vld [vmem:[#allocation99_spill] sm:$0xff]  ;;  %v13534_v5 = vld [vmem:[#allocation374_spill] sm:$0xff] }
 0x7e8   : > { %v6087_v49 = vmax.f32 %v5721_v4, %v6086_v36  ;;  %v5752_v10 = vadd.f32 %v13511_v38, %v5654_v42  ;;  %v5731_v54 = vadd.f32 %v13512_v48, %v5633_v31  ;;  %v5660_v59 = vmul.f32 %v13349_v3, %v13513_v46  ;;  %v13527_v31 = vld [vmem:[#allocation101_spill] sm:$0xff]  ;;  %v13533_v60 = vld [vmem:[#allocation395_spill] sm:$0xff]  ;;  %v13538_v46 = vld [vmem:[#allocation306_spill] sm:$0xff] }
 0x7e9   : > { %v6145_v7 = vmax.f32 %v5742_v8, %v6144_v33  ;;  %v5639_v22 = vmul.f32 %v13406_v35, %v13514_v37  ;;  %v5754_v33 = vadd.f32 %v13515_v23, %v5656_v40  ;;  %v13516_v8 = vld [vmem:[#allocation74_spill] sm:$0xff]  ;;  %v5662_v4 = vmul.f32 %v13349_v3, %v13517_v20  ;;  %v13537_v48 = vld [vmem:[#allocation299_spill] sm:$0xff]  ;;  %v13539_v37 = vld [vmem:[#allocation397_spill] sm:$0xff] }
 0x7ea   : > { %v6088_v25 = vmax.f32 %v5723_v21, %v6087_v49  ;;  %v5733_v36 = vadd.f32 %v13516_v8, %v5635_v61  ;;  %v5641_v44 = vmul.f32 %v13406_v35, %v13518_v6  ;;  %v5664_v21 = vmul.f32 %v13349_v3, %v13521_v30  ;;  %v13531_v61 = vld [vmem:[#allocation103_spill] sm:$0xff]  ;;  %v13542_v20 = vld [vmem:[#allocation86_spill] sm:$0xff] }
 0x7eb   : > { %v6146_v16 = vmax.f32 %v5744_v52, %v6145_v7  ;;  %v5756_v7 = vadd.f32 %v13519_v43, %v5658_v34  ;;  %v13520_v52 = vld [vmem:[#allocation76_spill] sm:$0xff]  ;;  %v5643_v63 = vmul.f32 %v13406_v35, %v13522_v17  ;;  %v5645_v42 = vmul.f32 %v13406_v35, %v13526_v2  ;;  %v13543_v6 = vld [vmem:[#allocation302_spill] sm:$0xff] }
 0x7ec   : > { %v6089_v41 = vmax.f32 %v5725_v1, %v6088_v25  ;;  %v5735_v49 = vadd.f32 %v13520_v52, %v5637_v55  ;;  %v5666_v1 = vmul.f32 %v13349_v3, %v13525_v58  ;;  %v5647_v40 = vmul.f32 %v13406_v35, %v13530_v19  ;;  %v13535_v55 = vld [vmem:[#allocation105_spill] sm:$0xff]  ;;  %v13546_v52 = vld [vmem:[#allocation378_spill] sm:$0xff] }
 0x7ed   : > { %v6147_v57 = vmax.f32 %v5746_v56, %v6146_v16  ;;  %v5758_v16 = vadd.f32 %v13523_v45, %v5660_v59  ;;  %v13524_v56 = vld [vmem:[#allocation78_spill] sm:$0xff]  ;;  %v5649_v34 = vmul.f32 %v13406_v35, %v13534_v5  ;;  %v5582_v59 = vmul.f32 %v13349_v3, %v13538_v46  ;;  %v13551_v58 = vld [vmem:[#allocation25_spill] sm:$0xff] }
 0x7ee   : > { %v6090_v26 = vmax.f32 %v5727_v47, %v6089_v41  ;;  %v5737_v25 = vadd.f32 %v13524_v56, %v5639_v22  ;;  %v5668_v47 = vmul.f32 %v13349_v3, %v13529_v29  ;;  %v5672_v22 = vmul.f32 %v13349_v3, %v13539_v37  ;;  %v13550_v56 = vld [vmem:[#allocation17_spill] sm:$0xff] }
 0x7ef   : > { %v6148_v32 = vmax.f32 %v5748_v12, %v6147_v57  ;;  %v5760_v57 = vadd.f32 %v13527_v31, %v5662_v4  ;;  %v13528_v12 = vld [vmem:[#allocation80_spill] sm:$0xff]  ;;  %v5745_v4 = vadd.f32 %v13542_v20, %v5647_v40  ;;  %v13553_v31 = vld [vmem:[#allocation90_spill] sm:$0xff] }
 0x7f0   : > { %v6091_v62 = vmax.f32 %v5729_v11, %v6090_v26  ;;  %v5739_v41 = vadd.f32 %v13528_v12, %v5641_v44  ;;  %v5670_v11 = vmul.f32 %v13349_v3, %v13533_v60  ;;  %v5580_v44 = vmul.f32 %v13349_v3, %v13543_v6  ;;  %v13566_v20 = vld [vmem:[#allocation100_spill] sm:$0xff]  ;;  %v7338_v6 = vld [vmem:[%s8240_s29 + $0x38] sm:$0xff] }
 0x7f1   : > { %v6149_v18 = vmax.f32 %v5750_v13, %v6148_v32  ;;  %v5762_v32 = vadd.f32 %v13531_v61, %v5664_v21  ;;  %v13532_v13 = vld [vmem:[#allocation82_spill] sm:$0xff]  ;;  %v13547_v21 = vld [vmem:[#allocation109_spill] sm:$0xff] }
 0x7f2   : > { %v6092_v39 = vmax.f32 %v5731_v54, %v6091_v62  ;;  %v5741_v26 = vadd.f32 %v13532_v13, %v5643_v63  ;;  %v5578_v54 = vmul.f32 %v13349_v3, %v13537_v48  ;;  %v5768_v17 = vadd.f32 %v13547_v21, %v5670_v11 }
 0x7f3   : > { %v6150_v0 = vmax.f32 %v5752_v10, %v6149_v18  ;;  %v5764_v18 = vadd.f32 %v13535_v55, %v5666_v1  ;;  %v13536_v10 = vld [vmem:[#allocation84_spill] sm:$0xff]  ;;  %v5680_v1 = vadd.f32 %v13551_v58, %v5582_v59 }
 0x7f4   : > { %v6093_v50 = vmax.f32 %v5733_v36, %v6092_v39  ;;  %v5743_v62 = vadd.f32 %v13536_v10, %v5645_v42  ;;  %v13541_v39 = vld [vmem:[#allocation107_spill] sm:$0xff]  ;;  %v13563_v59 = vld [vmem:[#allocation388_spill] sm:$0xff] }
 0x7f5   : > { %v6151_v9 = vmax.f32 %v5754_v33, %v6150_v0  ;;  %v13540_v0 = vld [vmem:[#allocation376_spill] sm:$0xff]  ;;  %v5766_v8 = vadd.f32 %v13541_v39, %v5668_v47  ;;  %v13552_v42 = vld [vmem:[#allocation111_spill] sm:$0xff]  ;;  %v13556_v47 = vld [vmem:[#allocation29_spill] sm:$0xff]  ;;  %v5663_v37 = vmul.f32 %v13406_v35, %v13563_v59 }
 0x7f6   : > { %v6094_v14 = vmax.f32 %v5735_v49, %v6093_v50  ;;  %v5651_v23 = vmul.f32 %v13406_v35, %v13540_v0  ;;  %v5653_v49 = vmul.f32 %v13406_v35, %v13546_v52  ;;  %v13564_v0 = vld [vmem:[#allocation98_spill] sm:$0xff] }
 0x7f7   : > { %v6152_v24 = vmax.f32 %v5756_v7, %v6151_v9  ;;  %v13544_v9 = vld [vmem:[#allocation307_spill] sm:$0xff]  ;;  %v13565_v39 = vld [vmem:[#allocation390_spill] sm:$0xff] }
 0x7f8   : > { %v6095_v53 = vmax.f32 %v5737_v25, %v6094_v14  ;;  %v5584_v43 = vmul.f32 %v13349_v3, %v13544_v9  ;;  %v13545_v7 = vld [vmem:[#allocation399_spill] sm:$0xff]  ;;  %v5676_v25 = vadd.f32 %v13550_v56, %v5578_v54  ;;  %v13567_v9 = vld [vmem:[#allocation392_spill] sm:$0xff] }
 0x7f9   : > { %v6153_v15 = vmax.f32 %v5758_v16, %v6152_v24  ;;  %v5674_v50 = vmul.f32 %v13349_v3, %v13545_v7  ;;  %v13548_v24 = vld [vmem:[#allocation88_spill] sm:$0xff] }
 0x7fa   : > { %v6096_v27 = vmax.f32 %v5739_v41, %v6095_v53  ;;  %v5747_v45 = vadd.f32 %v13548_v24, %v5649_v34  ;;  %v13549_v16 = vld [vmem:[#allocation380_spill] sm:$0xff]  ;;  %v13554_v53 = vld [vmem:[#allocation382_spill] sm:$0xff]  ;;  %v13555_v41 = vld [vmem:[#allocation23_spill] sm:$0xff]  ;;  %v5682_v19 = vadd.f32 %v13556_v47, %v5584_v43  ;;  %v6115_v55 = vmax.f32 %v5676_v25, %v5680_v1 }
 0x7fb   : > { %v6154_v28 = vmax.f32 %v5760_v57, %v6153_v15  ;;  %v5655_v14 = vmul.f32 %v13406_v35, %v13549_v16  ;;  %v5770_v15 = vadd.f32 %v13552_v42, %v5672_v22  ;;  %v5749_v57 = vadd.f32 %v13553_v31, %v5651_v23  ;;  %v13560_v34 = vld [vmem:[#allocation94_spill] sm:$0xff]  ;;  %v13572_v16 = vld [vmem:[#allocation300_spill] sm:$0xff]  ;;  %v13575_v42 = vld [vmem:[#allocation301_spill] sm:$0xff] }
 0x7fc   : > { %v6097_v38 = vmax.f32 %v5741_v26, %v6096_v27  ;;  %v5657_v12 = vmul.f32 %v13406_v35, %v13554_v53  ;;  %v5678_v29 = vadd.f32 %v13555_v41, %v5580_v44  ;;  %v13558_v27 = vld [vmem:[#allocation92_spill] sm:$0xff]  ;;  %v5667_v43 = vmul.f32 %v13406_v35, %v13567_v9  ;;  %v13571_v24 = vld [vmem:[#allocation298_spill] sm:$0xff] }
 0x7fd   : > { %v6155_v51 = vmax.f32 %v5762_v32, %v6154_v28  ;;  %v13557_v28 = vld [vmem:[#allocation113_spill] sm:$0xff]  ;;  %v5751_v13 = vadd.f32 %v13558_v27, %v5653_v49  ;;  %v13559_v26 = vld [vmem:[#allocation384_spill] sm:$0xff]  ;;  %v13569_v49 = vld [vmem:[#allocation394_spill] sm:$0xff] }
 0x7fe   : > { %v6098_v36 = vmax.f32 %v5743_v62, %v6097_v38  ;;  %v5772_v61 = vadd.f32 %v13557_v28, %v5674_v50  ;;  %v5659_v60 = vmul.f32 %v13406_v35, %v13559_v26  ;;  %v13562_v62 = vld [vmem:[#allocation96_spill] sm:$0xff]  ;;  %v6116_v46 = vmax.f32 %v5678_v29, %v5682_v19  ;;  %v13568_v50 = vld [vmem:[#allocation102_spill] sm:$0xff] }
 0x7ff   : > { %v6156_v33 = vmax.f32 %v5764_v18, %v6155_v51  ;;  %v5753_v51 = vadd.f32 %v13560_v34, %v5655_v14  ;;  %v13561_v18 = vld [vmem:[#allocation386_spill] sm:$0xff]  ;;  %v5755_v48 = vadd.f32 %v13562_v62, %v5657_v12  ;;  %v5761_v52 = vadd.f32 %v13568_v50, %v5663_v37  ;;  %v13573_v56 = vld [vmem:[#allocation396_spill] sm:$0xff] }
 0x800   : > { %v6099_v63 = vmax.f32 %v5745_v4, %v6098_v36  ;;  %v5661_v38 = vmul.f32 %v13406_v35, %v13561_v18  ;;  %v5757_v23 = vadd.f32 %v13564_v0, %v5659_v60  ;;  %v5581_v14 = vmul.f32 %v13406_v35, %v13572_v16  ;;  %v13574_v1 = vld [vmem:[#allocation106_spill] sm:$0xff]  ;;  %v13578_v41 = vld [vmem:[#allocation108_spill] sm:$0xff] }
 0x801   : > { %v6157_v30 = vmax.f32 %v5766_v8, %v6156_v33  ;;  %v5665_v8 = vmul.f32 %v13406_v35, %v13565_v39  ;;  %v5671_v25 = vmul.f32 %v13406_v35, %v13573_v56  ;;  %v13579_v47 = vld [vmem:[#allocation16_spill] sm:$0xff]  ;;  %v7339_v62 = vld [vmem:[%s8240_s29 + $0x30] sm:$0xff] }
 0x802   : > { %v6100_v3 = vmax.f32 %v5747_v45, %v6099_v63  ;;  %v5759_v4 = vadd.f32 %v13566_v20, %v5661_v38  ;;  %v5577_v45 = vmul.f32 %v13406_v35, %v13571_v24  ;;  %v13583_v60 = vld [vmem:[#allocation28_spill] sm:$0xff] }
 0x803   : > { %v6158_v2 = vmax.f32 %v5768_v17, %v6157_v30  ;;  %v5669_v30 = vmul.f32 %v13406_v35, %v13569_v49  ;;  %v13570_v17 = vld [vmem:[#allocation104_spill] sm:$0xff] }
 0x804   : > { %v6101_v32 = vmax.f32 %v5749_v57, %v6100_v3  ;;  %v5763_v63 = vadd.f32 %v13570_v17, %v5665_v8  ;;  %v13576_v3 = vld [vmem:[#allocation303_spill] sm:$0xff]  ;;  %v13577_v57 = vld [vmem:[#allocation398_spill] sm:$0xff]  ;;  %v5675_v19 = vadd.f32 %v13579_v47, %v5577_v45 }
 0x805   : > { %v6159_v40 = vmax.f32 %v5770_v15, %v6158_v2  ;;  %v5765_v2 = vadd.f32 %v13574_v1, %v5667_v43  ;;  %v5579_v15 = vmul.f32 %v13406_v35, %v13575_v42  ;;  %v5583_v31 = vmul.f32 %v13406_v35, %v13576_v3 }
 0x806   : > { %v6102_v5 = vmax.f32 %v5751_v13, %v6101_v32  ;;  %v5673_v53 = vmul.f32 %v13406_v35, %v13577_v57  ;;  %v5767_v29 = vadd.f32 %v13578_v41, %v5669_v30  ;;  %v13581_v32 = vld [vmem:[#allocation110_spill] sm:$0xff]  ;;  %v13584_v35 = vld [vmem:[#allocation112_spill] sm:$0xff] }
 0x807   : > { %v6160_v11 = vmax.f32 %v5772_v61, %v6159_v40  ;;  %v13580_v40 = vld [vmem:[#allocation24_spill] sm:$0xff]  ;;  %v5769_v27 = vadd.f32 %v13581_v32, %v5671_v25  ;;  %v13582_v13 = vld [vmem:[#allocation22_spill] sm:$0xff] }
 0x808   : > { %v6103_v10 = vmax.f32 %v5753_v51, %v6102_v5  ;;  %v5679_v28 = vadd.f32 %v13580_v40, %v5581_v14  ;;  %v5677_v26 = vadd.f32 %v13582_v13, %v5579_v15  ;;  %v5771_v34 = vadd.f32 %v13584_v35, %v5673_v53 }
 0x809   : > { %v6161_v54 = vmax.f32 %v6115_v55, %v6160_v11  ;;  %v5681_v11 = vadd.f32 %v13583_v60, %v5583_v31 }
 0x80a   : > { %v6104_v22 = vmax.f32 %v5755_v48, %v6103_v10  ;;  %v6067_v55 = vmax.f32 %v5675_v19, %v5679_v28 }
 0x80b   : > { %v6162_v33 = vmax.f32 %v6161_v54, %v6116_v46  ;;  %v6068_v38 = vmax.f32 %v5677_v26, %v5681_v11 }
 0x80c   : > { %v6105_v36 = vmax.f32 %v5757_v23, %v6104_v22 }
 0x80d   : > { %v6164_v44 = vadd.f32 %v7338_v6, %v6162_v33 }
 0x80e   : > { %v6106_v7 = vmax.f32 %v5759_v4, %v6105_v36 }
 0x80f   : > { %6264 = vst [vmem:[%s8240_s29 + $0x18] sm:$0xff] %v6164_v44 }
 0x810   : > { %v6107_v21 = vmax.f32 %v5761_v52, %v6106_v7 }
 0x812   : > { %v6108_v58 = vmax.f32 %v5763_v63, %v6107_v21 }
 0x814   : > { %v6109_v12 = vmax.f32 %v5765_v2, %v6108_v58 }
 0x816   : > { %v6110_v61 = vmax.f32 %v5767_v29, %v6109_v12 }
 0x818   : > { %v6111_v5 = vmax.f32 %v5769_v27, %v6110_v61 }
 0x81a   : > { %v6112_v51 = vmax.f32 %v5771_v34, %v6111_v5 }
 0x81c   : > { %v6113_v18 = vmax.f32 %v6067_v55, %v6112_v51 }
 0x81e   : > { %v6114_v10 = vmax.f32 %v6113_v18, %v6068_v38 }
 0x820   : > { %v6163_v48 = vadd.f32 %v7339_v62, %v6114_v10 }
 0x822   : > { %6263 = vst [vmem:[%s8240_s29 + $0x10] sm:$0xff] %v6163_v48 }
 0x823   : > { %7413 = shalt.err (!%p7410_p11)
}
 0x824   : > { %s7414_s29 = scalar_lea.hbm %s11554_s19, 1536  ;;  %s7418_s28 = scalar_lea.hbm %s11611_s10, 4608 }
 0x825   : > { %p7415_p3 = scmp.ne.s32.totalorder %s11554_s19, %s7414_s29  ;;  %p7419_p2 = scmp.lt.u32.totalorder %s11554_s19, %s11611_s10 }
 0x826   : > { %p7420_p4 = scmp.lt.u32.totalorder %s7418_s28, %s7414_s29  ;;  %p7422_p12 = scmp.lt.u32.totalorder %s7414_s29, %s11554_s19 }
 0x827   : > { %p7416_p8 = pnand %p7415_p3, %p13585_p1 }
 0x828   : > { %p7421_p6 = por %p7420_p4, %p7419_p2 }
 0x829   : > { %p7417_p0 = pneg %p7416_p8 }
 0x82a   : > { %p7423_p13 = por %p7422_p12, %p7421_p6 }
 0x82c   : > { %p7424_p9 = pnand %p7423_p13, %p7417_p0 }
 0x82e   : > { %7427 = shalt.err (!%p7424_p9)
}
 0x82f   : > { %s7483_s12 = smov 128   ;;  %s7484_s0 = smov 384  }
 0x830   : > { %s7485_s21 = smov 8  }
 0x831   : > { %7227 = dma.vmem_to_hbm [thread:$0]  (%p13585_p1), %s11556_s20, 1536, %s11554_s19, %s6274_s30, %s7483_s12, %s7484_s0, %s7485_s21  }
 0x832 PF: > { %s13586_s23 = sld [smem:[#allocation15_spill]]  ;;  %p7241_p5 = scmp.ge.s32.totalorder %s7470_s18, 2 }
 0x833   : > { %s6301_s11 = sand.u32 1, %s7458_s15  }
 0x834   : > { %s6302_s3 = scalar_lea.sflag [#allocation5], %s6301_s11 }
 0x838   : > { %p13587_p7 = scmp.ne.s32.totalorder %s13586_s23, 0 }
 0x83a   : > { %p7237_p10 = pnand %p7241_p5, %p13587_p7 }
 0x83c   : > { %7453 = dma.done.wait (!%p7237_p10), %s6302_s3, 1536  }
 0x83d   : > { %7455 = vsyncadd (!%p7237_p10), %s6302_s3, 4294965760  ;;  %s13588_s18 = sld [smem:[#allocation13_spill]]  ;;  %s13589_s13 = sld [smem:[#allocation12_spill]] }
 0x83e   : > { %s13590_s17 = sld [smem:[#allocation14_spill]]  ;;  %s13591_s15 = smov %s7462_s16 }
 0x843   : > { %p27_p11 = scmp.ge.s32.totalorder %s13588_s18, 5   ;;  %s13592_s16 = smov %s13589_s13 }
 0x845   :  { %29 = sbr.rel (!%p27_p11) target bundleno = 10 (0xa), region = 118 }
 0x84c   :  { %6307 = vsyncpa [#allocation4], 1 }
 0x84d   :  { %6309 = vsyncpa [#allocation4 + $0x1], 1 }
 0x84e   :  { %6310 = vsyncpa [#allocation7], 1 }
 0x84f   :  { %6312 = vsyncpa [#allocation7 + $0x1], 1 }
 0x850   :  { %6313 = vsyncpa [#allocation5], 1 }
 0x851   :  { %6315 = vsyncpa [#allocation5 + $0x1], 1 }

</bundles_post_ra>
